<compile_context>
chip_gen: v5e
topology: v5e:2x2
jax: 0.10.0
libtpu: 0.0.40
codegen_flags: <defaults>
</compile_context>

<pallas_src>
import jax
import jax.numpy as jnp
from jax.experimental import pallas as pl
from jax.experimental.pallas import tpu as pltpu

# ---- model hyper-parameters (module defaults) ----
IN_DIM = 64
STYLE_DIM = 64
HIDDEN_DIM = 512      # module default
NUM_DOMAIN = 3
NUM_LAYERS = 6        # module default
PADW = 128            # classifier heads lane-padded to a full 128-lane width

# Test batch: small, but sized so the grid has 2 steps (exercises the v7x
# megacore split) and the last tile is ragged (exercises Pallas OOB masking).
BS = 24

# TODO(synk): pixel_norm=True branch references an undefined `z` in the
# reference PyTorch forward, so it is not reproduced.


def _relu_layer(x_bf16, w_bf16, b_f32):
    y = jnp.dot(x_bf16, w_bf16, preferred_element_type=jnp.float32)
    return jnp.maximum(y + b_f32, 0.0).astype(jnp.bfloat16)


def _make_kernel(tb, split):
    """Build the fused MLP + classifier kernel for a fixed batch tile `tb`.

    split=True processes the tile as two independent halves so the scheduler
    can interleave their matmul pushes/pops (hides per-layer MXU result drain
    in the latency-bound small-M regime; halves are >= 8 rows so sublane
    slicing stays vreg-aligned).
    """
    def kernel(code_ref, cond_ref, w0_ref, b0_ref, wh_ref, bh_ref,
               wc_ref, bc_ref, out_ref):
        x = code_ref[...]                                  # f32 [tb, in_dim]
        cond = jnp.clip(cond_ref[...], 0, NUM_DOMAIN - 1)  # [tb, 1] int32

        if split:
            hh = tb // 2
            xs = [x[:hh].astype(jnp.bfloat16), x[hh:].astype(jnp.bfloat16)]
            cs = [cond[:hh], cond[hh:]]
            rows = [(0, hh), (hh, hh)]
        else:
            xs = [x.astype(jnp.bfloat16)]
            cs = [cond]
            rows = [(0, tb)]

        # First layer: Linear(in_dim -> hidden) + ReLU (bf16 in, f32 acc).
        w0 = w0_ref[...]
        b0 = b0_ref[...]
        hs = [_relu_layer(xi, w0, b0) for xi in xs]

        # Hidden layers, statically unrolled (NUM_LAYERS=6 is short; if vreg
        # spills appear at very large tb, switch to
        # lax.fori_loop(..., unroll=True) with dynamic wh_ref[l] indexing).
        for l in range(NUM_LAYERS):
            w = wh_ref[l]
            b = bh_ref[l]
            hs = [_relu_layer(h, w, b) for h in hs]

        # All classifier heads in a single wide matmul -> [rows, D * PADW],
        # then per-row domain selection over static full-lane slices.
        wc = wc_ref[...]
        bc = bc_ref[...]
        for (start, size), h, c in zip(rows, hs, cs):
            y_all = jnp.dot(h, wc, preferred_element_type=jnp.float32) + bc
            acc = y_all[:, 0:PADW]
            for d in range(1, NUM_DOMAIN):
                acc = jnp.where(c == d, y_all[:, d * PADW:(d + 1) * PADW], acc)
            # Narrow (64-lane) f32 store: half the writeback of a padded slab.
            out_ref[pl.ds(start, size), :] = acc[:, :STYLE_DIM].astype(out_ref.dtype)

    return kernel


def _round_up(x, m):
    return (x + m - 1) // m * m


def _choose_batch_tile(bs, max_tile=256):
    """Large M for MXU row occupancy; >= 2 grid steps whenever bs > 16 so the
    "parallel" grid axis can shard across v7x's two TensorCores."""
    if bs <= 16:
        return _round_up(max(bs, 8), 8)
    return min(max_tile, _round_up(-(-bs // 2), 16))


def prepare_params(raw_params):
    """One-time packing of raw f32 params into the kernel layout (hoisted out
    of the per-call path): bf16 weights for the MXU fast path, classifier
    heads packed + lane-padded to [hidden, num_domain * 128]."""
    w0, b0, wh, bh, wc, bc = raw_params
    wc_pad = jnp.pad(wc, ((0, 0), (0, 0), (0, PADW - STYLE_DIM)))
    wc_packed = jnp.transpose(wc_pad, (1, 0, 2)).reshape(HIDDEN_DIM, NUM_DOMAIN * PADW)
    bc_packed = jnp.pad(bc, ((0, 0), (0, 0), (0, PADW - STYLE_DIM))).reshape(1, NUM_DOMAIN * PADW)
    return (w0.astype(jnp.bfloat16), b0,
            wh.astype(jnp.bfloat16), bh,
            wc_packed.astype(jnp.bfloat16), bc_packed)


def mapping_network(code, condition, packed_params, *, max_batch_tile=256):
    """code: [bs, in_dim] f32, condition: [bs] int -> [bs, style_dim] f32."""
    w0, b0, wh, bh, wc, bc = packed_params
    bs = code.shape[0]

    tb = _choose_batch_tile(bs, max_batch_tile)
    split = (tb % 16 == 0) and (16 <= tb < 128)
    grid = (pl.cdiv(bs, tb),)

    cond2d = condition.astype(jnp.int32).reshape(bs, 1)

    out = pl.pallas_call(
        _make_kernel(tb, split),
        out_shape=jax.ShapeDtypeStruct((bs, STYLE_DIM), jnp.float32),
        grid=grid,
        in_specs=[
            pl.BlockSpec((tb, IN_DIM), lambda i: (i, 0)),                            # code (f32)
            pl.BlockSpec((tb, 1), lambda i: (i, 0)),                                 # condition
            # Weights: constant index maps keep them VMEM-resident across grid
            # steps (no re-DMA). ~8 MiB even double-buffered at hidden=512, far
            # below every generation's VMEM, so no Buffered(1) needed.
            pl.BlockSpec((IN_DIM, HIDDEN_DIM), lambda i: (0, 0)),                    # w0
            pl.BlockSpec((1, HIDDEN_DIM), lambda i: (0, 0)),                         # b0
            pl.BlockSpec((NUM_LAYERS, HIDDEN_DIM, HIDDEN_DIM), lambda i: (0, 0, 0)), # wh
            pl.BlockSpec((NUM_LAYERS, 1, HIDDEN_DIM), lambda i: (0, 0, 0)),          # bh
            pl.BlockSpec((HIDDEN_DIM, NUM_DOMAIN * PADW), lambda i: (0, 0)),         # wc packed
            pl.BlockSpec((1, NUM_DOMAIN * PADW), lambda i: (0, 0)),                  # bc packed
        ],
        out_specs=pl.BlockSpec((tb, STYLE_DIM), lambda i: (i, 0)),
        compiler_params=pltpu.CompilerParams(
            dimension_semantics=("parallel",)),
    )(code, cond2d, w0, b0, wh, bh, wc, bc)

    return out


def init_params(key):
    ks = jax.random.split(key, 6)

    def he(k, shape, fan_in):
        return jax.random.normal(k, shape, jnp.float32) * jnp.sqrt(2.0 / fan_in)

    w0 = he(ks[0], (IN_DIM, HIDDEN_DIM), IN_DIM)
    b0 = 0.1 * jax.random.normal(ks[1], (1, HIDDEN_DIM), jnp.float32)
    wh = he(ks[2], (NUM_LAYERS, HIDDEN_DIM, HIDDEN_DIM), HIDDEN_DIM)
    bh = 0.1 * jax.random.normal(ks[3], (NUM_LAYERS, 1, HIDDEN_DIM), jnp.float32)
    wc = he(ks[4], (NUM_DOMAIN, HIDDEN_DIM, STYLE_DIM), HIDDEN_DIM)
    bc = 0.1 * jax.random.normal(ks[5], (NUM_DOMAIN, 1, STYLE_DIM), jnp.float32)
    return (w0, b0, wh, bh, wc, bc)


def reference_forward(code, condition, raw_params):
    """Pure-JAX reference replicating the PyTorch forward (same bf16 matmul
    path; note bf16 weights/activations deviate slightly from an f32-exact
    PyTorch forward — hence the 2e-2 tolerance)."""
    w0, b0, wh, bh, wc, bc = raw_params
    bf = jnp.bfloat16
    h = jnp.dot(code.astype(bf), w0.astype(bf), preferred_element_type=jnp.float32)
    h = jnp.maximum(h + b0, 0.0)
    for l in range(NUM_LAYERS):
        h = jnp.dot(h.astype(bf), wh[l].astype(bf), preferred_element_type=jnp.float32)
        h = jnp.maximum(h + bh[l], 0.0)
    heads = [jnp.dot(h.astype(bf), wc[d].astype(bf), preferred_element_type=jnp.float32) + bc[d]
             for d in range(NUM_DOMAIN)]
    outs = jnp.stack(heads, axis=1)  # [bs, D, style]
    cond = jnp.clip(condition.astype(jnp.int32), 0, NUM_DOMAIN - 1)
    return outs[jnp.arange(code.shape[0]), cond]


if __name__ == "__main__":
    key = jax.random.PRNGKey(0)
    k_param, k_code, k_cond = jax.random.split(key, 3)

    raw_params = init_params(k_param)
    packed_params = prepare_params(raw_params)   # one-time preprocessing, not per-call

    code = jax.random.normal(k_code, (BS, IN_DIM), jnp.float32)
    condition = jax.random.randint(k_cond, (BS,), 0, NUM_DOMAIN, dtype=jnp.int32)

    style = mapping_network(code, condition, packed_params)
    style = jax.block_until_ready(style)

    ref = reference_forward(code, condition, raw_params)
    assert style.shape == (BS, STYLE_DIM)
    assert jnp.allclose(style, ref, atol=2e-2, rtol=2e-2), "mismatch vs reference"

    print("KERNEL_OK")
</pallas_src>

<mosaic_0001>
module attributes {stable_mosaic.version = 11 : i64} {
  func.func @kernel(%arg0: i32, %arg1: memref<16x64xf32, #tpu.memory_space<vmem>>, %arg2: memref<16x1xi32, #tpu.memory_space<vmem>>, %arg3: memref<64x512xbf16, #tpu.memory_space<vmem>>, %arg4: memref<1x512xf32, #tpu.memory_space<vmem>>, %arg5: memref<6x512x512xbf16, #tpu.memory_space<vmem>>, %arg6: memref<6x1x512xf32, #tpu.memory_space<vmem>>, %arg7: memref<512x384xbf16, #tpu.memory_space<vmem>>, %arg8: memref<1x384xf32, #tpu.memory_space<vmem>>, %arg9: memref<16x64xf32, #tpu.memory_space<vmem>>) attributes {dimension_semantics = [#tpu.dimension_semantics<parallel>], iteration_bounds = array<i64: 2>, scalar_prefetch = 0 : i64, scratch_operands = 0 : i64, tpu.core_type = #tpu.core_type<tc>, window_params = [{transform_indices = @transform_0, window_bounds = array<i64: 16, 64>}, {transform_indices = @transform_1, window_bounds = array<i64: 16, 1>}, {pipeline_mode = #tpu.pipeline_mode<synchronous>, transform_indices = @transform_2, window_bounds = array<i64: 64, 512>}, {pipeline_mode = #tpu.pipeline_mode<synchronous>, transform_indices = @transform_3, window_bounds = array<i64: 1, 512>}, {pipeline_mode = #tpu.pipeline_mode<synchronous>, transform_indices = @transform_4, window_bounds = array<i64: 6, 512, 512>}, {pipeline_mode = #tpu.pipeline_mode<synchronous>, transform_indices = @transform_5, window_bounds = array<i64: 6, 1, 512>}, {pipeline_mode = #tpu.pipeline_mode<synchronous>, transform_indices = @transform_6, window_bounds = array<i64: 512, 384>}, {pipeline_mode = #tpu.pipeline_mode<synchronous>, transform_indices = @transform_7, window_bounds = array<i64: 1, 384>}, {transform_indices = @transform_8, window_bounds = array<i64: 16, 64>}]} {
    %c0 = arith.constant 0 : index
    %c0_0 = arith.constant 0 : index
    %0 = vector.load %arg1[%c0, %c0_0] : memref<16x64xf32, #tpu.memory_space<vmem>>, vector<16x64xf32>
    %c0_1 = arith.constant 0 : index
    %c0_2 = arith.constant 0 : index
    %1 = vector.load %arg2[%c0_1, %c0_2] : memref<16x1xi32, #tpu.memory_space<vmem>>, vector<16x1xi32>
    %c0_i32 = arith.constant 0 : i32
    %c2_i32 = arith.constant 2 : i32
    %2 = vector.broadcast %c0_i32 : i32 to vector<16x1xi32>
    %3 = arith.maxsi %2, %1 : vector<16x1xi32>
    %4 = vector.broadcast %c2_i32 : i32 to vector<16x1xi32>
    %5 = arith.minsi %4, %3 : vector<16x1xi32>
    %6 = vector.extract_strided_slice %0 {offsets = [0, 0], sizes = [8, 64], strides = [1, 1]} : vector<16x64xf32> to vector<8x64xf32>
    %7 = arith.truncf %6 : vector<8x64xf32> to vector<8x64xbf16>
    %8 = vector.extract_strided_slice %0 {offsets = [8, 0], sizes = [8, 64], strides = [1, 1]} : vector<16x64xf32> to vector<8x64xf32>
    %9 = arith.truncf %8 : vector<8x64xf32> to vector<8x64xbf16>
    %10 = vector.extract_strided_slice %5 {offsets = [0, 0], sizes = [8, 1], strides = [1, 1]} : vector<16x1xi32> to vector<8x1xi32>
    %11 = vector.extract_strided_slice %5 {offsets = [8, 0], sizes = [8, 1], strides = [1, 1]} : vector<16x1xi32> to vector<8x1xi32>
    %c0_3 = arith.constant 0 : index
    %c0_4 = arith.constant 0 : index
    %12 = vector.load %arg3[%c0_3, %c0_4] : memref<64x512xbf16, #tpu.memory_space<vmem>>, vector<64x512xbf16>
    %c0_5 = arith.constant 0 : index
    %c0_6 = arith.constant 0 : index
    %13 = vector.load %arg4[%c0_5, %c0_6] : memref<1x512xf32, #tpu.memory_space<vmem>>, vector<1x512xf32>
    %cst = arith.constant dense<0.000000e+00> : vector<8x512xf32>
    %14 = tpu.matmul %7, %12, %cst {dimension_numbers = #tpu.dot_dimension_numbers<[1], [0], [0], [1], [0, 0, 1, 1], [], []>} : vector<8x64xbf16>, vector<64x512xbf16>, vector<8x512xf32> -> vector<8x512xf32>
    %15 = vector.broadcast %13 : vector<1x512xf32> to vector<8x512xf32>
    %16 = arith.addf %14, %15 : vector<8x512xf32>
    %cst_7 = arith.constant 0.000000e+00 : f32
    %17 = vector.broadcast %cst_7 : f32 to vector<8x512xf32>
    %18 = arith.maximumf %16, %17 : vector<8x512xf32>
    %19 = arith.truncf %18 : vector<8x512xf32> to vector<8x512xbf16>
    %cst_8 = arith.constant dense<0.000000e+00> : vector<8x512xf32>
    %20 = tpu.matmul %9, %12, %cst_8 {dimension_numbers = #tpu.dot_dimension_numbers<[1], [0], [0], [1], [0, 0, 1, 1], [], []>} : vector<8x64xbf16>, vector<64x512xbf16>, vector<8x512xf32> -> vector<8x512xf32>
    %21 = vector.broadcast %13 : vector<1x512xf32> to vector<8x512xf32>
    %22 = arith.addf %20, %21 : vector<8x512xf32>
    %cst_9 = arith.constant 0.000000e+00 : f32
    %23 = vector.broadcast %cst_9 : f32 to vector<8x512xf32>
    %24 = arith.maximumf %22, %23 : vector<8x512xf32>
    %25 = arith.truncf %24 : vector<8x512xf32> to vector<8x512xbf16>
    %c0_10 = arith.constant 0 : index
    %c0_11 = arith.constant 0 : index
    %c0_12 = arith.constant 0 : index
    %26 = vector.load %arg5[%c0_10, %c0_11, %c0_12] : memref<6x512x512xbf16, #tpu.memory_space<vmem>>, vector<1x512x512xbf16>
    %27 = vector.shape_cast %26 : vector<1x512x512xbf16> to vector<512x512xbf16>
    %c0_13 = arith.constant 0 : index
    %c0_14 = arith.constant 0 : index
    %c0_15 = arith.constant 0 : index
    %28 = vector.load %arg6[%c0_13, %c0_14, %c0_15] : memref<6x1x512xf32, #tpu.memory_space<vmem>>, vector<1x1x512xf32>
    %29 = vector.shape_cast %28 : vector<1x1x512xf32> to vector<1x512xf32>
    %cst_16 = arith.constant dense<0.000000e+00> : vector<8x512xf32>
    %30 = tpu.matmul %19, %27, %cst_16 {dimension_numbers = #tpu.dot_dimension_numbers<[1], [0], [0], [1], [0, 0, 1, 1], [], []>} : vector<8x512xbf16>, vector<512x512xbf16>, vector<8x512xf32> -> vector<8x512xf32>
    %31 = vector.broadcast %29 : vector<1x512xf32> to vector<8x512xf32>
    %32 = arith.addf %30, %31 : vector<8x512xf32>
    %cst_17 = arith.constant 0.000000e+00 : f32
    %33 = vector.broadcast %cst_17 : f32 to vector<8x512xf32>
    %34 = arith.maximumf %32, %33 : vector<8x512xf32>
    %35 = arith.truncf %34 : vector<8x512xf32> to vector<8x512xbf16>
    %cst_18 = arith.constant dense<0.000000e+00> : vector<8x512xf32>
    %36 = tpu.matmul %25, %27, %cst_18 {dimension_numbers = #tpu.dot_dimension_numbers<[1], [0], [0], [1], [0, 0, 1, 1], [], []>} : vector<8x512xbf16>, vector<512x512xbf16>, vector<8x512xf32> -> vector<8x512xf32>
    %37 = vector.broadcast %29 : vector<1x512xf32> to vector<8x512xf32>
    %38 = arith.addf %36, %37 : vector<8x512xf32>
    %cst_19 = arith.constant 0.000000e+00 : f32
    %39 = vector.broadcast %cst_19 : f32 to vector<8x512xf32>
    %40 = arith.maximumf %38, %39 : vector<8x512xf32>
    %41 = arith.truncf %40 : vector<8x512xf32> to vector<8x512xbf16>
    %c1 = arith.constant 1 : index
    %c0_20 = arith.constant 0 : index
    %c0_21 = arith.constant 0 : index
    %42 = vector.load %arg5[%c1, %c0_20, %c0_21] : memref<6x512x512xbf16, #tpu.memory_space<vmem>>, vector<1x512x512xbf16>
    %43 = vector.shape_cast %42 : vector<1x512x512xbf16> to vector<512x512xbf16>
    %c1_22 = arith.constant 1 : index
    %c0_23 = arith.constant 0 : index
    %c0_24 = arith.constant 0 : index
    %44 = vector.load %arg6[%c1_22, %c0_23, %c0_24] : memref<6x1x512xf32, #tpu.memory_space<vmem>>, vector<1x1x512xf32>
    %45 = vector.shape_cast %44 : vector<1x1x512xf32> to vector<1x512xf32>
    %cst_25 = arith.constant dense<0.000000e+00> : vector<8x512xf32>
    %46 = tpu.matmul %35, %43, %cst_25 {dimension_numbers = #tpu.dot_dimension_numbers<[1], [0], [0], [1], [0, 0, 1, 1], [], []>} : vector<8x512xbf16>, vector<512x512xbf16>, vector<8x512xf32> -> vector<8x512xf32>
    %47 = vector.broadcast %45 : vector<1x512xf32> to vector<8x512xf32>
    %48 = arith.addf %46, %47 : vector<8x512xf32>
    %cst_26 = arith.constant 0.000000e+00 : f32
    %49 = vector.broadcast %cst_26 : f32 to vector<8x512xf32>
    %50 = arith.maximumf %48, %49 : vector<8x512xf32>
    %51 = arith.truncf %50 : vector<8x512xf32> to vector<8x512xbf16>
    %cst_27 = arith.constant dense<0.000000e+00> : vector<8x512xf32>
    %52 = tpu.matmul %41, %43, %cst_27 {dimension_numbers = #tpu.dot_dimension_numbers<[1], [0], [0], [1], [0, 0, 1, 1], [], []>} : vector<8x512xbf16>, vector<512x512xbf16>, vector<8x512xf32> -> vector<8x512xf32>
    %53 = vector.broadcast %45 : vector<1x512xf32> to vector<8x512xf32>
    %54 = arith.addf %52, %53 : vector<8x512xf32>
    %cst_28 = arith.constant 0.000000e+00 : f32
    %55 = vector.broadcast %cst_28 : f32 to vector<8x512xf32>
    %56 = arith.maximumf %54, %55 : vector<8x512xf32>
    %57 = arith.truncf %56 : vector<8x512xf32> to vector<8x512xbf16>
    %c2 = arith.constant 2 : index
    %c0_29 = arith.constant 0 : index
    %c0_30 = arith.constant 0 : index
    %58 = vector.load %arg5[%c2, %c0_29, %c0_30] : memref<6x512x512xbf16, #tpu.memory_space<vmem>>, vector<1x512x512xbf16>
    %59 = vector.shape_cast %58 : vector<1x512x512xbf16> to vector<512x512xbf16>
    %c2_31 = arith.constant 2 : index
    %c0_32 = arith.constant 0 : index
    %c0_33 = arith.constant 0 : index
    %60 = vector.load %arg6[%c2_31, %c0_32, %c0_33] : memref<6x1x512xf32, #tpu.memory_space<vmem>>, vector<1x1x512xf32>
    %61 = vector.shape_cast %60 : vector<1x1x512xf32> to vector<1x512xf32>
    %cst_34 = arith.constant dense<0.000000e+00> : vector<8x512xf32>
    %62 = tpu.matmul %51, %59, %cst_34 {dimension_numbers = #tpu.dot_dimension_numbers<[1], [0], [0], [1], [0, 0, 1, 1], [], []>} : vector<8x512xbf16>, vector<512x512xbf16>, vector<8x512xf32> -> vector<8x512xf32>
    %63 = vector.broadcast %61 : vector<1x512xf32> to vector<8x512xf32>
    %64 = arith.addf %62, %63 : vector<8x512xf32>
    %cst_35 = arith.constant 0.000000e+00 : f32
    %65 = vector.broadcast %cst_35 : f32 to vector<8x512xf32>
    %66 = arith.maximumf %64, %65 : vector<8x512xf32>
    %67 = arith.truncf %66 : vector<8x512xf32> to vector<8x512xbf16>
    %cst_36 = arith.constant dense<0.000000e+00> : vector<8x512xf32>
    %68 = tpu.matmul %57, %59, %cst_36 {dimension_numbers = #tpu.dot_dimension_numbers<[1], [0], [0], [1], [0, 0, 1, 1], [], []>} : vector<8x512xbf16>, vector<512x512xbf16>, vector<8x512xf32> -> vector<8x512xf32>
    %69 = vector.broadcast %61 : vector<1x512xf32> to vector<8x512xf32>
    %70 = arith.addf %68, %69 : vector<8x512xf32>
    %cst_37 = arith.constant 0.000000e+00 : f32
    %71 = vector.broadcast %cst_37 : f32 to vector<8x512xf32>
    %72 = arith.maximumf %70, %71 : vector<8x512xf32>
    %73 = arith.truncf %72 : vector<8x512xf32> to vector<8x512xbf16>
    %c3 = arith.constant 3 : index
    %c0_38 = arith.constant 0 : index
    %c0_39 = arith.constant 0 : index
    %74 = vector.load %arg5[%c3, %c0_38, %c0_39] : memref<6x512x512xbf16, #tpu.memory_space<vmem>>, vector<1x512x512xbf16>
    %75 = vector.shape_cast %74 : vector<1x512x512xbf16> to vector<512x512xbf16>
    %c3_40 = arith.constant 3 : index
    %c0_41 = arith.constant 0 : index
    %c0_42 = arith.constant 0 : index
    %76 = vector.load %arg6[%c3_40, %c0_41, %c0_42] : memref<6x1x512xf32, #tpu.memory_space<vmem>>, vector<1x1x512xf32>
    %77 = vector.shape_cast %76 : vector<1x1x512xf32> to vector<1x512xf32>
    %cst_43 = arith.constant dense<0.000000e+00> : vector<8x512xf32>
    %78 = tpu.matmul %67, %75, %cst_43 {dimension_numbers = #tpu.dot_dimension_numbers<[1], [0], [0], [1], [0, 0, 1, 1], [], []>} : vector<8x512xbf16>, vector<512x512xbf16>, vector<8x512xf32> -> vector<8x512xf32>
    %79 = vector.broadcast %77 : vector<1x512xf32> to vector<8x512xf32>
    %80 = arith.addf %78, %79 : vector<8x512xf32>
    %cst_44 = arith.constant 0.000000e+00 : f32
    %81 = vector.broadcast %cst_44 : f32 to vector<8x512xf32>
    %82 = arith.maximumf %80, %81 : vector<8x512xf32>
    %83 = arith.truncf %82 : vector<8x512xf32> to vector<8x512xbf16>
    %cst_45 = arith.constant dense<0.000000e+00> : vector<8x512xf32>
    %84 = tpu.matmul %73, %75, %cst_45 {dimension_numbers = #tpu.dot_dimension_numbers<[1], [0], [0], [1], [0, 0, 1, 1], [], []>} : vector<8x512xbf16>, vector<512x512xbf16>, vector<8x512xf32> -> vector<8x512xf32>
    %85 = vector.broadcast %77 : vector<1x512xf32> to vector<8x512xf32>
    %86 = arith.addf %84, %85 : vector<8x512xf32>
    %cst_46 = arith.constant 0.000000e+00 : f32
    %87 = vector.broadcast %cst_46 : f32 to vector<8x512xf32>
    %88 = arith.maximumf %86, %87 : vector<8x512xf32>
    %89 = arith.truncf %88 : vector<8x512xf32> to vector<8x512xbf16>
    %c4 = arith.constant 4 : index
    %c0_47 = arith.constant 0 : index
    %c0_48 = arith.constant 0 : index
    %90 = vector.load %arg5[%c4, %c0_47, %c0_48] : memref<6x512x512xbf16, #tpu.memory_space<vmem>>, vector<1x512x512xbf16>
    %91 = vector.shape_cast %90 : vector<1x512x512xbf16> to vector<512x512xbf16>
    %c4_49 = arith.constant 4 : index
    %c0_50 = arith.constant 0 : index
    %c0_51 = arith.constant 0 : index
    %92 = vector.load %arg6[%c4_49, %c0_50, %c0_51] : memref<6x1x512xf32, #tpu.memory_space<vmem>>, vector<1x1x512xf32>
    %93 = vector.shape_cast %92 : vector<1x1x512xf32> to vector<1x512xf32>
    %cst_52 = arith.constant dense<0.000000e+00> : vector<8x512xf32>
    %94 = tpu.matmul %83, %91, %cst_52 {dimension_numbers = #tpu.dot_dimension_numbers<[1], [0], [0], [1], [0, 0, 1, 1], [], []>} : vector<8x512xbf16>, vector<512x512xbf16>, vector<8x512xf32> -> vector<8x512xf32>
    %95 = vector.broadcast %93 : vector<1x512xf32> to vector<8x512xf32>
    %96 = arith.addf %94, %95 : vector<8x512xf32>
    %cst_53 = arith.constant 0.000000e+00 : f32
    %97 = vector.broadcast %cst_53 : f32 to vector<8x512xf32>
    %98 = arith.maximumf %96, %97 : vector<8x512xf32>
    %99 = arith.truncf %98 : vector<8x512xf32> to vector<8x512xbf16>
    %cst_54 = arith.constant dense<0.000000e+00> : vector<8x512xf32>
    %100 = tpu.matmul %89, %91, %cst_54 {dimension_numbers = #tpu.dot_dimension_numbers<[1], [0], [0], [1], [0, 0, 1, 1], [], []>} : vector<8x512xbf16>, vector<512x512xbf16>, vector<8x512xf32> -> vector<8x512xf32>
    %101 = vector.broadcast %93 : vector<1x512xf32> to vector<8x512xf32>
    %102 = arith.addf %100, %101 : vector<8x512xf32>
    %cst_55 = arith.constant 0.000000e+00 : f32
    %103 = vector.broadcast %cst_55 : f32 to vector<8x512xf32>
    %104 = arith.maximumf %102, %103 : vector<8x512xf32>
    %105 = arith.truncf %104 : vector<8x512xf32> to vector<8x512xbf16>
    %c5 = arith.constant 5 : index
    %c0_56 = arith.constant 0 : index
    %c0_57 = arith.constant 0 : index
    %106 = vector.load %arg5[%c5, %c0_56, %c0_57] : memref<6x512x512xbf16, #tpu.memory_space<vmem>>, vector<1x512x512xbf16>
    %107 = vector.shape_cast %106 : vector<1x512x512xbf16> to vector<512x512xbf16>
    %c5_58 = arith.constant 5 : index
    %c0_59 = arith.constant 0 : index
    %c0_60 = arith.constant 0 : index
    %108 = vector.load %arg6[%c5_58, %c0_59, %c0_60] : memref<6x1x512xf32, #tpu.memory_space<vmem>>, vector<1x1x512xf32>
    %109 = vector.shape_cast %108 : vector<1x1x512xf32> to vector<1x512xf32>
    %cst_61 = arith.constant dense<0.000000e+00> : vector<8x512xf32>
    %110 = tpu.matmul %99, %107, %cst_61 {dimension_numbers = #tpu.dot_dimension_numbers<[1], [0], [0], [1], [0, 0, 1, 1], [], []>} : vector<8x512xbf16>, vector<512x512xbf16>, vector<8x512xf32> -> vector<8x512xf32>
    %111 = vector.broadcast %109 : vector<1x512xf32> to vector<8x512xf32>
    %112 = arith.addf %110, %111 : vector<8x512xf32>
    %cst_62 = arith.constant 0.000000e+00 : f32
    %113 = vector.broadcast %cst_62 : f32 to vector<8x512xf32>
    %114 = arith.maximumf %112, %113 : vector<8x512xf32>
    %115 = arith.truncf %114 : vector<8x512xf32> to vector<8x512xbf16>
    %cst_63 = arith.constant dense<0.000000e+00> : vector<8x512xf32>
    %116 = tpu.matmul %105, %107, %cst_63 {dimension_numbers = #tpu.dot_dimension_numbers<[1], [0], [0], [1], [0, 0, 1, 1], [], []>} : vector<8x512xbf16>, vector<512x512xbf16>, vector<8x512xf32> -> vector<8x512xf32>
    %117 = vector.broadcast %109 : vector<1x512xf32> to vector<8x512xf32>
    %118 = arith.addf %116, %117 : vector<8x512xf32>
    %cst_64 = arith.constant 0.000000e+00 : f32
    %119 = vector.broadcast %cst_64 : f32 to vector<8x512xf32>
    %120 = arith.maximumf %118, %119 : vector<8x512xf32>
    %121 = arith.truncf %120 : vector<8x512xf32> to vector<8x512xbf16>
    %c0_65 = arith.constant 0 : index
    %c0_66 = arith.constant 0 : index
    %122 = vector.load %arg7[%c0_65, %c0_66] : memref<512x384xbf16, #tpu.memory_space<vmem>>, vector<512x384xbf16>
    %c0_67 = arith.constant 0 : index
    %c0_68 = arith.constant 0 : index
    %123 = vector.load %arg8[%c0_67, %c0_68] : memref<1x384xf32, #tpu.memory_space<vmem>>, vector<1x384xf32>
    %cst_69 = arith.constant dense<0.000000e+00> : vector<8x384xf32>
    %124 = tpu.matmul %115, %122, %cst_69 {dimension_numbers = #tpu.dot_dimension_numbers<[1], [0], [0], [1], [0, 0, 1, 1], [], []>} : vector<8x512xbf16>, vector<512x384xbf16>, vector<8x384xf32> -> vector<8x384xf32>
    %125 = vector.broadcast %123 : vector<1x384xf32> to vector<8x384xf32>
    %126 = arith.addf %124, %125 : vector<8x384xf32>
    %127 = vector.extract_strided_slice %126 {offsets = [0, 0], sizes = [8, 128], strides = [1, 1]} : vector<8x384xf32> to vector<8x128xf32>
    %c1_i32 = arith.constant 1 : i32
    %128 = vector.broadcast %c1_i32 : i32 to vector<8x1xi32>
    %129 = arith.cmpi eq, %10, %128 : vector<8x1xi32>
    %130 = vector.extract_strided_slice %126 {offsets = [0, 128], sizes = [8, 128], strides = [1, 1]} : vector<8x384xf32> to vector<8x128xf32>
    %131 = vector.shape_cast %129 : vector<8x1xi1> to vector<8x1xi1>
    %132 = vector.broadcast %131 : vector<8x1xi1> to vector<8x128xi1>
    %133 = arith.select %132, %130, %127 : vector<8x128xi1>, vector<8x128xf32>
    %c2_i32_70 = arith.constant 2 : i32
    %134 = vector.broadcast %c2_i32_70 : i32 to vector<8x1xi32>
    %135 = arith.cmpi eq, %10, %134 : vector<8x1xi32>
    %136 = vector.extract_strided_slice %126 {offsets = [0, 256], sizes = [8, 128], strides = [1, 1]} : vector<8x384xf32> to vector<8x128xf32>
    %137 = vector.shape_cast %135 : vector<8x1xi1> to vector<8x1xi1>
    %138 = vector.broadcast %137 : vector<8x1xi1> to vector<8x128xi1>
    %139 = arith.select %138, %136, %133 : vector<8x128xi1>, vector<8x128xf32>
    %140 = vector.extract_strided_slice %139 {offsets = [0, 0], sizes = [8, 64], strides = [1, 1]} : vector<8x128xf32> to vector<8x64xf32>
    %c0_71 = arith.constant 0 : index
    %c0_72 = arith.constant 0 : index
    %141 = vector.load %arg9[%c0_71, %c0_72] : memref<16x64xf32, #tpu.memory_space<vmem>>, vector<8x64xf32>
    tpu.vector_store %arg9[%c0_71, %c0_72], %140 {strides = array<i32>} : memref<16x64xf32, #tpu.memory_space<vmem>>, vector<8x64xf32>,
    %cst_73 = arith.constant dense<0.000000e+00> : vector<8x384xf32>
    %142 = tpu.matmul %121, %122, %cst_73 {dimension_numbers = #tpu.dot_dimension_numbers<[1], [0], [0], [1], [0, 0, 1, 1], [], []>} : vector<8x512xbf16>, vector<512x384xbf16>, vector<8x384xf32> -> vector<8x384xf32>
    %143 = vector.broadcast %123 : vector<1x384xf32> to vector<8x384xf32>
    %144 = arith.addf %142, %143 : vector<8x384xf32>
    %145 = vector.extract_strided_slice %144 {offsets = [0, 0], sizes = [8, 128], strides = [1, 1]} : vector<8x384xf32> to vector<8x128xf32>
    %c1_i32_74 = arith.constant 1 : i32
    %146 = vector.broadcast %c1_i32_74 : i32 to vector<8x1xi32>
    %147 = arith.cmpi eq, %11, %146 : vector<8x1xi32>
    %148 = vector.extract_strided_slice %144 {offsets = [0, 128], sizes = [8, 128], strides = [1, 1]} : vector<8x384xf32> to vector<8x128xf32>
    %149 = vector.shape_cast %147 : vector<8x1xi1> to vector<8x1xi1>
    %150 = vector.broadcast %149 : vector<8x1xi1> to vector<8x128xi1>
    %151 = arith.select %150, %148, %145 : vector<8x128xi1>, vector<8x128xf32>
    %c2_i32_75 = arith.constant 2 : i32
    %152 = vector.broadcast %c2_i32_75 : i32 to vector<8x1xi32>
    %153 = arith.cmpi eq, %11, %152 : vector<8x1xi32>
    %154 = vector.extract_strided_slice %144 {offsets = [0, 256], sizes = [8, 128], strides = [1, 1]} : vector<8x384xf32> to vector<8x128xf32>
    %155 = vector.shape_cast %153 : vector<8x1xi1> to vector<8x1xi1>
    %156 = vector.broadcast %155 : vector<8x1xi1> to vector<8x128xi1>
    %157 = arith.select %156, %154, %151 : vector<8x128xi1>, vector<8x128xf32>
    %158 = vector.extract_strided_slice %157 {offsets = [0, 0], sizes = [8, 64], strides = [1, 1]} : vector<8x128xf32> to vector<8x64xf32>
    %c8 = arith.constant 8 : index
    %c0_76 = arith.constant 0 : index
    %159 = vector.load %arg9[%c8, %c0_76] : memref<16x64xf32, #tpu.memory_space<vmem>>, vector<8x64xf32>
    tpu.vector_store %arg9[%c8, %c0_76], %158 {strides = array<i32>} : memref<16x64xf32, #tpu.memory_space<vmem>>, vector<8x64xf32>,
    return
  }
  func.func @transform_0(%arg0: i32) -> (i32, i32) {
    %c0_i32 = arith.constant 0 : i32
    %c0_i32_0 = arith.constant 0 : i32
    return %arg0, %c0_i32 : i32, i32
  }
  func.func @transform_1(%arg0: i32) -> (i32, i32) {
    %c0_i32 = arith.constant 0 : i32
    %c0_i32_0 = arith.constant 0 : i32
    return %arg0, %c0_i32 : i32, i32
  }
  func.func @transform_2(%arg0: i32) -> (i32, i32) {
    %c0_i32 = arith.constant 0 : i32
    %c0_i32_0 = arith.constant 0 : i32
    %c0_i32_1 = arith.constant 0 : i32
    return %c0_i32, %c0_i32_0 : i32, i32
  }
  func.func @transform_3(%arg0: i32) -> (i32, i32) {
    %c0_i32 = arith.constant 0 : i32
    %c0_i32_0 = arith.constant 0 : i32
    %c0_i32_1 = arith.constant 0 : i32
    return %c0_i32, %c0_i32_0 : i32, i32
  }
  func.func @transform_4(%arg0: i32) -> (i32, i32, i32) {
    %c0_i32 = arith.constant 0 : i32
    %c0_i32_0 = arith.constant 0 : i32
    %c0_i32_1 = arith.constant 0 : i32
    %c0_i32_2 = arith.constant 0 : i32
    return %c0_i32, %c0_i32_0, %c0_i32_1 : i32, i32, i32
  }
  func.func @transform_5(%arg0: i32) -> (i32, i32, i32) {
    %c0_i32 = arith.constant 0 : i32
    %c0_i32_0 = arith.constant 0 : i32
    %c0_i32_1 = arith.constant 0 : i32
    %c0_i32_2 = arith.constant 0 : i32
    return %c0_i32, %c0_i32_0, %c0_i32_1 : i32, i32, i32
  }
  func.func @transform_6(%arg0: i32) -> (i32, i32) {
    %c0_i32 = arith.constant 0 : i32
    %c0_i32_0 = arith.constant 0 : i32
    %c0_i32_1 = arith.constant 0 : i32
    return %c0_i32, %c0_i32_0 : i32, i32
  }
  func.func @transform_7(%arg0: i32) -> (i32, i32) {
    %c0_i32 = arith.constant 0 : i32
    %c0_i32_0 = arith.constant 0 : i32
    %c0_i32_1 = arith.constant 0 : i32
    return %c0_i32, %c0_i32_0 : i32, i32
  }
  func.func @transform_8(%arg0: i32) -> (i32, i32) {
    %c0_i32 = arith.constant 0 : i32
    %c0_i32_0 = arith.constant 0 : i32
    return %arg0, %c0_i32 : i32, i32
  }
}

</mosaic_0001>

<bundles_post_ra>
// kernel: tpu_custom_call.1
= control target key start
LH: loop header
LB: loop body
LE: loop exit
PB: predicated region body
PF: predicated region fallthrough
CT: control target
= control target key end

     0   :  { %s18616_s0 = inlined_call_operand.hbm [shape: f32[24,64], index: 0, kind: input, shape index: {}]   ;;  %s18617_s1 = inlined_call_operand.vmem [shape: s32[24,1], index: 1, kind: input, shape index: {}]   ;;  %s18618_s2 = inlined_call_operand.hbm [shape: bf16[64,512], index: 2, kind: input, shape index: {}]   ;;  %s18619_s3 = inlined_call_operand.hbm [shape: f32[1,512], index: 3, kind: input, shape index: {}]   ;;  %s18620_s4 = inlined_call_operand.hbm [shape: bf16[6,512,512], index: 4, kind: input, shape index: {}]   ;;  %s18621_s5 = inlined_call_operand.hbm [shape: f32[6,1,512], index: 5, kind: input, shape index: {}]   ;;  %s18622_s6 = inlined_call_operand.hbm [shape: bf16[512,384], index: 6, kind: input, shape index: {}]   ;;  %s18623_s7 = inlined_call_operand.hbm [shape: f32[1,384], index: 7, kind: input, shape index: {}]   ;;  %s18624_s8 = inlined_call_operand.hbm [shape: f32[24,64], index: 8, kind: output, shape index: {}]  }
   0x1   :  { %19217 = sst [smem:[#allocation109_spill]] %s18618_s2 }
   0x2   :  { %19218 = sst [smem:[#allocation110_spill]] %s18620_s4 }
   0x3   :  { %19219 = sst [smem:[#allocation111_spill]] %s18622_s6 }
   0x4   :  { %13 = vsyncpa [#allocation3], 0 }
   0x5   :  { %15 = vsyncpa [#allocation3 + $0x1], 0 }
   0x6   :  { %16 = vsyncpa [#allocation6], 0 }
   0x7   :  { %17 = vsyncpa [#allocation9], 0 }
   0x8   :  { %18 = vsyncpa [#allocation12], 0 }
   0x9   :  { %19 = vsyncpa [#allocation4], 0 }
   0xa   :  { %21 = vsyncpa [#allocation4 + $0x1], 0  ;;  %s14086_s27 = smov 0   ;;  %s14088_s28 = smov 0  }
   0xb   :  { %s14090_s29 = smov 0   ;;  %s14092_s30 = smov 0  }
   0xc LB: > { %19220 = sst [smem:[#allocation20_spill]] %s14008_s27  ;;  %s14107_s9 = sadd.s32 4294967295, %s14020_s30   ;;  %s14020_s30 = sphi %s14092_s30, %s20386_s30   ;;  %s14016_s29 = sphi %s14090_s29, %s20390_s29   ;;  %s14012_s28 = sphi %s14088_s28, %s20389_s28   ;;  %s14008_s27 = sphi %s14086_s27, %s20388_s27  }
   0xd   : > { %s9153_s10 = sadd.s32 4294967294, %s14020_s30   ;;  %s14111_s11 = sadd.s32 1, %s14020_s30  }
   0xe   : > { %19221 = sst [smem:[#allocation21_spill]] %s14111_s11  ;;  %s34_s12 = sadd.s32 1, %s14016_s29 }
   0xf   : > { %s31_s13 = ssub.s32 %s14020_s30, %s14111_s11  ;;  %p41_p0 = scmp.ne.s32.totalorder %s14016_s29, %s14012_s28 }
  0x10   : > { %p32_p1 = scmp.eq.s32.totalorder %s31_s13, 0  ;;  %p42_p2 = scmp.eq.s32.totalorder %s14020_s30, 0 }
  0x11   : > { %p47_p3 = scmp.ne.s32.totalorder %s14012_s28, %s14008_s27  ;;  %p18630_p4 = scmp.eq.s32.totalorder %s14107_s9, 0 }
  0x12   : > { %s14123_s14 = scalar_select %p32_p1, %s14016_s29, %s34_s12  }
  0x13   : > { %p14125_p5 = por %p42_p2, %p41_p0  ;;  %p14131_p6 = por %p18630_p4, %p47_p3 }
  0x14   : > { %19222 = sst [smem:[#allocation22_spill]] %s14123_s14  ;;  %p223_p7 = scmp.eq.s32.totalorder %s14107_s9, 1 }
  0x15   : > { %p229_p8 = scmp.eq.s32.totalorder %s9153_s10, 1  ;;  %p9154_p9 = scmp.ge.s32.totalorder %s14020_s30, 1 }
  0x16   : > { %p236_p10 = scmp.lt.s32.totalorder %s14020_s30, 3  ;;  %p14138_p11 = por %p223_p7, %p41_p0 }
  0x17   : > { %p14142_p12 = por %p229_p8, %p47_p3  ;;  %s19229_s2 = sld [smem:[#allocation109_spill]] }
  0x18   : > { %p14146_p13 = pnand %p9154_p9, %p236_p10  ;;  %s14022_s23 = smov [#allocation5]  }
  0x19   : > { %s19226_s18 = scalar_select %p14142_p12, 1, 0 }
  0x1a   : > { %p13625_p1 = pneg %p14146_p13  ;;  %s249_s24 = sshll.u32 %s14022_s23, 4  ;;  %s250_s24 = int_to_ptr.vmem [resolvable:$true] %s249_s24 }
  0x1b   : > { %19227 = sst [smem:[#allocation23_spill]] %s19226_s18  ;;  %s14023_s13 = smov 256  }
  0x1c   : > { %p14157_p0 = pnand %p13625_p1, %p18630_p4  ;;  %s19231_s4 = sld [smem:[#allocation110_spill]] }
  0x1d   : > { %s247_s22 = sshll.u32 %s19229_s2, 4  ;;  %s14024_s20 = smov 16   ;;  %s248_s22 = int_to_ptr.hbm [resolvable:$true] %s247_s22 }
  0x1e   : > { %13628 = dma.hbm_to_vmem [thread:$0]  (!%p14157_p0), %s248_s22, 2048, %s250_s24, [#allocation6], %s14023_s13, %s14023_s13, %s14024_s20  }
  0x1f   : > { %s19232_s6 = sld [smem:[#allocation111_spill]]  ;;  %s14025_s14 = smov [#allocation8]  }
  0x20   : > { %s275_s11 = sshll.u32 %s14025_s14, 4  ;;  %s14026_s26 = smov [#allocation11]   ;;  %s276_s11 = int_to_ptr.vmem [resolvable:$true] %s275_s11 }
  0x21   : > { %s303_s10 = sshll.u32 %s14026_s26, 4  ;;  %s14028_s18 = smov 12   ;;  %s304_s10 = int_to_ptr.vmem [resolvable:$true] %s303_s10 }
  0x22   : > { %s273_s12 = sshll.u32 %s19231_s4, 4  ;;  %s14027_s4 = smov 192   ;;  %s274_s12 = int_to_ptr.hbm [resolvable:$true] %s273_s12 }
  0x23   : > { %13634 = dma.hbm_to_vmem [thread:$0]  (!%p14157_p0), %s274_s12, 98304, %s276_s11, [#allocation9], %s14023_s13, %s14023_s13, %s14024_s20  }
  0x24   : > { %s262_s21 = sshll.u32 %s18619_s3, 4  ;;  %s14029_s23 = smov [#allocation7]   ;;  %s263_s21 = int_to_ptr.hbm [resolvable:$true] %s262_s21 }
  0x25   : > { %s301_s2 = sshll.u32 %s19232_s6, 4  ;;  %s264_s14 = sshll.u32 %s14029_s23, 4  ;;  %s302_s2 = int_to_ptr.hbm [resolvable:$true] %s301_s2  ;;  %s265_s14 = int_to_ptr.vmem [resolvable:$true] %s264_s14 }
  0x26   : > { %13640 = dma.hbm_to_vmem [thread:$0]  (!%p14157_p0), %s302_s2, 12288, %s304_s10, [#allocation12], %s14027_s4, %s14027_s4, %s14028_s18  }
  0x27   : > { %s287_s11 = sshll.u32 %s18621_s5, 4  ;;  %s14030_s12 = smov [#allocation10]   ;;  %s288_s11 = int_to_ptr.hbm [resolvable:$true] %s287_s11 }
  0x28   : > { %13631 = dma.hbm_to_vmem [thread:$0]  (!%p14157_p0), %s263_s21, 64, %s265_s14, [#allocation6]  }
  0x29   : > { %s289_s13 = sshll.u32 %s14030_s12, 4  ;;  %s14031_s2 = smov 64   ;;  %s290_s13 = int_to_ptr.vmem [resolvable:$true] %s289_s13 }
  0x2a   : > { %s14032_s4 = smov 4   ;;  %s316_s26 = sshll.u32 %s18623_s7, 4  ;;  %s317_s26 = int_to_ptr.hbm [resolvable:$true] %s316_s26 }
  0x2b   : > { %13637 = dma.hbm_to_vmem [thread:$0]  (!%p14157_p0), %s288_s11, 384, %s290_s13, [#allocation9], %s14031_s2, %s14031_s2, %s14032_s4  }
  0x2c   : > { %s14033_s10 = smov [#allocation13]   ;;  %p18629_p2 = scmp.ge.s32.totalorder %s14020_s30, 2 }
  0x2d   : > { %s318_s22 = sshll.u32 %s14033_s10, 4  ;;  %s319_s22 = int_to_ptr.vmem [resolvable:$true] %s318_s22 }
  0x2e   : > { %13643 = dma.hbm_to_vmem [thread:$0]  (!%p14157_p0), %s317_s26, 48, %s319_s22, [#allocation12]  }
  0x2f   : > { %325 = sbr.rel (%p18629_p2) target bundleno = 88 (0x58), region = 40 }
  0x34   : > { %328 = sbr.rel (!%p14125_p5) target bundleno = 88 (0x58), region = 44  ;;  %s329_s6 = sand.u32 (%p14125_p5), 1, %s14016_s29  }
  0x35   : > { %s9163_s27 = sshll.u32 (%p14125_p5), %s14020_s30, 1  ;;  %s9162_s24 = sshll.u32 (%p14125_p5), %s329_s6, 4 }
  0x36   : > { %s335_s21 = ssub.s32 (%p14125_p5), 3, %s9163_s27  ;;  %s14198_s11 = scalar_lea.sflag (%p14125_p5), [#allocation3], %s329_s6 }
  0x37   : > { %p336_p3 = scmp.lt.s32.totalorder (%p14125_p5), %s335_s21, 2  ;;  %s333_s12 = scalar_lea.vmem (%p14125_p5), [#allocation2], %s9162_s24 }
  0x39   : > { %s20392_s21 = smov (!%p336_p3, %s335_s21), 2 }
  0x3a   : > { %s9164_s25 = sshll.u32 %s20392_s21, 3 }
  0x3b   : > { %s339_s23 = ssub.s32 16, %s9164_s25 }
  0x3c   : > { %s340_s14 = sshll.u32 %s339_s23, 4 }
  0x3d   : > { %341 = vsyncadd %s14198_s11, %s340_s14  ;;  %p14201_p5 = scmp.ne.s32.totalorder %s9164_s25, 0  ;;  %s12717_s13 = sshll.u32 %s14020_s30, 4 }
  0x3e   : > { %s344_s18 = scalar_lea.hbm %s18616_s0, %s12717_s13  ;;  %s14209_s20 = sshll.u32 %s333_s12, 4  ;;  %s349_s20 = int_to_ptr.vmem [resolvable:$true] %s14209_s20 }
  0x3f   : > { %s346_s26 = sshll.u32 %s344_s18, 4  ;;  %s9168_s10 = sshll.u32 %s20392_s21, 7  ;;  %s14212_s26 = int_to_ptr.hbm [resolvable:$true] %s346_s26 }
  0x40   : > { %s13892_s22 = sshra.s32 %s14212_s26, 4  ;;  %s13894_s6 = sshrl.u32 %s9168_s10, 4  ;;  %s13893_s22 = int_to_ptr.hbm [resolvable:$true] %s13892_s22 }
  0x41   : > { %s13899_s27 = scalar_lea.hbm %s13893_s22, %s13894_s6  ;;  %s13903_s23 = scalar_lea.hbm %s18616_s0, 24 }
  0x42   : > { %p13900_p7 = scmp.ne.s32.totalorder %s13893_s22, %s13899_s27  ;;  %p13904_p10 = scmp.lt.s32.totalorder %s13893_s22, %s18616_s0 }
  0x43   : > { %p13905_p1 = scmp.lt.s32.totalorder %s13903_s23, %s13899_s27 }
  0x44   : > { %p13901_p8 = pnand %p13900_p7, %p14201_p5 }
  0x45   : > { %p13906_p0 = por %p13905_p1, %p13904_p10 }
  0x46   : > { %p13902_p9 = pneg %p13901_p8 }
  0x48   : > { %p13907_p3 = pnand %p13906_p0, %p13902_p9 }
  0x4a   : > { %13910 = shalt.err (!%p13907_p3)
}
  0x4b   : > { %s13911_s13 = sshra.s32 %s349_s20, 4  ;;  %s14034_s4 = smov [#allocation2]   ;;  %s13912_s13 = int_to_ptr.vmem [resolvable:$true] %s13911_s13 }
  0x4c   : > { %s13918_s2 = scalar_lea.vmem %s13912_s13, %s13894_s6  ;;  %s13922_s18 = scalar_lea.vmem %s14034_s4, 32 }
  0x4d   : > { %p13919_p7 = scmp.ne.s32.totalorder %s13912_s13, %s13918_s2  ;;  %p13924_p4 = scmp.lt.s32.totalorder %s13922_s18, %s13918_s2 }
  0x4f   : > { %p13920_p8 = pnand %p13919_p7, %p14201_p5 }
  0x51   : > { %p13921_p2 = pneg %p13920_p8 }
  0x53   : > { %p13926_p12 = pnand %p13924_p4, %p13921_p2 }
  0x55   : > { %13929 = shalt.err (!%p13926_p12)
}
  0x56   : > { %s14035_s22 = smov 128   ;;  %s14036_s27 = smov 8  }
  0x57   : > { %354 = dma.hbm_to_vmem [thread:$0]  (%p14201_p5), %s14212_s26, %s9168_s10, %s349_s20, %s14198_s11, %s14035_s22, %s14035_s22, %s14036_s27  }
  0x58 PF: > { %377 = sbr.rel (%p14146_p13) target bundleno = 2101 (0x835), region = 52 }
  0x5d   : > { %s14241_s6 = sand.u32 1, %s14012_s28  }
  0x5e   : > { %s9170_s24 = sshll.u32 %s14241_s6, 4  ;;  %s380_s25 = scalar_lea.sflag [#allocation3], %s14241_s6 }
  0x5f   : > { %s14247_s23 = scalar_lea.vmem [#allocation2], %s9170_s24 }
  0x60   : > { %13987 = dma.done.wait (%p14131_p6), %s380_s25, 256  }
  0x61   : > { %13989 = vsyncadd (%p14131_p6), %s380_s25, 4294967040  ;;  %p19234_p4 = scmp.eq.s32.totalorder %s14107_s9, 0 }
  0x63   : > { %13991 = dma.done.wait (%p19234_p4), [#allocation6], 2112   ;;  %p19235_p12 = pmov %p19234_p4 }
  0x64   : > { %p19236_p13 = pmov %p19234_p4 }
  0x65   : > { %13993 = vsyncadd (%p19235_p12), [#allocation6], 4294965184 }
  0x66   : > { %13995 = dma.done.wait (%p19236_p13), [#allocation9], 98688   ;;  %p19237_p2 = pmov %p19234_p4 }
  0x68   : > { %13997 = vsyncadd (%p19237_p2), [#allocation9], 4294868608  ;;  %p19238_p5 = pmov %p19237_p2 }
  0x69   : > { %p19239_p9 = pmov %p19237_p2 }
  0x6a   : > { %13999 = dma.done.wait (%p19238_p5), [#allocation12], 12336  }
  0x6b   : > { %14001 = vsyncadd (%p19239_p9), [#allocation12], 4294954960  ;;  %v9230_v0 = vld [vmem:[#allocation5 + $0x60] sm:$0xf]  ;;  %v12732_v1 = vld [vmem:[#allocation5 + $0x6c] sm:$0xf0] }
  0x6c   : > { %v12730_v2 = vld [vmem:[#allocation5 + $0x64] sm:$0xf]  ;;  %v14265_v3 = vor.u32 %v12732_v1, %v9230_v0  ;;  %v9232_v4 = vld [vmem:[#allocation5 + $0x70] sm:$0xf0]  ;;  %v9238_v5 = vld [vmem:[#allocation5 + $0x68] sm:$0xf] }
  0x6d   : > { %v12733_v6 = vld [vmem:[#allocation5 + $0x74] sm:$0xf0]  ;;  %v9235_v7 = vor.u32 %v12730_v2, %v9232_v4  ;;  %v12731_v9 = vld [vmem:[#allocation5 + $0x6c] sm:$0xf]  ;;  %v9240_v10 = vld [vmem:[#allocation5 + $0x78] sm:$0xf0] }
  0x6e   : > { %v14267_v8 = vor.u32 %v12733_v6, %v9238_v5  ;;  %v9214_v11 = vld [vmem:[#allocation5 + $0x40] sm:$0xf]  ;;  %609 = vmatpush.bf16.msra.mxu0 %v14265_v3  ;;  %v9243_v12 = vor.u32 %v12731_v9, %v9240_v10  ;;  %v12728_v13 = vld [vmem:[#allocation5 + $0x4c] sm:$0xf0]  ;;  %v12726_v14 = vld [vmem:[#allocation5 + $0x44] sm:$0xf] }
  0x6f   : > { %v9216_v15 = vld [vmem:[#allocation5 + $0x50] sm:$0xf0]  ;;  %622 = vmatpush.bf16.msra.mxu1 %v9235_v7  ;;  %v9215_v16 = vor.u32 %v12728_v13, %v9214_v11  ;;  %v9222_v18 = vld [vmem:[#allocation5 + $0x48] sm:$0xf]  ;;  %v12729_v19 = vld [vmem:[#allocation5 + $0x54] sm:$0xf0] }
  0x70   : > { %635 = vmatpush.bf16.msra.mxu2 %v14267_v8  ;;  %v9219_v17 = vor.u32 %v12726_v14, %v9216_v15  ;;  %v12727_v20 = vld [vmem:[#allocation5 + $0x4c] sm:$0xf]  ;;  %648 = vmatpush.bf16.msra.mxu3 %v9243_v12  ;;  %v9223_v21 = vor.u32 %v12729_v19, %v9222_v18  ;;  %v9224_v22 = vld [vmem:[#allocation5 + $0x58] sm:$0xf0]  ;;  %v9198_v23 = vld [vmem:[#allocation5 + $0x20] sm:$0xf] }
  0x71   : > { %v12724_v24 = vld [vmem:[#allocation5 + $0x2c] sm:$0xf0]  ;;  %v9227_v25 = vor.u32 %v12727_v20, %v9224_v22  ;;  %v12722_v26 = vld [vmem:[#allocation5 + $0x24] sm:$0xf]  ;;  %v9200_v27 = vld [vmem:[#allocation5 + $0x30] sm:$0xf0] }
  0x72   : > { %v9206_v28 = vld [vmem:[#allocation5 + $0x28] sm:$0xf]  ;;  %610 = vmatpush.bf16.msra.mxu0 %v9215_v16  ;;  %v9199_v29 = vor.u32 %v12724_v24, %v9198_v23  ;;  %v12725_v30 = vld [vmem:[#allocation5 + $0x34] sm:$0xf0]  ;;  %v12723_v31 = vld [vmem:[#allocation5 + $0x2c] sm:$0xf]  ;;  %v9203_v33 = vor.u32 %v12722_v26, %v9200_v27 }
  0x73   : > { %v9208_v32 = vld [vmem:[#allocation5 + $0x38] sm:$0xf0]  ;;  %623 = vmatpush.bf16.msra.mxu1 %v9219_v17  ;;  %v9207_v34 = vor.u32 %v12725_v30, %v9206_v28  ;;  %v9182_v35 = vld [vmem:[#allocation5] sm:$0xf]  ;;  %v12720_v36 = vld [vmem:[#allocation5 + $0xc] sm:$0xf0] }
  0x74   : > { %636 = vmatpush.bf16.msra.mxu2 %v9223_v21  ;;  %v12718_v37 = vld [vmem:[#allocation5 + $0x4] sm:$0xf]  ;;  %649 = vmatpush.bf16.msra.mxu3 %v9227_v25  ;;  %v9211_v38 = vor.u32 %v12723_v31, %v9208_v32  ;;  %v9184_v39 = vld [vmem:[#allocation5 + $0x10] sm:$0xf0]  ;;  %v9190_v40 = vld [vmem:[#allocation5 + $0x8] sm:$0xf]  ;;  %v9183_v44 = vor.u32 %v12720_v36, %v9182_v35 }
  0x75   : > { %v12721_v41 = vld [vmem:[#allocation5 + $0x14] sm:$0xf0]  ;;  %v12719_v42 = vld [vmem:[#allocation5 + $0xc] sm:$0xf]  ;;  %v9192_v43 = vld [vmem:[#allocation5 + $0x18] sm:$0xf0]  ;;  %v9187_v46 = vor.u32 %v12718_v37, %v9184_v39 }
  0x76   : > { %611 = vmatpush.bf16.msra.mxu0 %v9199_v29  ;;  %v481_v45 = vld [vmem:[%s14247_s23] sm:$0xff]  ;;  %v9191_v47 = vor.u32 %v12721_v41, %v9190_v40  ;;  %v9195_v48 = vor.u32 %v12719_v42, %v9192_v43  ;;  %vm601_vm0 = vcmask 523264   ;;  %v482_v0 = vld [vmem:[%s14247_s23 + $0x8] sm:$0xff]  ;;  %s18177_s16 = sshll.u32 %s14107_s9, 1  ;;  %s18545_s26 = scalar_lea.vmem [#allocation14], %s9170_s24 }
  0x77   : > { %624 = vmatpush.bf16.msra.mxu1 %v9203_v33  ;;  %v493_v49 = vpack.c.bf16 %v481_v45, %v481_v45  ;;  %v9366_v50 = vld [vmem:[#allocation8 + $0xe0] sm:$0xf]  ;;  %v12764_v51 = vld [vmem:[#allocation8 + $0xec] sm:$0xf0]  ;;  %v494_v11 = vpack.c.bf16 %v482_v0, %v482_v0  ;;  %p466_p6 = scmp.lt.s32.totalorder %s18177_s16, 2  ;;  %s8989_s10 = scalar_lea.sflag [#allocation4], %s14241_s6 }
  0x78   : > { %637 = vmatpush.bf16.msra.mxu2 %v9207_v34  ;;  %650 = vmatpush.bf16.msra.mxu3 %v9211_v38  ;;  %v9494_v52 = vld [vmem:[#allocation8 + $0x1e0] sm:$0xf]  ;;  %v12796_v53 = vld [vmem:[#allocation8 + $0x1ec] sm:$0xf0]  ;;  %v14278_v54 = vor.u32 %v12764_v51, %v9366_v50  ;;  %s8997_s14 = ssub.s32 (%p14138_p11), 3, %s18177_s16 }
  0x79   : > { %v9350_v55 = vld [vmem:[#allocation8 + $0xc0] sm:$0xf]  ;;  %v12828_v57 = vld [vmem:[#allocation8 + $0x2ec] sm:$0xf0]  ;;  %v14280_v58 = vor.u32 %v12796_v53, %v9494_v52  ;;  %s18212_s19 = scalar_select %p466_p6, %s18177_s16, 2 }
  0x7a   : > { %612 = vmatpush.bf16.msra.mxu0 %v9183_v44  ;;  %v9622_v56 = vld [vmem:[#allocation8 + $0x2e0] sm:$0xf]  ;;  %v12760_v59 = vld [vmem:[#allocation8 + $0xcc] sm:$0xf0]  ;;  %p8998_p10 = scmp.lt.s32.totalorder (%p14138_p11), %s8997_s14, 2 }
  0x7b   : > { %625 = vmatpush.bf16.msra.mxu1 %v9187_v46  ;;  %v9750_v60 = vld [vmem:[#allocation8 + $0x3e0] sm:$0xf]  ;;  %v12860_v61 = vld [vmem:[#allocation8 + $0x3ec] sm:$0xf0]  ;;  %v14283_v1 = vor.u32 %v12828_v57, %v9622_v56  ;;  %v14286_v2 = vor.u32 %v12760_v59, %v9350_v55  ;;  %s9179_s21 = sshll.u32 %s18212_s19, 3 }
  0x7c   : > { %638 = vmatpush.bf16.msra.mxu2 %v9191_v47  ;;  %651 = vmatpush.bf16.msra.mxu3 %v9195_v48  ;;  %v9478_v62 = vld [vmem:[#allocation8 + $0x1c0] sm:$0xf]  ;;  %v12792_v63 = vld [vmem:[#allocation8 + $0x1cc] sm:$0xf0]  ;;  %s18243_s20 = scalar_lea.vmem %s18617_s1, %s9179_s21 }
  0x7d   : > { %9244 = vmatmul.msk.bf16.vlgmr.msra.gmra.mxu0 %vm601_vm0, %v493_v49  ;;  %v9334_v4 = vld [vmem:[#allocation8 + $0xa0] sm:$0xf]  ;;  %v12824_v6 = vld [vmem:[#allocation8 + $0x2cc] sm:$0xf0] }
  0x7e   : > { %672 = vmatpush.bf16.msrb.mxu0 %v14265_v3  ;;  %9245 = vmatmul.msk.bf16.vlgmr.msra.gmra.mxu1 %vm601_vm0, %v493_v49  ;;  %v14288_v3 = vor.u32 %v12860_v61, %v9750_v60  ;;  %v9606_v5 = vld [vmem:[#allocation8 + $0x2c0] sm:$0xf]  ;;  %v12856_v10 = vld [vmem:[#allocation8 + $0x3cc] sm:$0xf0] }
  0x7f   : > { %685 = vmatpush.bf16.msrb.mxu1 %v9235_v7  ;;  %9246 = vmatmul.msk.bf16.vlgmr.msra.gmra.mxu2 %vm601_vm0, %v493_v49  ;;  %v14291_v7 = vor.u32 %v12792_v63, %v9478_v62  ;;  %v9734_v9 = vld [vmem:[#allocation8 + $0x3c0] sm:$0xf]  ;;  %v12788_v13 = vld [vmem:[#allocation8 + $0x1ac] sm:$0xf0]  ;;  %v14294_v14 = vor.u32 %v12824_v6, %v9606_v5 }
  0x80   : > { %9247 = vmatmul.msk.bf16.vlgmr.msra.gmra.mxu3 %vm601_vm0, %v493_v49  ;;  %698 = vmatpush.bf16.msrb.mxu2 %v14267_v8  ;;  %v12756_v8 = vld [vmem:[#allocation8 + $0xac] sm:$0xf0]  ;;  %v9590_v18 = vld [vmem:[#allocation8 + $0x2a0] sm:$0xf] }
  0x81   : > { %711 = vmatpush.bf16.msrb.mxu3 %v9243_v12  ;;  %v9462_v12 = vld [vmem:[#allocation8 + $0x1a0] sm:$0xf]  ;;  %v14298_v15 = vor.u32 %v12756_v8, %v9334_v4  ;;  %v12820_v19 = vld [vmem:[#allocation8 + $0x2ac] sm:$0xf0] }
  0x82   : > { %673 = vmatpush.bf16.msrb.mxu0 %v9215_v16  ;;  %v14300_v16 = vor.u32 %v12856_v10, %v9734_v9  ;;  %v14303_v20 = vor.u32 %v12788_v13, %v9462_v12  ;;  %v9718_v22 = vld [vmem:[#allocation8 + $0x3a0] sm:$0xf]  ;;  %v12852_v23 = vld [vmem:[#allocation8 + $0x3ac] sm:$0xf0]  ;;  %v14309_v26 = vor.u32 %v12820_v19, %v9590_v18  ;;  %v12762_v19 = vld [vmem:[#allocation8 + $0xe4] sm:$0xf] }
  0x83   : > { %686 = vmatpush.bf16.msrb.mxu1 %v9219_v17  ;;  %v9318_v17 = vld [vmem:[#allocation8 + $0x80] sm:$0xf]  ;;  %v14316_v28 = vor.u32 %v12852_v23, %v9718_v22  ;;  %v12816_v31 = vld [vmem:[#allocation8 + $0x28c] sm:$0xf0]  ;;  %v12794_v22 = vld [vmem:[#allocation8 + $0x1e4] sm:$0xf] }
  0x84   : > { %699 = vmatpush.bf16.msrb.mxu2 %v9223_v21  ;;  %v12752_v21 = vld [vmem:[#allocation8 + $0x8c] sm:$0xf0]  ;;  %v9446_v24 = vld [vmem:[#allocation8 + $0x180] sm:$0xf]  ;;  %v9496_v23 = vld [vmem:[#allocation8 + $0x1f0] sm:$0xf0] }
  0x85   : > { %712 = vmatpush.bf16.msrb.mxu3 %v9227_v25  ;;  %v12784_v25 = vld [vmem:[#allocation8 + $0x18c] sm:$0xf0]  ;;  %v14314_v27 = vor.u32 %v12752_v21, %v9318_v17  ;;  %v9574_v30 = vld [vmem:[#allocation8 + $0x280] sm:$0xf]  ;;  %v9368_v21 = vld [vmem:[#allocation8 + $0xf0] sm:$0xf0] }
  0x86   : > { %674 = vmatpush.bf16.msrb.mxu0 %v9199_v29  ;;  %v9302_v29 = vld [vmem:[#allocation8 + $0x60] sm:$0xf]  ;;  %v14319_v32 = vor.u32 %v12784_v25, %v9446_v24  ;;  %v12848_v35 = vld [vmem:[#allocation8 + $0x38c] sm:$0xf0] }
  0x87   : > { %687 = vmatpush.bf16.msrb.mxu1 %v9203_v33  ;;  %v12748_v33 = vld [vmem:[#allocation8 + $0x6c] sm:$0xf0]  ;;  %v9430_v36 = vld [vmem:[#allocation8 + $0x160] sm:$0xf] }
  0x88   : > { %700 = vmatpush.bf16.msrb.mxu2 %v9207_v34  ;;  %v9702_v34 = vld [vmem:[#allocation8 + $0x380] sm:$0xf]  ;;  %v12780_v37 = vld [vmem:[#allocation8 + $0x16c] sm:$0xf0]  ;;  %v14326_v39 = vor.u32 %v12748_v33, %v9302_v29 }
  0x89   : > { %713 = vmatpush.bf16.msrb.mxu3 %v9211_v38  ;;  %v14322_v38 = vor.u32 %v12816_v31, %v9574_v30  ;;  %v14328_v40 = vor.u32 %v12848_v35, %v9702_v34  ;;  %v9286_v41 = vld [vmem:[#allocation8 + $0x40] sm:$0xf]  ;;  %v12812_v43 = vld [vmem:[#allocation8 + $0x26c] sm:$0xf0]  ;;  %v12758_v30 = vld [vmem:[#allocation8 + $0xc4] sm:$0xf] }
  0x8a   : > { %675 = vmatpush.bf16.msrb.mxu0 %v9183_v44  ;;  %v9558_v42 = vld [vmem:[#allocation8 + $0x260] sm:$0xf]  ;;  %v14331_v44 = vor.u32 %v12780_v37, %v9430_v36  ;;  %v12744_v45 = vld [vmem:[#allocation8 + $0x4c] sm:$0xf0]  ;;  %v14369_v36 = vor.u32 %v12762_v19, %v9368_v21  ;;  %v12750_v21 = vld [vmem:[#allocation8 + $0x84] sm:$0xf] }
  0x8b   : > { %688 = vmatpush.bf16.msrb.mxu1 %v9187_v46  ;;  %v9686_v46 = vld [vmem:[#allocation8 + $0x360] sm:$0xf]  ;;  %v12776_v49 = vld [vmem:[#allocation8 + $0x14c] sm:$0xf0]  ;;  %v14334_v50 = vor.u32 %v12812_v43, %v9558_v42  ;;  %v14338_v51 = vor.u32 %v12744_v45, %v9286_v41  ;;  %v12826_v41 = vld [vmem:[#allocation8 + $0x2e4] sm:$0xf]  ;;  %v14371_v43 = vor.u32 %v12794_v22, %v9496_v23 }
  0x8c   : > { %701 = vmatpush.bf16.msrb.mxu2 %v9191_v47  ;;  %v12844_v47 = vld [vmem:[#allocation8 + $0x36c] sm:$0xf0]  ;;  %v9270_v53 = vld [vmem:[#allocation8 + $0x20] sm:$0xf]  ;;  %v9624_v42 = vld [vmem:[#allocation8 + $0x2f0] sm:$0xf0] }
  0x8d   : > { %714 = vmatpush.bf16.msrb.mxu3 %v9195_v48  ;;  %9248 = vmatmul.msk.bf16.vlgmr.msrb.gmra.mxu0 %vm601_vm0, %v494_v11  ;;  %v9414_v48 = vld [vmem:[#allocation8 + $0x140] sm:$0xf]  ;;  %v14340_v52 = vor.u32 %v12844_v47, %v9686_v46  ;;  %v12808_v56 = vld [vmem:[#allocation8 + $0x24c] sm:$0xf0]  ;;  %v9352_v45 = vld [vmem:[#allocation8 + $0xd0] sm:$0xf0] }
  0x8e   : > { %1506 = vmatpush.bf16.msra.mxu0 %v14278_v54  ;;  %9249 = vmatmul.msk.bf16.vlgmr.msrb.gmra.mxu1 %vm601_vm0, %v494_v11  ;;  %v9542_v55 = vld [vmem:[#allocation8 + $0x240] sm:$0xf]  ;;  %v14343_v57 = vor.u32 %v12776_v49, %v9414_v48  ;;  %v12740_v59 = vld [vmem:[#allocation8 + $0x2c] sm:$0xf0]  ;;  %v12858_v46 = vld [vmem:[#allocation8 + $0x3e4] sm:$0xf] }
  0x8f   : > { %1519 = vmatpush.bf16.msra.mxu1 %v14280_v58  ;;  %9250 = vmatmul.msk.bf16.vlgmr.msrb.gmra.mxu2 %vm601_vm0, %v494_v11  ;;  %v9670_v60 = vld [vmem:[#allocation8 + $0x340] sm:$0xf]  ;;  %v12840_v61 = vld [vmem:[#allocation8 + $0x34c] sm:$0xf0]  ;;  %v14346_v0 = vor.u32 %v12808_v56, %v9542_v55  ;;  %v14350_v5 = vor.u32 %v12740_v59, %v9270_v53  ;;  %v9752_v47 = vld [vmem:[#allocation8 + $0x3f0] sm:$0xf0]  ;;  %v14380_v56 = vor.u32 %v12826_v41, %v9624_v42 }
  0x90   : > { %1532 = vmatpush.bf16.msra.mxu2 %v14283_v1  ;;  %9251 = vmatmul.msk.bf16.vlgmr.msrb.gmra.mxu3 %vm601_vm0, %v494_v11  ;;  %v9398_v62 = vld [vmem:[#allocation8 + $0x120] sm:$0xf]  ;;  %v12772_v63 = vld [vmem:[#allocation8 + $0x12c] sm:$0xf0]  ;;  %v14352_v6 = vor.u32 %v12840_v61, %v9670_v60  ;;  %v12790_v48 = vld [vmem:[#allocation8 + $0x1c4] sm:$0xf]  ;;  %v14384_v59 = vor.u32 %v12758_v30, %v9352_v45  ;;  %v14386_v60 = vor.u32 %v12858_v46, %v9752_v47 }
  0x91   : > { %1545 = vmatpush.bf16.msra.mxu3 %v14288_v3  ;;  %v9254_v4 = vld [vmem:[#allocation8] sm:$0xf]  ;;  %v12736_v8 = vld [vmem:[#allocation8 + $0xc] sm:$0xf0]  ;;  %v14355_v11 = vor.u32 %v12772_v63, %v9398_v62  ;;  %v9480_v49 = vld [vmem:[#allocation8 + $0x1d0] sm:$0xf0] }
  0x92   : > { %1507 = vmatpush.bf16.msra.mxu0 %v14286_v2  ;;  %v9526_v9 = vld [vmem:[#allocation8 + $0x220] sm:$0xf]  ;;  %v12804_v10 = vld [vmem:[#allocation8 + $0x22c] sm:$0xf0]  ;;  %v14362_v25 = vor.u32 %v12736_v8, %v9254_v4  ;;  %19241 = vst [vmem:[#allocation25_spill] sm:$0xff] %v14380_v56  ;;  %v14389_v4 = vor.u32 %v12790_v48, %v9480_v49 }
  0x93   : > { %1520 = vmatpush.bf16.msra.mxu1 %v14291_v7  ;;  %v9382_v12 = vld [vmem:[#allocation8 + $0x100] sm:$0xf]  ;;  %v12836_v17 = vld [vmem:[#allocation8 + $0x32c] sm:$0xf0]  ;;  %v14358_v24 = vor.u32 %v12804_v10, %v9526_v9  ;;  %19242 = vst [vmem:[#allocation26_spill] sm:$0xff] %v14386_v60 }
  0x94   : > { %1533 = vmatpush.bf16.msra.mxu2 %v14294_v14  ;;  %v9654_v13 = vld [vmem:[#allocation8 + $0x320] sm:$0xf]  ;;  %v12768_v18 = vld [vmem:[#allocation8 + $0x10c] sm:$0xf0]  ;;  %v12754_v61 = vld [vmem:[#allocation8 + $0xa4] sm:$0xf] }
  0x95   : > { %1546 = vmatpush.bf16.msra.mxu3 %v14300_v16  ;;  %v14364_v29 = vor.u32 %v12836_v17, %v9654_v13  ;;  %v9510_v31 = vld [vmem:[#allocation8 + $0x200] sm:$0xf]  ;;  %v12800_v33 = vld [vmem:[#allocation8 + $0x20c] sm:$0xf0]  ;;  %v14367_v35 = vor.u32 %v12768_v18, %v9382_v12  ;;  %v12822_v62 = vld [vmem:[#allocation8 + $0x2c4] sm:$0xf] }
  0x96   : > { %1508 = vmatpush.bf16.msra.mxu0 %v14298_v15  ;;  %v9638_v34 = vld [vmem:[#allocation8 + $0x300] sm:$0xf]  ;;  %v12832_v37 = vld [vmem:[#allocation8 + $0x30c] sm:$0xf0]  ;;  %v14374_v53 = vor.u32 %v12800_v33, %v9510_v31  ;;  %v9608_v63 = vld [vmem:[#allocation8 + $0x2d0] sm:$0xf0] }
  0x97   : > { %1521 = vmatpush.bf16.msra.mxu1 %v14303_v20  ;;  %v14378_v55 = vor.u32 %v12832_v37, %v9638_v34  ;;  %v9336_v8 = vld [vmem:[#allocation8 + $0xb0] sm:$0xf0]  ;;  %v12854_v9 = vld [vmem:[#allocation8 + $0x3c4] sm:$0xf]  ;;  %v14394_v17 = vor.u32 %v12822_v62, %v9608_v63 }
  0x98   : > { %1534 = vmatpush.bf16.msra.mxu2 %v14309_v26  ;;  %v9736_v10 = vld [vmem:[#allocation8 + $0x3d0] sm:$0xf0]  ;;  %v12786_v12 = vld [vmem:[#allocation8 + $0x1a4] sm:$0xf]  ;;  %v14398_v18 = vor.u32 %v12754_v61, %v9336_v8 }
  0x99   : > { %1547 = vmatpush.bf16.msra.mxu3 %v14316_v28  ;;  %19240 = vst [vmem:[#allocation24_spill] sm:$0xff] %v14378_v55  ;;  %v9464_v13 = vld [vmem:[#allocation8 + $0x1b0] sm:$0xf0]  ;;  %v14400_v19 = vor.u32 %v12854_v9, %v9736_v10  ;;  %v12818_v22 = vld [vmem:[#allocation8 + $0x2a4] sm:$0xf] }
  0x9a   : > { %1509 = vmatpush.bf16.msra.mxu0 %v14314_v27  ;;  %19243 = vst [vmem:[#allocation27_spill] sm:$0xff] %v14394_v17  ;;  %v9592_v23 = vld [vmem:[#allocation8 + $0x2b0] sm:$0xf0]  ;;  %v14403_v30 = vor.u32 %v12786_v12, %v9464_v13  ;;  %v12850_v33 = vld [vmem:[#allocation8 + $0x3a4] sm:$0xf] }
  0x9b   : > { %1522 = vmatpush.bf16.msra.mxu1 %v14319_v32  ;;  %19244 = vst [vmem:[#allocation28_spill] sm:$0xff] %v14398_v18  ;;  %v9320_v31 = vld [vmem:[#allocation8 + $0x90] sm:$0xf0]  ;;  %v12782_v37 = vld [vmem:[#allocation8 + $0x184] sm:$0xf]  ;;  %v14406_v42 = vor.u32 %v12818_v22, %v9592_v23 }
  0x9c   : > { %1535 = vmatpush.bf16.msra.mxu2 %v14322_v38  ;;  %19245 = vst [vmem:[#allocation29_spill] sm:$0xff] %v14400_v19  ;;  %v9720_v34 = vld [vmem:[#allocation8 + $0x3b0] sm:$0xf0]  ;;  %v14410_v45 = vor.u32 %v12750_v21, %v9320_v31  ;;  %v12746_v47 = vld [vmem:[#allocation8 + $0x64] sm:$0xf] }
  0x9d   : > { %1548 = vmatpush.bf16.msra.mxu3 %v14328_v40  ;;  %19246 = vst [vmem:[#allocation30_spill] sm:$0xff] %v14403_v30  ;;  %v9448_v41 = vld [vmem:[#allocation8 + $0x190] sm:$0xf0]  ;;  %v14412_v46 = vor.u32 %v12850_v33, %v9720_v34  ;;  %v12814_v48 = vld [vmem:[#allocation8 + $0x284] sm:$0xf] }
  0x9e   : > { %1510 = vmatpush.bf16.msra.mxu0 %v14326_v39  ;;  %19247 = vst [vmem:[#allocation31_spill] sm:$0xff] %v14406_v42  ;;  %v9576_v49 = vld [vmem:[#allocation8 + $0x290] sm:$0xf0]  ;;  %v14415_v61 = vor.u32 %v12782_v37, %v9448_v41  ;;  %v12846_v63 = vld [vmem:[#allocation8 + $0x384] sm:$0xf] }
  0x9f   : > { %1523 = vmatpush.bf16.msra.mxu1 %v14331_v44  ;;  %19248 = vst [vmem:[#allocation32_spill] sm:$0xff] %v14410_v45  ;;  %v9304_v62 = vld [vmem:[#allocation8 + $0x70] sm:$0xf0]  ;;  %v12778_v9 = vld [vmem:[#allocation8 + $0x164] sm:$0xf]  ;;  %v14418_v12 = vor.u32 %v12814_v48, %v9576_v49 }
  0xa0   : > { %1536 = vmatpush.bf16.msra.mxu2 %v14334_v50  ;;  %19249 = vst [vmem:[#allocation33_spill] sm:$0xff] %v14412_v46  ;;  %v9704_v8 = vld [vmem:[#allocation8 + $0x390] sm:$0xf0]  ;;  %v14422_v13 = vor.u32 %v12746_v47, %v9304_v62  ;;  %v12742_v23 = vld [vmem:[#allocation8 + $0x44] sm:$0xf] }
  0xa1   : > { %1549 = vmatpush.bf16.msra.mxu3 %v14340_v52  ;;  %19250 = vst [vmem:[#allocation34_spill] sm:$0xff] %v14415_v61  ;;  %v9432_v10 = vld [vmem:[#allocation8 + $0x170] sm:$0xf0]  ;;  %v14424_v21 = vor.u32 %v12846_v63, %v9704_v8  ;;  %v12774_v33 = vld [vmem:[#allocation8 + $0x144] sm:$0xf] }
  0xa2   : > { %1511 = vmatpush.bf16.msra.mxu0 %v14338_v51  ;;  %19251 = vst [vmem:[#allocation35_spill] sm:$0xff] %v14418_v12  ;;  %v14427_v22 = vor.u32 %v12778_v9, %v9432_v10  ;;  %v9288_v31 = vld [vmem:[#allocation8 + $0x50] sm:$0xf0]  ;;  %v12810_v47 = vld [vmem:[#allocation8 + $0x264] sm:$0xf] }
  0xa3   : > { %1524 = vmatpush.bf16.msra.mxu1 %v14343_v57  ;;  %19252 = vst [vmem:[#allocation36_spill] sm:$0xff] %v14422_v13  ;;  %v9416_v34 = vld [vmem:[#allocation8 + $0x150] sm:$0xf0]  ;;  %v14432_v37 = vor.u32 %v12742_v23, %v9288_v31  ;;  %v12842_v49 = vld [vmem:[#allocation8 + $0x364] sm:$0xf] }
  0xa4   : > { %1537 = vmatpush.bf16.msra.mxu2 %v14346_v0  ;;  %19253 = vst [vmem:[#allocation37_spill] sm:$0xff] %v14424_v21  ;;  %v14435_v41 = vor.u32 %v12774_v33, %v9416_v34  ;;  %v9560_v48 = vld [vmem:[#allocation8 + $0x270] sm:$0xf0]  ;;  %v12738_v9 = vld [vmem:[#allocation8 + $0x24] sm:$0xf] }
  0xa5   : > { %1550 = vmatpush.bf16.msra.mxu3 %v14352_v6  ;;  %19254 = vst [vmem:[#allocation38_spill] sm:$0xff] %v14427_v22  ;;  %v14439_v62 = vor.u32 %v12810_v47, %v9560_v48  ;;  %v9688_v63 = vld [vmem:[#allocation8 + $0x370] sm:$0xf0]  ;;  %v12770_v31 = vld [vmem:[#allocation8 + $0x124] sm:$0xf] }
  0xa6   : > { %1512 = vmatpush.bf16.msra.mxu0 %v14350_v5  ;;  %19255 = vst [vmem:[#allocation39_spill] sm:$0xff] %v14432_v37  ;;  %v14441_v8 = vor.u32 %v12842_v49, %v9688_v63  ;;  %v9272_v10 = vld [vmem:[#allocation8 + $0x30] sm:$0xf0]  ;;  %v12734_v63 = vld [vmem:[#allocation8 + $0x4] sm:$0xf] }
  0xa7   : > { %1525 = vmatpush.bf16.msra.mxu1 %v14355_v11  ;;  %19256 = vst [vmem:[#allocation40_spill] sm:$0xff] %v14435_v41  ;;  %v14444_v23 = vor.u32 %v12738_v9, %v9272_v10  ;;  %v9400_v33 = vld [vmem:[#allocation8 + $0x130] sm:$0xf0]  ;;  %v12766_v10 = vld [vmem:[#allocation8 + $0x104] sm:$0xf] }
  0xa8   : > { %1538 = vmatpush.bf16.msra.mxu2 %v14358_v24  ;;  %19257 = vst [vmem:[#allocation41_spill] sm:$0xff] %v14439_v62  ;;  %v14447_v34 = vor.u32 %v12770_v31, %v9400_v33  ;;  %v9672_v48 = vld [vmem:[#allocation8 + $0x350] sm:$0xf0] }
  0xa9   : > { %1551 = vmatpush.bf16.msra.mxu3 %v14364_v29  ;;  %19258 = vst [vmem:[#allocation42_spill] sm:$0xff] %v14441_v8  ;;  %v9256_v9 = vld [vmem:[#allocation8 + $0x10] sm:$0xf0] }
  0xaa   : > { %1513 = vmatpush.bf16.msra.mxu0 %v14362_v25  ;;  %19259 = vst [vmem:[#allocation43_spill] sm:$0xff] %v14444_v23  ;;  %v9384_v31 = vld [vmem:[#allocation8 + $0x110] sm:$0xf0] }
  0xab   : > { %1526 = vmatpush.bf16.msra.mxu1 %v14367_v35  ;;  %19260 = vst [vmem:[#allocation44_spill] sm:$0xff] %v14447_v34  ;;  %v14459_v33 = vor.u32 %v12766_v10, %v9384_v31  ;;  %v12830_v31 = vld [vmem:[#allocation8 + $0x304] sm:$0xf] }
  0xac   : > { %1539 = vmatpush.bf16.msra.mxu2 %v14374_v53 }
  0xad   : > { %1552 = vmatpush.bf16.msra.mxu3 %v14378_v55  ;;  %19264 = vst [vmem:[#allocation48_spill] sm:$0xff] %v14459_v33  ;;  %v12759_v55 = vld [vmem:[#allocation8 + $0xcc] sm:$0xf] }
  0xae   : > { %1558 = vmatpush.bf16.msrb.mxu0 %v14369_v36 }
  0xaf   : > { %1571 = vmatpush.bf16.msrb.mxu1 %v14371_v43 }
  0xb0   : > { %1584 = vmatpush.bf16.msrb.mxu2 %v14380_v56 }
  0xb1   : > { %1597 = vmatpush.bf16.msrb.mxu3 %v14386_v60  ;;  %v12781_v60 = vld [vmem:[#allocation8 + $0x174] sm:$0xf0] }
  0xb2   : > { %1559 = vmatpush.bf16.msrb.mxu0 %v14384_v59 }
  0xb3   : > { %1572 = vmatpush.bf16.msrb.mxu1 %v14389_v4 }
  0xb4   : > { %1585 = vmatpush.bf16.msrb.mxu2 %v14394_v17 }
  0xb5   : > { %1598 = vmatpush.bf16.msrb.mxu3 %v14400_v19  ;;  %v12757_v19 = vld [vmem:[#allocation8 + $0xb4] sm:$0xf0] }
  0xb6   : > { %1560 = vmatpush.bf16.msrb.mxu0 %v14398_v18 }
  0xb7   : > { %1573 = vmatpush.bf16.msrb.mxu1 %v14403_v30  ;;  %v9470_v30 = vld [vmem:[#allocation8 + $0x1a8] sm:$0xf] }
  0xb8   : > { %1586 = vmatpush.bf16.msrb.mxu2 %v14406_v42  ;;  %v9486_v42 = vld [vmem:[#allocation8 + $0x1c8] sm:$0xf] }
  0xb9   : > { %1599 = vmatpush.bf16.msrb.mxu3 %v14412_v46 }
  0xba   : > { %1561 = vmatpush.bf16.msrb.mxu0 %v14410_v45 }
  0xbb   : > { %1574 = vmatpush.bf16.msrb.mxu1 %v14415_v61 }
  0xbc   : > { %1587 = vmatpush.bf16.msrb.mxu2 %v14418_v12 }
  0xbd   : > { %1600 = vmatpush.bf16.msrb.mxu3 %v14424_v21  ;;  %v12838_v21 = vld [vmem:[#allocation8 + $0x344] sm:$0xf] }
  0xbe   : > { %1562 = vmatpush.bf16.msrb.mxu0 %v14422_v13  ;;  %v14453_v49 = vor.u32 %v12838_v21, %v9672_v48  ;;  %v12834_v48 = vld [vmem:[#allocation8 + $0x324] sm:$0xf] }
  0xbf   : > { %1575 = vmatpush.bf16.msrb.mxu1 %v14427_v22 }
  0xc0   : > { %1588 = vmatpush.bf16.msrb.mxu2 %v14439_v62  ;;  %19262 = vst [vmem:[#allocation46_spill] sm:$0xff] %v14453_v49 }
  0xc1   : > { %1601 = vmatpush.bf16.msrb.mxu3 %v14441_v8  ;;  %v14456_v8 = vor.u32 %v12734_v63, %v9256_v9  ;;  %v12798_v63 = vld [vmem:[#allocation8 + $0x204] sm:$0xf]  ;;  %v9512_v9 = vld [vmem:[#allocation8 + $0x210] sm:$0xf0] }
  0xc2   : > { %1563 = vmatpush.bf16.msrb.mxu0 %v14432_v37  ;;  %v9544_v37 = vld [vmem:[#allocation8 + $0x250] sm:$0xf0]  ;;  %v14469_v10 = vor.u32 %v12798_v63, %v9512_v9  ;;  %v9374_v9 = vld [vmem:[#allocation8 + $0xe8] sm:$0xf] }
  0xc3   : > { %1576 = vmatpush.bf16.msrb.mxu1 %v14435_v41  ;;  %v12806_v41 = vld [vmem:[#allocation8 + $0x244] sm:$0xf]  ;;  %19263 = vst [vmem:[#allocation47_spill] sm:$0xff] %v14456_v8 }
  0xc4   : > { %v14450_v47 = vor.u32 %v12806_v41, %v9544_v37  ;;  %v12802_v37 = vld [vmem:[#allocation8 + $0x224] sm:$0xf]  ;;  %v9528_v41 = vld [vmem:[#allocation8 + $0x230] sm:$0xf0]  ;;  %19267 = vst [vmem:[#allocation51_spill] sm:$0xff] %v14469_v10 }
  0xc5   : > { %1602 = vmatpush.bf16.msrb.mxu3 %v14453_v49  ;;  %v14463_v21 = vor.u32 %v12802_v37, %v9528_v41  ;;  %v14475_v37 = vld [vmem:[#allocation7] sm:$0xf] }
  0xc6   : > { %1564 = vmatpush.bf16.msrb.mxu0 %v14444_v23  ;;  %19261 = vst [vmem:[#allocation45_spill] sm:$0xff] %v14450_v47  ;;  %1589 = vmatpush.bf16.msrb.mxu2 %v14450_v47  ;;  %v18652_v41 = vperm.slane %v14475_v37, 1  ;;  %v18655_v47 = vperm.slane %v14475_v37, 2  ;;  %v18661_v22 = vperm.slane %v14475_v37, 3 }
  0xc7   : > { %1577 = vmatpush.bf16.msrb.mxu1 %v14447_v34  ;;  %19265 = vst [vmem:[#allocation49_spill] sm:$0xff] %v14463_v21  ;;  %v9656_v34 = vld [vmem:[#allocation8 + $0x330] sm:$0xf0] }
  0xc8   : > { %v14465_v23 = vor.u32 %v12834_v48, %v9656_v34  ;;  %v18649_v34 = vperm.slane %v14475_v37, 0 }
  0xca   : > { %1565 = vmatpush.bf16.msrb.mxu0 %v14456_v8  ;;  %19266 = vst [vmem:[#allocation50_spill] sm:$0xff] %v14465_v23  ;;  %1590 = vmatpush.bf16.msrb.mxu2 %v14463_v21  ;;  %v9640_v8 = vld [vmem:[#allocation8 + $0x310] sm:$0xf0]  ;;  %v12765_v21 = vld [vmem:[#allocation8 + $0xf4] sm:$0xf0] }
  0xcb   : > { %1578 = vmatpush.bf16.msrb.mxu1 %v14459_v33  ;;  %1603 = vmatpush.bf16.msrb.mxu3 %v14465_v23  ;;  %v14471_v49 = vor.u32 %v12830_v31, %v9640_v8  ;;  %v9502_v31 = vld [vmem:[#allocation8 + $0x1e8] sm:$0xf]  ;;  %v14484_v62 = vor.u32 %v12765_v21, %v9374_v9 }
  0xcc   : > { %v9630_v9 = vld [vmem:[#allocation8 + $0x2e8] sm:$0xf] }
  0xcd   : > { %19268 = vst [vmem:[#allocation52_spill] sm:$0xff] %v14471_v49 }
  0xce   : > { %1591 = vmatpush.bf16.msrb.mxu2 %v14469_v10  ;;  %v12797_v10 = vld [vmem:[#allocation8 + $0x1f4] sm:$0xf0]  ;;  %19269 = vst [vmem:[#allocation53_spill] sm:$0xff] %v14484_v62 }
  0xcf   : > { %1604 = vmatpush.bf16.msrb.mxu3 %v14471_v49  ;;  %v14489_v13 = vor.u32 %v12797_v10, %v9502_v31 }
  0xd1   : > { %19270 = vst [vmem:[#allocation54_spill] sm:$0xff] %v14489_v13 }
  0xfa   : > { %v614_v48 = vpop.f32.mrf.mxu0 }
  0xfb   : > { %v615_v23 = vadd.f32 %v614_v48, %v18649_v34  ;;  %v627_v63 = vpop.f32.mrf.mxu1  ;;  %v9358_v48 = vld [vmem:[#allocation8 + $0xc8] sm:$0xf]  ;;  %v12761_v34 = vld [vmem:[#allocation8 + $0xd4] sm:$0xf0] }
  0xfc   : > { %v628_v8 = vadd.f32 %v627_v63, %v18652_v41  ;;  %v12793_v63 = vld [vmem:[#allocation8 + $0x1d4] sm:$0xf0]  ;;  %v14498_v10 = vor.u32 %v12761_v34, %v9358_v48 }
  0xfd   : > { %v657_v33 = vmax.f32 %v615_v23, 0.0  ;;  %v14503_v61 = vor.u32 %v12793_v63, %v9486_v42  ;;  %v9614_v42 = vld [vmem:[#allocation8 + $0x2c8] sm:$0xf]  ;;  %v12825_v63 = vld [vmem:[#allocation8 + $0x2d4] sm:$0xf0] }
  0xfe   : > { %v658_v49 = vmax.f32 %v628_v8, 0.0  ;;  %19271 = vst [vmem:[#allocation55_spill] sm:$0xff] %v14498_v10  ;;  %v12829_v8 = vld [vmem:[#allocation8 + $0x2f4] sm:$0xf0] }
  0xff   : > { %v14486_v12 = vpack.c.bf16 %v657_v33, %v657_v33  ;;  %19272 = vst [vmem:[#allocation56_spill] sm:$0xff] %v14503_v61  ;;  %v14505_v34 = vor.u32 %v12829_v8, %v9630_v9  ;;  %v9326_v9 = vld [vmem:[#allocation8 + $0x88] sm:$0xf]  ;;  %v12753_v8 = vld [vmem:[#allocation8 + $0x94] sm:$0xf0] }
 0x100   : > { %v14491_v46 = vpack.c.bf16 %v658_v49, %v658_v49  ;;  %v9758_v49 = vld [vmem:[#allocation8 + $0x3e8] sm:$0xf] }
 0x101   : > { %1514 = vmatmul.bf16.vlgmr.msra.gmra.mxu0 %v14486_v12  ;;  %19273 = vst [vmem:[#allocation57_spill] sm:$0xff] %v14505_v34 }
 0x102   : > { %v640_v41 = vpop.f32.mrf.mxu2  ;;  %1527 = vmatmul.bf16.vlgmr.msra.gmra.mxu1 %v14491_v46  ;;  %1610 = vmatpush.bf16.msra.mxu0 %v14484_v62  ;;  %v616_v33 = vpop.f32.mrf.mxu0  ;;  %v12789_v62 = vld [vmem:[#allocation8 + $0x1b4] sm:$0xf0] }
 0x103   : > { %v641_v23 = vadd.f32 %v640_v41, %v18655_v47  ;;  %v653_v21 = vpop.f32.mrf.mxu3  ;;  %1623 = vmatpush.bf16.msra.mxu1 %v14489_v13  ;;  %v629_v45 = vpop.f32.mrf.mxu1  ;;  %v12861_v41 = vld [vmem:[#allocation8 + $0x3f4] sm:$0xf0]  ;;  %v9342_v47 = vld [vmem:[#allocation8 + $0xa8] sm:$0xf] }
 0x104   : > { %v654_v31 = vadd.f32 %v653_v21, %v18661_v22  ;;  %v14510_v18 = vor.u32 %v12861_v41, %v9758_v49  ;;  %v14512_v21 = vor.u32 %v12757_v19, %v9342_v47  ;;  %v9742_v45 = vld [vmem:[#allocation8 + $0x3c8] sm:$0xf]  ;;  %v14522_v47 = vor.u32 %v12825_v63, %v9614_v42  ;;  %v12749_v42 = vld [vmem:[#allocation8 + $0x74] sm:$0xf0] }
 0x105   : > { %v659_v17 = vmax.f32 %v641_v23, 0.0  ;;  %v14517_v23 = vor.u32 %v12789_v62, %v9470_v30  ;;  %v14528_v62 = vor.u32 %v12753_v8, %v9326_v9  ;;  %v9598_v41 = vld [vmem:[#allocation8 + $0x2a8] sm:$0xf]  ;;  %v12817_v9 = vld [vmem:[#allocation8 + $0x294] sm:$0xf0] }
 0x106   : > { %v660_v33 = vmax.f32 %v654_v31, 0.0  ;;  %1611 = vmatpush.bf16.msra.mxu0 %v14498_v10  ;;  %19274 = vst [vmem:[#allocation58_spill] sm:$0xff] %v14510_v18  ;;  %v12857_v31 = vld [vmem:[#allocation8 + $0x3d4] sm:$0xf0]  ;;  %v9726_v13 = vld [vmem:[#allocation8 + $0x3a8] sm:$0xf] }
 0x107   : > { %v14507_v48 = vpack.c.bf16 %v659_v17, %v659_v17  ;;  %19275 = vst [vmem:[#allocation59_spill] sm:$0xff] %v14512_v21  ;;  %1624 = vmatpush.bf16.msra.mxu1 %v14503_v61  ;;  %v9454_v17 = vld [vmem:[#allocation8 + $0x188] sm:$0xf]  ;;  %v12785_v10 = vld [vmem:[#allocation8 + $0x194] sm:$0xf0]  ;;  %v14526_v30 = vor.u32 %v12857_v31, %v9742_v45 }
 0x108   : > { %v14514_v22 = vpack.c.bf16 %v660_v33, %v660_v33  ;;  %19276 = vst [vmem:[#allocation60_spill] sm:$0xff] %v14517_v23  ;;  %v12821_v33 = vld [vmem:[#allocation8 + $0x2b4] sm:$0xf0]  ;;  %v14531_v61 = vor.u32 %v12785_v10, %v9454_v17  ;;  %v9438_v63 = vld [vmem:[#allocation8 + $0x168] sm:$0xf] }
 0x109   : > { %1540 = vmatmul.bf16.vlgmr.msra.gmra.mxu2 %v14507_v48  ;;  %19277 = vst [vmem:[#allocation61_spill] sm:$0xff] %v14522_v47  ;;  %v9582_v31 = vld [vmem:[#allocation8 + $0x288] sm:$0xf]  ;;  %v14543_v8 = vor.u32 %v12781_v60, %v9438_v63 }
 0x10a   : > { %1553 = vmatmul.bf16.vlgmr.msra.gmra.mxu3 %v14514_v22  ;;  %1636 = vmatpush.bf16.msra.mxu2 %v14505_v34  ;;  %v642_v19 = vpop.f32.mrf.mxu2  ;;  %19278 = vst [vmem:[#allocation62_spill] sm:$0xff] %v14526_v30  ;;  %v12853_v34 = vld [vmem:[#allocation8 + $0x3b4] sm:$0xf0]  ;;  %v9710_v17 = vld [vmem:[#allocation8 + $0x388] sm:$0xf] }
 0x10b   : > { %1649 = vmatpush.bf16.msra.mxu3 %v14510_v18  ;;  %v655_v49 = vpop.f32.mrf.mxu3  ;;  %1612 = vmatpush.bf16.msra.mxu0 %v14512_v21  ;;  %19279 = vst [vmem:[#allocation63_spill] sm:$0xff] %v14528_v62  ;;  %v9310_v19 = vld [vmem:[#allocation8 + $0x68] sm:$0xf]  ;;  %v14538_v45 = vor.u32 %v12853_v34, %v9726_v13  ;;  %v14547_v13 = vor.u32 %v12817_v9, %v9582_v31  ;;  %v12741_v9 = vld [vmem:[#allocation8 + $0x34] sm:$0xf0] }
 0x10c   : > { %1625 = vmatpush.bf16.msra.mxu1 %v14517_v23  ;;  %19280 = vst [vmem:[#allocation64_spill] sm:$0xff] %v14531_v61  ;;  %v14534_v49 = vor.u32 %v12821_v33, %v9598_v41  ;;  %v14541_v10 = vor.u32 %v12749_v42, %v9310_v19  ;;  %v12849_v23 = vld [vmem:[#allocation8 + $0x394] sm:$0xf0]  ;;  %v9294_v21 = vld [vmem:[#allocation8 + $0x48] sm:$0xf] }
 0x10d   : > { %19282 = vst [vmem:[#allocation66_spill] sm:$0xff] %v14538_v45  ;;  %v9422_v41 = vld [vmem:[#allocation8 + $0x148] sm:$0xf]  ;;  %v12777_v33 = vld [vmem:[#allocation8 + $0x154] sm:$0xf0]  ;;  %v14551_v34 = vor.u32 %v12849_v23, %v9710_v17 }
 0x10e   : > { %1637 = vmatpush.bf16.msra.mxu2 %v14522_v47  ;;  %19281 = vst [vmem:[#allocation65_spill] sm:$0xff] %v14534_v49  ;;  %v12745_v47 = vld [vmem:[#allocation8 + $0x54] sm:$0xf0]  ;;  %v9566_v60 = vld [vmem:[#allocation8 + $0x268] sm:$0xf]  ;;  %v14557_v63 = vor.u32 %v12777_v33, %v9422_v41 }
 0x10f   : > { %1650 = vmatpush.bf16.msra.mxu3 %v14526_v30  ;;  %1613 = vmatpush.bf16.msra.mxu0 %v14528_v62  ;;  %19283 = vst [vmem:[#allocation67_spill] sm:$0xff] %v14541_v10  ;;  %v12813_v19 = vld [vmem:[#allocation8 + $0x274] sm:$0xf0]  ;;  %v14555_v42 = vor.u32 %v12745_v47, %v9294_v21  ;;  %v9278_v31 = vld [vmem:[#allocation8 + $0x28] sm:$0xf] }
 0x110   : > { %1626 = vmatpush.bf16.msra.mxu1 %v14531_v61  ;;  %19284 = vst [vmem:[#allocation68_spill] sm:$0xff] %v14543_v8  ;;  %v12845_v61 = vld [vmem:[#allocation8 + $0x374] sm:$0xf0]  ;;  %v9406_v62 = vld [vmem:[#allocation8 + $0x128] sm:$0xf]  ;;  %v14560_v23 = vor.u32 %v12813_v19, %v9566_v60  ;;  %v14567_v47 = vor.u32 %v12741_v9, %v9278_v31 }
 0x111   : > { %1566 = vmatmul.bf16.vlgmr.msrb.gmra.mxu0 %v14486_v12  ;;  %19285 = vst [vmem:[#allocation69_spill] sm:$0xff] %v14547_v13  ;;  %v9678_v21 = vld [vmem:[#allocation8 + $0x348] sm:$0xf]  ;;  %v12841_v33 = vld [vmem:[#allocation8 + $0x354] sm:$0xf0] }
 0x112   : > { %1638 = vmatpush.bf16.msra.mxu2 %v14534_v49  ;;  %1579 = vmatmul.bf16.vlgmr.msrb.gmra.mxu1 %v14491_v46  ;;  %19286 = vst [vmem:[#allocation70_spill] sm:$0xff] %v14551_v34  ;;  %v9694_v49 = vld [vmem:[#allocation8 + $0x368] sm:$0xf]  ;;  %v12769_v19 = vld [vmem:[#allocation8 + $0x114] sm:$0xf0] }
 0x113   : > { %1651 = vmatpush.bf16.msra.mxu3 %v14538_v45  ;;  %1614 = vmatpush.bf16.msra.mxu0 %v14541_v10  ;;  %19287 = vst [vmem:[#allocation71_spill] sm:$0xff] %v14555_v42  ;;  %v12773_v45 = vld [vmem:[#allocation8 + $0x134] sm:$0xf0]  ;;  %v14563_v17 = vor.u32 %v12845_v61, %v9694_v49  ;;  %v9550_v10 = vld [vmem:[#allocation8 + $0x248] sm:$0xf] }
 0x114   : > { %1627 = vmatpush.bf16.msra.mxu1 %v14543_v8  ;;  %19288 = vst [vmem:[#allocation72_spill] sm:$0xff] %v14557_v63  ;;  %v12809_v8 = vld [vmem:[#allocation8 + $0x254] sm:$0xf0]  ;;  %v14569_v41 = vor.u32 %v12773_v45, %v9406_v62  ;;  %v9262_v30 = vld [vmem:[#allocation8 + $0x8] sm:$0xf]  ;;  %v14577_v62 = vor.u32 %v12841_v33, %v9678_v21 }
 0x115   : > { %19289 = vst [vmem:[#allocation73_spill] sm:$0xff] %v14560_v23  ;;  %v9390_v60 = vld [vmem:[#allocation8 + $0x108] sm:$0xf]  ;;  %v12763_v61 = vld [vmem:[#allocation8 + $0xec] sm:$0xf]  ;;  %v14574_v49 = vor.u32 %v12809_v8, %v9550_v10 }
 0x116   : > { %1639 = vmatpush.bf16.msra.mxu2 %v14547_v13  ;;  %19290 = vst [vmem:[#allocation74_spill] sm:$0xff] %v14563_v17  ;;  %v12737_v13 = vld [vmem:[#allocation8 + $0x14] sm:$0xf0]  ;;  %v9504_v31 = vld [vmem:[#allocation8 + $0x1f8] sm:$0xf0]  ;;  %v14583_v18 = vor.u32 %v12769_v19, %v9390_v60 }
 0x117   : > { %1652 = vmatpush.bf16.msra.mxu3 %v14551_v34  ;;  %1615 = vmatpush.bf16.msra.mxu0 %v14555_v42  ;;  %19291 = vst [vmem:[#allocation75_spill] sm:$0xff] %v14567_v47  ;;  %v9376_v42 = vld [vmem:[#allocation8 + $0xf8] sm:$0xf0]  ;;  %v9534_v45 = vld [vmem:[#allocation8 + $0x228] sm:$0xf]  ;;  %v14581_v34 = vor.u32 %v12737_v13, %v9262_v30 }
 0x118   : > { %1628 = vmatpush.bf16.msra.mxu1 %v14557_v63  ;;  %19292 = vst [vmem:[#allocation76_spill] sm:$0xff] %v14574_v49  ;;  %v12795_v63 = vld [vmem:[#allocation8 + $0x1ec] sm:$0xf]  ;;  %v12805_v9 = vld [vmem:[#allocation8 + $0x234] sm:$0xf0]  ;;  %v14585_v8 = vor.u32 %v12763_v61, %v9376_v42 }
 0x119   : > { %1592 = vmatmul.bf16.vlgmr.msrb.gmra.mxu2 %v14507_v48  ;;  %19293 = vst [vmem:[#allocation77_spill] sm:$0xff] %v14577_v62  ;;  %v12837_v10 = vld [vmem:[#allocation8 + $0x334] sm:$0xf0]  ;;  %v14587_v56 = vor.u32 %v12795_v63, %v9504_v31  ;;  %v14590_v21 = vor.u32 %v12805_v9, %v9534_v45  ;;  %v9360_v33 = vld [vmem:[#allocation8 + $0xd8] sm:$0xf0] }
 0x11a   : > { %1605 = vmatmul.bf16.vlgmr.msrb.gmra.mxu3 %v14514_v22  ;;  %1640 = vmatpush.bf16.msra.mxu2 %v14560_v23  ;;  %19294 = vst [vmem:[#allocation78_spill] sm:$0xff] %v14581_v34  ;;  %v9662_v23 = vld [vmem:[#allocation8 + $0x328] sm:$0xf]  ;;  %v12801_v60 = vld [vmem:[#allocation8 + $0x214] sm:$0xf0]  ;;  %v14599_v31 = vor.u32 %v12759_v55, %v9360_v33 }
 0x11b   : > { %1653 = vmatpush.bf16.msra.mxu3 %v14563_v17  ;;  %1616 = vmatpush.bf16.msra.mxu0 %v14567_v47  ;;  %19295 = vst [vmem:[#allocation79_spill] sm:$0xff] %v14583_v18  ;;  %v12791_v17 = vld [vmem:[#allocation8 + $0x1cc] sm:$0xf]  ;;  %v9488_v47 = vld [vmem:[#allocation8 + $0x1d8] sm:$0xf0]  ;;  %v14593_v30 = vor.u32 %v12837_v10, %v9662_v23 }
 0x11c   : > { %1629 = vmatpush.bf16.msra.mxu1 %v14569_v41  ;;  %19296 = vst [vmem:[#allocation80_spill] sm:$0xff] %v14585_v8  ;;  %v9518_v13 = vld [vmem:[#allocation8 + $0x208] sm:$0xf]  ;;  %v12833_v42 = vld [vmem:[#allocation8 + $0x314] sm:$0xf0]  ;;  %v14601_v45 = vor.u32 %v12791_v17, %v9488_v47 }
 0x11d   : > { %19297 = vst [vmem:[#allocation81_spill] sm:$0xff] %v14590_v21  ;;  %v9646_v19 = vld [vmem:[#allocation8 + $0x308] sm:$0xf]  ;;  %v12827_v63 = vld [vmem:[#allocation8 + $0x2ec] sm:$0xf] }
 0x11e   : > { %1641 = vmatpush.bf16.msra.mxu2 %v14574_v49  ;;  %19298 = vst [vmem:[#allocation82_spill] sm:$0xff] %v14593_v30  ;;  %v9632_v61 = vld [vmem:[#allocation8 + $0x2f8] sm:$0xf0]  ;;  %v12859_v23 = vld [vmem:[#allocation8 + $0x3ec] sm:$0xf] }
 0x11f   : > { %1654 = vmatpush.bf16.msra.mxu3 %v14577_v62  ;;  %1617 = vmatpush.bf16.msra.mxu0 %v14581_v34  ;;  %19299 = vst [vmem:[#allocation83_spill] sm:$0xff] %v14601_v45  ;;  %v9760_v9 = vld [vmem:[#allocation8 + $0x3f8] sm:$0xf0]  ;;  %v12755_v10 = vld [vmem:[#allocation8 + $0xac] sm:$0xf]  ;;  %v14604_v62 = vor.u32 %v12801_v60, %v9518_v13  ;;  %v14610_v55 = vor.u32 %v12827_v63, %v9632_v61 }
 0x120   : > { %1630 = vmatpush.bf16.msra.mxu1 %v14583_v18  ;;  %v9344_v34 = vld [vmem:[#allocation8 + $0xb8] sm:$0xf0]  ;;  %v12787_v18 = vld [vmem:[#allocation8 + $0x1ac] sm:$0xf]  ;;  %v14613_v17 = vor.u32 %v12859_v23, %v9760_v9 }
 0x121   : > { %19300 = vst [vmem:[#allocation84_spill] sm:$0xff] %v14604_v62  ;;  %v9472_v49 = vld [vmem:[#allocation8 + $0x1b8] sm:$0xf0]  ;;  %v12823_v47 = vld [vmem:[#allocation8 + $0x2cc] sm:$0xf]  ;;  %v14617_v13 = vor.u32 %v12755_v10, %v9344_v34 }
 0x122   : > { %1642 = vmatpush.bf16.msra.mxu2 %v14590_v21  ;;  %1618 = vmatmul.bf16.vlgmr.msra.gmra.mxu0 %v14486_v12  ;;  %19302 = vst [vmem:[#allocation86_spill] sm:$0xff] %v14610_v55  ;;  %v9616_v33 = vld [vmem:[#allocation8 + $0x2d8] sm:$0xf0]  ;;  %v14619_v60 = vor.u32 %v12787_v18, %v9472_v49  ;;  %v12783_v63 = vld [vmem:[#allocation8 + $0x18c] sm:$0xf] }
 0x123   : > { %1662 = vmatpush.bf16.msrb.mxu0 %v14585_v8  ;;  %1655 = vmatpush.bf16.msra.mxu3 %v14593_v30  ;;  %v14608_v8 = vor.u32 %v12833_v42, %v9646_v19  ;;  %19303 = vst [vmem:[#allocation87_spill] sm:$0xff] %v14613_v17  ;;  %v12855_v30 = vld [vmem:[#allocation8 + $0x3cc] sm:$0xf]  ;;  %v9744_v21 = vld [vmem:[#allocation8 + $0x3d8] sm:$0xf0]  ;;  %v14624_v23 = vor.u32 %v12823_v47, %v9616_v33 }
 0x124   : > { %1675 = vmatpush.bf16.msrb.mxu1 %v14587_v56  ;;  %19304 = vst [vmem:[#allocation88_spill] sm:$0xff] %v14617_v13  ;;  %v12751_v19 = vld [vmem:[#allocation8 + $0x8c] sm:$0xf]  ;;  %v9328_v42 = vld [vmem:[#allocation8 + $0x98] sm:$0xf0]  ;;  %v14627_v34 = vor.u32 %v12855_v30, %v9744_v21 }
 0x125   : > { %19301 = vst [vmem:[#allocation85_spill] sm:$0xff] %v14608_v8  ;;  %1631 = vmatmul.bf16.vlgmr.msra.gmra.mxu1 %v14491_v46  ;;  %v9456_v61 = vld [vmem:[#allocation8 + $0x198] sm:$0xf0]  ;;  %v12819_v18 = vld [vmem:[#allocation8 + $0x2ac] sm:$0xf]  ;;  %v14631_v9 = vor.u32 %v12751_v19, %v9328_v42 }
 0x126   : > { %19305 = vst [vmem:[#allocation89_spill] sm:$0xff] %v14619_v60  ;;  %1643 = vmatpush.bf16.msra.mxu2 %v14604_v62  ;;  %v9600_v49 = vld [vmem:[#allocation8 + $0x2b8] sm:$0xf0]  ;;  %v14633_v10 = vor.u32 %v12783_v63, %v9456_v61  ;;  %v12851_v62 = vld [vmem:[#allocation8 + $0x3ac] sm:$0xf] }
 0x127   : > { %1663 = vmatpush.bf16.msrb.mxu0 %v14599_v31  ;;  %1656 = vmatpush.bf16.msra.mxu3 %v14608_v8  ;;  %19306 = vst [vmem:[#allocation90_spill] sm:$0xff] %v14624_v23  ;;  %v9728_v8 = vld [vmem:[#allocation8 + $0x3b8] sm:$0xf0]  ;;  %v12779_v21 = vld [vmem:[#allocation8 + $0x16c] sm:$0xf]  ;;  %v14638_v33 = vor.u32 %v12819_v18, %v9600_v49 }
 0x128   : > { %1676 = vmatpush.bf16.msrb.mxu1 %v14601_v45  ;;  %19307 = vst [vmem:[#allocation91_spill] sm:$0xff] %v14627_v34  ;;  %v12747_v45 = vld [vmem:[#allocation8 + $0x6c] sm:$0xf]  ;;  %v9312_v47 = vld [vmem:[#allocation8 + $0x78] sm:$0xf0]  ;;  %v14641_v19 = vor.u32 %v12851_v62, %v9728_v8 }
 0x129   : > { %19308 = vst [vmem:[#allocation92_spill] sm:$0xff] %v14631_v9  ;;  %1644 = vmatmul.bf16.vlgmr.msra.gmra.mxu2 %v14507_v48  ;;  %v9440_v30 = vld [vmem:[#allocation8 + $0x178] sm:$0xf0]  ;;  %v12815_v42 = vld [vmem:[#allocation8 + $0x28c] sm:$0xf]  ;;  %v14645_v61 = vor.u32 %v12747_v45, %v9312_v47 }
 0x12a   : > { %1688 = vmatpush.bf16.msrb.mxu2 %v14610_v55  ;;  %19309 = vst [vmem:[#allocation93_spill] sm:$0xff] %v14633_v10  ;;  %1657 = vmatmul.bf16.vlgmr.msra.gmra.mxu3 %v14514_v22  ;;  %v9584_v63 = vld [vmem:[#allocation8 + $0x298] sm:$0xf0]  ;;  %v12743_v55 = vld [vmem:[#allocation8 + $0x4c] sm:$0xf] }
 0x12b   : > { %1701 = vmatpush.bf16.msrb.mxu3 %v14613_v17  ;;  %1664 = vmatpush.bf16.msrb.mxu0 %v14617_v13  ;;  %19310 = vst [vmem:[#allocation94_spill] sm:$0xff] %v14638_v33  ;;  %v12847_v13 = vld [vmem:[#allocation8 + $0x38c] sm:$0xf]  ;;  %v9712_v17 = vld [vmem:[#allocation8 + $0x398] sm:$0xf0]  ;;  %v14650_v62 = vor.u32 %v12815_v42, %v9584_v63 }
 0x12c   : > { %1677 = vmatpush.bf16.msrb.mxu1 %v14619_v60  ;;  %19311 = vst [vmem:[#allocation95_spill] sm:$0xff] %v14641_v19  ;;  %v14647_v60 = vor.u32 %v12779_v21, %v9440_v30  ;;  %v12775_v18 = vld [vmem:[#allocation8 + $0x14c] sm:$0xf]  ;;  %v9424_v49 = vld [vmem:[#allocation8 + $0x158] sm:$0xf0]  ;;  %v14653_v8 = vor.u32 %v12847_v13, %v9712_v17 }
 0x12d   : > { %19312 = vst [vmem:[#allocation96_spill] sm:$0xff] %v14645_v61  ;;  %v14659_v47 = vor.u32 %v12775_v18, %v9424_v49  ;;  %v12843_v21 = vld [vmem:[#allocation8 + $0x36c] sm:$0xf]  ;;  %v9696_v30 = vld [vmem:[#allocation8 + $0x378] sm:$0xf0] }
 0x12e   : > { %1689 = vmatpush.bf16.msrb.mxu2 %v14624_v23  ;;  %19313 = vst [vmem:[#allocation97_spill] sm:$0xff] %v14647_v60  ;;  %v9296_v23 = vld [vmem:[#allocation8 + $0x58] sm:$0xf0]  ;;  %v12771_v42 = vld [vmem:[#allocation8 + $0x12c] sm:$0xf]  ;;  %v14665_v13 = vor.u32 %v12843_v21, %v9696_v30 }
 0x12f   : > { %1702 = vmatpush.bf16.msrb.mxu3 %v14627_v34  ;;  %1665 = vmatpush.bf16.msrb.mxu0 %v14631_v9  ;;  %19314 = vst [vmem:[#allocation98_spill] sm:$0xff] %v14650_v62  ;;  %v12811_v9 = vld [vmem:[#allocation8 + $0x26c] sm:$0xf]  ;;  %v14657_v45 = vor.u32 %v12743_v55, %v9296_v23  ;;  %v9408_v63 = vld [vmem:[#allocation8 + $0x138] sm:$0xf0] }
 0x130   : > { %1678 = vmatpush.bf16.msrb.mxu1 %v14633_v10  ;;  %v9568_v10 = vld [vmem:[#allocation8 + $0x278] sm:$0xf0]  ;;  %19316 = vst [vmem:[#allocation100_spill] sm:$0xff] %v14659_v47  ;;  %v12739_v34 = vld [vmem:[#allocation8 + $0x2c] sm:$0xf]  ;;  %v14671_v23 = vor.u32 %v12771_v42, %v9408_v63 }
 0x131   : > { %19315 = vst [vmem:[#allocation99_spill] sm:$0xff] %v14657_v45  ;;  %v14662_v17 = vor.u32 %v12811_v9, %v9568_v10  ;;  %v12839_v18 = vld [vmem:[#allocation8 + $0x34c] sm:$0xf]  ;;  %v9680_v49 = vld [vmem:[#allocation8 + $0x358] sm:$0xf0] }
 0x132   : > { %1690 = vmatpush.bf16.msrb.mxu2 %v14638_v33  ;;  %v9280_v33 = vld [vmem:[#allocation8 + $0x38] sm:$0xf0]  ;;  %v12767_v9 = vld [vmem:[#allocation8 + $0x10c] sm:$0xf]  ;;  %v14677_v30 = vor.u32 %v12839_v18, %v9680_v49 }
 0x133   : > { %1703 = vmatpush.bf16.msrb.mxu3 %v14641_v19  ;;  %1666 = vmatpush.bf16.msrb.mxu0 %v14645_v61  ;;  %v12807_v61 = vld [vmem:[#allocation8 + $0x24c] sm:$0xf]  ;;  %v14669_v55 = vor.u32 %v12739_v34, %v9280_v33  ;;  %v9392_v10 = vld [vmem:[#allocation8 + $0x118] sm:$0xf0] }
 0x134   : > { %1679 = vmatpush.bf16.msrb.mxu1 %v14647_v60  ;;  %v9552_v60 = vld [vmem:[#allocation8 + $0x258] sm:$0xf0]  ;;  %v12735_v19 = vld [vmem:[#allocation8 + $0xc] sm:$0xf]  ;;  %v14683_v33 = vor.u32 %v12767_v9, %v9392_v10  ;;  %v677_v9 = vpop.f32.mrf.mxu0  ;;  %v19338_v10 = vld [vmem:[#allocation41_spill] sm:$0xff] }
 0x135   : > { %v14674_v21 = vor.u32 %v12807_v61, %v9552_v60  ;;  %v12835_v42 = vld [vmem:[#allocation8 + $0x32c] sm:$0xf]  ;;  %v9664_v63 = vld [vmem:[#allocation8 + $0x338] sm:$0xf0] }
 0x136   : > { %1691 = vmatpush.bf16.msrb.mxu2 %v14650_v62  ;;  %v9264_v62 = vld [vmem:[#allocation8 + $0x18] sm:$0xf0]  ;;  %v14689_v61 = vor.u32 %v12835_v42, %v9664_v63  ;;  %v12799_v18 = vld [vmem:[#allocation8 + $0x20c] sm:$0xf]  ;;  %v19340_v63 = vld [vmem:[#allocation43_spill] sm:$0xff] }
 0x137   : > { %1704 = vmatpush.bf16.msrb.mxu3 %v14653_v8  ;;  %1667 = vmatpush.bf16.msrb.mxu0 %v14657_v45  ;;  %v12803_v45 = vld [vmem:[#allocation8 + $0x22c] sm:$0xf]  ;;  %v14681_v34 = vor.u32 %v12735_v19, %v9264_v62  ;;  %v9520_v49 = vld [vmem:[#allocation8 + $0x218] sm:$0xf0] }
 0x138   : > { %1680 = vmatpush.bf16.msrb.mxu1 %v14659_v47  ;;  %v9536_v47 = vld [vmem:[#allocation8 + $0x238] sm:$0xf0]  ;;  %v12831_v19 = vld [vmem:[#allocation8 + $0x30c] sm:$0xf] }
 0x139   : > { %v14686_v60 = vor.u32 %v12803_v45, %v9536_v47  ;;  %v9648_v62 = vld [vmem:[#allocation8 + $0x318] sm:$0xf0]  ;;  %v14696_v45 = vor.u32 %v12799_v18, %v9520_v49  ;;  %v19339_v42 = vld [vmem:[#allocation42_spill] sm:$0xff]  ;;  %v19342_v49 = vld [vmem:[#allocation45_spill] sm:$0xff] }
 0x13a   : > { %1692 = vmatpush.bf16.msrb.mxu2 %v14662_v17  ;;  %v14700_v47 = vor.u32 %v12831_v19, %v9648_v62  ;;  %v19341_v18 = vld [vmem:[#allocation44_spill] sm:$0xff]  ;;  %v19343_v19 = vld [vmem:[#allocation46_spill] sm:$0xff]  ;;  %v19344_v62 = vld [vmem:[#allocation47_spill] sm:$0xff] }
 0x13b   : > { %1705 = vmatpush.bf16.msrb.mxu3 %v14665_v13  ;;  %1668 = vmatpush.bf16.msrb.mxu0 %v14669_v55 }
 0x13c   : > { %1681 = vmatpush.bf16.msrb.mxu1 %v14671_v23 }
 0x13e   : > { %1693 = vmatpush.bf16.msrb.mxu2 %v14674_v21 }
 0x13f   : > { %1706 = vmatpush.bf16.msrb.mxu3 %v14677_v30  ;;  %1669 = vmatpush.bf16.msrb.mxu0 %v14681_v34 }
 0x140   : > { %1682 = vmatpush.bf16.msrb.mxu1 %v14683_v33 }
 0x142   : > { %1694 = vmatpush.bf16.msrb.mxu2 %v14686_v60  ;;  %1670 = vmatmul.bf16.vlgmr.msrb.gmra.mxu0 %v14486_v12  ;;  %v19334_v12 = vld [vmem:[#allocation35_spill] sm:$0xff] }
 0x143   : > { %1722 = vmatpush.bf16.msra.mxu0 %v14278_v54  ;;  %1707 = vmatpush.bf16.msrb.mxu3 %v14689_v61  ;;  %v690_v54 = vpop.f32.mrf.mxu1 }
 0x144   : > { %1735 = vmatpush.bf16.msra.mxu1 %v14280_v58  ;;  %v703_v58 = vpop.f32.mrf.mxu2 }
 0x145   : > { %1683 = vmatmul.bf16.vlgmr.msrb.gmra.mxu1 %v14491_v46  ;;  %v19333_v46 = vld [vmem:[#allocation38_spill] sm:$0xff] }
 0x146   : > { %1695 = vmatpush.bf16.msrb.mxu2 %v14696_v45 }
 0x147   : > { %1723 = vmatpush.bf16.msra.mxu0 %v14286_v2  ;;  %1708 = vmatpush.bf16.msrb.mxu3 %v14700_v47  ;;  %v716_v2 = vpop.f32.mrf.mxu3 }
 0x148   : > { %1736 = vmatpush.bf16.msra.mxu1 %v14291_v7  ;;  %v679_v7 = vpop.f32.mrf.mxu0 }
 0x149   : > { %1696 = vmatmul.bf16.vlgmr.msrb.gmra.mxu2 %v14507_v48  ;;  %v19337_v48 = vld [vmem:[#allocation40_spill] sm:$0xff] }
 0x14a   : > { %1748 = vmatpush.bf16.msra.mxu2 %v14283_v1  ;;  %1709 = vmatmul.bf16.vlgmr.msrb.gmra.mxu3 %v14514_v22  ;;  %v19335_v22 = vld [vmem:[#allocation37_spill] sm:$0xff]  ;;  %v14788_v7 = vld [vmem:[#allocation10] sm:$0xf] }
 0x14b   : > { %1761 = vmatpush.bf16.msra.mxu3 %v14288_v3  ;;  %1724 = vmatpush.bf16.msra.mxu0 %v14298_v15  ;;  %v692_v1 = vpop.f32.mrf.mxu1  ;;  %v19317_v15 = vperm.slane %v14475_v37, 0 }
 0x14c   : > { %1737 = vmatpush.bf16.msra.mxu1 %v14303_v20  ;;  %v705_v3 = vpop.f32.mrf.mxu2  ;;  %v19318_v20 = vperm.slane %v14475_v37, 1  ;;  %v19349_v1 = vld [vmem:[#allocation50_spill] sm:$0xff] }
 0x14d   : > { %v19350_v3 = vld [vmem:[#allocation55_spill] sm:$0xff] }
 0x14e   : > { %1749 = vmatpush.bf16.msra.mxu2 %v14294_v14 }
 0x14f   : > { %1762 = vmatpush.bf16.msra.mxu3 %v14300_v16  ;;  %1725 = vmatpush.bf16.msra.mxu0 %v14314_v27  ;;  %v718_v14 = vpop.f32.mrf.mxu3  ;;  %v678_v16 = vadd.f32 %v677_v9, %v19317_v15  ;;  %v19345_v9 = vld [vmem:[#allocation48_spill] sm:$0xff] }
 0x150   : > { %1738 = vmatpush.bf16.msra.mxu1 %v14319_v32  ;;  %v19319_v32 = vperm.slane %v14475_v37, 2  ;;  %v18715_v14 = vperm.slane %v14788_v7, 0  ;;  %v19351_v15 = vld [vmem:[#allocation56_spill] sm:$0xff] }
 0x151   : > { %v720_v27 = vmax.f32 %v678_v16, 0.0  ;;  %v19352_v16 = vld [vmem:[#allocation51_spill] sm:$0xff] }
 0x152   : > { %1750 = vmatpush.bf16.msra.mxu2 %v14309_v26  ;;  %v691_v26 = vadd.f32 %v690_v54, %v19318_v20  ;;  %v19346_v54 = vld [vmem:[#allocation53_spill] sm:$0xff]  ;;  %v19353_v20 = vld [vmem:[#allocation52_spill] sm:$0xff] }
 0x153   : > { %1763 = vmatpush.bf16.msra.mxu3 %v14316_v28  ;;  %1726 = vmatpush.bf16.msra.mxu0 %v14326_v39  ;;  %v19320_v39 = vperm.slane %v14475_v37, 3  ;;  %v19336_v37 = vld [vmem:[#allocation39_spill] sm:$0xff] }
 0x154   : > { %1739 = vmatpush.bf16.msra.mxu1 %v14331_v44  ;;  %v721_v28 = vmax.f32 %v691_v26, 0.0  ;;  %v14739_v44 = vpack.c.bf16 %v720_v27, %v720_v27  ;;  %v19354_v26 = vld [vmem:[#allocation57_spill] sm:$0xff]  ;;  %v19355_v27 = vld [vmem:[#allocation58_spill] sm:$0xff] }
 0x156   : > { %1751 = vmatpush.bf16.msra.mxu2 %v14322_v38  ;;  %v704_v38 = vadd.f32 %v703_v58, %v19319_v32  ;;  %v19347_v58 = vld [vmem:[#allocation54_spill] sm:$0xff]  ;;  %v19356_v32 = vld [vmem:[#allocation59_spill] sm:$0xff] }
 0x157   : > { %1764 = vmatpush.bf16.msra.mxu3 %v14328_v40  ;;  %1727 = vmatpush.bf16.msra.mxu0 %v14338_v51  ;;  %v717_v40 = vadd.f32 %v716_v2, %v19320_v39  ;;  %v19348_v2 = vld [vmem:[#allocation49_spill] sm:$0xff] }
 0x158   : > { %1740 = vmatpush.bf16.msra.mxu1 %v14343_v57  ;;  %v722_v51 = vmax.f32 %v704_v38, 0.0 }
 0x15a   : > { %1752 = vmatpush.bf16.msra.mxu2 %v14334_v50  ;;  %v14742_v50 = vpack.c.bf16 %v721_v28, %v721_v28  ;;  %v14752_v57 = vpack.c.bf16 %v722_v51, %v722_v51 }
 0x15b   : > { %1765 = vmatpush.bf16.msra.mxu3 %v14340_v52  ;;  %1728 = vmatpush.bf16.msra.mxu0 %v14350_v5  ;;  %v723_v52 = vmax.f32 %v717_v40, 0.0  ;;  %v19321_v5 = vld [vmem:[#allocation24_spill] sm:$0xff] }
 0x15c   : > { %1741 = vmatpush.bf16.msra.mxu1 %v14355_v11  ;;  %v19323_v11 = vld [vmem:[#allocation26_spill] sm:$0xff]  ;;  %v19357_v40 = vld [vmem:[#allocation60_spill] sm:$0xff] }
 0x15e   : > { %1753 = vmatpush.bf16.msra.mxu2 %v14346_v0  ;;  %v14756_v0 = vpack.c.bf16 %v723_v52, %v723_v52  ;;  %v19358_v52 = vld [vmem:[#allocation61_spill] sm:$0xff] }
 0x15f   : > { %1766 = vmatpush.bf16.msra.mxu3 %v14352_v6  ;;  %1729 = vmatpush.bf16.msra.mxu0 %v14362_v25  ;;  %v19322_v6 = vld [vmem:[#allocation25_spill] sm:$0xff]  ;;  %v19325_v25 = vld [vmem:[#allocation30_spill] sm:$0xff] }
 0x160   : > { %1742 = vmatpush.bf16.msra.mxu1 %v14367_v35  ;;  %v19327_v35 = vld [vmem:[#allocation29_spill] sm:$0xff] }
 0x162   : > { %1754 = vmatpush.bf16.msra.mxu2 %v14358_v24  ;;  %1730 = vmatmul.bf16.vlgmr.msra.gmra.mxu0 %v14739_v44  ;;  %v19324_v24 = vld [vmem:[#allocation28_spill] sm:$0xff] }
 0x163   : > { %1774 = vmatpush.bf16.msrb.mxu0 %v14369_v36  ;;  %1767 = vmatpush.bf16.msra.mxu3 %v14364_v29  ;;  %v19326_v29 = vld [vmem:[#allocation27_spill] sm:$0xff]  ;;  %v19328_v36 = vld [vmem:[#allocation32_spill] sm:$0xff] }
 0x164   : > { %1787 = vmatpush.bf16.msrb.mxu1 %v14371_v43  ;;  %v19329_v43 = vld [vmem:[#allocation34_spill] sm:$0xff] }
 0x165   : > { %1743 = vmatmul.bf16.vlgmr.msra.gmra.mxu1 %v14742_v50 }
 0x166   : > { %1755 = vmatpush.bf16.msra.mxu2 %v14374_v53  ;;  %v19330_v53 = vld [vmem:[#allocation31_spill] sm:$0xff] }
 0x167   : > { %1775 = vmatpush.bf16.msrb.mxu0 %v14384_v59  ;;  %1768 = vmatpush.bf16.msra.mxu3 %v19321_v5  ;;  %v19331_v59 = vld [vmem:[#allocation33_spill] sm:$0xff]  ;;  %v19359_v5 = vld [vmem:[#allocation62_spill] sm:$0xff] }
 0x168   : > { %1788 = vmatpush.bf16.msrb.mxu1 %v14389_v4  ;;  %v19332_v4 = vld [vmem:[#allocation36_spill] sm:$0xff] }
 0x169   : > { %1756 = vmatmul.bf16.vlgmr.msra.gmra.mxu2 %v14752_v57 }
 0x16a   : > { %1800 = vmatpush.bf16.msrb.mxu2 %v19322_v6  ;;  %1769 = vmatmul.bf16.vlgmr.msra.gmra.mxu3 %v14756_v0  ;;  %v19360_v6 = vld [vmem:[#allocation63_spill] sm:$0xff] }
 0x16b   : > { %1813 = vmatpush.bf16.msrb.mxu3 %v19323_v11  ;;  %1776 = vmatpush.bf16.msrb.mxu0 %v19324_v24  ;;  %v19361_v11 = vld [vmem:[#allocation64_spill] sm:$0xff]  ;;  %v19362_v24 = vld [vmem:[#allocation65_spill] sm:$0xff] }
 0x16c   : > { %1789 = vmatpush.bf16.msrb.mxu1 %v19325_v25  ;;  %v19363_v25 = vld [vmem:[#allocation66_spill] sm:$0xff] }
 0x16e   : > { %1801 = vmatpush.bf16.msrb.mxu2 %v19326_v29 }
 0x16f   : > { %1814 = vmatpush.bf16.msrb.mxu3 %v19327_v35  ;;  %1777 = vmatpush.bf16.msrb.mxu0 %v19328_v36  ;;  %v19364_v35 = vld [vmem:[#allocation67_spill] sm:$0xff] }
 0x170   : > { %1790 = vmatpush.bf16.msrb.mxu1 %v19329_v43  ;;  %v19365_v43 = vld [vmem:[#allocation68_spill] sm:$0xff] }
 0x172   : > { %1802 = vmatpush.bf16.msrb.mxu2 %v19330_v53  ;;  %v19366_v53 = vld [vmem:[#allocation69_spill] sm:$0xff] }
 0x173   : > { %1815 = vmatpush.bf16.msrb.mxu3 %v19331_v59  ;;  %1778 = vmatpush.bf16.msrb.mxu0 %v19332_v4  ;;  %v19367_v59 = vld [vmem:[#allocation70_spill] sm:$0xff]  ;;  %v19368_v4 = vld [vmem:[#allocation71_spill] sm:$0xff] }
 0x174   : > { %1791 = vmatpush.bf16.msrb.mxu1 %v19333_v46 }
 0x176   : > { %1803 = vmatpush.bf16.msrb.mxu2 %v19334_v12  ;;  %v19369_v12 = vld [vmem:[#allocation72_spill] sm:$0xff] }
 0x177   : > { %1816 = vmatpush.bf16.msrb.mxu3 %v19335_v22  ;;  %1779 = vmatpush.bf16.msrb.mxu0 %v19336_v37  ;;  %v19370_v37 = vld [vmem:[#allocation73_spill] sm:$0xff] }
 0x178   : > { %1792 = vmatpush.bf16.msrb.mxu1 %v19337_v48  ;;  %v19371_v48 = vld [vmem:[#allocation74_spill] sm:$0xff] }
 0x17a   : > { %1804 = vmatpush.bf16.msrb.mxu2 %v19338_v10 }
 0x17b   : > { %1817 = vmatpush.bf16.msrb.mxu3 %v19339_v42  ;;  %1780 = vmatpush.bf16.msrb.mxu0 %v19340_v63  ;;  %v19372_v42 = vld [vmem:[#allocation75_spill] sm:$0xff] }
 0x17c   : > { %1793 = vmatpush.bf16.msrb.mxu1 %v19341_v18  ;;  %v19373_v18 = vld [vmem:[#allocation76_spill] sm:$0xff] }
 0x17e   : > { %1805 = vmatpush.bf16.msrb.mxu2 %v19342_v49  ;;  %v1515_v28 = vpop.f32.mrf.mxu0  ;;  %v19374_v49 = vld [vmem:[#allocation77_spill] sm:$0xff] }
 0x17f   : > { %1818 = vmatpush.bf16.msrb.mxu3 %v19343_v19  ;;  %1781 = vmatpush.bf16.msrb.mxu0 %v19344_v62  ;;  %v1516_v38 = vadd.f32 %v1515_v28, %v18715_v14  ;;  %v1528_v39 = vpop.f32.mrf.mxu1  ;;  %v19375_v19 = vld [vmem:[#allocation78_spill] sm:$0xff] }
 0x180   : > { %1794 = vmatpush.bf16.msrb.mxu1 %v19345_v9  ;;  %v19376_v9 = vld [vmem:[#allocation79_spill] sm:$0xff] }
 0x181   : > { %v14806_v51 = vadd.f32 %v1528_v39, %v1516_v38  ;;  %v19387_v38 = vld [vmem:[#allocation90_spill] sm:$0xff]  ;;  %v19388_v39 = vld [vmem:[#allocation91_spill] sm:$0xff] }
 0x182   : > { %1806 = vmatpush.bf16.msrb.mxu2 %v19348_v2  ;;  %1782 = vmatmul.bf16.vlgmr.msrb.gmra.mxu0 %v14739_v44  ;;  %v19378_v2 = vld [vmem:[#allocation81_spill] sm:$0xff] }
 0x183   : > { %1826 = vmatpush.bf16.msra.mxu0 %v19346_v54  ;;  %1819 = vmatpush.bf16.msrb.mxu3 %v19349_v1  ;;  %v19379_v1 = vld [vmem:[#allocation82_spill] sm:$0xff] }
 0x184   : > { %1839 = vmatpush.bf16.msra.mxu1 %v19347_v58  ;;  %v19377_v58 = vld [vmem:[#allocation80_spill] sm:$0xff] }
 0x185   : > { %1795 = vmatmul.bf16.vlgmr.msrb.gmra.mxu1 %v14742_v50 }
 0x186   : > { %1807 = vmatpush.bf16.msrb.mxu2 %v19352_v16  ;;  %v1517_v29 = vpop.f32.mrf.mxu0  ;;  %v19381_v16 = vld [vmem:[#allocation84_spill] sm:$0xff] }
 0x187   : > { %1827 = vmatpush.bf16.msra.mxu0 %v19350_v3  ;;  %1820 = vmatpush.bf16.msrb.mxu3 %v19353_v20  ;;  %v1530_v36 = vpop.f32.mrf.mxu1  ;;  %v19382_v20 = vld [vmem:[#allocation85_spill] sm:$0xff] }
 0x188   : > { %1840 = vmatpush.bf16.msra.mxu1 %v19351_v15  ;;  %v19380_v15 = vld [vmem:[#allocation83_spill] sm:$0xff]  ;;  %v19394_v36 = vld [vmem:[#allocation97_spill] sm:$0xff] }
 0x189   : > { %1808 = vmatmul.bf16.vlgmr.msrb.gmra.mxu2 %v14752_v57 }
 0x18a   : > { %1852 = vmatpush.bf16.msra.mxu2 %v19354_v26  ;;  %1821 = vmatmul.bf16.vlgmr.msrb.gmra.mxu3 %v14756_v0  ;;  %v19383_v26 = vld [vmem:[#allocation86_spill] sm:$0xff] }
 0x18b   : > { %1865 = vmatpush.bf16.msra.mxu3 %v19355_v27  ;;  %1828 = vmatpush.bf16.msra.mxu0 %v19356_v32  ;;  %v19385_v32 = vld [vmem:[#allocation88_spill] sm:$0xff] }
 0x18c   : > { %1841 = vmatpush.bf16.msra.mxu1 %v19357_v40  ;;  %v14819_v46 = vpop.f32.mrf.mxu2 }
 0x18d   : > { %v14822_v22 = vpop.f32.mrf.mxu3 }
 0x18e   : > { %1853 = vmatpush.bf16.msra.mxu2 %v19358_v52  ;;  %v14826_v10 = vpop.f32.mrf.mxu0 }
 0x18f   : > { %1866 = vmatpush.bf16.msra.mxu3 %v19359_v5  ;;  %1829 = vmatpush.bf16.msra.mxu0 %v19360_v6  ;;  %v14829_v63 = vpop.f32.mrf.mxu1  ;;  %v19389_v5 = vld [vmem:[#allocation92_spill] sm:$0xff]  ;;  %v19390_v6 = vld [vmem:[#allocation93_spill] sm:$0xff] }
 0x190   : > { %1842 = vmatpush.bf16.msra.mxu1 %v19361_v11  ;;  %v19391_v11 = vld [vmem:[#allocation94_spill] sm:$0xff] }
 0x192   : > { %1854 = vmatpush.bf16.msra.mxu2 %v19362_v24  ;;  %v19392_v24 = vld [vmem:[#allocation95_spill] sm:$0xff] }
 0x193   : > { %1867 = vmatpush.bf16.msra.mxu3 %v19363_v25  ;;  %1830 = vmatpush.bf16.msra.mxu0 %v19364_v35  ;;  %v19393_v35 = vld [vmem:[#allocation96_spill] sm:$0xff] }
 0x194   : > { %1843 = vmatpush.bf16.msra.mxu1 %v19365_v43  ;;  %v1543_v62 = vpop.f32.mrf.mxu2  ;;  %v19395_v43 = vld [vmem:[#allocation98_spill] sm:$0xff] }
 0x195   : > { %v1556_v54 = vpop.f32.mrf.mxu3 }
 0x196   : > { %1855 = vmatpush.bf16.msra.mxu2 %v19366_v53  ;;  %v12920_v54 = vld [vmem:[#allocation8 + $0x5cc] sm:$0xf0] }
 0x197   : > { %1868 = vmatpush.bf16.msra.mxu3 %v19367_v59  ;;  %1831 = vmatpush.bf16.msra.mxu0 %v19368_v4  ;;  %v1582_v3 = vpop.f32.mrf.mxu1  ;;  %v19396_v4 = vld [vmem:[#allocation99_spill] sm:$0xff] }
 0x198   : > { %1844 = vmatpush.bf16.msra.mxu1 %v19369_v12  ;;  %v19397_v12 = vld [vmem:[#allocation100_spill] sm:$0xff]  ;;  %v12916_v3 = vld [vmem:[#allocation8 + $0x5ac] sm:$0xf0] }
 0x19a   : > { %1856 = vmatpush.bf16.msra.mxu2 %v19370_v37  ;;  %v9878_v37 = vld [vmem:[#allocation8 + $0x4e0] sm:$0xf] }
 0x19b   : > { %1869 = vmatpush.bf16.msra.mxu3 %v19371_v48  ;;  %1832 = vmatpush.bf16.msra.mxu0 %v19372_v42  ;;  %v12892_v48 = vld [vmem:[#allocation8 + $0x4ec] sm:$0xf0]  ;;  %v10006_v42 = vld [vmem:[#allocation8 + $0x5e0] sm:$0xf] }
 0x19c   : > { %1845 = vmatpush.bf16.msra.mxu1 %v14569_v41  ;;  %v1569_v41 = vpop.f32.mrf.mxu0  ;;  %v14848_v27 = vpop.f32.mrf.mxu2 }
 0x19d   : > { %v14850_v28 = vpop.f32.mrf.mxu3  ;;  %v12884_v41 = vld [vmem:[#allocation8 + $0x4ac] sm:$0xf0] }
 0x19e   : > { %1857 = vmatpush.bf16.msra.mxu2 %v19373_v18  ;;  %v12924_v18 = vld [vmem:[#allocation8 + $0x5ec] sm:$0xf0] }
 0x19f   : > { %1870 = vmatpush.bf16.msra.mxu3 %v19374_v49  ;;  %1833 = vmatpush.bf16.msra.mxu0 %v19375_v19  ;;  %v14883_v62 = vor.u32 %v12924_v18, %v10006_v42 }
 0x1a0   : > { %1846 = vmatpush.bf16.msra.mxu1 %v19376_v9  ;;  %v12888_v9 = vld [vmem:[#allocation8 + $0x4cc] sm:$0xf0] }
 0x1a2   : > { %1858 = vmatpush.bf16.msra.mxu2 %v19378_v2  ;;  %1834 = vmatmul.bf16.vlgmr.msra.gmra.mxu0 %v14739_v44  ;;  %v14860_v52 = vpop.f32.mrf.mxu1  ;;  %v12956_v2 = vld [vmem:[#allocation8 + $0x6ec] sm:$0xf0] }
 0x1a3   : > { %1878 = vmatpush.bf16.msrb.mxu0 %v19377_v58  ;;  %1871 = vmatpush.bf16.msra.mxu3 %v19379_v1  ;;  %v10134_v58 = vld [vmem:[#allocation8 + $0x6e0] sm:$0xf] }
 0x1a4   : > { %1891 = vmatpush.bf16.msrb.mxu1 %v14587_v56  ;;  %v19384_v56 = vld [vmem:[#allocation87_spill] sm:$0xff]  ;;  %v14858_v40 = vpop.f32.mrf.mxu0  ;;  %v1595_v25 = vpop.f32.mrf.mxu2 }
 0x1a5   : > { %1847 = vmatmul.bf16.vlgmr.msra.gmra.mxu1 %v14742_v50  ;;  %v1608_v29 = vpop.f32.mrf.mxu3 }
 0x1a6   : > { %1859 = vmatpush.bf16.msra.mxu2 %v19381_v16  ;;  %v12980_v29 = vld [vmem:[#allocation8 + $0x7ac] sm:$0xf0] }
 0x1a7   : > { %1879 = vmatpush.bf16.msrb.mxu0 %v14599_v31  ;;  %1872 = vmatpush.bf16.msra.mxu3 %v19382_v20  ;;  %v19386_v31 = vld [vmem:[#allocation89_spill] sm:$0xff] }
 0x1a8   : > { %1892 = vmatpush.bf16.msrb.mxu1 %v19380_v15 }
 0x1a9   : > { %1860 = vmatmul.bf16.vlgmr.msra.gmra.mxu2 %v14752_v57 }
 0x1aa   : > { %1904 = vmatpush.bf16.msrb.mxu2 %v19383_v26  ;;  %1873 = vmatmul.bf16.vlgmr.msra.gmra.mxu3 %v14756_v0  ;;  %v1634_v59 = vpop.f32.mrf.mxu1  ;;  %v10118_v26 = vld [vmem:[#allocation8 + $0x6c0] sm:$0xf] }
 0x1ab   : > { %1917 = vmatpush.bf16.msrb.mxu3 %v19384_v56  ;;  %1880 = vmatpush.bf16.msrb.mxu0 %v19385_v32  ;;  %v10246_v32 = vld [vmem:[#allocation8 + $0x7c0] sm:$0xf] }
 0x1ac   : > { %1893 = vmatpush.bf16.msrb.mxu1 %v19386_v31  ;;  %v1621_v53 = vpop.f32.mrf.mxu0  ;;  %v14874_v49 = vpop.f32.mrf.mxu2  ;;  %v9830_v31 = vld [vmem:[#allocation8 + $0x480] sm:$0xf] }
 0x1ad   : > { %v14876_v19 = vpop.f32.mrf.mxu3  ;;  %v9942_v59 = vld [vmem:[#allocation8 + $0x560] sm:$0xf] }
 0x1ae   : > { %1905 = vmatpush.bf16.msrb.mxu2 %v19387_v38 }
 0x1af   : > { %1918 = vmatpush.bf16.msrb.mxu3 %v19388_v39  ;;  %1881 = vmatpush.bf16.msrb.mxu0 %v19389_v5  ;;  %v9958_v39 = vld [vmem:[#allocation8 + $0x580] sm:$0xf]  ;;  %v12912_v5 = vld [vmem:[#allocation8 + $0x58c] sm:$0xf0] }
 0x1b0   : > { %1894 = vmatpush.bf16.msrb.mxu1 %v19390_v6  ;;  %v18714_v6 = vperm.slane %v14788_v7, 1 }
 0x1b2   : > { %1906 = vmatpush.bf16.msrb.mxu2 %v19391_v11 }
 0x1b3   : > { %1919 = vmatpush.bf16.msrb.mxu3 %v19392_v24  ;;  %1882 = vmatpush.bf16.msrb.mxu0 %v19393_v35  ;;  %v10102_v24 = vld [vmem:[#allocation8 + $0x6a0] sm:$0xf]  ;;  %v14923_v35 = vor.u32 %v12912_v5, %v9958_v39  ;;  %v12868_v39 = vld [vmem:[#allocation8 + $0x42c] sm:$0xf0] }
 0x1b4   : > { %1895 = vmatpush.bf16.msrb.mxu1 %v19394_v36  ;;  %v1647_v15 = vpop.f32.mrf.mxu2  ;;  %v9814_v36 = vld [vmem:[#allocation8 + $0x460] sm:$0xf] }
 0x1b5   : > { %v1660_v16 = vpop.f32.mrf.mxu3  ;;  %v12940_v15 = vld [vmem:[#allocation8 + $0x66c] sm:$0xf0] }
 0x1b6   : > { %1907 = vmatpush.bf16.msrb.mxu2 %v19395_v43  ;;  %v12876_v43 = vld [vmem:[#allocation8 + $0x46c] sm:$0xf0] }
 0x1b7   : > { %1920 = vmatpush.bf16.msrb.mxu3 %v14653_v8  ;;  %1883 = vmatpush.bf16.msrb.mxu0 %v19396_v4  ;;  %v14880_v8 = vor.u32 %v12892_v48, %v9878_v37  ;;  %v1568_v4 = vadd.f32 %v14826_v10, %v18714_v6  ;;  %v10086_v37 = vld [vmem:[#allocation8 + $0x680] sm:$0xf]  ;;  %v12944_v48 = vld [vmem:[#allocation8 + $0x68c] sm:$0xf0]  ;;  %v14935_v18 = vor.u32 %v12876_v43, %v9814_v36  ;;  %v10088_v6 = vld [vmem:[#allocation8 + $0x690] sm:$0xf0] }
 0x1b8   : > { %1896 = vmatpush.bf16.msrb.mxu1 %v19397_v12  ;;  %v9798_v10 = vld [vmem:[#allocation8 + $0x440] sm:$0xf] }
 0x1b9   : > { %v10182_v43 = vld [vmem:[#allocation8 + $0x740] sm:$0xf] }
 0x1ba   : > { %1908 = vmatpush.bf16.msrb.mxu2 %v14662_v17  ;;  %v9862_v17 = vld [vmem:[#allocation8 + $0x4c0] sm:$0xf] }
 0x1bb   : > { %1921 = vmatpush.bf16.msrb.mxu3 %v14665_v13  ;;  %1884 = vmatpush.bf16.msrb.mxu0 %v14669_v55  ;;  %v9990_v13 = vld [vmem:[#allocation8 + $0x5c0] sm:$0xf]  ;;  %v14889_v55 = vor.u32 %v12888_v9, %v9862_v17  ;;  %v12976_v9 = vld [vmem:[#allocation8 + $0x78c] sm:$0xf0] }
 0x1bc   : > { %1897 = vmatpush.bf16.msrb.mxu1 %v14671_v23  ;;  %v10262_v23 = vld [vmem:[#allocation8 + $0x7e0] sm:$0xf]  ;;  %v14893_v1 = vor.u32 %v12920_v54, %v9990_v13  ;;  %v18713_v13 = vperm.slane %v14788_v7, 2 }
 0x1bd   : > { %v10214_v17 = vld [vmem:[#allocation8 + $0x780] sm:$0xf] }
 0x1be   : > { %1909 = vmatpush.bf16.msrb.mxu2 %v14674_v21  ;;  %v12988_v21 = vld [vmem:[#allocation8 + $0x7ec] sm:$0xf0] }
 0x1bf   : > { %1922 = vmatpush.bf16.msrb.mxu3 %v14677_v30  ;;  %1885 = vmatpush.bf16.msrb.mxu0 %v14681_v34  ;;  %v9846_v30 = vld [vmem:[#allocation8 + $0x4a0] sm:$0xf]  ;;  %v14897_v34 = vor.u32 %v12956_v2, %v10134_v58  ;;  %v14900_v20 = vor.u32 %v12988_v21, %v10262_v23  ;;  %v1671_v12 = vpop.f32.mrf.mxu0  ;;  %v12872_v58 = vld [vmem:[#allocation8 + $0x44c] sm:$0xf0]  ;;  %v18712_v2 = vperm.slane %v14788_v7, 3  ;;  %v14943_v23 = vor.u32 %v12944_v48, %v10086_v37 }
 0x1c0   : > { %1898 = vmatpush.bf16.msrb.mxu1 %v14683_v33  ;;  %v9974_v33 = vld [vmem:[#allocation8 + $0x5a0] sm:$0xf]  ;;  %v14903_v56 = vor.u32 %v12884_v41, %v9846_v30  ;;  %v12904_v30 = vld [vmem:[#allocation8 + $0x54c] sm:$0xf0]  ;;  %v1581_v41 = vadd.f32 %v14829_v63, %v1568_v4  ;;  %v14950_v16 = vor.u32 %v12872_v58, %v9798_v10  ;;  %v1620_v63 = vadd.f32 %v14858_v40, %v18713_v13  ;;  %v9944_v13 = vld [vmem:[#allocation8 + $0x570] sm:$0xf0] }
 0x1c1   : > { %v9926_v21 = vld [vmem:[#allocation8 + $0x540] sm:$0xf]  ;;  %v1672_v5 = vadd.f32 %v1671_v12, %v18712_v2  ;;  %v12896_v10 = vld [vmem:[#allocation8 + $0x50c] sm:$0xf0]  ;;  %v10232_v2 = vld [vmem:[#allocation8 + $0x7b0] sm:$0xf0] }
 0x1c2   : > { %1910 = vmatpush.bf16.msrb.mxu2 %v14686_v60  ;;  %1886 = vmatmul.bf16.vlgmr.msrb.gmra.mxu0 %v14739_v44  ;;  %v12952_v60 = vld [vmem:[#allocation8 + $0x6cc] sm:$0xf0]  ;;  %v14907_v44 = vor.u32 %v12916_v3, %v9974_v33  ;;  %v1684_v42 = vpop.f32.mrf.mxu1  ;;  %v14947_v33 = vor.u32 %v12976_v9, %v10214_v17  ;;  %v10070_v3 = vld [vmem:[#allocation8 + $0x660] sm:$0xf]  ;;  %v1633_v37 = vadd.f32 %v14860_v52, %v1620_v63 }
 0x1c3   : > { %2718 = vmatpush.bf16.msra.mxu0 %v14880_v8  ;;  %1923 = vmatpush.bf16.msrb.mxu3 %v14689_v61  ;;  %v12984_v61 = vld [vmem:[#allocation8 + $0x7cc] sm:$0xf0]  ;;  %v14911_v38 = vor.u32 %v12952_v60, %v10118_v26  ;;  %v10198_v26 = vld [vmem:[#allocation8 + $0x760] sm:$0xf]  ;;  %v1685_v58 = vadd.f32 %v1684_v42, %v1672_v5 }
 0x1c4   : > { %2731 = vmatpush.bf16.msra.mxu1 %v14883_v62  ;;  %v14915_v11 = vor.u32 %v12984_v61, %v10246_v32  ;;  %v12972_v60 = vld [vmem:[#allocation8 + $0x76c] sm:$0xf0]  ;;  %v1542_v32 = vadd.f32 %v14819_v46, %v14806_v51  ;;  %v1594_v61 = vadd.f32 %v14848_v27, %v1581_v41  ;;  %v9910_v51 = vld [vmem:[#allocation8 + $0x520] sm:$0xf]  ;;  %v9880_v41 = vld [vmem:[#allocation8 + $0x4f0] sm:$0xf0] }
 0x1c5   : > { %1899 = vmatmul.bf16.vlgmr.msrb.gmra.mxu1 %v14742_v50  ;;  %v12880_v50 = vld [vmem:[#allocation8 + $0x48c] sm:$0xf0]  ;;  %v10054_v40 = vld [vmem:[#allocation8 + $0x640] sm:$0xf] }
 0x1c6   : > { %1911 = vmatpush.bf16.msrb.mxu2 %v14696_v45  ;;  %v12948_v45 = vld [vmem:[#allocation8 + $0x6ac] sm:$0xf0]  ;;  %v14919_v25 = vor.u32 %v12880_v50, %v9830_v31  ;;  %v14959_v31 = vor.u32 %v12904_v30, %v9926_v21  ;;  %v9782_v50 = vld [vmem:[#allocation8 + $0x420] sm:$0xf]  ;;  %v1555_v4 = vadd.f32 %v14822_v22, %v1542_v32  ;;  %v1607_v12 = vadd.f32 %v14850_v28, %v1594_v61  ;;  %v12890_v30 = vld [vmem:[#allocation8 + $0x4e4] sm:$0xf] }
 0x1c7   : > { %2719 = vmatpush.bf16.msra.mxu0 %v14889_v55  ;;  %1924 = vmatpush.bf16.msrb.mxu3 %v14700_v47  ;;  %v10230_v47 = vld [vmem:[#allocation8 + $0x7a0] sm:$0xf]  ;;  %v14926_v53 = vor.u32 %v12948_v45, %v10102_v24  ;;  %v14964_v24 = vor.u32 %v12940_v15, %v10070_v3  ;;  %v12900_v46 = vld [vmem:[#allocation8 + $0x52c] sm:$0xf0]  ;;  %v1673_v27 = vpop.f32.mrf.mxu0  ;;  %v14967_v45 = vor.u32 %v12972_v60, %v10198_v26  ;;  %v12922_v3 = vld [vmem:[#allocation8 + $0x5e4] sm:$0xf] }
 0x1c8   : > { %2732 = vmatpush.bf16.msra.mxu1 %v14893_v1  ;;  %v14970_v36 = vor.u32 %v12868_v39, %v9782_v50  ;;  %v14976_v48 = vor.u32 %v12900_v46, %v9910_v51  ;;  %v12864_v17 = vld [vmem:[#allocation8 + $0x40c] sm:$0xf0]  ;;  %v9894_v9 = vld [vmem:[#allocation8 + $0x500] sm:$0xf]  ;;  %v1646_v22 = vadd.f32 %v14874_v49, %v1633_v37  ;;  %v10008_v15 = vld [vmem:[#allocation8 + $0x5f0] sm:$0xf0]  ;;  %v14991_v51 = vor.u32 %v12890_v30, %v9880_v41 }
 0x1c9   : > { %1912 = vmatmul.bf16.vlgmr.msrb.gmra.mxu2 %v14752_v57  ;;  %v12908_v57 = vld [vmem:[#allocation8 + $0x56c] sm:$0xf0]  ;;  %v10038_v26 = vld [vmem:[#allocation8 + $0x620] sm:$0xf]  ;;  %v1714_v39 = vmax.f32 %v1555_v4, 0.0  ;;  %v1715_v5 = vmax.f32 %v1607_v12, 0.0  ;;  %v14989_v49 = vor.u32 %v12896_v10, %v9894_v9  ;;  %v14994_v27 = vor.u32 %v12922_v3, %v10008_v15 }
 0x1ca   : > { %2744 = vmatpush.bf16.msra.mxu2 %v14897_v34  ;;  %1925 = vmatmul.bf16.vlgmr.msrb.gmra.mxu3 %v14756_v0  ;;  %v14932_v0 = vor.u32 %v12980_v29, %v10230_v47  ;;  %v14939_v54 = vor.u32 %v12908_v57, %v9942_v59  ;;  %v12936_v47 = vld [vmem:[#allocation8 + $0x64c] sm:$0xf0]  ;;  %v1686_v29 = vpop.f32.mrf.mxu1  ;;  %v9766_v57 = vld [vmem:[#allocation8 + $0x400] sm:$0xf]  ;;  %v12886_v46 = vld [vmem:[#allocation8 + $0x4c4] sm:$0xf] }
 0x1cb   : > { %2757 = vmatpush.bf16.msra.mxu3 %v14900_v20  ;;  %2720 = vmatpush.bf16.msra.mxu0 %v14903_v56  ;;  %v12968_v59 = vld [vmem:[#allocation8 + $0x74c] sm:$0xf0]  ;;  %v14979_v21 = vor.u32 %v12936_v47, %v10054_v40  ;;  %v14986_v42 = vor.u32 %v12864_v17, %v9766_v57  ;;  %v10166_v63 = vld [vmem:[#allocation8 + $0x720] sm:$0xf]  ;;  %v9864_v47 = vld [vmem:[#allocation8 + $0x4d0] sm:$0xf0]  ;;  %v15003_v30 = vpack.c.bf16 %v1714_v39, %v1714_v39 }
 0x1cc   : > { %2733 = vmatpush.bf16.msra.mxu1 %v14907_v44  ;;  %v1697_v28 = vpop.f32.mrf.mxu2  ;;  %v14983_v52 = vor.u32 %v12968_v59, %v10182_v43  ;;  %v12932_v60 = vld [vmem:[#allocation8 + $0x62c] sm:$0xf0]  ;;  %v12918_v29 = vld [vmem:[#allocation8 + $0x5c4] sm:$0xf]  ;;  %v9992_v43 = vld [vmem:[#allocation8 + $0x5d0] sm:$0xf0]  ;;  %v1659_v59 = vadd.f32 %v14876_v19, %v1646_v22  ;;  %v15007_v19 = vor.u32 %v12886_v46, %v9864_v47  ;;  %v15009_v22 = vpack.c.bf16 %v1715_v5, %v1715_v5 }
 0x1cd   : > { %v1698_v32 = vadd.f32 %v1697_v28, %v1685_v58  ;;  %v1710_v61 = vpop.f32.mrf.mxu3  ;;  %v12964_v50 = vld [vmem:[#allocation8 + $0x72c] sm:$0xf0]  ;;  %v14996_v40 = vor.u32 %v12932_v60, %v10038_v26  ;;  %v10022_v4 = vld [vmem:[#allocation8 + $0x600] sm:$0xf]  ;;  %v12954_v10 = vld [vmem:[#allocation8 + $0x6e4] sm:$0xf]  ;;  %v15013_v28 = vor.u32 %v12918_v29, %v9992_v43 }
 0x1ce   : > { %2745 = vmatpush.bf16.msra.mxu2 %v14911_v38  ;;  %v15000_v57 = vor.u32 %v12964_v50, %v10166_v63  ;;  %v12928_v12 = vld [vmem:[#allocation8 + $0x60c] sm:$0xf0]  ;;  %v10150_v37 = vld [vmem:[#allocation8 + $0x700] sm:$0xf]  ;;  %v10136_v58 = vld [vmem:[#allocation8 + $0x6f0] sm:$0xf0] }
 0x1cf   : > { %2758 = vmatpush.bf16.msra.mxu3 %v14915_v11  ;;  %2721 = vmatpush.bf16.msra.mxu0 %v14919_v25  ;;  %v1711_v17 = vadd.f32 %v1710_v61, %v1698_v32  ;;  %v12960_v9 = vld [vmem:[#allocation8 + $0x70c] sm:$0xf0]  ;;  %19399 = vst [vmem:[#allocation25_spill] sm:$0xff] %v15007_v19  ;;  %v12986_v41 = vld [vmem:[#allocation8 + $0x7e4] sm:$0xf]  ;;  %v15015_v15 = vor.u32 %v12928_v12, %v10022_v4  ;;  %v1716_v32 = vmax.f32 %v1659_v59, 0.0 }
 0x1d0   : > { %2734 = vmatpush.bf16.msra.mxu1 %v14923_v35  ;;  %19398 = vst [vmem:[#allocation24_spill] sm:$0xff] %v15000_v57  ;;  %v10264_v3 = vld [vmem:[#allocation8 + $0x7f0] sm:$0xf0]  ;;  %v12882_v26 = vld [vmem:[#allocation8 + $0x4a4] sm:$0xf]  ;;  %v15019_v63 = vor.u32 %v12960_v9, %v10150_v37  ;;  %v15021_v50 = vor.u32 %v12954_v10, %v10136_v58 }
 0x1d1   : > { %19400 = vst [vmem:[#allocation26_spill] sm:$0xff] %v15013_v28  ;;  %v9848_v60 = vld [vmem:[#allocation8 + $0x4b0] sm:$0xf0]  ;;  %v12914_v39 = vld [vmem:[#allocation8 + $0x5a4] sm:$0xf]  ;;  %v1717_v46 = vmax.f32 %v1711_v17, 0.0  ;;  %v15024_v29 = vor.u32 %v12986_v41, %v10264_v3  ;;  %v15033_v10 = vpack.c.bf16 %v1716_v32, %v1716_v32 }
 0x1d2   : > { %2746 = vmatpush.bf16.msra.mxu2 %v14926_v53  ;;  %19401 = vst [vmem:[#allocation28_spill] sm:$0xff] %v15015_v15  ;;  %v9976_v5 = vld [vmem:[#allocation8 + $0x5b0] sm:$0xf0]  ;;  %v12950_v43 = vld [vmem:[#allocation8 + $0x6c4] sm:$0xf]  ;;  %v15027_v59 = vor.u32 %v12882_v26, %v9848_v60 }
 0x1d3   : > { %2759 = vmatpush.bf16.msra.mxu3 %v14932_v0  ;;  %2722 = vmatpush.bf16.msra.mxu0 %v14935_v18  ;;  %19402 = vst [vmem:[#allocation30_spill] sm:$0xff] %v15019_v63  ;;  %v10120_v4 = vld [vmem:[#allocation8 + $0x6d0] sm:$0xf0]  ;;  %v12982_v12 = vld [vmem:[#allocation8 + $0x7c4] sm:$0xf]  ;;  %v15031_v37 = vor.u32 %v12914_v39, %v9976_v5  ;;  %v15039_v26 = vpack.c.bf16 %v1717_v46, %v1717_v46 }
 0x1d4   : > { %2735 = vmatpush.bf16.msra.mxu1 %v14939_v54  ;;  %v1699_v61 = vpop.f32.mrf.mxu2  ;;  %19403 = vst [vmem:[#allocation27_spill] sm:$0xff] %v15021_v50  ;;  %v12878_v17 = vld [vmem:[#allocation8 + $0x484] sm:$0xf]  ;;  %v9832_v9 = vld [vmem:[#allocation8 + $0x490] sm:$0xf0]  ;;  %v15037_v58 = vor.u32 %v12950_v43, %v10120_v4 }
 0x1d5   : > { %v1712_v47 = vpop.f32.mrf.mxu3  ;;  %19404 = vst [vmem:[#allocation29_spill] sm:$0xff] %v15024_v29  ;;  %v10248_v61 = vld [vmem:[#allocation8 + $0x7d0] sm:$0xf0]  ;;  %v12910_v41 = vld [vmem:[#allocation8 + $0x584] sm:$0xf]  ;;  %v15046_v32 = vor.u32 %v12878_v17, %v9832_v9 }
 0x1d6   : > { %2747 = vmatpush.bf16.msra.mxu2 %v14943_v23  ;;  %19405 = vst [vmem:[#allocation32_spill] sm:$0xff] %v15027_v59  ;;  %v9960_v3 = vld [vmem:[#allocation8 + $0x590] sm:$0xf0]  ;;  %v15042_v60 = vor.u32 %v12982_v12, %v10248_v61  ;;  %v12946_v39 = vld [vmem:[#allocation8 + $0x6a4] sm:$0xf] }
 0x1d7   : > { %2760 = vmatpush.bf16.msra.mxu3 %v14947_v33  ;;  %2723 = vmatpush.bf16.msra.mxu0 %v14950_v16  ;;  %19406 = vst [vmem:[#allocation34_spill] sm:$0xff] %v15031_v37  ;;  %v10104_v5 = vld [vmem:[#allocation8 + $0x6b0] sm:$0xf0]  ;;  %v12978_v47 = vld [vmem:[#allocation8 + $0x7a4] sm:$0xf]  ;;  %v15050_v46 = vor.u32 %v12910_v41, %v9960_v3 }
 0x1d8   : > { %2736 = vmatpush.bf16.msra.mxu1 %v14959_v31  ;;  %19407 = vst [vmem:[#allocation31_spill] sm:$0xff] %v15037_v58  ;;  %v12874_v43 = vld [vmem:[#allocation8 + $0x464] sm:$0xf]  ;;  %v9816_v4 = vld [vmem:[#allocation8 + $0x470] sm:$0xf0]  ;;  %v15053_v12 = vor.u32 %v12946_v39, %v10104_v5  ;;  %v15056_v17 = vor.u32 %v12978_v47, %v10232_v2 }
 0x1d9   : > { %19408 = vst [vmem:[#allocation33_spill] sm:$0xff] %v15042_v60  ;;  %v12906_v61 = vld [vmem:[#allocation8 + $0x564] sm:$0xf]  ;;  %v10216_v3 = vld [vmem:[#allocation8 + $0x790] sm:$0xf0] }
 0x1da   : > { %2748 = vmatpush.bf16.msra.mxu2 %v14964_v24  ;;  %19409 = vst [vmem:[#allocation36_spill] sm:$0xff] %v15046_v32  ;;  %v12942_v9 = vld [vmem:[#allocation8 + $0x684] sm:$0xf]  ;;  %v15064_v5 = vor.u32 %v12906_v61, %v9944_v13  ;;  %v9800_v2 = vld [vmem:[#allocation8 + $0x450] sm:$0xf0] }
 0x1db   : > { %2761 = vmatpush.bf16.msra.mxu3 %v14967_v45  ;;  %2724 = vmatpush.bf16.msra.mxu0 %v14970_v36  ;;  %19410 = vst [vmem:[#allocation38_spill] sm:$0xff] %v15050_v46  ;;  %v12974_v41 = vld [vmem:[#allocation8 + $0x784] sm:$0xf]  ;;  %v15067_v47 = vor.u32 %v12942_v9, %v10088_v6  ;;  %v10200_v61 = vld [vmem:[#allocation8 + $0x770] sm:$0xf0] }
 0x1dc   : > { %2737 = vmatpush.bf16.msra.mxu1 %v14976_v48  ;;  %19411 = vst [vmem:[#allocation35_spill] sm:$0xff] %v15053_v12  ;;  %v12970_v13 = vld [vmem:[#allocation8 + $0x764] sm:$0xf]  ;;  %v9784_v9 = vld [vmem:[#allocation8 + $0x430] sm:$0xf0] }
 0x1dd   : > { %19412 = vst [vmem:[#allocation37_spill] sm:$0xff] %v15056_v17  ;;  %v12866_v6 = vld [vmem:[#allocation8 + $0x424] sm:$0xf] }
 0x1de   : > { %2749 = vmatpush.bf16.msra.mxu2 %v14979_v21  ;;  %19415 = vst [vmem:[#allocation40_spill] sm:$0xff] %v15064_v5 }
 0x1df   : > { %2762 = vmatpush.bf16.msra.mxu3 %v14983_v52  ;;  %2725 = vmatpush.bf16.msra.mxu0 %v14986_v42  ;;  %v1731_v14 = vpop.f32.mrf.mxu0  ;;  %19416 = vst [vmem:[#allocation41_spill] sm:$0xff] %v15067_v47 }
 0x1e0   : > { %2738 = vmatpush.bf16.msra.mxu1 %v14989_v49 }
 0x1e2   : > { %2750 = vmatpush.bf16.msra.mxu2 %v14996_v40  ;;  %2726 = vmatmul.bf16.vlgmr.msra.gmra.mxu0 %v15003_v30  ;;  %v1744_v39 = vpop.f32.mrf.mxu1 }
 0x1e3   : > { %2770 = vmatpush.bf16.msrb.mxu0 %v14991_v51  ;;  %2763 = vmatpush.bf16.msra.mxu3 %v15000_v57  ;;  %v12919_v57 = vld [vmem:[#allocation8 + $0x5cc] sm:$0xf] }
 0x1e4   : > { %2783 = vmatpush.bf16.msrb.mxu1 %v14994_v27 }
 0x1e5   : > { %2739 = vmatmul.bf16.vlgmr.msra.gmra.mxu1 %v15009_v22 }
 0x1e6   : > { %2751 = vmatpush.bf16.msra.mxu2 %v15015_v15  ;;  %v10168_v15 = vld [vmem:[#allocation8 + $0x730] sm:$0xf0] }
 0x1e7   : > { %2771 = vmatpush.bf16.msrb.mxu0 %v15007_v19  ;;  %2764 = vmatpush.bf16.msra.mxu3 %v15019_v63  ;;  %v10040_v63 = vld [vmem:[#allocation8 + $0x630] sm:$0xf0] }
 0x1e8   : > { %2784 = vmatpush.bf16.msrb.mxu1 %v15013_v28 }
 0x1e9   : > { %2752 = vmatmul.bf16.vlgmr.msra.gmra.mxu2 %v15033_v10 }
 0x1ea   : > { %2796 = vmatpush.bf16.msrb.mxu2 %v15021_v50  ;;  %2765 = vmatmul.bf16.vlgmr.msra.gmra.mxu3 %v15039_v26  ;;  %v12938_v50 = vld [vmem:[#allocation8 + $0x664] sm:$0xf] }
 0x1eb   : > { %2809 = vmatpush.bf16.msrb.mxu3 %v15024_v29  ;;  %2772 = vmatpush.bf16.msrb.mxu0 %v15027_v59  ;;  %v19414_v59 = vperm.slane %v14788_v7, 0  ;;  %v12902_v29 = vld [vmem:[#allocation8 + $0x544] sm:$0xf] }
 0x1ec   : > { %2785 = vmatpush.bf16.msrb.mxu1 %v15031_v37  ;;  %v15059_v37 = vor.u32 %v12874_v43, %v9816_v4  ;;  %v15070_v4 = vor.u32 %v12974_v41, %v10216_v3  ;;  %v12898_v41 = vld [vmem:[#allocation8 + $0x524] sm:$0xf]  ;;  %v9912_v3 = vld [vmem:[#allocation8 + $0x530] sm:$0xf0] }
 0x1ee   : > { %2797 = vmatpush.bf16.msrb.mxu2 %v15037_v58  ;;  %19413 = vst [vmem:[#allocation39_spill] sm:$0xff] %v15059_v37  ;;  %v1732_v58 = vadd.f32 %v1731_v14, %v19414_v59  ;;  %v10072_v14 = vld [vmem:[#allocation8 + $0x670] sm:$0xf0] }
 0x1ef   : > { %2810 = vmatpush.bf16.msrb.mxu3 %v15042_v60  ;;  %2773 = vmatpush.bf16.msrb.mxu0 %v15046_v32  ;;  %v12870_v60 = vld [vmem:[#allocation8 + $0x444] sm:$0xf]  ;;  %v9928_v32 = vld [vmem:[#allocation8 + $0x550] sm:$0xf0]  ;;  %19417 = vst [vmem:[#allocation42_spill] sm:$0xff] %v15070_v4 }
 0x1f0   : > { %2786 = vmatpush.bf16.msrb.mxu1 %v15050_v46  ;;  %v1745_v43 = vadd.f32 %v1744_v39, %v1732_v58  ;;  %v15073_v59 = vor.u32 %v12870_v60, %v9800_v2  ;;  %v15079_v58 = vor.u32 %v12938_v50, %v10072_v14  ;;  %v15082_v39 = vor.u32 %v12970_v13, %v10200_v61  ;;  %v12934_v60 = vld [vmem:[#allocation8 + $0x644] sm:$0xf]  ;;  %v10056_v2 = vld [vmem:[#allocation8 + $0x650] sm:$0xf0]  ;;  %v1746_v46 = vpop.f32.mrf.mxu1  ;;  %v12893_v61 = vld [vmem:[#allocation8 + $0x4f4] sm:$0xf0] }
 0x1f1   : > { %v15088_v50 = vor.u32 %v12898_v41, %v9912_v3  ;;  %v9768_v14 = vld [vmem:[#allocation8 + $0x410] sm:$0xf0]  ;;  %v15091_v13 = vor.u32 %v12934_v60, %v10056_v2  ;;  %v12930_v46 = vld [vmem:[#allocation8 + $0x624] sm:$0xf]  ;;  %v1770_v60 = vpop.f32.mrf.mxu3 }
 0x1f2   : > { %2798 = vmatpush.bf16.msrb.mxu2 %v15053_v12  ;;  %19418 = vst [vmem:[#allocation43_spill] sm:$0xff] %v15073_v59  ;;  %v15076_v12 = vor.u32 %v12902_v29, %v9928_v32  ;;  %v12966_v29 = vld [vmem:[#allocation8 + $0x744] sm:$0xf]  ;;  %v10184_v32 = vld [vmem:[#allocation8 + $0x750] sm:$0xf0] }
 0x1f3   : > { %2811 = vmatpush.bf16.msrb.mxu3 %v15056_v17  ;;  %2774 = vmatpush.bf16.msrb.mxu0 %v15059_v37  ;;  %19420 = vst [vmem:[#allocation45_spill] sm:$0xff] %v15079_v58  ;;  %v1733_v37 = vpop.f32.mrf.mxu0  ;;  %v12862_v17 = vld [vmem:[#allocation8 + $0x404] sm:$0xf] }
 0x1f4   : > { %2787 = vmatpush.bf16.msrb.mxu1 %v15064_v5  ;;  %19419 = vst [vmem:[#allocation44_spill] sm:$0xff] %v15076_v12  ;;  %v15085_v5 = vor.u32 %v12866_v6, %v9784_v9  ;;  %v9886_v37 = vld [vmem:[#allocation8 + $0x4e8] sm:$0xf]  ;;  %v15094_v6 = vor.u32 %v12966_v29, %v10184_v32  ;;  %v12925_v9 = vld [vmem:[#allocation8 + $0x5f4] sm:$0xf0]  ;;  %v15097_v41 = vor.u32 %v12862_v17, %v9768_v14 }
 0x1f5   : > { %19421 = vst [vmem:[#allocation46_spill] sm:$0xff] %v15082_v39  ;;  %v12962_v3 = vld [vmem:[#allocation8 + $0x724] sm:$0xf]  ;;  %v15102_v28 = vor.u32 %v12893_v61, %v9886_v37  ;;  %v9870_v29 = vld [vmem:[#allocation8 + $0x4c8] sm:$0xf] }
 0x1f6   : > { %2799 = vmatpush.bf16.msrb.mxu2 %v15067_v47  ;;  %19422 = vst [vmem:[#allocation47_spill] sm:$0xff] %v15085_v5  ;;  %v12894_v47 = vld [vmem:[#allocation8 + $0x504] sm:$0xf]  ;;  %v9998_v17 = vld [vmem:[#allocation8 + $0x5c8] sm:$0xf] }
 0x1f7   : > { %2812 = vmatpush.bf16.msrb.mxu3 %v15070_v4  ;;  %2775 = vmatpush.bf16.msrb.mxu0 %v15073_v59  ;;  %19423 = vst [vmem:[#allocation48_spill] sm:$0xff] %v15088_v50  ;;  %v9896_v4 = vld [vmem:[#allocation8 + $0x510] sm:$0xf0]  ;;  %v10014_v59 = vld [vmem:[#allocation8 + $0x5e8] sm:$0xf] }
 0x1f8   : > { %2788 = vmatpush.bf16.msrb.mxu1 %v15076_v12  ;;  %19424 = vst [vmem:[#allocation53_spill] sm:$0xff] %v15091_v13  ;;  %v1757_v12 = vpop.f32.mrf.mxu2  ;;  %v15100_v2 = vor.u32 %v12894_v47, %v9896_v4  ;;  %v15105_v32 = vor.u32 %v12925_v9, %v10014_v59  ;;  %v12921_v14 = vld [vmem:[#allocation8 + $0x5d4] sm:$0xf0]  ;;  %v12926_v47 = vld [vmem:[#allocation8 + $0x604] sm:$0xf] }
 0x1f9   : > { %19425 = vst [vmem:[#allocation54_spill] sm:$0xff] %v15094_v6  ;;  %v12958_v4 = vld [vmem:[#allocation8 + $0x704] sm:$0xf]  ;;  %v10152_v37 = vld [vmem:[#allocation8 + $0x710] sm:$0xf0] }
 0x1fa   : > { %2800 = vmatpush.bf16.msrb.mxu2 %v15079_v58  ;;  %19426 = vst [vmem:[#allocation49_spill] sm:$0xff] %v15097_v41  ;;  %v1758_v58 = vadd.f32 %v1757_v12, %v1745_v43  ;;  %v15112_v12 = vor.u32 %v12962_v3, %v10168_v15  ;;  %v10024_v43 = vld [vmem:[#allocation8 + $0x610] sm:$0xf0]  ;;  %v10142_v61 = vld [vmem:[#allocation8 + $0x6e8] sm:$0xf]  ;;  %v15121_v15 = vor.u32 %v12921_v14, %v9998_v17 }
 0x1fb   : > { %2813 = vmatpush.bf16.msrb.mxu3 %v15082_v39  ;;  %2776 = vmatpush.bf16.msrb.mxu0 %v15085_v5  ;;  %19427 = vst [vmem:[#allocation50_spill] sm:$0xff] %v15100_v2  ;;  %v15107_v39 = vor.u32 %v12930_v46, %v10040_v63  ;;  %v12889_v5 = vld [vmem:[#allocation8 + $0x4d4] sm:$0xf0]  ;;  %v15123_v46 = vor.u32 %v12926_v47, %v10024_v43  ;;  %v9854_v3 = vld [vmem:[#allocation8 + $0x4a8] sm:$0xf]  ;;  %v1772_v47 = vpop.f32.mrf.mxu3 }
 0x1fc   : > { %2789 = vmatpush.bf16.msrb.mxu1 %v15088_v50  ;;  %19428 = vst [vmem:[#allocation55_spill] sm:$0xff] %v15102_v28  ;;  %v15109_v19 = vadd.f32 %v1770_v60, %v1758_v58  ;;  %v12957_v59 = vld [vmem:[#allocation8 + $0x6f4] sm:$0xf0]  ;;  %v15117_v63 = vor.u32 %v12889_v5, %v9870_v29  ;;  %v10270_v58 = vld [vmem:[#allocation8 + $0x7e8] sm:$0xf] }
 0x1fd   : > { %19429 = vst [vmem:[#allocation56_spill] sm:$0xff] %v15105_v32  ;;  %v12989_v9 = vld [vmem:[#allocation8 + $0x7f4] sm:$0xf0]  ;;  %v15129_v5 = vor.u32 %v12957_v59, %v10142_v61  ;;  %v9982_v29 = vld [vmem:[#allocation8 + $0x5a8] sm:$0xf] }
 0x1fe   : > { %2801 = vmatpush.bf16.msrb.mxu2 %v15091_v13  ;;  %19430 = vst [vmem:[#allocation51_spill] sm:$0xff] %v15107_v39  ;;  %v12885_v60 = vld [vmem:[#allocation8 + $0x4b4] sm:$0xf0]  ;;  %v10126_v17 = vld [vmem:[#allocation8 + $0x6c8] sm:$0xf] }
 0x1ff   : > { %2814 = vmatpush.bf16.msrb.mxu3 %v15094_v6  ;;  %19431 = vst [vmem:[#allocation52_spill] sm:$0xff] %v15112_v12  ;;  %2777 = vmatpush.bf16.msrb.mxu0 %v15097_v41  ;;  %v12953_v14 = vld [vmem:[#allocation8 + $0x6d4] sm:$0xf0]  ;;  %v15135_v43 = vor.u32 %v12885_v60, %v9854_v3  ;;  %v9966_v59 = vld [vmem:[#allocation8 + $0x588] sm:$0xf] }
 0x200   : > { %2790 = vmatpush.bf16.msrb.mxu1 %v15100_v2  ;;  %19432 = vst [vmem:[#allocation57_spill] sm:$0xff] %v15117_v63  ;;  %v15127_v2 = vor.u32 %v12958_v4, %v10152_v37  ;;  %v1759_v41 = vpop.f32.mrf.mxu2  ;;  %v12881_v37 = vld [vmem:[#allocation8 + $0x494] sm:$0xf0]  ;;  %v15143_v61 = vor.u32 %v12953_v14, %v10126_v17  ;;  %v10110_v3 = vld [vmem:[#allocation8 + $0x6a8] sm:$0xf] }
 0x201   : > { %19433 = vst [vmem:[#allocation58_spill] sm:$0xff] %v15121_v15  ;;  %v9838_v41 = vld [vmem:[#allocation8 + $0x488] sm:$0xf]  ;;  %v12949_v60 = vld [vmem:[#allocation8 + $0x6b4] sm:$0xf0] }
 0x202   : > { %2802 = vmatpush.bf16.msrb.mxu2 %v15107_v39  ;;  %19434 = vst [vmem:[#allocation59_spill] sm:$0xff] %v15123_v46  ;;  %2778 = vmatmul.bf16.vlgmr.msrb.gmra.mxu0 %v15003_v30  ;;  %v15132_v39 = vor.u32 %v12989_v9, %v10270_v58  ;;  %v12913_v58 = vld [vmem:[#allocation8 + $0x594] sm:$0xf0]  ;;  %v9822_v14 = vld [vmem:[#allocation8 + $0x468] sm:$0xf] }
 0x203   : > { %2822 = vmatpush.bf16.msra.mxu0 %v15102_v28  ;;  %2815 = vmatpush.bf16.msrb.mxu3 %v15112_v12  ;;  %19435 = vst [vmem:[#allocation60_spill] sm:$0xff] %v15127_v2  ;;  %v12917_v28 = vld [vmem:[#allocation8 + $0x5b4] sm:$0xf0]  ;;  %v10254_v12 = vld [vmem:[#allocation8 + $0x7c8] sm:$0xf]  ;;  %v15154_v17 = vor.u32 %v12913_v58, %v9966_v59  ;;  %v1796_v59 = vpop.f32.mrf.mxu1 }
 0x204   : > { %2835 = vmatpush.bf16.msra.mxu1 %v15105_v32  ;;  %19436 = vst [vmem:[#allocation61_spill] sm:$0xff] %v15129_v5  ;;  %v12985_v32 = vld [vmem:[#allocation8 + $0x7d4] sm:$0xf0]  ;;  %v15139_v4 = vor.u32 %v12917_v28, %v9982_v29  ;;  %v15150_v28 = vor.u32 %v12881_v37, %v9838_v41  ;;  %v10238_v29 = vld [vmem:[#allocation8 + $0x7a8] sm:$0xf]  ;;  %v1783_v41 = vpop.f32.mrf.mxu0 }
 0x205   : > { %2791 = vmatmul.bf16.vlgmr.msrb.gmra.mxu1 %v15009_v22  ;;  %19437 = vst [vmem:[#allocation62_spill] sm:$0xff] %v15132_v39  ;;  %v15146_v9 = vor.u32 %v12985_v32, %v10254_v12  ;;  %v12981_v47 = vld [vmem:[#allocation8 + $0x7b4] sm:$0xf0]  ;;  %v15157_v32 = vor.u32 %v12949_v60, %v10110_v3  ;;  %v9950_v12 = vld [vmem:[#allocation8 + $0x568] sm:$0xf] }
 0x206   : > { %19438 = vst [vmem:[#allocation63_spill] sm:$0xff] %v15135_v43  ;;  %2803 = vmatpush.bf16.msrb.mxu2 %v15123_v46  ;;  %v15160_v37 = vor.u32 %v12981_v47, %v10238_v29  ;;  %v19446_v46 = vperm.slane %v14788_v7, 1  ;;  %v12977_v3 = vld [vmem:[#allocation8 + $0x794] sm:$0xf0]  ;;  %v12887_v13 = vld [vmem:[#allocation8 + $0x4cc] sm:$0xf] }
 0x207   : > { %2823 = vmatpush.bf16.msra.mxu0 %v15117_v63  ;;  %19439 = vst [vmem:[#allocation64_spill] sm:$0xff] %v15139_v4  ;;  %2816 = vmatpush.bf16.msrb.mxu3 %v15127_v2  ;;  %v12945_v2 = vld [vmem:[#allocation8 + $0x694] sm:$0xf0]  ;;  %v9774_v63 = vld [vmem:[#allocation8 + $0x408] sm:$0xf] }
 0x208   : > { %2836 = vmatpush.bf16.msra.mxu1 %v15121_v15  ;;  %19440 = vst [vmem:[#allocation65_spill] sm:$0xff] %v15143_v61  ;;  %v12873_v15 = vld [vmem:[#allocation8 + $0x454] sm:$0xf0]  ;;  %v9872_v50 = vld [vmem:[#allocation8 + $0x4d8] sm:$0xf0] }
 0x209   : > { %19441 = vst [vmem:[#allocation66_spill] sm:$0xff] %v15146_v9  ;;  %2804 = vmatmul.bf16.vlgmr.msrb.gmra.mxu2 %v15033_v10 }
 0x20a   : > { %2848 = vmatpush.bf16.msra.mxu2 %v15129_v5  ;;  %19442 = vst [vmem:[#allocation67_spill] sm:$0xff] %v15150_v28  ;;  %2817 = vmatmul.bf16.vlgmr.msrb.gmra.mxu3 %v15039_v26  ;;  %v12909_v5 = vld [vmem:[#allocation8 + $0x574] sm:$0xf0] }
 0x20b   : > { %2861 = vmatpush.bf16.msra.mxu3 %v15132_v39  ;;  %2824 = vmatpush.bf16.msra.mxu0 %v15135_v43  ;;  %19443 = vst [vmem:[#allocation68_spill] sm:$0xff] %v15154_v17  ;;  %v12877_v39 = vld [vmem:[#allocation8 + $0x474] sm:$0xf0]  ;;  %v10094_v43 = vld [vmem:[#allocation8 + $0x688] sm:$0xf]  ;;  %v15168_v60 = vor.u32 %v12909_v5, %v9950_v12 }
 0x20c   : > { %2837 = vmatpush.bf16.msra.mxu1 %v15139_v4  ;;  %19444 = vst [vmem:[#allocation69_spill] sm:$0xff] %v15157_v32  ;;  %v1784_v4 = vadd.f32 %v1783_v41, %v19446_v46  ;;  %v15165_v58 = vor.u32 %v12877_v39, %v9822_v14  ;;  %v15173_v47 = vor.u32 %v12945_v2, %v10094_v43  ;;  %v9934_v46 = vld [vmem:[#allocation8 + $0x548] sm:$0xf]  ;;  %v12905_v41 = vld [vmem:[#allocation8 + $0x554] sm:$0xf0] }
 0x20d   : > { %19445 = vst [vmem:[#allocation70_spill] sm:$0xff] %v15160_v37  ;;  %v10078_v14 = vld [vmem:[#allocation8 + $0x668] sm:$0xf]  ;;  %v12869_v43 = vld [vmem:[#allocation8 + $0x434] sm:$0xf0] }
 0x20e   : > { %2849 = vmatpush.bf16.msra.mxu2 %v15143_v61  ;;  %19447 = vst [vmem:[#allocation71_spill] sm:$0xff] %v15165_v58  ;;  %v10222_v61 = vld [vmem:[#allocation8 + $0x788] sm:$0xf]  ;;  %v15170_v29 = vadd.f32 %v1796_v59, %v1784_v4  ;;  %v15182_v4 = vor.u32 %v12905_v41, %v9934_v46 }
 0x20f   : > { %2862 = vmatpush.bf16.msra.mxu3 %v15146_v9  ;;  %2825 = vmatpush.bf16.msra.mxu0 %v15150_v28  ;;  %19448 = vst [vmem:[#allocation72_spill] sm:$0xff] %v15168_v60  ;;  %v9806_v9 = vld [vmem:[#allocation8 + $0x448] sm:$0xf]  ;;  %v15176_v39 = vor.u32 %v12977_v3, %v10222_v61  ;;  %v12941_v28 = vld [vmem:[#allocation8 + $0x674] sm:$0xf0] }
 0x210   : > { %2838 = vmatpush.bf16.msra.mxu1 %v15154_v17  ;;  %19449 = vst [vmem:[#allocation73_spill] sm:$0xff] %v15173_v47  ;;  %v15179_v5 = vor.u32 %v12873_v15, %v9806_v9  ;;  %v10206_v12 = vld [vmem:[#allocation8 + $0x768] sm:$0xf]  ;;  %v12973_v17 = vld [vmem:[#allocation8 + $0x774] sm:$0xf0]  ;;  %v15185_v59 = vor.u32 %v12941_v28, %v10078_v14 }
 0x211   : > { %19450 = vst [vmem:[#allocation74_spill] sm:$0xff] %v15176_v39  ;;  %v9790_v2 = vld [vmem:[#allocation8 + $0x428] sm:$0xf]  ;;  %v12901_v3 = vld [vmem:[#allocation8 + $0x534] sm:$0xf0] }
 0x212   : > { %2850 = vmatpush.bf16.msra.mxu2 %v15157_v32  ;;  %19451 = vst [vmem:[#allocation75_spill] sm:$0xff] %v15179_v5  ;;  %v9918_v61 = vld [vmem:[#allocation8 + $0x528] sm:$0xf]  ;;  %v12937_v9 = vld [vmem:[#allocation8 + $0x654] sm:$0xf0]  ;;  %v1798_v32 = vpop.f32.mrf.mxu1  ;;  %v15191_v46 = vor.u32 %v12869_v43, %v9790_v2  ;;  %v15200_v2 = vpop.f32.mrf.mxu2 }
 0x213   : > { %2863 = vmatpush.bf16.msra.mxu3 %v15160_v37  ;;  %2826 = vmatpush.bf16.msra.mxu0 %v15165_v58  ;;  %19452 = vst [vmem:[#allocation76_spill] sm:$0xff] %v15182_v4  ;;  %v1785_v37 = vpop.f32.mrf.mxu0  ;;  %v15188_v58 = vor.u32 %v12973_v17, %v10206_v12  ;;  %v10062_v15 = vld [vmem:[#allocation8 + $0x648] sm:$0xf]  ;;  %v15194_v28 = vor.u32 %v12901_v3, %v9918_v61  ;;  %v12865_v14 = vld [vmem:[#allocation8 + $0x414] sm:$0xf0]  ;;  %v15204_v3 = vpop.f32.mrf.mxu3 }
 0x214   : > { %2839 = vmatpush.bf16.msra.mxu1 %v15168_v60  ;;  %19453 = vst [vmem:[#allocation77_spill] sm:$0xff] %v15185_v59  ;;  %v10190_v41 = vld [vmem:[#allocation8 + $0x748] sm:$0xf]  ;;  %v12969_v60 = vld [vmem:[#allocation8 + $0x754] sm:$0xf0]  ;;  %v15197_v17 = vor.u32 %v12937_v9, %v10062_v15  ;;  %v15207_v6 = vor.u32 %v12865_v14, %v9774_v63 }
 0x215   : > { %19454 = vst [vmem:[#allocation78_spill] sm:$0xff] %v15188_v58  ;;  %v12891_v37 = vld [vmem:[#allocation8 + $0x4ec] sm:$0xf]  ;;  %v9888_v32 = vld [vmem:[#allocation8 + $0x4f8] sm:$0xf0]  ;;  %v15202_v43 = vor.u32 %v12969_v60, %v10190_v41 }
 0x216   : > { %2851 = vmatpush.bf16.msra.mxu2 %v15173_v47  ;;  %19455 = vst [vmem:[#allocation79_spill] sm:$0xff] %v15191_v46  ;;  %v9902_v47 = vld [vmem:[#allocation8 + $0x508] sm:$0xf]  ;;  %v12923_v12 = vld [vmem:[#allocation8 + $0x5ec] sm:$0xf] }
 0x217   : > { %2864 = vmatpush.bf16.msra.mxu3 %v15176_v39  ;;  %2827 = vmatpush.bf16.msra.mxu0 %v15179_v5  ;;  %19456 = vst [vmem:[#allocation80_spill] sm:$0xff] %v15194_v28  ;;  %v12897_v39 = vld [vmem:[#allocation8 + $0x514] sm:$0xf0]  ;;  %v10016_v5 = vld [vmem:[#allocation8 + $0x5f8] sm:$0xf0] }
 0x218   : > { %2840 = vmatpush.bf16.msra.mxu1 %v15182_v4  ;;  %19457 = vst [vmem:[#allocation81_spill] sm:$0xff] %v15202_v43  ;;  %v10046_v4 = vld [vmem:[#allocation8 + $0x628] sm:$0xf]  ;;  %v12933_v61 = vld [vmem:[#allocation8 + $0x634] sm:$0xf0]  ;;  %v15215_v60 = vor.u32 %v12923_v12, %v10016_v5  ;;  %v15225_v5 = vor.u32 %v12887_v13, %v9872_v50 }
 0x219   : > { %19458 = vst [vmem:[#allocation82_spill] sm:$0xff] %v15207_v6  ;;  %v10174_v15 = vld [vmem:[#allocation8 + $0x728] sm:$0xf]  ;;  %v12965_v9 = vld [vmem:[#allocation8 + $0x734] sm:$0xf0]  ;;  %v15217_v41 = vor.u32 %v12933_v61, %v10046_v4 }
 0x21a   : > { %2852 = vmatpush.bf16.msra.mxu2 %v15185_v59  ;;  %v15210_v59 = vor.u32 %v12897_v39, %v9902_v47  ;;  %19461 = vst [vmem:[#allocation85_spill] sm:$0xff] %v15215_v60  ;;  %v15220_v63 = vor.u32 %v12965_v9, %v10174_v15  ;;  %v10030_v14 = vld [vmem:[#allocation8 + $0x608] sm:$0xf]  ;;  %v12961_v39 = vld [vmem:[#allocation8 + $0x714] sm:$0xf0] }
 0x21b   : > { %2865 = vmatpush.bf16.msra.mxu3 %v15188_v58  ;;  %2828 = vmatpush.bf16.msra.mxu0 %v15191_v46  ;;  %v15212_v58 = vor.u32 %v12891_v37, %v9888_v32  ;;  %19462 = vst [vmem:[#allocation86_spill] sm:$0xff] %v15217_v41  ;;  %v10000_v46 = vld [vmem:[#allocation8 + $0x5d8] sm:$0xf0]  ;;  %v10158_v47 = vld [vmem:[#allocation8 + $0x708] sm:$0xf] }
 0x21c   : > { %2841 = vmatpush.bf16.msra.mxu1 %v15194_v28  ;;  %19459 = vst [vmem:[#allocation83_spill] sm:$0xff] %v15210_v59  ;;  %v12929_v28 = vld [vmem:[#allocation8 + $0x614] sm:$0xf0]  ;;  %v12955_v37 = vld [vmem:[#allocation8 + $0x6ec] sm:$0xf]  ;;  %v15229_v61 = vor.u32 %v12919_v57, %v10000_v46 }
 0x21d   : > { %19460 = vst [vmem:[#allocation84_spill] sm:$0xff] %v15212_v58  ;;  %v10144_v32 = vld [vmem:[#allocation8 + $0x6f8] sm:$0xf0]  ;;  %v12987_v4 = vld [vmem:[#allocation8 + $0x7ec] sm:$0xf]  ;;  %v15231_v15 = vor.u32 %v12929_v28, %v10030_v14 }
 0x21e   : > { %2853 = vmatpush.bf16.msra.mxu2 %v15197_v17  ;;  %19463 = vst [vmem:[#allocation87_spill] sm:$0xff] %v15220_v63  ;;  %v10272_v12 = vld [vmem:[#allocation8 + $0x7f8] sm:$0xf0]  ;;  %v12883_v9 = vld [vmem:[#allocation8 + $0x4ac] sm:$0xf]  ;;  %v15237_v50 = vor.u32 %v12955_v37, %v10144_v32 }
 0x21f   : > { %2866 = vmatpush.bf16.msra.mxu3 %v15202_v43  ;;  %2829 = vmatpush.bf16.msra.mxu0 %v15207_v6  ;;  %19464 = vst [vmem:[#allocation88_spill] sm:$0xff] %v15225_v5  ;;  %v9856_v6 = vld [vmem:[#allocation8 + $0x4b8] sm:$0xf0]  ;;  %v1811_v43 = vpop.f32.mrf.mxu2  ;;  %v12915_v13 = vld [vmem:[#allocation8 + $0x5ac] sm:$0xf]  ;;  %v15240_v57 = vor.u32 %v12987_v4, %v10272_v12 }
 0x220   : > { %2842 = vmatpush.bf16.msra.mxu1 %v15210_v59  ;;  %19465 = vst [vmem:[#allocation89_spill] sm:$0xff] %v15229_v61  ;;  %v9984_v59 = vld [vmem:[#allocation8 + $0x5b8] sm:$0xf0]  ;;  %v12951_v46 = vld [vmem:[#allocation8 + $0x6cc] sm:$0xf]  ;;  %v15243_v14 = vor.u32 %v12883_v9, %v9856_v6 }
 0x221   : > { %19466 = vst [vmem:[#allocation90_spill] sm:$0xff] %v15231_v15  ;;  %v10128_v28 = vld [vmem:[#allocation8 + $0x6d8] sm:$0xf0]  ;;  %v12983_v43 = vld [vmem:[#allocation8 + $0x7cc] sm:$0xf] }
 0x222   : > { %2854 = vmatpush.bf16.msra.mxu2 %v15217_v41  ;;  %2830 = vmatmul.bf16.vlgmr.msra.gmra.mxu0 %v15003_v30  ;;  %19468 = vst [vmem:[#allocation92_spill] sm:$0xff] %v15237_v50  ;;  %v15251_v37 = vor.u32 %v12951_v46, %v10128_v28  ;;  %v12911_v32 = vld [vmem:[#allocation8 + $0x58c] sm:$0xf]  ;;  %v9968_v4 = vld [vmem:[#allocation8 + $0x598] sm:$0xf0] }
 0x223   : > { %2874 = vmatpush.bf16.msrb.mxu0 %v15212_v58  ;;  %2867 = vmatpush.bf16.msra.mxu3 %v15220_v63  ;;  %v15235_v58 = vor.u32 %v12961_v39, %v10158_v47  ;;  %19469 = vst [vmem:[#allocation93_spill] sm:$0xff] %v15240_v57  ;;  %v10256_v63 = vld [vmem:[#allocation8 + $0x7d8] sm:$0xf0]  ;;  %v15247_v47 = vor.u32 %v12915_v13, %v9984_v59  ;;  %v12879_v39 = vld [vmem:[#allocation8 + $0x48c] sm:$0xf] }
 0x224   : > { %2887 = vmatpush.bf16.msrb.mxu1 %v15215_v60  ;;  %v1824_v60 = vpop.f32.mrf.mxu3  ;;  %19470 = vst [vmem:[#allocation94_spill] sm:$0xff] %v15243_v14  ;;  %v15254_v6 = vor.u32 %v12983_v43, %v10256_v63  ;;  %v12947_v12 = vld [vmem:[#allocation8 + $0x6ac] sm:$0xf]  ;;  %v10112_v9 = vld [vmem:[#allocation8 + $0x6b8] sm:$0xf0]  ;;  %v15262_v46 = vor.u32 %v12911_v32, %v9968_v4 }
 0x225   : > { %19467 = vst [vmem:[#allocation91_spill] sm:$0xff] %v15235_v58  ;;  %2843 = vmatmul.bf16.vlgmr.msra.gmra.mxu1 %v15009_v22  ;;  %v9840_v60 = vld [vmem:[#allocation8 + $0x498] sm:$0xf0]  ;;  %v12979_v13 = vld [vmem:[#allocation8 + $0x7ac] sm:$0xf]  ;;  %v15265_v63 = vor.u32 %v12947_v12, %v10112_v9 }
 0x226   : > { %2855 = vmatpush.bf16.msra.mxu2 %v15231_v15  ;;  %19471 = vst [vmem:[#allocation95_spill] sm:$0xff] %v15247_v47  ;;  %v15258_v59 = vor.u32 %v12879_v39, %v9840_v60  ;;  %v12875_v28 = vld [vmem:[#allocation8 + $0x46c] sm:$0xf]  ;;  %v15268_v39 = vpop.f32.mrf.mxu0  ;;  %v10096_v15 = vld [vmem:[#allocation8 + $0x698] sm:$0xf0] }
 0x227   : > { %2875 = vmatpush.bf16.msrb.mxu0 %v15225_v5  ;;  %2868 = vmatpush.bf16.msra.mxu3 %v15235_v58  ;;  %19472 = vst [vmem:[#allocation96_spill] sm:$0xff] %v15251_v37  ;;  %v10240_v58 = vld [vmem:[#allocation8 + $0x7b8] sm:$0xf0]  ;;  %v12907_v43 = vld [vmem:[#allocation8 + $0x56c] sm:$0xf] }
 0x228   : > { %2888 = vmatpush.bf16.msrb.mxu1 %v15229_v61  ;;  %19473 = vst [vmem:[#allocation97_spill] sm:$0xff] %v15254_v6  ;;  %v15270_v60 = vor.u32 %v12979_v13, %v10240_v58  ;;  %v15272_v61 = vpop.f32.mrf.mxu1  ;;  %v12975_v4 = vld [vmem:[#allocation8 + $0x78c] sm:$0xf] }
 0x229   : > { %2856 = vmatmul.bf16.vlgmr.msra.gmra.mxu2 %v15033_v10  ;;  %19474 = vst [vmem:[#allocation98_spill] sm:$0xff] %v15258_v59  ;;  %v12871_v9 = vld [vmem:[#allocation8 + $0x44c] sm:$0xf] }
 0x22a   : > { %2900 = vmatpush.bf16.msrb.mxu2 %v15237_v50  ;;  %2869 = vmatmul.bf16.vlgmr.msra.gmra.mxu3 %v15039_v26  ;;  %19475 = vst [vmem:[#allocation99_spill] sm:$0xff] %v15262_v46  ;;  %v9952_v50 = vld [vmem:[#allocation8 + $0x578] sm:$0xf0]  ;;  %v12903_v13 = vld [vmem:[#allocation8 + $0x54c] sm:$0xf] }
 0x22b   : > { %2913 = vmatpush.bf16.msrb.mxu3 %v15240_v57  ;;  %2876 = vmatpush.bf16.msrb.mxu0 %v15243_v14  ;;  %v9824_v57 = vld [vmem:[#allocation8 + $0x478] sm:$0xf0]  ;;  %19476 = vst [vmem:[#allocation100_spill] sm:$0xff] %v15265_v63  ;;  %v12943_v14 = vld [vmem:[#allocation8 + $0x68c] sm:$0xf]  ;;  %v15278_v12 = vor.u32 %v12907_v43, %v9952_v50 }
 0x22c   : > { %2889 = vmatpush.bf16.msrb.mxu1 %v15247_v47  ;;  %19477 = vst [vmem:[#allocation101_spill] sm:$0xff] %v15270_v60  ;;  %v15275_v32 = vor.u32 %v12875_v28, %v9824_v57  ;;  %v15281_v58 = vor.u32 %v12943_v14, %v10096_v15  ;;  %v9936_v47 = vld [vmem:[#allocation8 + $0x558] sm:$0xf0]  ;;  %v12939_v57 = vld [vmem:[#allocation8 + $0x66c] sm:$0xf] }
 0x22d   : > { %19479 = vst [vmem:[#allocation103_spill] sm:$0xff] %v15278_v12  ;;  %v10080_v28 = vld [vmem:[#allocation8 + $0x678] sm:$0xf0]  ;;  %v12971_v50 = vld [vmem:[#allocation8 + $0x76c] sm:$0xf] }
 0x22e   : > { %2901 = vmatpush.bf16.msrb.mxu2 %v15251_v37  ;;  %19478 = vst [vmem:[#allocation102_spill] sm:$0xff] %v15275_v32  ;;  %v10224_v37 = vld [vmem:[#allocation8 + $0x798] sm:$0xf0]  ;;  %v12867_v15 = vld [vmem:[#allocation8 + $0x42c] sm:$0xf] }
 0x22f   : > { %2914 = vmatpush.bf16.msrb.mxu3 %v15254_v6  ;;  %2877 = vmatpush.bf16.msrb.mxu0 %v15258_v59  ;;  %v9808_v6 = vld [vmem:[#allocation8 + $0x458] sm:$0xf0]  ;;  %19480 = vst [vmem:[#allocation104_spill] sm:$0xff] %v15281_v58  ;;  %v15284_v5 = vor.u32 %v12975_v4, %v10224_v37  ;;  %v12899_v37 = vld [vmem:[#allocation8 + $0x52c] sm:$0xf] }
 0x230   : > { %2890 = vmatpush.bf16.msrb.mxu1 %v15262_v46  ;;  %v15287_v59 = vor.u32 %v12871_v9, %v9808_v6  ;;  %v10208_v43 = vld [vmem:[#allocation8 + $0x778] sm:$0xf0]  ;;  %v15290_v46 = vor.u32 %v12903_v13, %v9936_v47  ;;  %v12935_v6 = vld [vmem:[#allocation8 + $0x64c] sm:$0xf]  ;;  %v1850_v41 = vpop.f32.mrf.mxu1 }
 0x231   : > { %19481 = vst [vmem:[#allocation105_spill] sm:$0xff] %v15284_v5  ;;  %v9792_v14 = vld [vmem:[#allocation8 + $0x438] sm:$0xf0]  ;;  %v12967_v13 = vld [vmem:[#allocation8 + $0x74c] sm:$0xf]  ;;  %v15308_v41 = vpop.f32.mrf.mxu2 }
 0x232   : > { %2902 = vmatpush.bf16.msrb.mxu2 %v15265_v63  ;;  %19482 = vst [vmem:[#allocation106_spill] sm:$0xff] %v15287_v59  ;;  %v15293_v63 = vor.u32 %v12939_v57, %v10080_v28  ;;  %v9920_v4 = vld [vmem:[#allocation8 + $0x538] sm:$0xf0]  ;;  %v15299_v47 = vor.u32 %v12867_v15, %v9792_v14  ;;  %v12863_v28 = vld [vmem:[#allocation8 + $0x40c] sm:$0xf] }
 0x233   : > { %2915 = vmatpush.bf16.msrb.mxu3 %v15270_v60  ;;  %2878 = vmatpush.bf16.msrb.mxu0 %v15275_v32  ;;  %v1837_v60 = vpop.f32.mrf.mxu0  ;;  %v15296_v32 = vor.u32 %v12971_v50, %v10208_v43  ;;  %v10064_v9 = vld [vmem:[#allocation8 + $0x658] sm:$0xf0]  ;;  %v15302_v57 = vor.u32 %v12899_v37, %v9920_v4  ;;  %v12895_v50 = vld [vmem:[#allocation8 + $0x50c] sm:$0xf] }
 0x234   : > { %2891 = vmatpush.bf16.msrb.mxu1 %v15278_v12  ;;  %19483 = vst [vmem:[#allocation107_spill] sm:$0xff] %v15293_v63  ;;  %v10192_v12 = vld [vmem:[#allocation8 + $0x758] sm:$0xf0]  ;;  %v15305_v60 = vor.u32 %v12935_v6, %v10064_v9  ;;  %v12931_v14 = vld [vmem:[#allocation8 + $0x62c] sm:$0xf] }
 0x235   : > { %19484 = vst [vmem:[#allocation108_spill] sm:$0xff] %v15296_v32  ;;  %v9904_v43 = vld [vmem:[#allocation8 + $0x518] sm:$0xf0]  ;;  %v15310_v15 = vor.u32 %v12967_v13, %v10192_v12  ;;  %v12963_v4 = vld [vmem:[#allocation8 + $0x72c] sm:$0xf] }
 0x236   : > { %2903 = vmatpush.bf16.msrb.mxu2 %v15281_v58  ;;  %v9776_v58 = vld [vmem:[#allocation8 + $0x418] sm:$0xf0]  ;;  %v15318_v6 = vor.u32 %v12895_v50, %v9904_v43  ;;  %v12927_v13 = vld [vmem:[#allocation8 + $0x60c] sm:$0xf] }
 0x237   : > { %2916 = vmatpush.bf16.msrb.mxu3 %v15284_v5  ;;  %2879 = vmatpush.bf16.msrb.mxu0 %v15287_v59  ;;  %v10048_v59 = vld [vmem:[#allocation8 + $0x638] sm:$0xf0]  ;;  %v15312_v5 = vpop.f32.mrf.mxu3  ;;  %v15315_v37 = vor.u32 %v12863_v28, %v9776_v58  ;;  %v12959_v58 = vld [vmem:[#allocation8 + $0x70c] sm:$0xf] }
 0x238   : > { %2892 = vmatpush.bf16.msrb.mxu1 %v15290_v46  ;;  %v15321_v9 = vor.u32 %v12931_v14, %v10048_v59  ;;  %v10160_v28 = vld [vmem:[#allocation8 + $0x718] sm:$0xf0]  ;;  %v19499_v14 = vld [vmem:[#allocation38_spill] sm:$0xff] }
 0x239   : > { %v15335_v50 = vor.u32 %v12959_v58, %v10160_v28  ;;  %v19501_v58 = vld [vmem:[#allocation37_spill] sm:$0xff]  ;;  %v19502_v28 = vld [vmem:[#allocation39_spill] sm:$0xff] }
 0x23a   : > { %2904 = vmatpush.bf16.msrb.mxu2 %v15293_v63  ;;  %v10176_v63 = vld [vmem:[#allocation8 + $0x738] sm:$0xf0] }
 0x23b   : > { %2917 = vmatpush.bf16.msrb.mxu3 %v15296_v32  ;;  %2880 = vmatpush.bf16.msrb.mxu0 %v15299_v47  ;;  %v15324_v12 = vor.u32 %v12963_v4, %v10176_v63  ;;  %v10032_v32 = vld [vmem:[#allocation8 + $0x618] sm:$0xf0]  ;;  %v1863_v63 = vpop.f32.mrf.mxu2 }
 0x23c   : > { %2893 = vmatpush.bf16.msrb.mxu1 %v15302_v57  ;;  %v15331_v59 = vor.u32 %v12927_v13, %v10032_v32  ;;  %v19500_v13 = vld [vmem:[#allocation35_spill] sm:$0xff]  ;;  %v19503_v63 = vld [vmem:[#allocation40_spill] sm:$0xff] }
 0x23e   : > { %2905 = vmatpush.bf16.msrb.mxu2 %v15305_v60 }
 0x23f   : > { %2918 = vmatpush.bf16.msrb.mxu3 %v15310_v15  ;;  %2881 = vmatpush.bf16.msrb.mxu0 %v15315_v37  ;;  %v1876_v43 = vpop.f32.mrf.mxu3 }
 0x240   : > { %2894 = vmatpush.bf16.msrb.mxu1 %v15318_v6  ;;  %v19504_v43 = vld [vmem:[#allocation41_spill] sm:$0xff] }
 0x242   : > { %2906 = vmatpush.bf16.msrb.mxu2 %v15321_v9  ;;  %2882 = vmatmul.bf16.vlgmr.msrb.gmra.mxu0 %v15003_v30  ;;  %v15393_v30 = vld [vmem:[#allocation10 + $0x4] sm:$0xf] }
 0x243   : > { %2934 = vmatpush.bf16.msra.mxu0 %v14880_v8  ;;  %2919 = vmatpush.bf16.msrb.mxu3 %v15324_v12  ;;  %v1887_v8 = vpop.f32.mrf.mxu0 }
 0x244   : > { %2947 = vmatpush.bf16.msra.mxu1 %v14883_v62  ;;  %v1900_v62 = vpop.f32.mrf.mxu1 }
 0x245   : > { %2895 = vmatmul.bf16.vlgmr.msrb.gmra.mxu1 %v15009_v22 }
 0x246   : > { %2907 = vmatpush.bf16.msrb.mxu2 %v15331_v59 }
 0x247   : > { %2935 = vmatpush.bf16.msra.mxu0 %v14889_v55  ;;  %2920 = vmatpush.bf16.msrb.mxu3 %v15335_v50  ;;  %v19485_v55 = vperm.slane %v14788_v7, 2 }
 0x248   : > { %2948 = vmatpush.bf16.msra.mxu1 %v14893_v1 }
 0x249   : > { %2908 = vmatmul.bf16.vlgmr.msrb.gmra.mxu2 %v15033_v10  ;;  %v1836_v1 = vadd.f32 %v15268_v39, %v19485_v55  ;;  %v19493_v10 = vld [vmem:[#allocation29_spill] sm:$0xff] }
 0x24a   : > { %2960 = vmatpush.bf16.msra.mxu2 %v14897_v34  ;;  %2921 = vmatmul.bf16.vlgmr.msrb.gmra.mxu3 %v15039_v26  ;;  %v1810_v34 = vadd.f32 %v15200_v2, %v15170_v29  ;;  %v19494_v26 = vld [vmem:[#allocation32_spill] sm:$0xff]  ;;  %v18804_v29 = vperm.slane %v15393_v30, 0  ;;  %v19495_v2 = vld [vmem:[#allocation34_spill] sm:$0xff] }
 0x24b   : > { %2973 = vmatpush.bf16.msra.mxu3 %v14900_v20  ;;  %2936 = vmatpush.bf16.msra.mxu0 %v14903_v56  ;;  %v19486_v20 = vperm.slane %v14788_v7, 3 }
 0x24c   : > { %2949 = vmatpush.bf16.msra.mxu1 %v14907_v44  ;;  %v1889_v44 = vpop.f32.mrf.mxu0 }
 0x24d   : > { %v1888_v56 = vadd.f32 %v1887_v8, %v19486_v20  ;;  %v19505_v8 = vld [vmem:[#allocation42_spill] sm:$0xff]  ;;  %v19508_v20 = vld [vmem:[#allocation45_spill] sm:$0xff] }
 0x24e   : > { %2961 = vmatpush.bf16.msra.mxu2 %v14911_v38  ;;  %v1902_v38 = vpop.f32.mrf.mxu1 }
 0x24f   : > { %2974 = vmatpush.bf16.msra.mxu3 %v14915_v11  ;;  %2937 = vmatpush.bf16.msra.mxu0 %v14919_v25  ;;  %v1849_v11 = vadd.f32 %v15272_v61, %v1836_v1  ;;  %v1823_v25 = vadd.f32 %v15204_v3, %v1810_v34  ;;  %v19496_v3 = vld [vmem:[#allocation31_spill] sm:$0xff]  ;;  %v19507_v34 = vld [vmem:[#allocation44_spill] sm:$0xff] }
 0x250   : > { %2950 = vmatpush.bf16.msra.mxu1 %v14923_v35  ;;  %v1901_v35 = vadd.f32 %v1900_v62, %v1888_v56  ;;  %v19506_v1 = vld [vmem:[#allocation43_spill] sm:$0xff]  ;;  %v19509_v56 = vld [vmem:[#allocation46_spill] sm:$0xff] }
 0x251   : > { %v1862_v7 = vadd.f32 %v15308_v41, %v1849_v11  ;;  %v19498_v41 = vld [vmem:[#allocation36_spill] sm:$0xff] }
 0x252   : > { %2962 = vmatpush.bf16.msra.mxu2 %v14926_v53  ;;  %v1913_v53 = vpop.f32.mrf.mxu2 }
 0x253   : > { %2975 = vmatpush.bf16.msra.mxu3 %v14932_v0  ;;  %2938 = vmatpush.bf16.msra.mxu0 %v14935_v18  ;;  %v1914_v0 = vadd.f32 %v1913_v53, %v1901_v35  ;;  %v1926_v18 = vpop.f32.mrf.mxu3  ;;  %v19511_v35 = vld [vmem:[#allocation48_spill] sm:$0xff]  ;;  %v19512_v53 = vld [vmem:[#allocation53_spill] sm:$0xff] }
 0x254   : > { %2951 = vmatpush.bf16.msra.mxu1 %v14939_v54  ;;  %v1930_v54 = vmax.f32 %v15109_v19, 0.0  ;;  %v19492_v19 = vld [vmem:[#allocation27_spill] sm:$0xff] }
 0x256   : > { %2963 = vmatpush.bf16.msra.mxu2 %v14943_v23  ;;  %v1931_v23 = vmax.f32 %v1823_v25, 0.0  ;;  %v19510_v25 = vld [vmem:[#allocation47_spill] sm:$0xff] }
 0x257   : > { %2976 = vmatpush.bf16.msra.mxu3 %v14947_v33  ;;  %2939 = vmatpush.bf16.msra.mxu0 %v14950_v16  ;;  %v1875_v33 = vadd.f32 %v15312_v5, %v1862_v7  ;;  %v1927_v16 = vadd.f32 %v1926_v18, %v1914_v0  ;;  %v19497_v5 = vld [vmem:[#allocation33_spill] sm:$0xff]  ;;  %v19513_v0 = vld [vmem:[#allocation54_spill] sm:$0xff] }
 0x258   : > { %2952 = vmatpush.bf16.msra.mxu1 %v14959_v31  ;;  %v15379_v31 = vpack.c.bf16 %v1930_v54, %v1930_v54  ;;  %v19514_v18 = vld [vmem:[#allocation49_spill] sm:$0xff]  ;;  %v19515_v54 = vld [vmem:[#allocation50_spill] sm:$0xff] }
 0x25a   : > { %2964 = vmatpush.bf16.msra.mxu2 %v14964_v24  ;;  %v15383_v24 = vpack.c.bf16 %v1931_v23, %v1931_v23  ;;  %v19516_v23 = vld [vmem:[#allocation55_spill] sm:$0xff] }
 0x25b   : > { %2977 = vmatpush.bf16.msra.mxu3 %v14967_v45  ;;  %2940 = vmatpush.bf16.msra.mxu0 %v14970_v36  ;;  %v1932_v45 = vmax.f32 %v1875_v33, 0.0  ;;  %v19487_v36 = vld [vmem:[#allocation24_spill] sm:$0xff] }
 0x25c   : > { %2953 = vmatpush.bf16.msra.mxu1 %v14976_v48  ;;  %v1915_v48 = vpop.f32.mrf.mxu2  ;;  %v19517_v33 = vld [vmem:[#allocation56_spill] sm:$0xff] }
 0x25e   : > { %2965 = vmatpush.bf16.msra.mxu2 %v14979_v21  ;;  %v1933_v21 = vmax.f32 %v1927_v16, 0.0  ;;  %v19518_v16 = vld [vmem:[#allocation51_spill] sm:$0xff] }
 0x25f   : > { %2978 = vmatpush.bf16.msra.mxu3 %v14983_v52  ;;  %2941 = vmatpush.bf16.msra.mxu0 %v14986_v42  ;;  %v1928_v52 = vpop.f32.mrf.mxu3  ;;  %v19488_v42 = vld [vmem:[#allocation25_spill] sm:$0xff]  ;;  %v2727_v61 = vpop.f32.mrf.mxu0 }
 0x260   : > { %2954 = vmatpush.bf16.msra.mxu1 %v14989_v49  ;;  %v19489_v49 = vld [vmem:[#allocation26_spill] sm:$0xff]  ;;  %v15399_v22 = vpack.c.bf16 %v1933_v21, %v1933_v21  ;;  %v2728_v39 = vadd.f32 %v2727_v61, %v18804_v29  ;;  %v19520_v21 = vld [vmem:[#allocation57_spill] sm:$0xff]  ;;  %v10600_v29 = vld [vmem:[#allocation8 + $0xa90] sm:$0xf0] }
 0x261   : > { %v19521_v52 = vld [vmem:[#allocation58_spill] sm:$0xff] }
 0x262   : > { %2966 = vmatpush.bf16.msra.mxu2 %v14996_v40  ;;  %2942 = vmatmul.bf16.vlgmr.msra.gmra.mxu0 %v15379_v31  ;;  %v19491_v40 = vld [vmem:[#allocation30_spill] sm:$0xff]  ;;  %v2740_v32 = vpop.f32.mrf.mxu1 }
 0x263   : > { %2986 = vmatpush.bf16.msrb.mxu0 %v14991_v51  ;;  %2979 = vmatpush.bf16.msra.mxu3 %v19487_v36  ;;  %v19490_v51 = vld [vmem:[#allocation28_spill] sm:$0xff]  ;;  %v2741_v4 = vadd.f32 %v2740_v32, %v2728_v39  ;;  %v19530_v32 = vld [vmem:[#allocation67_spill] sm:$0xff] }
 0x264   : > { %2999 = vmatpush.bf16.msrb.mxu1 %v14994_v27  ;;  %v15395_v27 = vpack.c.bf16 %v1932_v45, %v1932_v45  ;;  %v19519_v45 = vld [vmem:[#allocation52_spill] sm:$0xff] }
 0x265   : > { %2955 = vmatmul.bf16.vlgmr.msra.gmra.mxu1 %v15383_v24 }
 0x266   : > { %2967 = vmatpush.bf16.msra.mxu2 %v19490_v51  ;;  %v19524_v51 = vld [vmem:[#allocation61_spill] sm:$0xff] }
 0x267   : > { %2987 = vmatpush.bf16.msrb.mxu0 %v19488_v42  ;;  %2980 = vmatpush.bf16.msra.mxu3 %v19491_v40  ;;  %v2729_v62 = vpop.f32.mrf.mxu0  ;;  %v19522_v42 = vld [vmem:[#allocation59_spill] sm:$0xff]  ;;  %v19525_v40 = vld [vmem:[#allocation62_spill] sm:$0xff] }
 0x268   : > { %3000 = vmatpush.bf16.msrb.mxu1 %v19489_v49  ;;  %v19523_v49 = vld [vmem:[#allocation60_spill] sm:$0xff] }
 0x269   : > { %2968 = vmatmul.bf16.vlgmr.msra.gmra.mxu2 %v15395_v27 }
 0x26a   : > { %3012 = vmatpush.bf16.msrb.mxu2 %v19492_v19  ;;  %2981 = vmatmul.bf16.vlgmr.msra.gmra.mxu3 %v15399_v22  ;;  %v2742_v55 = vpop.f32.mrf.mxu1  ;;  %v19526_v19 = vld [vmem:[#allocation63_spill] sm:$0xff] }
 0x26b   : > { %3025 = vmatpush.bf16.msrb.mxu3 %v19493_v10  ;;  %2988 = vmatpush.bf16.msrb.mxu0 %v19494_v26  ;;  %v18803_v10 = vperm.slane %v15393_v30, 1  ;;  %v19527_v26 = vld [vmem:[#allocation64_spill] sm:$0xff]  ;;  %v19538_v55 = vld [vmem:[#allocation75_spill] sm:$0xff] }
 0x26c   : > { %3001 = vmatpush.bf16.msrb.mxu1 %v19495_v2  ;;  %v2753_v44 = vpop.f32.mrf.mxu2  ;;  %v19528_v2 = vld [vmem:[#allocation65_spill] sm:$0xff] }
 0x26d   : > { %v2754_v38 = vadd.f32 %v2753_v44, %v2741_v4  ;;  %v2766_v11 = vpop.f32.mrf.mxu3  ;;  %v19532_v4 = vld [vmem:[#allocation69_spill] sm:$0xff] }
 0x26e   : > { %3013 = vmatpush.bf16.msrb.mxu2 %v19496_v3  ;;  %v19529_v3 = vld [vmem:[#allocation66_spill] sm:$0xff] }
 0x26f   : > { %3026 = vmatpush.bf16.msrb.mxu3 %v19497_v5  ;;  %2989 = vmatpush.bf16.msrb.mxu0 %v19498_v41  ;;  %v15425_v7 = vadd.f32 %v2766_v11, %v2754_v38  ;;  %v19531_v41 = vld [vmem:[#allocation68_spill] sm:$0xff]  ;;  %v19542_v38 = vld [vmem:[#allocation79_spill] sm:$0xff] }
 0x270   : > { %3002 = vmatpush.bf16.msrb.mxu1 %v19499_v14  ;;  %v19543_v11 = vld [vmem:[#allocation80_spill] sm:$0xff] }
 0x272   : > { %3014 = vmatpush.bf16.msrb.mxu2 %v19500_v13  ;;  %v19533_v13 = vld [vmem:[#allocation70_spill] sm:$0xff] }
 0x273   : > { %3027 = vmatpush.bf16.msrb.mxu3 %v19501_v58  ;;  %2990 = vmatpush.bf16.msrb.mxu0 %v19502_v28  ;;  %v19534_v58 = vld [vmem:[#allocation71_spill] sm:$0xff]  ;;  %v19535_v28 = vld [vmem:[#allocation72_spill] sm:$0xff] }
 0x274   : > { %3003 = vmatpush.bf16.msrb.mxu1 %v19503_v63  ;;  %v2755_v36 = vpop.f32.mrf.mxu2  ;;  %v19536_v63 = vld [vmem:[#allocation73_spill] sm:$0xff] }
 0x275   : > { %v2768_v48 = vpop.f32.mrf.mxu3  ;;  %v19553_v36 = vld [vmem:[#allocation90_spill] sm:$0xff] }
 0x276   : > { %3015 = vmatpush.bf16.msrb.mxu2 %v19504_v43  ;;  %v19537_v43 = vld [vmem:[#allocation74_spill] sm:$0xff]  ;;  %v19554_v48 = vld [vmem:[#allocation91_spill] sm:$0xff] }
 0x277   : > { %3028 = vmatpush.bf16.msrb.mxu3 %v19505_v8  ;;  %2991 = vmatpush.bf16.msrb.mxu0 %v19506_v1  ;;  %v19539_v1 = vld [vmem:[#allocation76_spill] sm:$0xff] }
 0x278   : > { %3004 = vmatpush.bf16.msrb.mxu1 %v19507_v34  ;;  %v19540_v34 = vld [vmem:[#allocation77_spill] sm:$0xff] }
 0x27a   : > { %3016 = vmatpush.bf16.msrb.mxu2 %v19508_v20  ;;  %v19541_v20 = vld [vmem:[#allocation78_spill] sm:$0xff] }
 0x27b   : > { %3029 = vmatpush.bf16.msrb.mxu3 %v19509_v56  ;;  %2992 = vmatpush.bf16.msrb.mxu0 %v19510_v25  ;;  %v19544_v25 = vld [vmem:[#allocation81_spill] sm:$0xff] }
 0x27c   : > { %3005 = vmatpush.bf16.msrb.mxu1 %v19511_v35  ;;  %v19545_v35 = vld [vmem:[#allocation82_spill] sm:$0xff] }
 0x27e   : > { %3017 = vmatpush.bf16.msrb.mxu2 %v19512_v53  ;;  %v19546_v53 = vld [vmem:[#allocation83_spill] sm:$0xff] }
 0x27f   : > { %3030 = vmatpush.bf16.msrb.mxu3 %v19513_v0  ;;  %2993 = vmatpush.bf16.msrb.mxu0 %v19514_v18  ;;  %v2779_v5 = vpop.f32.mrf.mxu0  ;;  %v19547_v0 = vld [vmem:[#allocation84_spill] sm:$0xff]  ;;  %v19548_v18 = vld [vmem:[#allocation85_spill] sm:$0xff] }
 0x280   : > { %3006 = vmatpush.bf16.msrb.mxu1 %v19515_v54  ;;  %v2780_v61 = vadd.f32 %v2779_v5, %v18803_v10  ;;  %v19549_v54 = vld [vmem:[#allocation86_spill] sm:$0xff]  ;;  %v19563_v5 = vld [vmem:[#allocation100_spill] sm:$0xff]  ;;  %v13070_v10 = vld [vmem:[#allocation8 + $0xa84] sm:$0xf] }
 0x282   : > { %3018 = vmatpush.bf16.msrb.mxu2 %v19518_v16  ;;  %2994 = vmatmul.bf16.vlgmr.msrb.gmra.mxu0 %v15379_v31  ;;  %v2792_v39 = vpop.f32.mrf.mxu1 }
 0x283   : > { %3038 = vmatpush.bf16.msra.mxu0 %v19516_v23  ;;  %3031 = vmatpush.bf16.msrb.mxu3 %v19519_v45  ;;  %v15454_v14 = vadd.f32 %v2792_v39, %v2780_v61  ;;  %v19550_v23 = vld [vmem:[#allocation87_spill] sm:$0xff]  ;;  %v19552_v45 = vld [vmem:[#allocation89_spill] sm:$0xff]  ;;  %v19565_v39 = vld [vmem:[#allocation102_spill] sm:$0xff] }
 0x284   : > { %3051 = vmatpush.bf16.msra.mxu1 %v19517_v33  ;;  %v19564_v61 = vld [vmem:[#allocation101_spill] sm:$0xff] }
 0x285   : > { %3007 = vmatmul.bf16.vlgmr.msrb.gmra.mxu1 %v15383_v24 }
 0x286   : > { %3019 = vmatpush.bf16.msrb.mxu2 %v19522_v42  ;;  %v19557_v42 = vld [vmem:[#allocation94_spill] sm:$0xff] }
 0x287   : > { %3039 = vmatpush.bf16.msra.mxu0 %v19520_v21  ;;  %3032 = vmatpush.bf16.msrb.mxu3 %v19523_v49  ;;  %v2781_v8 = vpop.f32.mrf.mxu0  ;;  %v19555_v21 = vld [vmem:[#allocation92_spill] sm:$0xff]  ;;  %v19558_v49 = vld [vmem:[#allocation95_spill] sm:$0xff] }
 0x288   : > { %3052 = vmatpush.bf16.msra.mxu1 %v19521_v52  ;;  %v19556_v52 = vld [vmem:[#allocation93_spill] sm:$0xff]  ;;  %v13020_v8 = vld [vmem:[#allocation8 + $0x8ec] sm:$0xf0] }
 0x289   : > { %3020 = vmatmul.bf16.vlgmr.msrb.gmra.mxu2 %v15395_v27 }
 0x28a   : > { %3064 = vmatpush.bf16.msra.mxu2 %v19524_v51  ;;  %3033 = vmatmul.bf16.vlgmr.msrb.gmra.mxu3 %v15399_v22  ;;  %v2794_v62 = vpop.f32.mrf.mxu1  ;;  %v19559_v51 = vld [vmem:[#allocation96_spill] sm:$0xff] }
 0x28b   : > { %3077 = vmatpush.bf16.msra.mxu3 %v19525_v40  ;;  %3040 = vmatpush.bf16.msra.mxu0 %v19526_v19  ;;  %v19560_v40 = vld [vmem:[#allocation97_spill] sm:$0xff]  ;;  %v19571_v62 = vld [vmem:[#allocation108_spill] sm:$0xff] }
 0x28c   : > { %3053 = vmatpush.bf16.msra.mxu1 %v19527_v26  ;;  %v15466_v56 = vpop.f32.mrf.mxu2 }
 0x28d   : > { %v15468_v44 = vpop.f32.mrf.mxu3 }
 0x28e   : > { %3065 = vmatpush.bf16.msra.mxu2 %v19528_v2  ;;  %v19561_v2 = vld [vmem:[#allocation98_spill] sm:$0xff] }
 0x28f   : > { %3078 = vmatpush.bf16.msra.mxu3 %v19529_v3  ;;  %3041 = vmatpush.bf16.msra.mxu0 %v19530_v32  ;;  %v19562_v3 = vld [vmem:[#allocation99_spill] sm:$0xff] }
 0x290   : > { %3054 = vmatpush.bf16.msra.mxu1 %v19531_v41  ;;  %v19566_v32 = vld [vmem:[#allocation103_spill] sm:$0xff]  ;;  %v19567_v41 = vld [vmem:[#allocation104_spill] sm:$0xff] }
 0x292   : > { %3066 = vmatpush.bf16.msra.mxu2 %v19532_v4  ;;  %v19568_v4 = vld [vmem:[#allocation105_spill] sm:$0xff] }
 0x293   : > { %3079 = vmatpush.bf16.msra.mxu3 %v19533_v13  ;;  %3042 = vmatpush.bf16.msra.mxu0 %v19534_v58 }
 0x294   : > { %3055 = vmatpush.bf16.msra.mxu1 %v19535_v28  ;;  %v2807_v33 = vpop.f32.mrf.mxu2  ;;  %v19569_v28 = vld [vmem:[#allocation106_spill] sm:$0xff] }
 0x295   : > { %v2820_v16 = vpop.f32.mrf.mxu3  ;;  %v10486_v33 = vld [vmem:[#allocation8 + $0x9a0] sm:$0xf] }
 0x296   : > { %3067 = vmatpush.bf16.msra.mxu2 %v19536_v63  ;;  %v19570_v63 = vld [vmem:[#allocation107_spill] sm:$0xff]  ;;  %v13044_v16 = vld [vmem:[#allocation8 + $0x9ac] sm:$0xf0] }
 0x297   : > { %3080 = vmatpush.bf16.msra.mxu3 %v19537_v43  ;;  %3043 = vmatpush.bf16.msra.mxu0 %v19538_v55  ;;  %v10390_v43 = vld [vmem:[#allocation8 + $0x8e0] sm:$0xf] }
 0x298   : > { %3056 = vmatpush.bf16.msra.mxu1 %v19539_v1  ;;  %v10518_v1 = vld [vmem:[#allocation8 + $0x9e0] sm:$0xf] }
 0x29a   : > { %3068 = vmatpush.bf16.msra.mxu2 %v19540_v34  ;;  %v13052_v34 = vld [vmem:[#allocation8 + $0x9ec] sm:$0xf0] }
 0x29b   : > { %3081 = vmatpush.bf16.msra.mxu3 %v19541_v20  ;;  %3044 = vmatpush.bf16.msra.mxu0 %v19542_v38  ;;  %v15516_v38 = vor.u32 %v13020_v8, %v10390_v43  ;;  %v10726_v8 = vld [vmem:[#allocation8 + $0xb80] sm:$0xf] }
 0x29c   : > { %3057 = vmatpush.bf16.msra.mxu1 %v19543_v11  ;;  %v10374_v11 = vld [vmem:[#allocation8 + $0x8c0] sm:$0xf] }
 0x29e   : > { %3069 = vmatpush.bf16.msra.mxu2 %v15197_v17  ;;  %v19551_v17 = vld [vmem:[#allocation88_spill] sm:$0xff] }
 0x29f   : > { %3082 = vmatpush.bf16.msra.mxu3 %v19544_v25  ;;  %3045 = vmatpush.bf16.msra.mxu0 %v19545_v35  ;;  %v15494_v19 = vpop.f32.mrf.mxu0  ;;  %v13016_v25 = vld [vmem:[#allocation8 + $0x8cc] sm:$0xf0]  ;;  %v10502_v35 = vld [vmem:[#allocation8 + $0x9c0] sm:$0xf] }
 0x2a0   : > { %3058 = vmatpush.bf16.msra.mxu1 %v19546_v53  ;;  %v13048_v53 = vld [vmem:[#allocation8 + $0x9cc] sm:$0xf0] }
 0x2a2   : > { %3070 = vmatpush.bf16.msra.mxu2 %v19549_v54  ;;  %3046 = vmatmul.bf16.vlgmr.msra.gmra.mxu0 %v15379_v31  ;;  %v15496_v26 = vpop.f32.mrf.mxu1  ;;  %v15529_v54 = vor.u32 %v13048_v53, %v10502_v35  ;;  %v18801_v35 = vperm.slane %v15393_v30, 3 }
 0x2a3   : > { %3090 = vmatpush.bf16.msrb.mxu0 %v19547_v0  ;;  %3083 = vmatpush.bf16.msra.mxu3 %v19550_v23  ;;  %v10646_v0 = vld [vmem:[#allocation8 + $0xae0] sm:$0xf]  ;;  %v13012_v23 = vld [vmem:[#allocation8 + $0x8ac] sm:$0xf0] }
 0x2a4   : > { %3103 = vmatpush.bf16.msrb.mxu1 %v19548_v18  ;;  %v13084_v18 = vld [vmem:[#allocation8 + $0xaec] sm:$0xf0] }
 0x2a5   : > { %3059 = vmatmul.bf16.vlgmr.msra.gmra.mxu1 %v15383_v24 }
 0x2a6   : > { %3071 = vmatpush.bf16.msra.mxu2 %v19553_v36  ;;  %v10630_v36 = vld [vmem:[#allocation8 + $0xac0] sm:$0xf] }
 0x2a7   : > { %3091 = vmatpush.bf16.msrb.mxu0 %v19551_v17  ;;  %3084 = vmatpush.bf16.msra.mxu3 %v19554_v48  ;;  %v2833_v13 = vpop.f32.mrf.mxu0 }
 0x2a8   : > { %3104 = vmatpush.bf16.msrb.mxu1 %v19552_v45 }
 0x2a9   : > { %3072 = vmatmul.bf16.vlgmr.msra.gmra.mxu2 %v15395_v27 }
 0x2aa   : > { %3116 = vmatpush.bf16.msrb.mxu2 %v19555_v21  ;;  %3085 = vmatmul.bf16.vlgmr.msra.gmra.mxu3 %v15399_v22  ;;  %v2846_v58 = vpop.f32.mrf.mxu1  ;;  %v10758_v21 = vld [vmem:[#allocation8 + $0xbc0] sm:$0xf] }
 0x2ab   : > { %3129 = vmatpush.bf16.msrb.mxu3 %v19556_v52  ;;  %3092 = vmatpush.bf16.msrb.mxu0 %v19557_v42  ;;  %v10342_v52 = vld [vmem:[#allocation8 + $0x880] sm:$0xf]  ;;  %v13008_v42 = vld [vmem:[#allocation8 + $0x88c] sm:$0xf0] }
 0x2ac   : > { %3105 = vmatpush.bf16.msrb.mxu1 %v19558_v49  ;;  %v15510_v55 = vpop.f32.mrf.mxu2  ;;  %v10470_v49 = vld [vmem:[#allocation8 + $0x980] sm:$0xf] }
 0x2ad   : > { %v15512_v20 = vpop.f32.mrf.mxu3 }
 0x2ae   : > { %3117 = vmatpush.bf16.msrb.mxu2 %v19559_v51  ;;  %v13040_v51 = vld [vmem:[#allocation8 + $0x98c] sm:$0xf0] }
 0x2af   : > { %3130 = vmatpush.bf16.msrb.mxu3 %v19560_v40  ;;  %3093 = vmatpush.bf16.msrb.mxu0 %v19561_v2  ;;  %v10614_v2 = vld [vmem:[#allocation8 + $0xaa0] sm:$0xf] }
 0x2b0   : > { %3106 = vmatpush.bf16.msrb.mxu1 %v19562_v3  ;;  %v13076_v3 = vld [vmem:[#allocation8 + $0xaac] sm:$0xf0] }
 0x2b2   : > { %3118 = vmatpush.bf16.msrb.mxu2 %v19563_v5  ;;  %v10742_v5 = vld [vmem:[#allocation8 + $0xba0] sm:$0xf] }
 0x2b3   : > { %3131 = vmatpush.bf16.msrb.mxu3 %v19564_v61  ;;  %3094 = vmatpush.bf16.msrb.mxu0 %v19565_v39  ;;  %v15558_v61 = vor.u32 %v13040_v51, %v10470_v49  ;;  %v10326_v39 = vld [vmem:[#allocation8 + $0x860] sm:$0xf]  ;;  %v13028_v49 = vld [vmem:[#allocation8 + $0x92c] sm:$0xf0] }
 0x2b4   : > { %3107 = vmatpush.bf16.msrb.mxu1 %v19566_v32  ;;  %v13004_v32 = vld [vmem:[#allocation8 + $0x86c] sm:$0xf0] }
 0x2b5   : > { %v2872_v17 = vpop.f32.mrf.mxu3  ;;  %v15567_v43 = vor.u32 %v13004_v32, %v10326_v39  ;;  %v13064_v51 = vld [vmem:[#allocation8 + $0xa4c] sm:$0xf0]  ;;  %v10278_v39 = vld [vmem:[#allocation8 + $0x800] sm:$0xf] }
 0x2b6   : > { %3119 = vmatpush.bf16.msrb.mxu2 %v19567_v41  ;;  %v15561_v41 = vor.u32 %v13076_v3, %v10614_v2 }
 0x2b7   : > { %3132 = vmatpush.bf16.msrb.mxu3 %v19568_v4  ;;  %3095 = vmatpush.bf16.msrb.mxu0 %v19569_v28  ;;  %v10454_v4 = vld [vmem:[#allocation8 + $0x960] sm:$0xf] }
 0x2b8   : > { %3108 = vmatpush.bf16.msrb.mxu1 %v15290_v46  ;;  %v15519_v46 = vor.u32 %v13052_v34, %v10518_v1  ;;  %v10598_v28 = vld [vmem:[#allocation8 + $0xa80] sm:$0xf]  ;;  %v18802_v1 = vperm.slane %v15393_v30, 2 }
 0x2ba   : > { %3120 = vmatpush.bf16.msrb.mxu2 %v19570_v63  ;;  %v13072_v63 = vld [vmem:[#allocation8 + $0xa8c] sm:$0xf0]  ;;  %v2832_v17 = vadd.f32 %v15494_v19, %v18802_v1  ;;  %v10566_v19 = vld [vmem:[#allocation8 + $0xa40] sm:$0xf]  ;;  %v10456_v1 = vld [vmem:[#allocation8 + $0x970] sm:$0xf0] }
 0x2bb   : > { %3133 = vmatpush.bf16.msrb.mxu3 %v19571_v62  ;;  %3096 = vmatpush.bf16.msrb.mxu0 %v15299_v47  ;;  %v15525_v47 = vor.u32 %v13016_v25, %v10374_v11  ;;  %v13104_v62 = vld [vmem:[#allocation8 + $0xb8c] sm:$0xf0]  ;;  %v10310_v11 = vld [vmem:[#allocation8 + $0x840] sm:$0xf]  ;;  %v15575_v53 = vor.u32 %v13072_v63, %v10598_v28 }
 0x2bc   : > { %3109 = vmatpush.bf16.msrb.mxu1 %v15302_v57  ;;  %v10774_v57 = vld [vmem:[#allocation8 + $0xbe0] sm:$0xf]  ;;  %v13000_v25 = vld [vmem:[#allocation8 + $0x84c] sm:$0xf0] }
 0x2bd   : > { %v10406_v28 = vld [vmem:[#allocation8 + $0x900] sm:$0xf]  ;;  %v13024_v63 = vld [vmem:[#allocation8 + $0x90c] sm:$0xf0] }
 0x2be   : > { %3121 = vmatpush.bf16.msrb.mxu2 %v15305_v60  ;;  %v13116_v60 = vld [vmem:[#allocation8 + $0xbec] sm:$0xf0] }
 0x2bf   : > { %3134 = vmatpush.bf16.msrb.mxu3 %v15310_v15  ;;  %3097 = vmatpush.bf16.msrb.mxu0 %v15315_v37  ;;  %v10358_v15 = vld [vmem:[#allocation8 + $0x8a0] sm:$0xf]  ;;  %v2859_v37 = vpop.f32.mrf.mxu2  ;;  %v15536_v45 = vor.u32 %v13116_v60, %v10774_v57  ;;  %v2883_v13 = vpop.f32.mrf.mxu0  ;;  %v15578_v57 = vor.u32 %v13104_v62, %v10726_v8  ;;  %v15608_v62 = vor.u32 %v13064_v51, %v10566_v19  ;;  %v10376_v51 = vld [vmem:[#allocation8 + $0x8d0] sm:$0xf0] }
 0x2c0   : > { %3110 = vmatpush.bf16.msrb.mxu1 %v15318_v6  ;;  %v15533_v6 = vor.u32 %v13084_v18, %v10646_v0  ;;  %v15539_v48 = vor.u32 %v13012_v23, %v10358_v15  ;;  %v10438_v0 = vld [vmem:[#allocation8 + $0x940] sm:$0xf]  ;;  %v13032_v18 = vld [vmem:[#allocation8 + $0x94c] sm:$0xf0]  ;;  %v15581_v23 = vor.u32 %v13000_v25, %v10310_v11  ;;  %v13018_v11 = vld [vmem:[#allocation8 + $0x8e4] sm:$0xf] }
 0x2c1   : > { %v10582_v60 = vld [vmem:[#allocation8 + $0xa60] sm:$0xf]  ;;  %v13068_v15 = vld [vmem:[#allocation8 + $0xa6c] sm:$0xf0]  ;;  %v10392_v25 = vld [vmem:[#allocation8 + $0x8f0] sm:$0xf0] }
 0x2c2   : > { %3122 = vmatpush.bf16.msrb.mxu2 %v15321_v9  ;;  %3098 = vmatmul.bf16.vlgmr.msrb.gmra.mxu0 %v15379_v31  ;;  %v13080_v9 = vld [vmem:[#allocation8 + $0xacc] sm:$0xf0]  ;;  %v15543_v31 = vor.u32 %v13044_v16, %v10486_v33  ;;  %v10710_v37 = vld [vmem:[#allocation8 + $0xb60] sm:$0xf]  ;;  %v2806_v16 = vadd.f32 %v15466_v56, %v15454_v14 }
 0x2c3   : > { %3930 = vmatpush.bf16.msra.mxu0 %v15516_v38  ;;  %3135 = vmatpush.bf16.msrb.mxu3 %v15324_v12  ;;  %v13112_v12 = vld [vmem:[#allocation8 + $0xbcc] sm:$0xf0] }
 0x2c4   : > { %3943 = vmatpush.bf16.msra.mxu1 %v15519_v46  ;;  %v15550_v40 = vor.u32 %v13112_v12, %v10758_v21  ;;  %v13100_v33 = vld [vmem:[#allocation8 + $0xb6c] sm:$0xf0]  ;;  %v2884_v12 = vadd.f32 %v2883_v13, %v18801_v35  ;;  %v2819_v32 = vadd.f32 %v15468_v44, %v2806_v16  ;;  %v10744_v35 = vld [vmem:[#allocation8 + $0xbb0] sm:$0xf0] }
 0x2c5   : > { %3111 = vmatmul.bf16.vlgmr.msrb.gmra.mxu1 %v15383_v24  ;;  %v15547_v24 = vor.u32 %v13080_v9, %v10630_v36  ;;  %v15589_v36 = vor.u32 %v13032_v18, %v10438_v0  ;;  %v10294_v9 = vld [vmem:[#allocation8 + $0x820] sm:$0xf]  ;;  %v12996_v21 = vld [vmem:[#allocation8 + $0x82c] sm:$0xf0]  ;;  %v15597_v56 = vor.u32 %v13100_v33, %v10710_v37  ;;  %v13050_v0 = vld [vmem:[#allocation8 + $0x9e4] sm:$0xf] }
 0x2c6   : > { %3123 = vmatpush.bf16.msrb.mxu2 %v15331_v59  ;;  %v15554_v59 = vor.u32 %v13008_v42, %v10342_v52  ;;  %v15594_v52 = vor.u32 %v13068_v15, %v10582_v60  ;;  %v10422_v42 = vld [vmem:[#allocation8 + $0x920] sm:$0xf]  ;;  %v15600_v3 = vor.u32 %v12996_v21, %v10294_v9  ;;  %v12992_v13 = vld [vmem:[#allocation8 + $0x80c] sm:$0xf0]  ;;  %v10520_v60 = vld [vmem:[#allocation8 + $0x9f0] sm:$0xf0] }
 0x2c7   : > { %3931 = vmatpush.bf16.msra.mxu0 %v15525_v47  ;;  %3136 = vmatpush.bf16.msrb.mxu3 %v15335_v50  ;;  %v13108_v50 = vld [vmem:[#allocation8 + $0xbac] sm:$0xf0]  ;;  %v2885_v14 = vpop.f32.mrf.mxu0  ;;  %v10550_v15 = vld [vmem:[#allocation8 + $0xa20] sm:$0xf]  ;;  %v2926_v21 = vmax.f32 %v15425_v7, 0.0 }
 0x2c8   : > { %3944 = vmatpush.bf16.msra.mxu1 %v15529_v54  ;;  %v15564_v58 = vor.u32 %v13108_v50, %v10742_v5  ;;  %v10694_v5 = vld [vmem:[#allocation8 + $0xb40] sm:$0xf]  ;;  %v13096_v50 = vld [vmem:[#allocation8 + $0xb4c] sm:$0xf0]  ;;  %v15624_v14 = vor.u32 %v13050_v0, %v10520_v60  ;;  %v10776_v0 = vld [vmem:[#allocation8 + $0xbf0] sm:$0xf0] }
 0x2c9   : > { %3124 = vmatmul.bf16.vlgmr.msrb.gmra.mxu2 %v15395_v27  ;;  %v13036_v27 = vld [vmem:[#allocation8 + $0x96c] sm:$0xf0] }
 0x2ca   : > { %3956 = vmatpush.bf16.msra.mxu2 %v15533_v6  ;;  %3137 = vmatmul.bf16.vlgmr.msrb.gmra.mxu3 %v15399_v22  ;;  %v2896_v22 = vpop.f32.mrf.mxu1  ;;  %v15571_v34 = vor.u32 %v13036_v27, %v10454_v4  ;;  %v2845_v4 = vadd.f32 %v15496_v26, %v2832_v17  ;;  %v15605_v27 = vor.u32 %v13028_v49, %v10422_v42  ;;  %v13060_v37 = vld [vmem:[#allocation8 + $0xa2c] sm:$0xf0]  ;;  %v10678_v17 = vld [vmem:[#allocation8 + $0xb20] sm:$0xf]  ;;  %v13014_v49 = vld [vmem:[#allocation8 + $0x8c4] sm:$0xf] }
 0x2cb   : > { %3969 = vmatpush.bf16.msra.mxu3 %v15536_v45  ;;  %3932 = vmatpush.bf16.msra.mxu0 %v15539_v48  ;;  %v2897_v8 = vadd.f32 %v2896_v22, %v2884_v12  ;;  %v15612_v26 = vor.u32 %v13096_v50, %v10694_v5  ;;  %v15615_v22 = vor.u32 %v12992_v13, %v10278_v39  ;;  %v13092_v9 = vld [vmem:[#allocation8 + $0xb2c] sm:$0xf0]  ;;  %v2927_v12 = vmax.f32 %v2819_v32, 0.0  ;;  %v10504_v5 = vld [vmem:[#allocation8 + $0x9d0] sm:$0xf0] }
 0x2cc   : > { %3945 = vmatpush.bf16.msra.mxu1 %v15543_v31  ;;  %v2858_v18 = vadd.f32 %v15510_v55, %v2845_v4  ;;  %v2909_v44 = vpop.f32.mrf.mxu2  ;;  %v15619_v55 = vor.u32 %v13024_v63, %v10406_v28  ;;  %v15621_v42 = vor.u32 %v13018_v11, %v10392_v25  ;;  %v15626_v19 = vor.u32 %v13060_v37, %v10550_v15  ;;  %v10534_v39 = vld [vmem:[#allocation8 + $0xa00] sm:$0xf]  ;;  %v13056_v32 = vld [vmem:[#allocation8 + $0xa0c] sm:$0xf0]  ;;  %v13082_v63 = vld [vmem:[#allocation8 + $0xae4] sm:$0xf] }
 0x2cd   : > { %v2910_v33 = vadd.f32 %v2909_v44, %v2897_v8  ;;  %v2922_v16 = vpop.f32.mrf.mxu3  ;;  %v15630_v7 = vor.u32 %v13092_v9, %v10678_v17  ;;  %v10662_v4 = vld [vmem:[#allocation8 + $0xb00] sm:$0xf]  ;;  %v13088_v28 = vld [vmem:[#allocation8 + $0xb0c] sm:$0xf0]  ;;  %v10648_v8 = vld [vmem:[#allocation8 + $0xaf0] sm:$0xf0]  ;;  %v15633_v11 = vpack.c.bf16 %v2926_v21, %v2926_v21  ;;  %v15645_v60 = vor.u32 %v13056_v32, %v10534_v39 }
 0x2ce   : > { %3957 = vmatpush.bf16.msra.mxu2 %v15547_v24  ;;  %v2871_v50 = vadd.f32 %v15512_v20, %v2858_v18  ;;  %v15637_v20 = vor.u32 %v13014_v49, %v10376_v51  ;;  %v13114_v25 = vld [vmem:[#allocation8 + $0xbe4] sm:$0xf]  ;;  %v15639_v18 = vpack.c.bf16 %v2927_v12, %v2927_v12  ;;  %v10360_v37 = vld [vmem:[#allocation8 + $0x8b0] sm:$0xf0]  ;;  %v15649_v17 = vor.u32 %v13088_v28, %v10662_v4 }
 0x2cf   : > { %3970 = vmatpush.bf16.msra.mxu3 %v15550_v40  ;;  %3933 = vmatpush.bf16.msra.mxu0 %v15554_v59  ;;  %19572 = vst [vmem:[#allocation24_spill] sm:$0xff] %v15630_v7  ;;  %v2923_v13 = vadd.f32 %v2922_v16, %v2910_v33  ;;  %v13010_v15 = vld [vmem:[#allocation8 + $0x8a4] sm:$0xf]  ;;  %v15651_v9 = vor.u32 %v13082_v63, %v10648_v8  ;;  %v10488_v12 = vld [vmem:[#allocation8 + $0x9b0] sm:$0xf0] }
 0x2d0   : > { %3946 = vmatpush.bf16.msra.mxu1 %v15558_v61  ;;  %19573 = vst [vmem:[#allocation25_spill] sm:$0xff] %v15637_v20  ;;  %v2928_v33 = vmax.f32 %v2871_v50, 0.0  ;;  %v13042_v21 = vld [vmem:[#allocation8 + $0x9a4] sm:$0xf]  ;;  %v10632_v39 = vld [vmem:[#allocation8 + $0xad0] sm:$0xf0]  ;;  %v15657_v50 = vor.u32 %v13010_v15, %v10360_v37 }
 0x2d1   : > { %19575 = vst [vmem:[#allocation28_spill] sm:$0xff] %v15645_v60  ;;  %v2929_v49 = vmax.f32 %v2923_v13, 0.0  ;;  %v13110_v32 = vld [vmem:[#allocation8 + $0xbc4] sm:$0xf]  ;;  %v15661_v4 = vor.u32 %v13042_v21, %v10488_v12  ;;  %v10344_v28 = vld [vmem:[#allocation8 + $0x890] sm:$0xf0] }
 0x2d2   : > { %3958 = vmatpush.bf16.msra.mxu2 %v15561_v41  ;;  %v2898_v2 = vpop.f32.mrf.mxu1  ;;  %19576 = vst [vmem:[#allocation30_spill] sm:$0xff] %v15649_v17  ;;  %v13006_v13 = vld [vmem:[#allocation8 + $0x884] sm:$0xf]  ;;  %v15663_v63 = vpack.c.bf16 %v2928_v33, %v2928_v33  ;;  %v10616_v12 = vld [vmem:[#allocation8 + $0xab0] sm:$0xf0] }
 0x2d3   : > { %3971 = vmatpush.bf16.msra.mxu3 %v15564_v58  ;;  %3934 = vmatpush.bf16.msra.mxu0 %v15567_v43  ;;  %v13046_v2 = vld [vmem:[#allocation8 + $0x9c4] sm:$0xf]  ;;  %19577 = vst [vmem:[#allocation27_spill] sm:$0xff] %v15651_v9  ;;  %v15669_v15 = vpack.c.bf16 %v2929_v49, %v2929_v49  ;;  %v15676_v33 = vor.u32 %v13006_v13, %v10344_v28 }
 0x2d4   : > { %3947 = vmatpush.bf16.msra.mxu1 %v15571_v34  ;;  %v15643_v44 = vor.u32 %v13046_v2, %v10504_v5  ;;  %v2911_v16 = vpop.f32.mrf.mxu2  ;;  %v15654_v2 = vor.u32 %v13114_v25, %v10776_v0  ;;  %v13078_v5 = vld [vmem:[#allocation8 + $0xac4] sm:$0xf]  ;;  %19579 = vst [vmem:[#allocation32_spill] sm:$0xff] %v15657_v50  ;;  %v10472_v0 = vld [vmem:[#allocation8 + $0x990] sm:$0xf0] }
 0x2d5   : > { %v2924_v51 = vpop.f32.mrf.mxu3  ;;  %v10760_v16 = vld [vmem:[#allocation8 + $0xbd0] sm:$0xf0]  ;;  %19580 = vst [vmem:[#allocation34_spill] sm:$0xff] %v15661_v4  ;;  %v15667_v8 = vor.u32 %v13078_v5, %v10632_v39  ;;  %v13038_v25 = vld [vmem:[#allocation8 + $0x984] sm:$0xf] }
 0x2d6   : > { %3959 = vmatpush.bf16.msra.mxu2 %v15575_v53  ;;  %19574 = vst [vmem:[#allocation26_spill] sm:$0xff] %v15643_v44  ;;  %v15672_v37 = vor.u32 %v13110_v32, %v10760_v16  ;;  %v13074_v21 = vld [vmem:[#allocation8 + $0xaa4] sm:$0xf]  ;;  %v15680_v49 = vor.u32 %v13038_v25, %v10472_v0  ;;  %v10328_v39 = vld [vmem:[#allocation8 + $0x870] sm:$0xf0] }
 0x2d7   : > { %3972 = vmatpush.bf16.msra.mxu3 %v15578_v57  ;;  %3935 = vmatpush.bf16.msra.mxu0 %v15581_v23  ;;  %19578 = vst [vmem:[#allocation29_spill] sm:$0xff] %v15654_v2  ;;  %v13106_v51 = vld [vmem:[#allocation8 + $0xba4] sm:$0xf]  ;;  %v15683_v32 = vor.u32 %v13074_v21, %v10616_v12  ;;  %v10728_v21 = vld [vmem:[#allocation8 + $0xb90] sm:$0xf0] }
 0x2d8   : > { %3948 = vmatpush.bf16.msra.mxu1 %v15589_v36  ;;  %19581 = vst [vmem:[#allocation31_spill] sm:$0xff] %v15667_v8  ;;  %v13002_v5 = vld [vmem:[#allocation8 + $0x864] sm:$0xf]  ;;  %v15686_v28 = vor.u32 %v13106_v51, %v10744_v35  ;;  %v15697_v51 = vor.u32 %v13070_v10, %v10600_v29  ;;  %v10296_v10 = vld [vmem:[#allocation8 + $0x830] sm:$0xf0] }
 0x2d9   : > { %19582 = vst [vmem:[#allocation33_spill] sm:$0xff] %v15672_v37  ;;  %v13034_v16 = vld [vmem:[#allocation8 + $0x964] sm:$0xf]  ;;  %v15691_v0 = vor.u32 %v13002_v5, %v10328_v39  ;;  %v10584_v39 = vld [vmem:[#allocation8 + $0xa70] sm:$0xf0] }
 0x2da   : > { %3960 = vmatpush.bf16.msra.mxu2 %v15594_v52  ;;  %19583 = vst [vmem:[#allocation36_spill] sm:$0xff] %v15676_v33  ;;  %v15694_v12 = vor.u32 %v13034_v16, %v10456_v1  ;;  %v13066_v5 = vld [vmem:[#allocation8 + $0xa64] sm:$0xf]  ;;  %v10712_v16 = vld [vmem:[#allocation8 + $0xb70] sm:$0xf0] }
 0x2db   : > { %3973 = vmatpush.bf16.msra.mxu3 %v15597_v56  ;;  %3936 = vmatpush.bf16.msra.mxu0 %v15600_v3  ;;  %19584 = vst [vmem:[#allocation38_spill] sm:$0xff] %v15680_v49  ;;  %v13098_v1 = vld [vmem:[#allocation8 + $0xb64] sm:$0xf] }
 0x2dc   : > { %3949 = vmatpush.bf16.msra.mxu1 %v15605_v27  ;;  %19585 = vst [vmem:[#allocation35_spill] sm:$0xff] %v15683_v32  ;;  %v12994_v29 = vld [vmem:[#allocation8 + $0x824] sm:$0xf] }
 0x2dd   : > { %19586 = vst [vmem:[#allocation37_spill] sm:$0xff] %v15686_v28 }
 0x2de   : > { %3961 = vmatpush.bf16.msra.mxu2 %v15608_v62  ;;  %19588 = vst [vmem:[#allocation39_spill] sm:$0xff] %v15691_v0 }
 0x2df   : > { %3974 = vmatpush.bf16.msra.mxu3 %v15612_v26  ;;  %3937 = vmatpush.bf16.msra.mxu0 %v15615_v22  ;;  %v2943_v13 = vpop.f32.mrf.mxu0  ;;  %19589 = vst [vmem:[#allocation40_spill] sm:$0xff] %v15694_v12 }
 0x2e0   : > { %3950 = vmatpush.bf16.msra.mxu1 %v15619_v55  ;;  %19590 = vst [vmem:[#allocation41_spill] sm:$0xff] %v15697_v51 }
 0x2e2   : > { %3962 = vmatpush.bf16.msra.mxu2 %v15626_v19  ;;  %3938 = vmatmul.bf16.vlgmr.msra.gmra.mxu0 %v15633_v11  ;;  %v2956_v25 = vpop.f32.mrf.mxu1 }
 0x2e3   : > { %3982 = vmatpush.bf16.msrb.mxu0 %v15621_v42  ;;  %3975 = vmatpush.bf16.msra.mxu3 %v15630_v7  ;;  %v13047_v7 = vld [vmem:[#allocation8 + $0x9cc] sm:$0xf] }
 0x2e4   : > { %3995 = vmatpush.bf16.msrb.mxu1 %v15624_v14 }
 0x2e5   : > { %3951 = vmatmul.bf16.vlgmr.msra.gmra.mxu1 %v15639_v18 }
 0x2e6   : > { %3963 = vmatpush.bf16.msra.mxu2 %v15645_v60 }
 0x2e7   : > { %3983 = vmatpush.bf16.msrb.mxu0 %v15637_v20  ;;  %3976 = vmatpush.bf16.msra.mxu3 %v15649_v17  ;;  %v13058_v17 = vld [vmem:[#allocation8 + $0xa24] sm:$0xf]  ;;  %v10384_v20 = vld [vmem:[#allocation8 + $0x8d8] sm:$0xf0] }
 0x2e8   : > { %3996 = vmatpush.bf16.msrb.mxu1 %v15643_v44 }
 0x2e9   : > { %3964 = vmatmul.bf16.vlgmr.msra.gmra.mxu2 %v15663_v63 }
 0x2ea   : > { %4008 = vmatpush.bf16.msrb.mxu2 %v15651_v9  ;;  %3977 = vmatmul.bf16.vlgmr.msra.gmra.mxu3 %v15669_v15  ;;  %v13030_v9 = vld [vmem:[#allocation8 + $0x944] sm:$0xf] }
 0x2eb   : > { %4021 = vmatpush.bf16.msrb.mxu3 %v15654_v2  ;;  %3984 = vmatpush.bf16.msrb.mxu0 %v15657_v50  ;;  %v19587_v50 = vperm.slane %v15393_v30, 0  ;;  %v10312_v2 = vld [vmem:[#allocation8 + $0x850] sm:$0xf0] }
 0x2ec   : > { %3997 = vmatpush.bf16.msrb.mxu1 %v15661_v4 }
 0x2ed   : > { %v2944_v4 = vadd.f32 %v2943_v13, %v19587_v50  ;;  %v10440_v50 = vld [vmem:[#allocation8 + $0x950] sm:$0xf0] }
 0x2ee   : > { %4009 = vmatpush.bf16.msrb.mxu2 %v15667_v8  ;;  %v13102_v8 = vld [vmem:[#allocation8 + $0xb84] sm:$0xf] }
 0x2ef   : > { %4022 = vmatpush.bf16.msrb.mxu3 %v15672_v37  ;;  %3985 = vmatpush.bf16.msrb.mxu0 %v15676_v33  ;;  %v12998_v37 = vld [vmem:[#allocation8 + $0x844] sm:$0xf]  ;;  %v2957_v35 = vadd.f32 %v2956_v25, %v2944_v4  ;;  %v15700_v13 = vor.u32 %v13102_v8, %v10728_v21  ;;  %v15706_v4 = vor.u32 %v13030_v9, %v10440_v50  ;;  %v10424_v21 = vld [vmem:[#allocation8 + $0x930] sm:$0xf0] }
 0x2f0   : > { %3998 = vmatpush.bf16.msrb.mxu1 %v15680_v49  ;;  %v15703_v49 = vor.u32 %v12998_v37, %v10312_v2  ;;  %v15709_v25 = vor.u32 %v13066_v5, %v10584_v39  ;;  %v13026_v8 = vld [vmem:[#allocation8 + $0x924] sm:$0xf]  ;;  %v10568_v37 = vld [vmem:[#allocation8 + $0xa50] sm:$0xf0]  ;;  %v15715_v9 = vor.u32 %v12994_v29, %v10296_v10  ;;  %v2969_v29 = vpop.f32.mrf.mxu2 }
 0x2f1   : > { %19591 = vst [vmem:[#allocation42_spill] sm:$0xff] %v15700_v13  ;;  %v13062_v2 = vld [vmem:[#allocation8 + $0xa44] sm:$0xf]  ;;  %v15718_v5 = vor.u32 %v13026_v8, %v10424_v21  ;;  %v10280_v39 = vld [vmem:[#allocation8 + $0x810] sm:$0xf0]  ;;  %v2970_v8 = vadd.f32 %v2969_v29, %v2957_v35  ;;  %v2982_v21 = vpop.f32.mrf.mxu3 }
 0x2f2   : > { %4010 = vmatpush.bf16.msrb.mxu2 %v15683_v32  ;;  %19592 = vst [vmem:[#allocation43_spill] sm:$0xff] %v15703_v49  ;;  %v2958_v32 = vpop.f32.mrf.mxu1  ;;  %v13094_v50 = vld [vmem:[#allocation8 + $0xb44] sm:$0xf]  ;;  %v13017_v29 = vld [vmem:[#allocation8 + $0x8d4] sm:$0xf0] }
 0x2f3   : > { %4023 = vmatpush.bf16.msrb.mxu3 %v15686_v28  ;;  %3986 = vmatpush.bf16.msrb.mxu0 %v15691_v0  ;;  %19593 = vst [vmem:[#allocation44_spill] sm:$0xff] %v15706_v4  ;;  %v2945_v28 = vpop.f32.mrf.mxu0  ;;  %v15712_v0 = vor.u32 %v13098_v1, %v10712_v16  ;;  %v12990_v33 = vld [vmem:[#allocation8 + $0x804] sm:$0xf]  ;;  %v10398_v1 = vld [vmem:[#allocation8 + $0x8e8] sm:$0xf] }
 0x2f4   : > { %3999 = vmatpush.bf16.msrb.mxu1 %v15694_v12  ;;  %19594 = vst [vmem:[#allocation45_spill] sm:$0xff] %v15709_v25  ;;  %v10696_v12 = vld [vmem:[#allocation8 + $0xb50] sm:$0xf0]  ;;  %v15721_v28 = vor.u32 %v13062_v2, %v10568_v37  ;;  %v13021_v32 = vld [vmem:[#allocation8 + $0x8f4] sm:$0xf0]  ;;  %v15727_v60 = vor.u32 %v12990_v33, %v10280_v39 }
 0x2f5   : > { %19595 = vst [vmem:[#allocation46_spill] sm:$0xff] %v15712_v0  ;;  %v10526_v16 = vld [vmem:[#allocation8 + $0x9e8] sm:$0xf]  ;;  %v15724_v10 = vor.u32 %v13094_v50, %v10696_v12  ;;  %v10680_v2 = vld [vmem:[#allocation8 + $0xb30] sm:$0xf0]  ;;  %v15732_v44 = vor.u32 %v13021_v32, %v10398_v1  ;;  %v15734_v12 = vadd.f32 %v2982_v21, %v2970_v8 }
 0x2f6   : > { %4011 = vmatpush.bf16.msrb.mxu2 %v15697_v51  ;;  %19596 = vst [vmem:[#allocation47_spill] sm:$0xff] %v15715_v9  ;;  %v13022_v51 = vld [vmem:[#allocation8 + $0x904] sm:$0xf]  ;;  %v10510_v33 = vld [vmem:[#allocation8 + $0x9c8] sm:$0xf] }
 0x2f7   : > { %4024 = vmatpush.bf16.msrb.mxu3 %v15700_v13  ;;  %3987 = vmatpush.bf16.msrb.mxu0 %v15703_v49  ;;  %19597 = vst [vmem:[#allocation48_spill] sm:$0xff] %v15718_v5  ;;  %v10408_v13 = vld [vmem:[#allocation8 + $0x910] sm:$0xf0]  ;;  %v13053_v49 = vld [vmem:[#allocation8 + $0x9f4] sm:$0xf0] }
 0x2f8   : > { %4000 = vmatpush.bf16.msrb.mxu1 %v15706_v4  ;;  %19598 = vst [vmem:[#allocation53_spill] sm:$0xff] %v15721_v28  ;;  %v10552_v4 = vld [vmem:[#allocation8 + $0xa30] sm:$0xf0]  ;;  %v15730_v37 = vor.u32 %v13022_v51, %v10408_v13  ;;  %v15737_v50 = vor.u32 %v13053_v49, %v10526_v16  ;;  %v13049_v39 = vld [vmem:[#allocation8 + $0x9d4] sm:$0xf0] }
 0x2f9   : > { %19599 = vst [vmem:[#allocation54_spill] sm:$0xff] %v15724_v10  ;;  %v15739_v35 = vor.u32 %v13058_v17, %v10552_v4  ;;  %v13054_v51 = vld [vmem:[#allocation8 + $0xa04] sm:$0xf]  ;;  %v10536_v13 = vld [vmem:[#allocation8 + $0xa10] sm:$0xf0] }
 0x2fa   : > { %4012 = vmatpush.bf16.msrb.mxu2 %v15709_v25  ;;  %19600 = vst [vmem:[#allocation49_spill] sm:$0xff] %v15727_v60  ;;  %v13090_v25 = vld [vmem:[#allocation8 + $0xb24] sm:$0xf]  ;;  %v10664_v32 = vld [vmem:[#allocation8 + $0xb10] sm:$0xf0]  ;;  %v15753_v16 = vor.u32 %v13054_v51, %v10536_v13 }
 0x2fb   : > { %4025 = vmatpush.bf16.msrb.mxu3 %v15712_v0  ;;  %3988 = vmatpush.bf16.msrb.mxu0 %v15715_v9  ;;  %19601 = vst [vmem:[#allocation50_spill] sm:$0xff] %v15730_v37  ;;  %v10382_v0 = vld [vmem:[#allocation8 + $0x8c8] sm:$0xf]  ;;  %v15742_v9 = vor.u32 %v13090_v25, %v10680_v2  ;;  %v13086_v1 = vld [vmem:[#allocation8 + $0xb04] sm:$0xf]  ;;  %v15751_v25 = vor.u32 %v13049_v39, %v10510_v33 }
 0x2fc   : > { %4001 = vmatpush.bf16.msrb.mxu1 %v15718_v5  ;;  %19602 = vst [vmem:[#allocation55_spill] sm:$0xff] %v15732_v44  ;;  %v10654_v8 = vld [vmem:[#allocation8 + $0xae8] sm:$0xf]  ;;  %v13085_v21 = vld [vmem:[#allocation8 + $0xaf4] sm:$0xf0]  ;;  %v15747_v17 = vor.u32 %v13017_v29, %v10382_v0 }
 0x2fd   : > { %19603 = vst [vmem:[#allocation56_spill] sm:$0xff] %v15737_v50  ;;  %v10782_v49 = vld [vmem:[#allocation8 + $0xbe8] sm:$0xf]  ;;  %v13117_v4 = vld [vmem:[#allocation8 + $0xbf4] sm:$0xf0]  ;;  %v15759_v0 = vor.u32 %v13085_v21, %v10654_v8 }
 0x2fe   : > { %4013 = vmatpush.bf16.msrb.mxu2 %v15721_v28  ;;  %19604 = vst [vmem:[#allocation51_spill] sm:$0xff] %v15739_v35  ;;  %v10366_v2 = vld [vmem:[#allocation8 + $0x8a8] sm:$0xf]  ;;  %v15762_v33 = vor.u32 %v13117_v4, %v10782_v49  ;;  %v13081_v51 = vld [vmem:[#allocation8 + $0xad4] sm:$0xf0] }
 0x2ff   : > { %4026 = vmatpush.bf16.msrb.mxu3 %v15724_v10  ;;  %19605 = vst [vmem:[#allocation52_spill] sm:$0xff] %v15742_v9  ;;  %3989 = vmatpush.bf16.msrb.mxu0 %v15727_v60  ;;  %v13013_v60 = vld [vmem:[#allocation8 + $0x8b4] sm:$0xf0]  ;;  %v2971_v10 = vpop.f32.mrf.mxu2  ;;  %v10494_v29 = vld [vmem:[#allocation8 + $0x9a8] sm:$0xf] }
 0x300   : > { %4002 = vmatpush.bf16.msrb.mxu1 %v15730_v37  ;;  %19606 = vst [vmem:[#allocation57_spill] sm:$0xff] %v15747_v17  ;;  %v13045_v37 = vld [vmem:[#allocation8 + $0x9b4] sm:$0xf0]  ;;  %v10638_v39 = vld [vmem:[#allocation8 + $0xac8] sm:$0xf]  ;;  %v15765_v13 = vor.u32 %v13013_v60, %v10366_v2 }
 0x301   : > { %19607 = vst [vmem:[#allocation58_spill] sm:$0xff] %v15751_v25  ;;  %v10766_v10 = vld [vmem:[#allocation8 + $0xbc8] sm:$0xf]  ;;  %v15773_v8 = vor.u32 %v13081_v51, %v10638_v39  ;;  %v13041_v49 = vld [vmem:[#allocation8 + $0x994] sm:$0xf0] }
 0x302   : > { %4014 = vmatpush.bf16.msrb.mxu2 %v15739_v35  ;;  %19608 = vst [vmem:[#allocation59_spill] sm:$0xff] %v15753_v16  ;;  %3990 = vmatmul.bf16.vlgmr.msrb.gmra.mxu0 %v15633_v11  ;;  %v10478_v21 = vld [vmem:[#allocation8 + $0x988] sm:$0xf]  ;;  %v13077_v2 = vld [vmem:[#allocation8 + $0xab4] sm:$0xf0] }
 0x303   : > { %4034 = vmatpush.bf16.msra.mxu0 %v15732_v44  ;;  %4027 = vmatpush.bf16.msrb.mxu3 %v15742_v9  ;;  %v15757_v44 = vor.u32 %v13086_v1, %v10664_v32  ;;  %19610 = vst [vmem:[#allocation61_spill] sm:$0xff] %v15759_v0  ;;  %v13113_v9 = vld [vmem:[#allocation8 + $0xbd4] sm:$0xf0]  ;;  %v15769_v1 = vor.u32 %v13045_v37, %v10494_v29  ;;  %v10350_v32 = vld [vmem:[#allocation8 + $0x888] sm:$0xf] }
 0x304   : > { %4047 = vmatpush.bf16.msra.mxu1 %v15737_v50  ;;  %v2984_v50 = vpop.f32.mrf.mxu3  ;;  %19611 = vst [vmem:[#allocation62_spill] sm:$0xff] %v15762_v33  ;;  %v15776_v60 = vor.u32 %v13113_v9, %v10766_v10  ;;  %v10622_v4 = vld [vmem:[#allocation8 + $0xaa8] sm:$0xf]  ;;  %v15784_v39 = vor.u32 %v13041_v49, %v10478_v21  ;;  %v3008_v21 = vpop.f32.mrf.mxu1  ;;  %v13015_v5 = vld [vmem:[#allocation8 + $0x8cc] sm:$0xf] }
 0x305   : > { %19609 = vst [vmem:[#allocation60_spill] sm:$0xff] %v15757_v44  ;;  %4003 = vmatmul.bf16.vlgmr.msrb.gmra.mxu1 %v15639_v18  ;;  %v13009_v50 = vld [vmem:[#allocation8 + $0x894] sm:$0xf0]  ;;  %v10750_v29 = vld [vmem:[#allocation8 + $0xba8] sm:$0xf]  ;;  %v15787_v9 = vor.u32 %v13077_v2, %v10622_v4 }
 0x306   : > { %19612 = vst [vmem:[#allocation63_spill] sm:$0xff] %v15765_v13  ;;  %4015 = vmatpush.bf16.msrb.mxu2 %v15753_v16  ;;  %v15780_v37 = vor.u32 %v13009_v50, %v10350_v32  ;;  %v10334_v51 = vld [vmem:[#allocation8 + $0x868] sm:$0xf]  ;;  %v2995_v32 = vpop.f32.mrf.mxu0  ;;  %v13073_v16 = vld [vmem:[#allocation8 + $0xa94] sm:$0xf0] }
 0x307   : > { %4035 = vmatpush.bf16.msra.mxu0 %v15747_v17  ;;  %19613 = vst [vmem:[#allocation64_spill] sm:$0xff] %v15769_v1  ;;  %4028 = vmatpush.bf16.msrb.mxu3 %v15757_v44  ;;  %v13109_v44 = vld [vmem:[#allocation8 + $0xbb4] sm:$0xf0]  ;;  %v10462_v10 = vld [vmem:[#allocation8 + $0x968] sm:$0xf] }
 0x308   : > { %4048 = vmatpush.bf16.msra.mxu1 %v15751_v25  ;;  %19614 = vst [vmem:[#allocation65_spill] sm:$0xff] %v15773_v8  ;;  %v15790_v50 = vor.u32 %v13109_v44, %v10750_v29  ;;  %v19620_v25 = vperm.slane %v15393_v30, 1  ;;  %v13105_v4 = vld [vmem:[#allocation8 + $0xb94] sm:$0xf0]  ;;  %v10286_v35 = vld [vmem:[#allocation8 + $0x808] sm:$0xf] }
 0x309   : > { %19615 = vst [vmem:[#allocation66_spill] sm:$0xff] %v15776_v60  ;;  %4016 = vmatmul.bf16.vlgmr.msrb.gmra.mxu2 %v15663_v63  ;;  %v13001_v17 = vld [vmem:[#allocation8 + $0x854] sm:$0xf0] }
 0x30a   : > { %4060 = vmatpush.bf16.msra.mxu2 %v15759_v0  ;;  %19616 = vst [vmem:[#allocation67_spill] sm:$0xff] %v15780_v37  ;;  %4029 = vmatmul.bf16.vlgmr.msrb.gmra.mxu3 %v15669_v15  ;;  %v13037_v0 = vld [vmem:[#allocation8 + $0x974] sm:$0xf0] }
 0x30b   : > { %4073 = vmatpush.bf16.msra.mxu3 %v15762_v33  ;;  %4036 = vmatpush.bf16.msra.mxu0 %v15765_v13  ;;  %19617 = vst [vmem:[#allocation68_spill] sm:$0xff] %v15784_v39  ;;  %v13005_v33 = vld [vmem:[#allocation8 + $0x874] sm:$0xf0]  ;;  %v10606_v13 = vld [vmem:[#allocation8 + $0xa88] sm:$0xf]  ;;  %v15798_v2 = vor.u32 %v13037_v0, %v10462_v10 }
 0x30c   : > { %4049 = vmatpush.bf16.msra.mxu1 %v15769_v1  ;;  %19618 = vst [vmem:[#allocation69_spill] sm:$0xff] %v15787_v9  ;;  %v2996_v1 = vadd.f32 %v2995_v32, %v19620_v25  ;;  %v15795_v49 = vor.u32 %v13005_v33, %v10334_v51  ;;  %v15803_v29 = vor.u32 %v13073_v16, %v10606_v13  ;;  %v10446_v25 = vld [vmem:[#allocation8 + $0x948] sm:$0xf]  ;;  %v13033_v32 = vld [vmem:[#allocation8 + $0x954] sm:$0xf0] }
 0x30d   : > { %19619 = vst [vmem:[#allocation70_spill] sm:$0xff] %v15790_v50  ;;  %v10590_v51 = vld [vmem:[#allocation8 + $0xa68] sm:$0xf]  ;;  %v12997_v13 = vld [vmem:[#allocation8 + $0x834] sm:$0xf0] }
 0x30e   : > { %4061 = vmatpush.bf16.msra.mxu2 %v15773_v8  ;;  %19621 = vst [vmem:[#allocation71_spill] sm:$0xff] %v15795_v49  ;;  %v10734_v8 = vld [vmem:[#allocation8 + $0xb88] sm:$0xf]  ;;  %v15800_v44 = vadd.f32 %v3008_v21, %v2996_v1  ;;  %v15812_v1 = vor.u32 %v13033_v32, %v10446_v25 }
 0x30f   : > { %4074 = vmatpush.bf16.msra.mxu3 %v15776_v60  ;;  %4037 = vmatpush.bf16.msra.mxu0 %v15780_v37  ;;  %19622 = vst [vmem:[#allocation72_spill] sm:$0xff] %v15798_v2  ;;  %v10318_v60 = vld [vmem:[#allocation8 + $0x848] sm:$0xf]  ;;  %v15806_v33 = vor.u32 %v13105_v4, %v10734_v8  ;;  %v13069_v37 = vld [vmem:[#allocation8 + $0xa74] sm:$0xf0] }
 0x310   : > { %4050 = vmatpush.bf16.msra.mxu1 %v15784_v39  ;;  %19623 = vst [vmem:[#allocation73_spill] sm:$0xff] %v15803_v29  ;;  %v15809_v0 = vor.u32 %v13001_v17, %v10318_v60  ;;  %v10718_v10 = vld [vmem:[#allocation8 + $0xb68] sm:$0xf]  ;;  %v13101_v39 = vld [vmem:[#allocation8 + $0xb74] sm:$0xf0]  ;;  %v15815_v21 = vor.u32 %v13069_v37, %v10590_v51 }
 0x311   : > { %19624 = vst [vmem:[#allocation74_spill] sm:$0xff] %v15806_v33  ;;  %v10302_v16 = vld [vmem:[#allocation8 + $0x828] sm:$0xf]  ;;  %v13029_v4 = vld [vmem:[#allocation8 + $0x934] sm:$0xf0] }
 0x312   : > { %4062 = vmatpush.bf16.msra.mxu2 %v15787_v9  ;;  %19625 = vst [vmem:[#allocation75_spill] sm:$0xff] %v15809_v0  ;;  %v10430_v8 = vld [vmem:[#allocation8 + $0x928] sm:$0xf]  ;;  %v13065_v60 = vld [vmem:[#allocation8 + $0xa54] sm:$0xf0]  ;;  %v3010_v9 = vpop.f32.mrf.mxu1  ;;  %v15821_v25 = vor.u32 %v12997_v13, %v10302_v16  ;;  %v15830_v16 = vpop.f32.mrf.mxu2 }
 0x313   : > { %4075 = vmatpush.bf16.msra.mxu3 %v15790_v50  ;;  %4038 = vmatpush.bf16.msra.mxu0 %v15795_v49  ;;  %19626 = vst [vmem:[#allocation76_spill] sm:$0xff] %v15812_v1  ;;  %v2997_v50 = vpop.f32.mrf.mxu0  ;;  %v15818_v49 = vor.u32 %v13101_v39, %v10718_v10  ;;  %v10574_v17 = vld [vmem:[#allocation8 + $0xa48] sm:$0xf]  ;;  %v15824_v37 = vor.u32 %v13029_v4, %v10430_v8  ;;  %v12993_v51 = vld [vmem:[#allocation8 + $0x814] sm:$0xf0]  ;;  %v15834_v4 = vpop.f32.mrf.mxu3 }
 0x314   : > { %4051 = vmatpush.bf16.msra.mxu1 %v15798_v2  ;;  %19627 = vst [vmem:[#allocation77_spill] sm:$0xff] %v15815_v21  ;;  %v10702_v32 = vld [vmem:[#allocation8 + $0xb48] sm:$0xf]  ;;  %v13097_v2 = vld [vmem:[#allocation8 + $0xb54] sm:$0xf0]  ;;  %v15827_v39 = vor.u32 %v13065_v60, %v10574_v17  ;;  %v15837_v28 = vor.u32 %v12993_v51, %v10286_v35 }
 0x315   : > { %19628 = vst [vmem:[#allocation78_spill] sm:$0xff] %v15818_v49  ;;  %v13019_v50 = vld [vmem:[#allocation8 + $0x8ec] sm:$0xf]  ;;  %v10400_v9 = vld [vmem:[#allocation8 + $0x8f8] sm:$0xf0]  ;;  %v15832_v13 = vor.u32 %v13097_v2, %v10702_v32 }
 0x316   : > { %4063 = vmatpush.bf16.msra.mxu2 %v15803_v29  ;;  %19629 = vst [vmem:[#allocation79_spill] sm:$0xff] %v15821_v25  ;;  %v10414_v29 = vld [vmem:[#allocation8 + $0x908] sm:$0xf]  ;;  %v13051_v10 = vld [vmem:[#allocation8 + $0x9ec] sm:$0xf] }
 0x317   : > { %4076 = vmatpush.bf16.msra.mxu3 %v15806_v33  ;;  %4039 = vmatpush.bf16.msra.mxu0 %v15809_v0  ;;  %19630 = vst [vmem:[#allocation80_spill] sm:$0xff] %v15824_v37  ;;  %v13025_v33 = vld [vmem:[#allocation8 + $0x914] sm:$0xf0]  ;;  %v10528_v0 = vld [vmem:[#allocation8 + $0x9f8] sm:$0xf0] }
 0x318   : > { %4052 = vmatpush.bf16.msra.mxu1 %v15812_v1  ;;  %19631 = vst [vmem:[#allocation81_spill] sm:$0xff] %v15832_v13  ;;  %v10558_v1 = vld [vmem:[#allocation8 + $0xa28] sm:$0xf]  ;;  %v13061_v8 = vld [vmem:[#allocation8 + $0xa34] sm:$0xf0]  ;;  %v15845_v2 = vor.u32 %v13051_v10, %v10528_v0  ;;  %v15855_v0 = vor.u32 %v13015_v5, %v10384_v20 }
 0x319   : > { %19632 = vst [vmem:[#allocation82_spill] sm:$0xff] %v15837_v28  ;;  %v10686_v17 = vld [vmem:[#allocation8 + $0xb28] sm:$0xf]  ;;  %v13093_v60 = vld [vmem:[#allocation8 + $0xb34] sm:$0xf0]  ;;  %v15847_v32 = vor.u32 %v13061_v8, %v10558_v1 }
 0x31a   : > { %4064 = vmatpush.bf16.msra.mxu2 %v15815_v21  ;;  %v15840_v21 = vor.u32 %v13025_v33, %v10414_v29  ;;  %19635 = vst [vmem:[#allocation85_spill] sm:$0xff] %v15845_v2  ;;  %v15850_v35 = vor.u32 %v13093_v60, %v10686_v17  ;;  %v10542_v51 = vld [vmem:[#allocation8 + $0xa08] sm:$0xf]  ;;  %v13089_v33 = vld [vmem:[#allocation8 + $0xb14] sm:$0xf0] }
 0x31b   : > { %4077 = vmatpush.bf16.msra.mxu3 %v15818_v49  ;;  %4040 = vmatpush.bf16.msra.mxu0 %v15821_v25  ;;  %v15842_v49 = vor.u32 %v13019_v50, %v10400_v9  ;;  %19636 = vst [vmem:[#allocation86_spill] sm:$0xff] %v15847_v32  ;;  %v10512_v25 = vld [vmem:[#allocation8 + $0x9d8] sm:$0xf0]  ;;  %v10670_v29 = vld [vmem:[#allocation8 + $0xb08] sm:$0xf] }
 0x31c   : > { %4053 = vmatpush.bf16.msra.mxu1 %v15824_v37  ;;  %19633 = vst [vmem:[#allocation83_spill] sm:$0xff] %v15840_v21  ;;  %v13057_v37 = vld [vmem:[#allocation8 + $0xa14] sm:$0xf0]  ;;  %v13083_v50 = vld [vmem:[#allocation8 + $0xaec] sm:$0xf]  ;;  %v15859_v8 = vor.u32 %v13047_v7, %v10512_v25 }
 0x31d   : > { %19634 = vst [vmem:[#allocation84_spill] sm:$0xff] %v15842_v49  ;;  %v10656_v9 = vld [vmem:[#allocation8 + $0xaf8] sm:$0xf0]  ;;  %v13115_v1 = vld [vmem:[#allocation8 + $0xbec] sm:$0xf]  ;;  %v15861_v17 = vor.u32 %v13057_v37, %v10542_v51 }
 0x31e   : > { %4065 = vmatpush.bf16.msra.mxu2 %v15827_v39  ;;  %19637 = vst [vmem:[#allocation87_spill] sm:$0xff] %v15850_v35  ;;  %v10784_v10 = vld [vmem:[#allocation8 + $0xbf8] sm:$0xf0]  ;;  %v13011_v60 = vld [vmem:[#allocation8 + $0x8ac] sm:$0xf]  ;;  %v15867_v20 = vor.u32 %v13083_v50, %v10656_v9 }
 0x31f   : > { %4078 = vmatpush.bf16.msra.mxu3 %v15832_v13  ;;  %4041 = vmatpush.bf16.msra.mxu0 %v15837_v28  ;;  %19638 = vst [vmem:[#allocation88_spill] sm:$0xff] %v15855_v0  ;;  %v10368_v28 = vld [vmem:[#allocation8 + $0x8b8] sm:$0xf0]  ;;  %v3023_v13 = vpop.f32.mrf.mxu2  ;;  %v13043_v5 = vld [vmem:[#allocation8 + $0x9ac] sm:$0xf]  ;;  %v15870_v7 = vor.u32 %v13115_v1, %v10784_v10 }
 0x320   : > { %4054 = vmatpush.bf16.msra.mxu1 %v15840_v21  ;;  %19639 = vst [vmem:[#allocation89_spill] sm:$0xff] %v15859_v8  ;;  %v10496_v21 = vld [vmem:[#allocation8 + $0x9b8] sm:$0xf0]  ;;  %v13079_v25 = vld [vmem:[#allocation8 + $0xacc] sm:$0xf]  ;;  %v15873_v51 = vor.u32 %v13011_v60, %v10368_v28 }
 0x321   : > { %19640 = vst [vmem:[#allocation90_spill] sm:$0xff] %v15861_v17  ;;  %v10640_v37 = vld [vmem:[#allocation8 + $0xad8] sm:$0xf0]  ;;  %v13111_v13 = vld [vmem:[#allocation8 + $0xbcc] sm:$0xf] }
 0x322   : > { %4066 = vmatpush.bf16.msra.mxu2 %v15847_v32  ;;  %4042 = vmatmul.bf16.vlgmr.msra.gmra.mxu0 %v15633_v11  ;;  %19642 = vst [vmem:[#allocation92_spill] sm:$0xff] %v15867_v20  ;;  %v15881_v50 = vor.u32 %v13079_v25, %v10640_v37  ;;  %v13039_v9 = vld [vmem:[#allocation8 + $0x98c] sm:$0xf]  ;;  %v10480_v1 = vld [vmem:[#allocation8 + $0x998] sm:$0xf0] }
 0x323   : > { %4086 = vmatpush.bf16.msrb.mxu0 %v15842_v49  ;;  %4079 = vmatpush.bf16.msra.mxu3 %v15850_v35  ;;  %v15865_v49 = vor.u32 %v13089_v33, %v10670_v29  ;;  %19643 = vst [vmem:[#allocation93_spill] sm:$0xff] %v15870_v7  ;;  %v10768_v35 = vld [vmem:[#allocation8 + $0xbd8] sm:$0xf0]  ;;  %v15877_v29 = vor.u32 %v13043_v5, %v10496_v21  ;;  %v13007_v33 = vld [vmem:[#allocation8 + $0x88c] sm:$0xf] }
 0x324   : > { %4099 = vmatpush.bf16.msrb.mxu1 %v15845_v2  ;;  %v3036_v2 = vpop.f32.mrf.mxu3  ;;  %19644 = vst [vmem:[#allocation94_spill] sm:$0xff] %v15873_v51  ;;  %v15884_v28 = vor.u32 %v13111_v13, %v10768_v35  ;;  %v13075_v10 = vld [vmem:[#allocation8 + $0xaac] sm:$0xf]  ;;  %v10624_v60 = vld [vmem:[#allocation8 + $0xab8] sm:$0xf0]  ;;  %v15892_v25 = vor.u32 %v13039_v9, %v10480_v1 }
 0x325   : > { %19641 = vst [vmem:[#allocation91_spill] sm:$0xff] %v15865_v49  ;;  %4055 = vmatmul.bf16.vlgmr.msra.gmra.mxu1 %v15639_v18  ;;  %v10352_v2 = vld [vmem:[#allocation8 + $0x898] sm:$0xf0]  ;;  %v13107_v5 = vld [vmem:[#allocation8 + $0xbac] sm:$0xf]  ;;  %v15895_v35 = vor.u32 %v13075_v10, %v10624_v60 }
 0x326   : > { %4067 = vmatpush.bf16.msra.mxu2 %v15861_v17  ;;  %19645 = vst [vmem:[#allocation95_spill] sm:$0xff] %v15877_v29  ;;  %v15888_v21 = vor.u32 %v13007_v33, %v10352_v2  ;;  %v13003_v37 = vld [vmem:[#allocation8 + $0x86c] sm:$0xf]  ;;  %v15898_v33 = vpop.f32.mrf.mxu0  ;;  %v10608_v17 = vld [vmem:[#allocation8 + $0xa98] sm:$0xf0] }
 0x327   : > { %4087 = vmatpush.bf16.msrb.mxu0 %v15855_v0  ;;  %4080 = vmatpush.bf16.msra.mxu3 %v15865_v49  ;;  %19646 = vst [vmem:[#allocation96_spill] sm:$0xff] %v15881_v50  ;;  %v10752_v49 = vld [vmem:[#allocation8 + $0xbb8] sm:$0xf0]  ;;  %v13035_v13 = vld [vmem:[#allocation8 + $0x96c] sm:$0xf] }
 0x328   : > { %4100 = vmatpush.bf16.msrb.mxu1 %v15859_v8  ;;  %19647 = vst [vmem:[#allocation97_spill] sm:$0xff] %v15884_v28  ;;  %v15900_v2 = vor.u32 %v13107_v5, %v10752_v49  ;;  %v15902_v8 = vpop.f32.mrf.mxu1  ;;  %v13103_v1 = vld [vmem:[#allocation8 + $0xb8c] sm:$0xf] }
 0x329   : > { %4068 = vmatmul.bf16.vlgmr.msra.gmra.mxu2 %v15663_v63  ;;  %19648 = vst [vmem:[#allocation98_spill] sm:$0xff] %v15888_v21  ;;  %v12999_v60 = vld [vmem:[#allocation8 + $0x84c] sm:$0xf] }
 0x32a   : > { %4112 = vmatpush.bf16.msrb.mxu2 %v15867_v20  ;;  %4081 = vmatmul.bf16.vlgmr.msra.gmra.mxu3 %v15669_v15  ;;  %19649 = vst [vmem:[#allocation99_spill] sm:$0xff] %v15892_v25  ;;  %v10464_v20 = vld [vmem:[#allocation8 + $0x978] sm:$0xf0]  ;;  %v13031_v5 = vld [vmem:[#allocation8 + $0x94c] sm:$0xf] }
 0x32b   : > { %4125 = vmatpush.bf16.msrb.mxu3 %v15870_v7  ;;  %4088 = vmatpush.bf16.msrb.mxu0 %v15873_v51  ;;  %v10336_v7 = vld [vmem:[#allocation8 + $0x878] sm:$0xf0]  ;;  %19650 = vst [vmem:[#allocation100_spill] sm:$0xff] %v15895_v35  ;;  %v13071_v51 = vld [vmem:[#allocation8 + $0xa8c] sm:$0xf]  ;;  %v15908_v10 = vor.u32 %v13035_v13, %v10464_v20 }
 0x32c   : > { %4101 = vmatpush.bf16.msrb.mxu1 %v15877_v29  ;;  %19651 = vst [vmem:[#allocation101_spill] sm:$0xff] %v15900_v2  ;;  %v15905_v9 = vor.u32 %v13003_v37, %v10336_v7  ;;  %v15911_v49 = vor.u32 %v13071_v51, %v10608_v17  ;;  %v10448_v29 = vld [vmem:[#allocation8 + $0x958] sm:$0xf0]  ;;  %v13067_v7 = vld [vmem:[#allocation8 + $0xa6c] sm:$0xf] }
 0x32d   : > { %19653 = vst [vmem:[#allocation103_spill] sm:$0xff] %v15908_v10  ;;  %v10592_v37 = vld [vmem:[#allocation8 + $0xa78] sm:$0xf0]  ;;  %v13099_v20 = vld [vmem:[#allocation8 + $0xb6c] sm:$0xf] }
 0x32e   : > { %4113 = vmatpush.bf16.msrb.mxu2 %v15881_v50  ;;  %19652 = vst [vmem:[#allocation102_spill] sm:$0xff] %v15905_v9  ;;  %v10736_v50 = vld [vmem:[#allocation8 + $0xb98] sm:$0xf0]  ;;  %v12995_v17 = vld [vmem:[#allocation8 + $0x82c] sm:$0xf] }
 0x32f   : > { %4126 = vmatpush.bf16.msrb.mxu3 %v15884_v28  ;;  %4089 = vmatpush.bf16.msrb.mxu0 %v15888_v21  ;;  %v10320_v28 = vld [vmem:[#allocation8 + $0x858] sm:$0xf0]  ;;  %19654 = vst [vmem:[#allocation104_spill] sm:$0xff] %v15911_v49  ;;  %v15914_v0 = vor.u32 %v13103_v1, %v10736_v50  ;;  %v13027_v50 = vld [vmem:[#allocation8 + $0x92c] sm:$0xf] }
 0x330   : > { %4102 = vmatpush.bf16.msrb.mxu1 %v15892_v25  ;;  %v15917_v21 = vor.u32 %v12999_v60, %v10320_v28  ;;  %v10720_v13 = vld [vmem:[#allocation8 + $0xb78] sm:$0xf0]  ;;  %v15920_v25 = vor.u32 %v13031_v5, %v10448_v29  ;;  %v13063_v28 = vld [vmem:[#allocation8 + $0xa4c] sm:$0xf]  ;;  %v3062_v32 = vpop.f32.mrf.mxu1 }
 0x331   : > { %19655 = vst [vmem:[#allocation105_spill] sm:$0xff] %v15914_v0  ;;  %v10304_v51 = vld [vmem:[#allocation8 + $0x838] sm:$0xf0]  ;;  %v13095_v5 = vld [vmem:[#allocation8 + $0xb4c] sm:$0xf]  ;;  %v15938_v32 = vpop.f32.mrf.mxu2 }
 0x332   : > { %4114 = vmatpush.bf16.msrb.mxu2 %v15895_v35  ;;  %19656 = vst [vmem:[#allocation106_spill] sm:$0xff] %v15917_v21  ;;  %v15923_v35 = vor.u32 %v13067_v7, %v10592_v37  ;;  %v10432_v1 = vld [vmem:[#allocation8 + $0x938] sm:$0xf0]  ;;  %v15929_v29 = vor.u32 %v12995_v17, %v10304_v51  ;;  %v12991_v37 = vld [vmem:[#allocation8 + $0x80c] sm:$0xf] }
 0x333   : > { %4127 = vmatpush.bf16.msrb.mxu3 %v15900_v2  ;;  %4090 = vmatpush.bf16.msrb.mxu0 %v15905_v9  ;;  %v3049_v2 = vpop.f32.mrf.mxu0  ;;  %v15926_v9 = vor.u32 %v13099_v20, %v10720_v13  ;;  %v10576_v60 = vld [vmem:[#allocation8 + $0xa58] sm:$0xf0]  ;;  %v15932_v7 = vor.u32 %v13027_v50, %v10432_v1  ;;  %v13023_v20 = vld [vmem:[#allocation8 + $0x90c] sm:$0xf] }
 0x334   : > { %4103 = vmatpush.bf16.msrb.mxu1 %v15908_v10  ;;  %19657 = vst [vmem:[#allocation107_spill] sm:$0xff] %v15923_v35  ;;  %v10704_v10 = vld [vmem:[#allocation8 + $0xb58] sm:$0xf0]  ;;  %v15935_v2 = vor.u32 %v13063_v28, %v10576_v60  ;;  %v13059_v51 = vld [vmem:[#allocation8 + $0xa2c] sm:$0xf] }
 0x335   : > { %19658 = vst [vmem:[#allocation108_spill] sm:$0xff] %v15926_v9  ;;  %v10416_v13 = vld [vmem:[#allocation8 + $0x918] sm:$0xf0]  ;;  %v15940_v17 = vor.u32 %v13095_v5, %v10704_v10  ;;  %v13091_v1 = vld [vmem:[#allocation8 + $0xb2c] sm:$0xf] }
 0x336   : > { %4115 = vmatpush.bf16.msrb.mxu2 %v15911_v49  ;;  %v10288_v49 = vld [vmem:[#allocation8 + $0x818] sm:$0xf0]  ;;  %v15948_v28 = vor.u32 %v13023_v20, %v10416_v13  ;;  %v13055_v5 = vld [vmem:[#allocation8 + $0xa0c] sm:$0xf] }
 0x337   : > { %4128 = vmatpush.bf16.msrb.mxu3 %v15914_v0  ;;  %4091 = vmatpush.bf16.msrb.mxu0 %v15917_v21  ;;  %v10560_v21 = vld [vmem:[#allocation8 + $0xa38] sm:$0xf0]  ;;  %v15942_v0 = vpop.f32.mrf.mxu3  ;;  %v15945_v50 = vor.u32 %v12991_v37, %v10288_v49  ;;  %v13087_v49 = vld [vmem:[#allocation8 + $0xb0c] sm:$0xf] }
 0x338   : > { %4104 = vmatpush.bf16.msrb.mxu1 %v15920_v25  ;;  %v15951_v60 = vor.u32 %v13059_v51, %v10560_v21  ;;  %v10672_v37 = vld [vmem:[#allocation8 + $0xb18] sm:$0xf0]  ;;  %v19673_v51 = vld [vmem:[#allocation38_spill] sm:$0xff] }
 0x339   : > { %v15965_v20 = vor.u32 %v13087_v49, %v10672_v37  ;;  %v19675_v49 = vld [vmem:[#allocation37_spill] sm:$0xff]  ;;  %v19676_v37 = vld [vmem:[#allocation39_spill] sm:$0xff] }
 0x33a   : > { %4116 = vmatpush.bf16.msrb.mxu2 %v15923_v35  ;;  %v10688_v35 = vld [vmem:[#allocation8 + $0xb38] sm:$0xf0] }
 0x33b   : > { %4129 = vmatpush.bf16.msrb.mxu3 %v15926_v9  ;;  %4092 = vmatpush.bf16.msrb.mxu0 %v15929_v29  ;;  %v15954_v10 = vor.u32 %v13091_v1, %v10688_v35  ;;  %v10544_v9 = vld [vmem:[#allocation8 + $0xa18] sm:$0xf0]  ;;  %v3075_v35 = vpop.f32.mrf.mxu2 }
 0x33c   : > { %4105 = vmatpush.bf16.msrb.mxu1 %v15932_v7  ;;  %v15961_v21 = vor.u32 %v13055_v5, %v10544_v9  ;;  %v19674_v5 = vld [vmem:[#allocation35_spill] sm:$0xff]  ;;  %v19677_v35 = vld [vmem:[#allocation40_spill] sm:$0xff] }
 0x33e   : > { %4117 = vmatpush.bf16.msrb.mxu2 %v15935_v2 }
 0x33f   : > { %4130 = vmatpush.bf16.msrb.mxu3 %v15940_v17  ;;  %4093 = vmatpush.bf16.msrb.mxu0 %v15945_v50  ;;  %v3088_v13 = vpop.f32.mrf.mxu3 }
 0x340   : > { %4106 = vmatpush.bf16.msrb.mxu1 %v15948_v28  ;;  %v19678_v13 = vld [vmem:[#allocation41_spill] sm:$0xff] }
 0x342   : > { %4118 = vmatpush.bf16.msrb.mxu2 %v15951_v60  ;;  %4094 = vmatmul.bf16.vlgmr.msrb.gmra.mxu0 %v15633_v11  ;;  %v16023_v11 = vld [vmem:[#allocation10 + $0x8] sm:$0xf] }
 0x343   : > { %4146 = vmatpush.bf16.msra.mxu0 %v15516_v38  ;;  %4131 = vmatpush.bf16.msrb.mxu3 %v15954_v10  ;;  %v3099_v38 = vpop.f32.mrf.mxu0 }
 0x344   : > { %4159 = vmatpush.bf16.msra.mxu1 %v15519_v46  ;;  %v3112_v46 = vpop.f32.mrf.mxu1 }
 0x345   : > { %4107 = vmatmul.bf16.vlgmr.msrb.gmra.mxu1 %v15639_v18  ;;  %v19666_v18 = vld [vmem:[#allocation27_spill] sm:$0xff] }
 0x346   : > { %4119 = vmatpush.bf16.msrb.mxu2 %v15961_v21 }
 0x347   : > { %4147 = vmatpush.bf16.msra.mxu0 %v15525_v47  ;;  %4132 = vmatpush.bf16.msrb.mxu3 %v15965_v20  ;;  %v19659_v47 = vperm.slane %v15393_v30, 2 }
 0x348   : > { %4160 = vmatpush.bf16.msra.mxu1 %v15529_v54 }
 0x349   : > { %4120 = vmatmul.bf16.vlgmr.msrb.gmra.mxu2 %v15663_v63  ;;  %v3048_v54 = vadd.f32 %v15898_v33, %v19659_v47 }
 0x34a   : > { %4172 = vmatpush.bf16.msra.mxu2 %v15533_v6  ;;  %4133 = vmatmul.bf16.vlgmr.msrb.gmra.mxu3 %v15669_v15  ;;  %v3022_v6 = vadd.f32 %v15830_v16, %v15800_v44  ;;  %v19667_v15 = vld [vmem:[#allocation29_spill] sm:$0xff]  ;;  %v18893_v44 = vperm.slane %v16023_v11, 0  ;;  %v19669_v16 = vld [vmem:[#allocation34_spill] sm:$0xff] }
 0x34b   : > { %4185 = vmatpush.bf16.msra.mxu3 %v15536_v45  ;;  %4148 = vmatpush.bf16.msra.mxu0 %v15539_v48  ;;  %v19660_v45 = vperm.slane %v15393_v30, 3 }
 0x34c   : > { %4161 = vmatpush.bf16.msra.mxu1 %v15543_v31  ;;  %v3101_v31 = vpop.f32.mrf.mxu0 }
 0x34d   : > { %v3100_v48 = vadd.f32 %v3099_v38, %v19660_v45  ;;  %v19679_v38 = vld [vmem:[#allocation42_spill] sm:$0xff]  ;;  %v19682_v45 = vld [vmem:[#allocation45_spill] sm:$0xff] }
 0x34e   : > { %4173 = vmatpush.bf16.msra.mxu2 %v15547_v24  ;;  %v3114_v24 = vpop.f32.mrf.mxu1 }
 0x34f   : > { %4186 = vmatpush.bf16.msra.mxu3 %v15550_v40  ;;  %4149 = vmatpush.bf16.msra.mxu0 %v15554_v59  ;;  %v3061_v40 = vadd.f32 %v15902_v8, %v3048_v54  ;;  %v3035_v59 = vadd.f32 %v15834_v4, %v3022_v6  ;;  %v19670_v4 = vld [vmem:[#allocation31_spill] sm:$0xff]  ;;  %v19681_v6 = vld [vmem:[#allocation44_spill] sm:$0xff] }
 0x350   : > { %4162 = vmatpush.bf16.msra.mxu1 %v15558_v61  ;;  %v3113_v61 = vadd.f32 %v3112_v46, %v3100_v48  ;;  %v19680_v54 = vld [vmem:[#allocation43_spill] sm:$0xff]  ;;  %v19683_v48 = vld [vmem:[#allocation46_spill] sm:$0xff] }
 0x351   : > { %v3074_v30 = vadd.f32 %v15938_v32, %v3061_v40  ;;  %v19672_v32 = vld [vmem:[#allocation36_spill] sm:$0xff] }
 0x352   : > { %4174 = vmatpush.bf16.msra.mxu2 %v15561_v41  ;;  %v3125_v41 = vpop.f32.mrf.mxu2 }
 0x353   : > { %4187 = vmatpush.bf16.msra.mxu3 %v15564_v58  ;;  %4150 = vmatpush.bf16.msra.mxu0 %v15567_v43  ;;  %v3126_v58 = vadd.f32 %v3125_v41, %v3113_v61  ;;  %v3138_v43 = vpop.f32.mrf.mxu3  ;;  %v19685_v61 = vld [vmem:[#allocation48_spill] sm:$0xff]  ;;  %v19686_v41 = vld [vmem:[#allocation53_spill] sm:$0xff] }
 0x354   : > { %4163 = vmatpush.bf16.msra.mxu1 %v15571_v34  ;;  %v3142_v34 = vmax.f32 %v15734_v12, 0.0  ;;  %v19668_v12 = vld [vmem:[#allocation32_spill] sm:$0xff] }
 0x356   : > { %4175 = vmatpush.bf16.msra.mxu2 %v15575_v53  ;;  %v3143_v53 = vmax.f32 %v3035_v59, 0.0  ;;  %v19684_v59 = vld [vmem:[#allocation47_spill] sm:$0xff] }
 0x357   : > { %4188 = vmatpush.bf16.msra.mxu3 %v15578_v57  ;;  %4151 = vmatpush.bf16.msra.mxu0 %v15581_v23  ;;  %v3087_v57 = vadd.f32 %v15942_v0, %v3074_v30  ;;  %v3139_v23 = vadd.f32 %v3138_v43, %v3126_v58  ;;  %v19671_v0 = vld [vmem:[#allocation33_spill] sm:$0xff]  ;;  %v19687_v58 = vld [vmem:[#allocation54_spill] sm:$0xff] }
 0x358   : > { %4164 = vmatpush.bf16.msra.mxu1 %v15589_v36  ;;  %v16009_v36 = vpack.c.bf16 %v3142_v34, %v3142_v34  ;;  %v19688_v43 = vld [vmem:[#allocation49_spill] sm:$0xff]  ;;  %v19689_v34 = vld [vmem:[#allocation50_spill] sm:$0xff] }
 0x35a   : > { %4176 = vmatpush.bf16.msra.mxu2 %v15594_v52  ;;  %v16013_v52 = vpack.c.bf16 %v3143_v53, %v3143_v53  ;;  %v19690_v53 = vld [vmem:[#allocation55_spill] sm:$0xff] }
 0x35b   : > { %4189 = vmatpush.bf16.msra.mxu3 %v15597_v56  ;;  %4152 = vmatpush.bf16.msra.mxu0 %v15600_v3  ;;  %v3144_v56 = vmax.f32 %v3087_v57, 0.0  ;;  %v19661_v3 = vld [vmem:[#allocation24_spill] sm:$0xff] }
 0x35c   : > { %4165 = vmatpush.bf16.msra.mxu1 %v15605_v27  ;;  %v3127_v27 = vpop.f32.mrf.mxu2  ;;  %v19691_v57 = vld [vmem:[#allocation56_spill] sm:$0xff] }
 0x35e   : > { %4177 = vmatpush.bf16.msra.mxu2 %v15608_v62  ;;  %v3145_v62 = vmax.f32 %v3139_v23, 0.0  ;;  %v19692_v23 = vld [vmem:[#allocation51_spill] sm:$0xff] }
 0x35f   : > { %4190 = vmatpush.bf16.msra.mxu3 %v15612_v26  ;;  %4153 = vmatpush.bf16.msra.mxu0 %v15615_v22  ;;  %v3140_v26 = vpop.f32.mrf.mxu3  ;;  %v19662_v22 = vld [vmem:[#allocation25_spill] sm:$0xff]  ;;  %v3939_v8 = vpop.f32.mrf.mxu0 }
 0x360   : > { %4166 = vmatpush.bf16.msra.mxu1 %v15619_v55  ;;  %v19663_v55 = vld [vmem:[#allocation26_spill] sm:$0xff]  ;;  %v16029_v63 = vpack.c.bf16 %v3145_v62, %v3145_v62  ;;  %v3940_v33 = vadd.f32 %v3939_v8, %v18893_v44  ;;  %v19694_v62 = vld [vmem:[#allocation57_spill] sm:$0xff]  ;;  %v11112_v44 = vld [vmem:[#allocation8 + $0xe90] sm:$0xf0] }
 0x361   : > { %v19695_v26 = vld [vmem:[#allocation58_spill] sm:$0xff] }
 0x362   : > { %4178 = vmatpush.bf16.msra.mxu2 %v15626_v19  ;;  %4154 = vmatmul.bf16.vlgmr.msra.gmra.mxu0 %v16009_v36  ;;  %v19665_v19 = vld [vmem:[#allocation30_spill] sm:$0xff]  ;;  %v3952_v9 = vpop.f32.mrf.mxu1 }
 0x363   : > { %4198 = vmatpush.bf16.msrb.mxu0 %v15621_v42  ;;  %4191 = vmatpush.bf16.msra.mxu3 %v19661_v3  ;;  %v19664_v42 = vld [vmem:[#allocation28_spill] sm:$0xff]  ;;  %v3953_v1 = vadd.f32 %v3952_v9, %v3940_v33  ;;  %v19704_v9 = vld [vmem:[#allocation67_spill] sm:$0xff] }
 0x364   : > { %4211 = vmatpush.bf16.msrb.mxu1 %v15624_v14  ;;  %v16025_v14 = vpack.c.bf16 %v3144_v56, %v3144_v56  ;;  %v19693_v56 = vld [vmem:[#allocation52_spill] sm:$0xff] }
 0x365   : > { %4167 = vmatmul.bf16.vlgmr.msra.gmra.mxu1 %v16013_v52 }
 0x366   : > { %4179 = vmatpush.bf16.msra.mxu2 %v19664_v42  ;;  %v19698_v42 = vld [vmem:[#allocation61_spill] sm:$0xff] }
 0x367   : > { %4199 = vmatpush.bf16.msrb.mxu0 %v19662_v22  ;;  %4192 = vmatpush.bf16.msra.mxu3 %v19665_v19  ;;  %v3941_v46 = vpop.f32.mrf.mxu0  ;;  %v19696_v22 = vld [vmem:[#allocation59_spill] sm:$0xff]  ;;  %v19699_v19 = vld [vmem:[#allocation62_spill] sm:$0xff] }
 0x368   : > { %4212 = vmatpush.bf16.msrb.mxu1 %v19663_v55  ;;  %v19697_v55 = vld [vmem:[#allocation60_spill] sm:$0xff] }
 0x369   : > { %4180 = vmatmul.bf16.vlgmr.msra.gmra.mxu2 %v16025_v14 }
 0x36a   : > { %4224 = vmatpush.bf16.msrb.mxu2 %v19666_v18  ;;  %4193 = vmatmul.bf16.vlgmr.msra.gmra.mxu3 %v16029_v63  ;;  %v3954_v47 = vpop.f32.mrf.mxu1  ;;  %v19700_v18 = vld [vmem:[#allocation63_spill] sm:$0xff] }
 0x36b   : > { %4237 = vmatpush.bf16.msrb.mxu3 %v19667_v15  ;;  %4200 = vmatpush.bf16.msrb.mxu0 %v19668_v12  ;;  %v18892_v15 = vperm.slane %v16023_v11, 1  ;;  %v19701_v12 = vld [vmem:[#allocation64_spill] sm:$0xff]  ;;  %v19712_v47 = vld [vmem:[#allocation75_spill] sm:$0xff] }
 0x36c   : > { %4213 = vmatpush.bf16.msrb.mxu1 %v19669_v16  ;;  %v3965_v31 = vpop.f32.mrf.mxu2  ;;  %v19702_v16 = vld [vmem:[#allocation65_spill] sm:$0xff] }
 0x36d   : > { %v3966_v24 = vadd.f32 %v3965_v31, %v3953_v1  ;;  %v3978_v40 = vpop.f32.mrf.mxu3  ;;  %v19706_v1 = vld [vmem:[#allocation69_spill] sm:$0xff] }
 0x36e   : > { %4225 = vmatpush.bf16.msrb.mxu2 %v19670_v4  ;;  %v19703_v4 = vld [vmem:[#allocation66_spill] sm:$0xff] }
 0x36f   : > { %4238 = vmatpush.bf16.msrb.mxu3 %v19671_v0  ;;  %4201 = vmatpush.bf16.msrb.mxu0 %v19672_v32  ;;  %v16055_v30 = vadd.f32 %v3978_v40, %v3966_v24  ;;  %v19705_v32 = vld [vmem:[#allocation68_spill] sm:$0xff]  ;;  %v19716_v24 = vld [vmem:[#allocation79_spill] sm:$0xff] }
 0x370   : > { %4214 = vmatpush.bf16.msrb.mxu1 %v19673_v51  ;;  %v19717_v40 = vld [vmem:[#allocation80_spill] sm:$0xff] }
 0x372   : > { %4226 = vmatpush.bf16.msrb.mxu2 %v19674_v5  ;;  %v19707_v5 = vld [vmem:[#allocation70_spill] sm:$0xff] }
 0x373   : > { %4239 = vmatpush.bf16.msrb.mxu3 %v19675_v49  ;;  %4202 = vmatpush.bf16.msrb.mxu0 %v19676_v37  ;;  %v19708_v49 = vld [vmem:[#allocation71_spill] sm:$0xff]  ;;  %v19709_v37 = vld [vmem:[#allocation72_spill] sm:$0xff] }
 0x374   : > { %4215 = vmatpush.bf16.msrb.mxu1 %v19677_v35  ;;  %v3967_v3 = vpop.f32.mrf.mxu2  ;;  %v19710_v35 = vld [vmem:[#allocation73_spill] sm:$0xff] }
 0x375   : > { %v3980_v27 = vpop.f32.mrf.mxu3  ;;  %v19727_v3 = vld [vmem:[#allocation90_spill] sm:$0xff] }
 0x376   : > { %4227 = vmatpush.bf16.msrb.mxu2 %v19678_v13  ;;  %v19711_v13 = vld [vmem:[#allocation74_spill] sm:$0xff]  ;;  %v19728_v27 = vld [vmem:[#allocation91_spill] sm:$0xff] }
 0x377   : > { %4240 = vmatpush.bf16.msrb.mxu3 %v19679_v38  ;;  %4203 = vmatpush.bf16.msrb.mxu0 %v19680_v54  ;;  %v19713_v54 = vld [vmem:[#allocation76_spill] sm:$0xff] }
 0x378   : > { %4216 = vmatpush.bf16.msrb.mxu1 %v19681_v6  ;;  %v19714_v6 = vld [vmem:[#allocation77_spill] sm:$0xff] }
 0x37a   : > { %4228 = vmatpush.bf16.msrb.mxu2 %v19682_v45  ;;  %v19715_v45 = vld [vmem:[#allocation78_spill] sm:$0xff] }
 0x37b   : > { %4241 = vmatpush.bf16.msrb.mxu3 %v19683_v48  ;;  %4204 = vmatpush.bf16.msrb.mxu0 %v19684_v59  ;;  %v19718_v59 = vld [vmem:[#allocation81_spill] sm:$0xff] }
 0x37c   : > { %4217 = vmatpush.bf16.msrb.mxu1 %v19685_v61  ;;  %v19719_v61 = vld [vmem:[#allocation82_spill] sm:$0xff] }
 0x37e   : > { %4229 = vmatpush.bf16.msrb.mxu2 %v19686_v41  ;;  %v19720_v41 = vld [vmem:[#allocation83_spill] sm:$0xff] }
 0x37f   : > { %4242 = vmatpush.bf16.msrb.mxu3 %v19687_v58  ;;  %4205 = vmatpush.bf16.msrb.mxu0 %v19688_v43  ;;  %v3991_v0 = vpop.f32.mrf.mxu0  ;;  %v19721_v58 = vld [vmem:[#allocation84_spill] sm:$0xff]  ;;  %v19722_v43 = vld [vmem:[#allocation85_spill] sm:$0xff] }
 0x380   : > { %4218 = vmatpush.bf16.msrb.mxu1 %v19689_v34  ;;  %v3992_v8 = vadd.f32 %v3991_v0, %v18892_v15  ;;  %v19723_v34 = vld [vmem:[#allocation86_spill] sm:$0xff]  ;;  %v19737_v0 = vld [vmem:[#allocation100_spill] sm:$0xff]  ;;  %v13198_v15 = vld [vmem:[#allocation8 + $0xe84] sm:$0xf] }
 0x382   : > { %4230 = vmatpush.bf16.msrb.mxu2 %v19692_v23  ;;  %4206 = vmatmul.bf16.vlgmr.msrb.gmra.mxu0 %v16009_v36  ;;  %v4004_v33 = vpop.f32.mrf.mxu1 }
 0x383   : > { %4250 = vmatpush.bf16.msra.mxu0 %v19690_v53  ;;  %4243 = vmatpush.bf16.msrb.mxu3 %v19693_v56  ;;  %v16084_v51 = vadd.f32 %v4004_v33, %v3992_v8  ;;  %v19724_v53 = vld [vmem:[#allocation87_spill] sm:$0xff]  ;;  %v19726_v56 = vld [vmem:[#allocation89_spill] sm:$0xff]  ;;  %v19739_v33 = vld [vmem:[#allocation102_spill] sm:$0xff] }
 0x384   : > { %4263 = vmatpush.bf16.msra.mxu1 %v19691_v57  ;;  %v19738_v8 = vld [vmem:[#allocation101_spill] sm:$0xff] }
 0x385   : > { %4219 = vmatmul.bf16.vlgmr.msrb.gmra.mxu1 %v16013_v52 }
 0x386   : > { %4231 = vmatpush.bf16.msrb.mxu2 %v19696_v22  ;;  %v19731_v22 = vld [vmem:[#allocation94_spill] sm:$0xff] }
 0x387   : > { %4251 = vmatpush.bf16.msra.mxu0 %v19694_v62  ;;  %4244 = vmatpush.bf16.msrb.mxu3 %v19697_v55  ;;  %v3993_v38 = vpop.f32.mrf.mxu0  ;;  %v19729_v62 = vld [vmem:[#allocation92_spill] sm:$0xff]  ;;  %v19732_v55 = vld [vmem:[#allocation95_spill] sm:$0xff] }
 0x388   : > { %4264 = vmatpush.bf16.msra.mxu1 %v19695_v26  ;;  %v19730_v26 = vld [vmem:[#allocation93_spill] sm:$0xff]  ;;  %v13148_v38 = vld [vmem:[#allocation8 + $0xcec] sm:$0xf0] }
 0x389   : > { %4232 = vmatmul.bf16.vlgmr.msrb.gmra.mxu2 %v16025_v14 }
 0x38a   : > { %4276 = vmatpush.bf16.msra.mxu2 %v19698_v42  ;;  %4245 = vmatmul.bf16.vlgmr.msrb.gmra.mxu3 %v16029_v63  ;;  %v4006_v46 = vpop.f32.mrf.mxu1  ;;  %v19733_v42 = vld [vmem:[#allocation96_spill] sm:$0xff] }
 0x38b   : > { %4289 = vmatpush.bf16.msra.mxu3 %v19699_v19  ;;  %4252 = vmatpush.bf16.msra.mxu0 %v19700_v18  ;;  %v19734_v19 = vld [vmem:[#allocation97_spill] sm:$0xff]  ;;  %v19745_v46 = vld [vmem:[#allocation108_spill] sm:$0xff] }
 0x38c   : > { %4265 = vmatpush.bf16.msra.mxu1 %v19701_v12  ;;  %v16096_v48 = vpop.f32.mrf.mxu2 }
 0x38d   : > { %v16098_v31 = vpop.f32.mrf.mxu3 }
 0x38e   : > { %4277 = vmatpush.bf16.msra.mxu2 %v19702_v16  ;;  %v19735_v16 = vld [vmem:[#allocation98_spill] sm:$0xff] }
 0x38f   : > { %4290 = vmatpush.bf16.msra.mxu3 %v19703_v4  ;;  %4253 = vmatpush.bf16.msra.mxu0 %v19704_v9  ;;  %v19736_v4 = vld [vmem:[#allocation99_spill] sm:$0xff] }
 0x390   : > { %4266 = vmatpush.bf16.msra.mxu1 %v19705_v32  ;;  %v19740_v9 = vld [vmem:[#allocation103_spill] sm:$0xff]  ;;  %v19741_v32 = vld [vmem:[#allocation104_spill] sm:$0xff] }
 0x392   : > { %4278 = vmatpush.bf16.msra.mxu2 %v19706_v1  ;;  %v19742_v1 = vld [vmem:[#allocation105_spill] sm:$0xff] }
 0x393   : > { %4291 = vmatpush.bf16.msra.mxu3 %v19707_v5  ;;  %4254 = vmatpush.bf16.msra.mxu0 %v19708_v49 }
 0x394   : > { %4267 = vmatpush.bf16.msra.mxu1 %v19709_v37  ;;  %v4019_v57 = vpop.f32.mrf.mxu2  ;;  %v19743_v37 = vld [vmem:[#allocation106_spill] sm:$0xff] }
 0x395   : > { %v4032_v23 = vpop.f32.mrf.mxu3  ;;  %v10998_v57 = vld [vmem:[#allocation8 + $0xda0] sm:$0xf] }
 0x396   : > { %4279 = vmatpush.bf16.msra.mxu2 %v19710_v35  ;;  %v19744_v35 = vld [vmem:[#allocation107_spill] sm:$0xff]  ;;  %v13172_v23 = vld [vmem:[#allocation8 + $0xdac] sm:$0xf0] }
 0x397   : > { %4292 = vmatpush.bf16.msra.mxu3 %v19711_v13  ;;  %4255 = vmatpush.bf16.msra.mxu0 %v19712_v47  ;;  %v10902_v13 = vld [vmem:[#allocation8 + $0xce0] sm:$0xf] }
 0x398   : > { %4268 = vmatpush.bf16.msra.mxu1 %v19713_v54  ;;  %v11030_v54 = vld [vmem:[#allocation8 + $0xde0] sm:$0xf] }
 0x39a   : > { %4280 = vmatpush.bf16.msra.mxu2 %v19714_v6  ;;  %v13180_v6 = vld [vmem:[#allocation8 + $0xdec] sm:$0xf0] }
 0x39b   : > { %4293 = vmatpush.bf16.msra.mxu3 %v19715_v45  ;;  %4256 = vmatpush.bf16.msra.mxu0 %v19716_v24  ;;  %v16146_v24 = vor.u32 %v13148_v38, %v10902_v13  ;;  %v11238_v38 = vld [vmem:[#allocation8 + $0xf80] sm:$0xf] }
 0x39c   : > { %4269 = vmatpush.bf16.msra.mxu1 %v19717_v40  ;;  %v10886_v40 = vld [vmem:[#allocation8 + $0xcc0] sm:$0xf] }
 0x39e   : > { %4281 = vmatpush.bf16.msra.mxu2 %v15827_v39  ;;  %v19725_v39 = vld [vmem:[#allocation88_spill] sm:$0xff] }
 0x39f   : > { %4294 = vmatpush.bf16.msra.mxu3 %v19718_v59  ;;  %4257 = vmatpush.bf16.msra.mxu0 %v19719_v61  ;;  %v16124_v18 = vpop.f32.mrf.mxu0  ;;  %v13144_v59 = vld [vmem:[#allocation8 + $0xccc] sm:$0xf0]  ;;  %v11014_v61 = vld [vmem:[#allocation8 + $0xdc0] sm:$0xf] }
 0x3a0   : > { %4270 = vmatpush.bf16.msra.mxu1 %v19720_v41  ;;  %v13176_v41 = vld [vmem:[#allocation8 + $0xdcc] sm:$0xf0] }
 0x3a2   : > { %4282 = vmatpush.bf16.msra.mxu2 %v19723_v34  ;;  %4258 = vmatmul.bf16.vlgmr.msra.gmra.mxu0 %v16009_v36  ;;  %v16126_v12 = vpop.f32.mrf.mxu1  ;;  %v16159_v34 = vor.u32 %v13176_v41, %v11014_v61  ;;  %v18890_v61 = vperm.slane %v16023_v11, 3 }
 0x3a3   : > { %4302 = vmatpush.bf16.msrb.mxu0 %v19721_v58  ;;  %4295 = vmatpush.bf16.msra.mxu3 %v19724_v53  ;;  %v11158_v58 = vld [vmem:[#allocation8 + $0xee0] sm:$0xf]  ;;  %v13140_v53 = vld [vmem:[#allocation8 + $0xcac] sm:$0xf0] }
 0x3a4   : > { %4315 = vmatpush.bf16.msrb.mxu1 %v19722_v43  ;;  %v13212_v43 = vld [vmem:[#allocation8 + $0xeec] sm:$0xf0] }
 0x3a5   : > { %4271 = vmatmul.bf16.vlgmr.msra.gmra.mxu1 %v16013_v52 }
 0x3a6   : > { %4283 = vmatpush.bf16.msra.mxu2 %v19727_v3  ;;  %v11142_v3 = vld [vmem:[#allocation8 + $0xec0] sm:$0xf] }
 0x3a7   : > { %4303 = vmatpush.bf16.msrb.mxu0 %v19725_v39  ;;  %4296 = vmatpush.bf16.msra.mxu3 %v19728_v27  ;;  %v4045_v5 = vpop.f32.mrf.mxu0 }
 0x3a8   : > { %4316 = vmatpush.bf16.msrb.mxu1 %v19726_v56 }
 0x3a9   : > { %4284 = vmatmul.bf16.vlgmr.msra.gmra.mxu2 %v16025_v14 }
 0x3aa   : > { %4328 = vmatpush.bf16.msrb.mxu2 %v19729_v62  ;;  %4297 = vmatmul.bf16.vlgmr.msra.gmra.mxu3 %v16029_v63  ;;  %v4058_v49 = vpop.f32.mrf.mxu1  ;;  %v11270_v62 = vld [vmem:[#allocation8 + $0xfc0] sm:$0xf] }
 0x3ab   : > { %4341 = vmatpush.bf16.msrb.mxu3 %v19730_v26  ;;  %4304 = vmatpush.bf16.msrb.mxu0 %v19731_v22  ;;  %v10854_v26 = vld [vmem:[#allocation8 + $0xc80] sm:$0xf]  ;;  %v13136_v22 = vld [vmem:[#allocation8 + $0xc8c] sm:$0xf0] }
 0x3ac   : > { %4317 = vmatpush.bf16.msrb.mxu1 %v19732_v55  ;;  %v16140_v47 = vpop.f32.mrf.mxu2  ;;  %v10982_v55 = vld [vmem:[#allocation8 + $0xd80] sm:$0xf] }
 0x3ad   : > { %v16142_v45 = vpop.f32.mrf.mxu3 }
 0x3ae   : > { %4329 = vmatpush.bf16.msrb.mxu2 %v19733_v42  ;;  %v13168_v42 = vld [vmem:[#allocation8 + $0xd8c] sm:$0xf0] }
 0x3af   : > { %4342 = vmatpush.bf16.msrb.mxu3 %v19734_v19  ;;  %4305 = vmatpush.bf16.msrb.mxu0 %v19735_v16  ;;  %v11126_v16 = vld [vmem:[#allocation8 + $0xea0] sm:$0xf] }
 0x3b0   : > { %4318 = vmatpush.bf16.msrb.mxu1 %v19736_v4  ;;  %v13204_v4 = vld [vmem:[#allocation8 + $0xeac] sm:$0xf0] }
 0x3b2   : > { %4330 = vmatpush.bf16.msrb.mxu2 %v19737_v0  ;;  %v11254_v0 = vld [vmem:[#allocation8 + $0xfa0] sm:$0xf] }
 0x3b3   : > { %4343 = vmatpush.bf16.msrb.mxu3 %v19738_v8  ;;  %4306 = vmatpush.bf16.msrb.mxu0 %v19739_v33  ;;  %v16188_v8 = vor.u32 %v13168_v42, %v10982_v55  ;;  %v10838_v33 = vld [vmem:[#allocation8 + $0xc60] sm:$0xf]  ;;  %v13156_v55 = vld [vmem:[#allocation8 + $0xd2c] sm:$0xf0] }
 0x3b4   : > { %4319 = vmatpush.bf16.msrb.mxu1 %v19740_v9  ;;  %v13132_v9 = vld [vmem:[#allocation8 + $0xc6c] sm:$0xf0] }
 0x3b5   : > { %v4084_v39 = vpop.f32.mrf.mxu3  ;;  %v16197_v13 = vor.u32 %v13132_v9, %v10838_v33  ;;  %v13192_v42 = vld [vmem:[#allocation8 + $0xe4c] sm:$0xf0]  ;;  %v10790_v33 = vld [vmem:[#allocation8 + $0xc00] sm:$0xf] }
 0x3b6   : > { %4331 = vmatpush.bf16.msrb.mxu2 %v19741_v32  ;;  %v16191_v32 = vor.u32 %v13204_v4, %v11126_v16 }
 0x3b7   : > { %4344 = vmatpush.bf16.msrb.mxu3 %v19742_v1  ;;  %4307 = vmatpush.bf16.msrb.mxu0 %v19743_v37  ;;  %v10966_v1 = vld [vmem:[#allocation8 + $0xd60] sm:$0xf] }
 0x3b8   : > { %4320 = vmatpush.bf16.msrb.mxu1 %v15920_v25  ;;  %v16149_v25 = vor.u32 %v13180_v6, %v11030_v54  ;;  %v11110_v37 = vld [vmem:[#allocation8 + $0xe80] sm:$0xf]  ;;  %v18891_v54 = vperm.slane %v16023_v11, 2 }
 0x3ba   : > { %4332 = vmatpush.bf16.msrb.mxu2 %v19744_v35  ;;  %v13200_v35 = vld [vmem:[#allocation8 + $0xe8c] sm:$0xf0]  ;;  %v4044_v39 = vadd.f32 %v16124_v18, %v18891_v54  ;;  %v11078_v18 = vld [vmem:[#allocation8 + $0xe40] sm:$0xf]  ;;  %v10968_v54 = vld [vmem:[#allocation8 + $0xd70] sm:$0xf0] }
 0x3bb   : > { %4345 = vmatpush.bf16.msrb.mxu3 %v19745_v46  ;;  %4308 = vmatpush.bf16.msrb.mxu0 %v15929_v29  ;;  %v16155_v29 = vor.u32 %v13144_v59, %v10886_v40  ;;  %v13232_v46 = vld [vmem:[#allocation8 + $0xf8c] sm:$0xf0]  ;;  %v10822_v40 = vld [vmem:[#allocation8 + $0xc40] sm:$0xf]  ;;  %v16205_v41 = vor.u32 %v13200_v35, %v11110_v37 }
 0x3bc   : > { %4321 = vmatpush.bf16.msrb.mxu1 %v15932_v7  ;;  %v11286_v7 = vld [vmem:[#allocation8 + $0xfe0] sm:$0xf]  ;;  %v13128_v59 = vld [vmem:[#allocation8 + $0xc4c] sm:$0xf0] }
 0x3bd   : > { %v10918_v37 = vld [vmem:[#allocation8 + $0xd00] sm:$0xf]  ;;  %v13152_v35 = vld [vmem:[#allocation8 + $0xd0c] sm:$0xf0] }
 0x3be   : > { %4333 = vmatpush.bf16.msrb.mxu2 %v15935_v2  ;;  %v13244_v2 = vld [vmem:[#allocation8 + $0xfec] sm:$0xf0] }
 0x3bf   : > { %4346 = vmatpush.bf16.msrb.mxu3 %v15940_v17  ;;  %4309 = vmatpush.bf16.msrb.mxu0 %v15945_v50  ;;  %v10870_v17 = vld [vmem:[#allocation8 + $0xca0] sm:$0xf]  ;;  %v4071_v50 = vpop.f32.mrf.mxu2  ;;  %v16166_v56 = vor.u32 %v13244_v2, %v11286_v7  ;;  %v4095_v5 = vpop.f32.mrf.mxu0  ;;  %v16208_v7 = vor.u32 %v13232_v46, %v11238_v38  ;;  %v16238_v46 = vor.u32 %v13192_v42, %v11078_v18  ;;  %v10888_v42 = vld [vmem:[#allocation8 + $0xcd0] sm:$0xf0] }
 0x3c0   : > { %4322 = vmatpush.bf16.msrb.mxu1 %v15948_v28  ;;  %v16163_v28 = vor.u32 %v13212_v43, %v11158_v58  ;;  %v16169_v27 = vor.u32 %v13140_v53, %v10870_v17  ;;  %v10950_v58 = vld [vmem:[#allocation8 + $0xd40] sm:$0xf]  ;;  %v13160_v43 = vld [vmem:[#allocation8 + $0xd4c] sm:$0xf0]  ;;  %v16211_v53 = vor.u32 %v13128_v59, %v10822_v40  ;;  %v13146_v40 = vld [vmem:[#allocation8 + $0xce4] sm:$0xf] }
 0x3c1   : > { %v11094_v2 = vld [vmem:[#allocation8 + $0xe60] sm:$0xf]  ;;  %v13196_v17 = vld [vmem:[#allocation8 + $0xe6c] sm:$0xf0]  ;;  %v10904_v59 = vld [vmem:[#allocation8 + $0xcf0] sm:$0xf0] }
 0x3c2   : > { %4334 = vmatpush.bf16.msrb.mxu2 %v15951_v60  ;;  %4310 = vmatmul.bf16.vlgmr.msrb.gmra.mxu0 %v16009_v36  ;;  %v13208_v60 = vld [vmem:[#allocation8 + $0xecc] sm:$0xf0]  ;;  %v16173_v36 = vor.u32 %v13172_v23, %v10998_v57  ;;  %v11222_v50 = vld [vmem:[#allocation8 + $0xf60] sm:$0xf]  ;;  %v4018_v23 = vadd.f32 %v16096_v48, %v16084_v51 }
 0x3c3   : > { %5142 = vmatpush.bf16.msra.mxu0 %v16146_v24  ;;  %4347 = vmatpush.bf16.msrb.mxu3 %v15954_v10  ;;  %v13240_v10 = vld [vmem:[#allocation8 + $0xfcc] sm:$0xf0] }
 0x3c4   : > { %5155 = vmatpush.bf16.msra.mxu1 %v16149_v25  ;;  %v16180_v19 = vor.u32 %v13240_v10, %v11270_v62  ;;  %v13228_v57 = vld [vmem:[#allocation8 + $0xf6c] sm:$0xf0]  ;;  %v4096_v10 = vadd.f32 %v4095_v5, %v18890_v61  ;;  %v4031_v9 = vadd.f32 %v16098_v31, %v4018_v23  ;;  %v11256_v61 = vld [vmem:[#allocation8 + $0xfb0] sm:$0xf0] }
 0x3c5   : > { %4323 = vmatmul.bf16.vlgmr.msrb.gmra.mxu1 %v16013_v52  ;;  %v16177_v52 = vor.u32 %v13208_v60, %v11142_v3  ;;  %v16219_v3 = vor.u32 %v13160_v43, %v10950_v58  ;;  %v10806_v60 = vld [vmem:[#allocation8 + $0xc20] sm:$0xf]  ;;  %v13124_v62 = vld [vmem:[#allocation8 + $0xc2c] sm:$0xf0]  ;;  %v16227_v48 = vor.u32 %v13228_v57, %v11222_v50  ;;  %v13178_v58 = vld [vmem:[#allocation8 + $0xde4] sm:$0xf] }
 0x3c6   : > { %4335 = vmatpush.bf16.msrb.mxu2 %v15961_v21  ;;  %v16184_v21 = vor.u32 %v13136_v22, %v10854_v26  ;;  %v16224_v26 = vor.u32 %v13196_v17, %v11094_v2  ;;  %v10934_v22 = vld [vmem:[#allocation8 + $0xd20] sm:$0xf]  ;;  %v16230_v4 = vor.u32 %v13124_v62, %v10806_v60  ;;  %v13120_v5 = vld [vmem:[#allocation8 + $0xc0c] sm:$0xf0]  ;;  %v11032_v2 = vld [vmem:[#allocation8 + $0xdf0] sm:$0xf0] }
 0x3c7   : > { %5143 = vmatpush.bf16.msra.mxu0 %v16155_v29  ;;  %4348 = vmatpush.bf16.msrb.mxu3 %v15965_v20  ;;  %v13236_v20 = vld [vmem:[#allocation8 + $0xfac] sm:$0xf0]  ;;  %v4097_v51 = vpop.f32.mrf.mxu0  ;;  %v11062_v17 = vld [vmem:[#allocation8 + $0xe20] sm:$0xf]  ;;  %v4138_v62 = vmax.f32 %v16055_v30, 0.0 }
 0x3c8   : > { %5156 = vmatpush.bf16.msra.mxu1 %v16159_v34  ;;  %v16194_v49 = vor.u32 %v13236_v20, %v11254_v0  ;;  %v11206_v0 = vld [vmem:[#allocation8 + $0xf40] sm:$0xf]  ;;  %v13224_v20 = vld [vmem:[#allocation8 + $0xf4c] sm:$0xf0]  ;;  %v16254_v51 = vor.u32 %v13178_v58, %v11032_v2  ;;  %v11288_v58 = vld [vmem:[#allocation8 + $0xff0] sm:$0xf0] }
 0x3c9   : > { %4336 = vmatmul.bf16.vlgmr.msrb.gmra.mxu2 %v16025_v14  ;;  %v13164_v14 = vld [vmem:[#allocation8 + $0xd6c] sm:$0xf0] }
 0x3ca   : > { %5168 = vmatpush.bf16.msra.mxu2 %v16163_v28  ;;  %4349 = vmatmul.bf16.vlgmr.msrb.gmra.mxu3 %v16029_v63  ;;  %v4108_v63 = vpop.f32.mrf.mxu1  ;;  %v16201_v6 = vor.u32 %v13164_v14, %v10966_v1  ;;  %v4057_v1 = vadd.f32 %v16126_v12, %v4044_v39  ;;  %v16235_v14 = vor.u32 %v13156_v55, %v10934_v22  ;;  %v13188_v50 = vld [vmem:[#allocation8 + $0xe2c] sm:$0xf0]  ;;  %v11190_v39 = vld [vmem:[#allocation8 + $0xf20] sm:$0xf]  ;;  %v13142_v55 = vld [vmem:[#allocation8 + $0xcc4] sm:$0xf] }
 0x3cb   : > { %5181 = vmatpush.bf16.msra.mxu3 %v16166_v56  ;;  %5144 = vmatpush.bf16.msra.mxu0 %v16169_v27  ;;  %v4109_v38 = vadd.f32 %v4108_v63, %v4096_v10  ;;  %v16242_v12 = vor.u32 %v13224_v20, %v11206_v0  ;;  %v16245_v63 = vor.u32 %v13120_v5, %v10790_v33  ;;  %v13220_v60 = vld [vmem:[#allocation8 + $0xf2c] sm:$0xf0]  ;;  %v4139_v10 = vmax.f32 %v4031_v9, 0.0  ;;  %v11016_v0 = vld [vmem:[#allocation8 + $0xdd0] sm:$0xf0] }
 0x3cc   : > { %5157 = vmatpush.bf16.msra.mxu1 %v16173_v36  ;;  %v4070_v43 = vadd.f32 %v16140_v47, %v4057_v1  ;;  %v4121_v31 = vpop.f32.mrf.mxu2  ;;  %v16249_v47 = vor.u32 %v13152_v35, %v10918_v37  ;;  %v16251_v22 = vor.u32 %v13146_v40, %v10904_v59  ;;  %v16256_v18 = vor.u32 %v13188_v50, %v11062_v17  ;;  %v11046_v33 = vld [vmem:[#allocation8 + $0xe00] sm:$0xf]  ;;  %v13184_v9 = vld [vmem:[#allocation8 + $0xe0c] sm:$0xf0]  ;;  %v13210_v35 = vld [vmem:[#allocation8 + $0xee4] sm:$0xf] }
 0x3cd   : > { %v4122_v57 = vadd.f32 %v4121_v31, %v4109_v38  ;;  %v4134_v23 = vpop.f32.mrf.mxu3  ;;  %v16260_v30 = vor.u32 %v13220_v60, %v11190_v39  ;;  %v11174_v1 = vld [vmem:[#allocation8 + $0xf00] sm:$0xf]  ;;  %v13216_v37 = vld [vmem:[#allocation8 + $0xf0c] sm:$0xf0]  ;;  %v11160_v38 = vld [vmem:[#allocation8 + $0xef0] sm:$0xf0]  ;;  %v16263_v40 = vpack.c.bf16 %v4138_v62, %v4138_v62  ;;  %v16275_v2 = vor.u32 %v13184_v9, %v11046_v33 }
 0x3ce   : > { %5169 = vmatpush.bf16.msra.mxu2 %v16177_v52  ;;  %v4083_v20 = vadd.f32 %v16142_v45, %v4070_v43  ;;  %v16267_v45 = vor.u32 %v13142_v55, %v10888_v42  ;;  %v13242_v59 = vld [vmem:[#allocation8 + $0xfe4] sm:$0xf]  ;;  %v16269_v43 = vpack.c.bf16 %v4139_v10, %v4139_v10  ;;  %v10872_v50 = vld [vmem:[#allocation8 + $0xcb0] sm:$0xf0]  ;;  %v16279_v39 = vor.u32 %v13216_v37, %v11174_v1 }
 0x3cf   : > { %5182 = vmatpush.bf16.msra.mxu3 %v16180_v19  ;;  %5145 = vmatpush.bf16.msra.mxu0 %v16184_v21  ;;  %19746 = vst [vmem:[#allocation24_spill] sm:$0xff] %v16260_v30  ;;  %v4135_v5 = vadd.f32 %v4134_v23, %v4122_v57  ;;  %v13138_v17 = vld [vmem:[#allocation8 + $0xca4] sm:$0xf]  ;;  %v16281_v60 = vor.u32 %v13210_v35, %v11160_v38  ;;  %v11000_v10 = vld [vmem:[#allocation8 + $0xdb0] sm:$0xf0] }
 0x3d0   : > { %5158 = vmatpush.bf16.msra.mxu1 %v16188_v8  ;;  %19747 = vst [vmem:[#allocation25_spill] sm:$0xff] %v16267_v45  ;;  %v4140_v57 = vmax.f32 %v4083_v20, 0.0  ;;  %v13170_v62 = vld [vmem:[#allocation8 + $0xda4] sm:$0xf]  ;;  %v11144_v33 = vld [vmem:[#allocation8 + $0xed0] sm:$0xf0]  ;;  %v16287_v20 = vor.u32 %v13138_v17, %v10872_v50 }
 0x3d1   : > { %19749 = vst [vmem:[#allocation28_spill] sm:$0xff] %v16275_v2  ;;  %v4141_v55 = vmax.f32 %v4135_v5, 0.0  ;;  %v13238_v9 = vld [vmem:[#allocation8 + $0xfc4] sm:$0xf]  ;;  %v16291_v1 = vor.u32 %v13170_v62, %v11000_v10  ;;  %v10856_v37 = vld [vmem:[#allocation8 + $0xc90] sm:$0xf0] }
 0x3d2   : > { %5170 = vmatpush.bf16.msra.mxu2 %v16191_v32  ;;  %v4110_v16 = vpop.f32.mrf.mxu1  ;;  %19750 = vst [vmem:[#allocation30_spill] sm:$0xff] %v16279_v39  ;;  %v13134_v5 = vld [vmem:[#allocation8 + $0xc84] sm:$0xf]  ;;  %v16293_v35 = vpack.c.bf16 %v4140_v57, %v4140_v57  ;;  %v11128_v10 = vld [vmem:[#allocation8 + $0xeb0] sm:$0xf0] }
 0x3d3   : > { %5183 = vmatpush.bf16.msra.mxu3 %v16194_v49  ;;  %5146 = vmatpush.bf16.msra.mxu0 %v16197_v13  ;;  %v13174_v16 = vld [vmem:[#allocation8 + $0xdc4] sm:$0xf]  ;;  %19751 = vst [vmem:[#allocation27_spill] sm:$0xff] %v16281_v60  ;;  %v16299_v17 = vpack.c.bf16 %v4141_v55, %v4141_v55  ;;  %v16306_v57 = vor.u32 %v13134_v5, %v10856_v37 }
 0x3d4   : > { %5159 = vmatpush.bf16.msra.mxu1 %v16201_v6  ;;  %v16273_v31 = vor.u32 %v13174_v16, %v11016_v0  ;;  %v4123_v23 = vpop.f32.mrf.mxu2  ;;  %v16284_v16 = vor.u32 %v13242_v59, %v11288_v58  ;;  %v13206_v0 = vld [vmem:[#allocation8 + $0xec4] sm:$0xf]  ;;  %19753 = vst [vmem:[#allocation32_spill] sm:$0xff] %v16287_v20  ;;  %v10984_v58 = vld [vmem:[#allocation8 + $0xd90] sm:$0xf0] }
 0x3d5   : > { %v4136_v42 = vpop.f32.mrf.mxu3  ;;  %v11272_v23 = vld [vmem:[#allocation8 + $0xfd0] sm:$0xf0]  ;;  %19754 = vst [vmem:[#allocation34_spill] sm:$0xff] %v16291_v1  ;;  %v16297_v38 = vor.u32 %v13206_v0, %v11144_v33  ;;  %v13166_v59 = vld [vmem:[#allocation8 + $0xd84] sm:$0xf] }
 0x3d6   : > { %5171 = vmatpush.bf16.msra.mxu2 %v16205_v41  ;;  %19748 = vst [vmem:[#allocation26_spill] sm:$0xff] %v16273_v31  ;;  %v16302_v50 = vor.u32 %v13238_v9, %v11272_v23  ;;  %v13202_v62 = vld [vmem:[#allocation8 + $0xea4] sm:$0xf]  ;;  %v16310_v55 = vor.u32 %v13166_v59, %v10984_v58  ;;  %v10840_v33 = vld [vmem:[#allocation8 + $0xc70] sm:$0xf0] }
 0x3d7   : > { %5184 = vmatpush.bf16.msra.mxu3 %v16208_v7  ;;  %5147 = vmatpush.bf16.msra.mxu0 %v16211_v53  ;;  %19752 = vst [vmem:[#allocation29_spill] sm:$0xff] %v16284_v16  ;;  %v13234_v42 = vld [vmem:[#allocation8 + $0xfa4] sm:$0xf]  ;;  %v16313_v9 = vor.u32 %v13202_v62, %v11128_v10  ;;  %v11240_v62 = vld [vmem:[#allocation8 + $0xf90] sm:$0xf0] }
 0x3d8   : > { %5160 = vmatpush.bf16.msra.mxu1 %v16219_v3  ;;  %19755 = vst [vmem:[#allocation31_spill] sm:$0xff] %v16297_v38  ;;  %v13130_v0 = vld [vmem:[#allocation8 + $0xc64] sm:$0xf]  ;;  %v16316_v37 = vor.u32 %v13234_v42, %v11256_v61  ;;  %v16327_v42 = vor.u32 %v13198_v15, %v11112_v44  ;;  %v10808_v15 = vld [vmem:[#allocation8 + $0xc30] sm:$0xf0] }
 0x3d9   : > { %19756 = vst [vmem:[#allocation33_spill] sm:$0xff] %v16302_v50  ;;  %v13162_v23 = vld [vmem:[#allocation8 + $0xd64] sm:$0xf]  ;;  %v16321_v58 = vor.u32 %v13130_v0, %v10840_v33  ;;  %v11096_v33 = vld [vmem:[#allocation8 + $0xe70] sm:$0xf0] }
 0x3da   : > { %5172 = vmatpush.bf16.msra.mxu2 %v16224_v26  ;;  %19757 = vst [vmem:[#allocation36_spill] sm:$0xff] %v16306_v57  ;;  %v16324_v10 = vor.u32 %v13162_v23, %v10968_v54  ;;  %v13194_v0 = vld [vmem:[#allocation8 + $0xe64] sm:$0xf]  ;;  %v11224_v23 = vld [vmem:[#allocation8 + $0xf70] sm:$0xf0] }
 0x3db   : > { %5185 = vmatpush.bf16.msra.mxu3 %v16227_v48  ;;  %5148 = vmatpush.bf16.msra.mxu0 %v16230_v4  ;;  %19758 = vst [vmem:[#allocation38_spill] sm:$0xff] %v16310_v55  ;;  %v13226_v54 = vld [vmem:[#allocation8 + $0xf64] sm:$0xf] }
 0x3dc   : > { %5161 = vmatpush.bf16.msra.mxu1 %v16235_v14  ;;  %19759 = vst [vmem:[#allocation35_spill] sm:$0xff] %v16313_v9  ;;  %v13122_v44 = vld [vmem:[#allocation8 + $0xc24] sm:$0xf] }
 0x3dd   : > { %19760 = vst [vmem:[#allocation37_spill] sm:$0xff] %v16316_v37 }
 0x3de   : > { %5173 = vmatpush.bf16.msra.mxu2 %v16238_v46  ;;  %19762 = vst [vmem:[#allocation39_spill] sm:$0xff] %v16321_v58 }
 0x3df   : > { %5186 = vmatpush.bf16.msra.mxu3 %v16242_v12  ;;  %5149 = vmatpush.bf16.msra.mxu0 %v16245_v63  ;;  %v4155_v5 = vpop.f32.mrf.mxu0  ;;  %19763 = vst [vmem:[#allocation40_spill] sm:$0xff] %v16324_v10 }
 0x3e0   : > { %5162 = vmatpush.bf16.msra.mxu1 %v16249_v47  ;;  %19764 = vst [vmem:[#allocation41_spill] sm:$0xff] %v16327_v42 }
 0x3e2   : > { %5174 = vmatpush.bf16.msra.mxu2 %v16256_v18  ;;  %5150 = vmatmul.bf16.vlgmr.msra.gmra.mxu0 %v16263_v40  ;;  %v4168_v59 = vpop.f32.mrf.mxu1 }
 0x3e3   : > { %5194 = vmatpush.bf16.msrb.mxu0 %v16251_v22  ;;  %5187 = vmatpush.bf16.msra.mxu3 %v16260_v30  ;;  %v13175_v30 = vld [vmem:[#allocation8 + $0xdcc] sm:$0xf] }
 0x3e4   : > { %5207 = vmatpush.bf16.msrb.mxu1 %v16254_v51 }
 0x3e5   : > { %5163 = vmatmul.bf16.vlgmr.msra.gmra.mxu1 %v16269_v43 }
 0x3e6   : > { %5175 = vmatpush.bf16.msra.mxu2 %v16275_v2 }
 0x3e7   : > { %5195 = vmatpush.bf16.msrb.mxu0 %v16267_v45  ;;  %5188 = vmatpush.bf16.msra.mxu3 %v16279_v39  ;;  %v13186_v39 = vld [vmem:[#allocation8 + $0xe24] sm:$0xf]  ;;  %v10896_v45 = vld [vmem:[#allocation8 + $0xcd8] sm:$0xf0] }
 0x3e8   : > { %5208 = vmatpush.bf16.msrb.mxu1 %v16273_v31 }
 0x3e9   : > { %5176 = vmatmul.bf16.vlgmr.msra.gmra.mxu2 %v16293_v35 }
 0x3ea   : > { %5220 = vmatpush.bf16.msrb.mxu2 %v16281_v60  ;;  %5189 = vmatmul.bf16.vlgmr.msra.gmra.mxu3 %v16299_v17  ;;  %v13158_v60 = vld [vmem:[#allocation8 + $0xd44] sm:$0xf] }
 0x3eb   : > { %5233 = vmatpush.bf16.msrb.mxu3 %v16284_v16  ;;  %5196 = vmatpush.bf16.msrb.mxu0 %v16287_v20  ;;  %v19761_v20 = vperm.slane %v16023_v11, 0  ;;  %v10824_v16 = vld [vmem:[#allocation8 + $0xc50] sm:$0xf0] }
 0x3ec   : > { %5209 = vmatpush.bf16.msrb.mxu1 %v16291_v1 }
 0x3ed   : > { %v4156_v1 = vadd.f32 %v4155_v5, %v19761_v20  ;;  %v10952_v20 = vld [vmem:[#allocation8 + $0xd50] sm:$0xf0] }
 0x3ee   : > { %5221 = vmatpush.bf16.msrb.mxu2 %v16297_v38  ;;  %v13230_v38 = vld [vmem:[#allocation8 + $0xf84] sm:$0xf] }
 0x3ef   : > { %5234 = vmatpush.bf16.msrb.mxu3 %v16302_v50  ;;  %5197 = vmatpush.bf16.msrb.mxu0 %v16306_v57  ;;  %v13126_v50 = vld [vmem:[#allocation8 + $0xc44] sm:$0xf]  ;;  %v4169_v61 = vadd.f32 %v4168_v59, %v4156_v1  ;;  %v16330_v5 = vor.u32 %v13230_v38, %v11240_v62  ;;  %v16336_v1 = vor.u32 %v13158_v60, %v10952_v20  ;;  %v10936_v62 = vld [vmem:[#allocation8 + $0xd30] sm:$0xf0] }
 0x3f0   : > { %5210 = vmatpush.bf16.msrb.mxu1 %v16310_v55  ;;  %v16333_v55 = vor.u32 %v13126_v50, %v10824_v16  ;;  %v16339_v59 = vor.u32 %v13194_v0, %v11096_v33  ;;  %v13154_v38 = vld [vmem:[#allocation8 + $0xd24] sm:$0xf]  ;;  %v11080_v50 = vld [vmem:[#allocation8 + $0xe50] sm:$0xf0]  ;;  %v16345_v60 = vor.u32 %v13122_v44, %v10808_v15  ;;  %v4181_v44 = vpop.f32.mrf.mxu2 }
 0x3f1   : > { %19765 = vst [vmem:[#allocation42_spill] sm:$0xff] %v16330_v5  ;;  %v13190_v16 = vld [vmem:[#allocation8 + $0xe44] sm:$0xf]  ;;  %v16348_v0 = vor.u32 %v13154_v38, %v10936_v62  ;;  %v10792_v33 = vld [vmem:[#allocation8 + $0xc10] sm:$0xf0]  ;;  %v4182_v38 = vadd.f32 %v4181_v44, %v4169_v61  ;;  %v4194_v62 = vpop.f32.mrf.mxu3 }
 0x3f2   : > { %5222 = vmatpush.bf16.msrb.mxu2 %v16313_v9  ;;  %19766 = vst [vmem:[#allocation43_spill] sm:$0xff] %v16333_v55  ;;  %v4170_v9 = vpop.f32.mrf.mxu1  ;;  %v13222_v20 = vld [vmem:[#allocation8 + $0xf44] sm:$0xf]  ;;  %v13145_v44 = vld [vmem:[#allocation8 + $0xcd4] sm:$0xf0] }
 0x3f3   : > { %5235 = vmatpush.bf16.msrb.mxu3 %v16316_v37  ;;  %5198 = vmatpush.bf16.msrb.mxu0 %v16321_v58  ;;  %19767 = vst [vmem:[#allocation44_spill] sm:$0xff] %v16336_v1  ;;  %v4157_v37 = vpop.f32.mrf.mxu0  ;;  %v16342_v58 = vor.u32 %v13226_v54, %v11224_v23  ;;  %v13118_v57 = vld [vmem:[#allocation8 + $0xc04] sm:$0xf]  ;;  %v10910_v54 = vld [vmem:[#allocation8 + $0xce8] sm:$0xf] }
 0x3f4   : > { %5211 = vmatpush.bf16.msrb.mxu1 %v16324_v10  ;;  %19768 = vst [vmem:[#allocation45_spill] sm:$0xff] %v16339_v59  ;;  %v11208_v10 = vld [vmem:[#allocation8 + $0xf50] sm:$0xf0]  ;;  %v16351_v37 = vor.u32 %v13190_v16, %v11080_v50  ;;  %v13149_v9 = vld [vmem:[#allocation8 + $0xcf4] sm:$0xf0]  ;;  %v16357_v2 = vor.u32 %v13118_v57, %v10792_v33 }
 0x3f5   : > { %19769 = vst [vmem:[#allocation46_spill] sm:$0xff] %v16342_v58  ;;  %v11038_v23 = vld [vmem:[#allocation8 + $0xde8] sm:$0xf]  ;;  %v16354_v15 = vor.u32 %v13222_v20, %v11208_v10  ;;  %v11192_v16 = vld [vmem:[#allocation8 + $0xf30] sm:$0xf0]  ;;  %v16362_v31 = vor.u32 %v13149_v9, %v10910_v54  ;;  %v16364_v10 = vadd.f32 %v4194_v62, %v4182_v38 }
 0x3f6   : > { %5223 = vmatpush.bf16.msrb.mxu2 %v16327_v42  ;;  %19770 = vst [vmem:[#allocation47_spill] sm:$0xff] %v16345_v60  ;;  %v13150_v42 = vld [vmem:[#allocation8 + $0xd04] sm:$0xf]  ;;  %v11022_v57 = vld [vmem:[#allocation8 + $0xdc8] sm:$0xf] }
 0x3f7   : > { %5236 = vmatpush.bf16.msrb.mxu3 %v16330_v5  ;;  %5199 = vmatpush.bf16.msrb.mxu0 %v16333_v55  ;;  %19771 = vst [vmem:[#allocation48_spill] sm:$0xff] %v16348_v0  ;;  %v10920_v5 = vld [vmem:[#allocation8 + $0xd10] sm:$0xf0]  ;;  %v13181_v55 = vld [vmem:[#allocation8 + $0xdf4] sm:$0xf0] }
 0x3f8   : > { %5212 = vmatpush.bf16.msrb.mxu1 %v16336_v1  ;;  %19772 = vst [vmem:[#allocation53_spill] sm:$0xff] %v16351_v37  ;;  %v11064_v1 = vld [vmem:[#allocation8 + $0xe30] sm:$0xf0]  ;;  %v16360_v50 = vor.u32 %v13150_v42, %v10920_v5  ;;  %v16367_v20 = vor.u32 %v13181_v55, %v11038_v23  ;;  %v13177_v33 = vld [vmem:[#allocation8 + $0xdd4] sm:$0xf0] }
 0x3f9   : > { %19773 = vst [vmem:[#allocation54_spill] sm:$0xff] %v16354_v15  ;;  %v16369_v61 = vor.u32 %v13186_v39, %v11064_v1  ;;  %v13182_v42 = vld [vmem:[#allocation8 + $0xe04] sm:$0xf]  ;;  %v11048_v5 = vld [vmem:[#allocation8 + $0xe10] sm:$0xf0] }
 0x3fa   : > { %5224 = vmatpush.bf16.msrb.mxu2 %v16339_v59  ;;  %19774 = vst [vmem:[#allocation49_spill] sm:$0xff] %v16357_v2  ;;  %v13218_v59 = vld [vmem:[#allocation8 + $0xf24] sm:$0xf]  ;;  %v11176_v9 = vld [vmem:[#allocation8 + $0xf10] sm:$0xf0]  ;;  %v16383_v23 = vor.u32 %v13182_v42, %v11048_v5 }
 0x3fb   : > { %5237 = vmatpush.bf16.msrb.mxu3 %v16342_v58  ;;  %5200 = vmatpush.bf16.msrb.mxu0 %v16345_v60  ;;  %19775 = vst [vmem:[#allocation50_spill] sm:$0xff] %v16360_v50  ;;  %v10894_v58 = vld [vmem:[#allocation8 + $0xcc8] sm:$0xf]  ;;  %v16372_v60 = vor.u32 %v13218_v59, %v11192_v16  ;;  %v13214_v54 = vld [vmem:[#allocation8 + $0xf04] sm:$0xf]  ;;  %v16381_v59 = vor.u32 %v13177_v33, %v11022_v57 }
 0x3fc   : > { %5213 = vmatpush.bf16.msrb.mxu1 %v16348_v0  ;;  %19776 = vst [vmem:[#allocation55_spill] sm:$0xff] %v16362_v31  ;;  %v11166_v38 = vld [vmem:[#allocation8 + $0xee8] sm:$0xf]  ;;  %v13213_v62 = vld [vmem:[#allocation8 + $0xef4] sm:$0xf0]  ;;  %v16377_v39 = vor.u32 %v13145_v44, %v10894_v58 }
 0x3fd   : > { %19777 = vst [vmem:[#allocation56_spill] sm:$0xff] %v16367_v20  ;;  %v11294_v55 = vld [vmem:[#allocation8 + $0xfe8] sm:$0xf]  ;;  %v13245_v1 = vld [vmem:[#allocation8 + $0xff4] sm:$0xf0]  ;;  %v16389_v58 = vor.u32 %v13213_v62, %v11166_v38 }
 0x3fe   : > { %5225 = vmatpush.bf16.msrb.mxu2 %v16351_v37  ;;  %19778 = vst [vmem:[#allocation51_spill] sm:$0xff] %v16369_v61  ;;  %v10878_v16 = vld [vmem:[#allocation8 + $0xca8] sm:$0xf]  ;;  %v16392_v57 = vor.u32 %v13245_v1, %v11294_v55  ;;  %v13209_v42 = vld [vmem:[#allocation8 + $0xed4] sm:$0xf0] }
 0x3ff   : > { %5238 = vmatpush.bf16.msrb.mxu3 %v16354_v15  ;;  %19779 = vst [vmem:[#allocation52_spill] sm:$0xff] %v16372_v60  ;;  %5201 = vmatpush.bf16.msrb.mxu0 %v16357_v2  ;;  %v13141_v2 = vld [vmem:[#allocation8 + $0xcb4] sm:$0xf0]  ;;  %v4183_v15 = vpop.f32.mrf.mxu2  ;;  %v11006_v44 = vld [vmem:[#allocation8 + $0xda8] sm:$0xf] }
 0x400   : > { %5214 = vmatpush.bf16.msrb.mxu1 %v16360_v50  ;;  %19780 = vst [vmem:[#allocation57_spill] sm:$0xff] %v16377_v39  ;;  %v13173_v50 = vld [vmem:[#allocation8 + $0xdb4] sm:$0xf0]  ;;  %v11150_v33 = vld [vmem:[#allocation8 + $0xec8] sm:$0xf]  ;;  %v16395_v5 = vor.u32 %v13141_v2, %v10878_v16 }
 0x401   : > { %19781 = vst [vmem:[#allocation58_spill] sm:$0xff] %v16381_v59  ;;  %v11278_v15 = vld [vmem:[#allocation8 + $0xfc8] sm:$0xf]  ;;  %v16403_v38 = vor.u32 %v13209_v42, %v11150_v33  ;;  %v13169_v55 = vld [vmem:[#allocation8 + $0xd94] sm:$0xf0] }
 0x402   : > { %5226 = vmatpush.bf16.msrb.mxu2 %v16369_v61  ;;  %19782 = vst [vmem:[#allocation59_spill] sm:$0xff] %v16383_v23  ;;  %5202 = vmatmul.bf16.vlgmr.msrb.gmra.mxu0 %v16263_v40  ;;  %v10990_v62 = vld [vmem:[#allocation8 + $0xd88] sm:$0xf]  ;;  %v13205_v16 = vld [vmem:[#allocation8 + $0xeb4] sm:$0xf0] }
 0x403   : > { %5246 = vmatpush.bf16.msra.mxu0 %v16362_v31  ;;  %5239 = vmatpush.bf16.msrb.mxu3 %v16372_v60  ;;  %v16387_v31 = vor.u32 %v13214_v54, %v11176_v9  ;;  %19784 = vst [vmem:[#allocation61_spill] sm:$0xff] %v16389_v58  ;;  %v13241_v60 = vld [vmem:[#allocation8 + $0xfd4] sm:$0xf0]  ;;  %v16399_v54 = vor.u32 %v13173_v50, %v11006_v44  ;;  %v10862_v9 = vld [vmem:[#allocation8 + $0xc88] sm:$0xf] }
 0x404   : > { %5259 = vmatpush.bf16.msra.mxu1 %v16367_v20  ;;  %v4196_v20 = vpop.f32.mrf.mxu3  ;;  %19785 = vst [vmem:[#allocation62_spill] sm:$0xff] %v16392_v57  ;;  %v16406_v2 = vor.u32 %v13241_v60, %v11278_v15  ;;  %v11134_v1 = vld [vmem:[#allocation8 + $0xea8] sm:$0xf]  ;;  %v16414_v33 = vor.u32 %v13169_v55, %v10990_v62  ;;  %v4220_v62 = vpop.f32.mrf.mxu1  ;;  %v13143_v0 = vld [vmem:[#allocation8 + $0xccc] sm:$0xf] }
 0x405   : > { %19783 = vst [vmem:[#allocation60_spill] sm:$0xff] %v16387_v31  ;;  %5215 = vmatmul.bf16.vlgmr.msrb.gmra.mxu1 %v16269_v43  ;;  %v13137_v20 = vld [vmem:[#allocation8 + $0xc94] sm:$0xf0]  ;;  %v11262_v44 = vld [vmem:[#allocation8 + $0xfa8] sm:$0xf]  ;;  %v16417_v60 = vor.u32 %v13205_v16, %v11134_v1 }
 0x406   : > { %19786 = vst [vmem:[#allocation63_spill] sm:$0xff] %v16395_v5  ;;  %5227 = vmatpush.bf16.msrb.mxu2 %v16383_v23  ;;  %v16410_v50 = vor.u32 %v13137_v20, %v10862_v9  ;;  %v10846_v42 = vld [vmem:[#allocation8 + $0xc68] sm:$0xf]  ;;  %v4207_v9 = vpop.f32.mrf.mxu0  ;;  %v13201_v23 = vld [vmem:[#allocation8 + $0xe94] sm:$0xf0] }
 0x407   : > { %5247 = vmatpush.bf16.msra.mxu0 %v16377_v39  ;;  %19787 = vst [vmem:[#allocation64_spill] sm:$0xff] %v16399_v54  ;;  %5240 = vmatpush.bf16.msrb.mxu3 %v16387_v31  ;;  %v13237_v31 = vld [vmem:[#allocation8 + $0xfb4] sm:$0xf0]  ;;  %v10974_v15 = vld [vmem:[#allocation8 + $0xd68] sm:$0xf] }
 0x408   : > { %5260 = vmatpush.bf16.msra.mxu1 %v16381_v59  ;;  %19788 = vst [vmem:[#allocation65_spill] sm:$0xff] %v16403_v38  ;;  %v16420_v20 = vor.u32 %v13237_v31, %v11262_v44  ;;  %v19794_v59 = vperm.slane %v16023_v11, 1  ;;  %v13233_v1 = vld [vmem:[#allocation8 + $0xf94] sm:$0xf0]  ;;  %v10798_v61 = vld [vmem:[#allocation8 + $0xc08] sm:$0xf] }
 0x409   : > { %19789 = vst [vmem:[#allocation66_spill] sm:$0xff] %v16406_v2  ;;  %5228 = vmatmul.bf16.vlgmr.msrb.gmra.mxu2 %v16293_v35  ;;  %v13129_v39 = vld [vmem:[#allocation8 + $0xc54] sm:$0xf0] }
 0x40a   : > { %5272 = vmatpush.bf16.msra.mxu2 %v16389_v58  ;;  %19790 = vst [vmem:[#allocation67_spill] sm:$0xff] %v16410_v50  ;;  %5241 = vmatmul.bf16.vlgmr.msrb.gmra.mxu3 %v16299_v17  ;;  %v13165_v58 = vld [vmem:[#allocation8 + $0xd74] sm:$0xf0] }
 0x40b   : > { %5285 = vmatpush.bf16.msra.mxu3 %v16392_v57  ;;  %5248 = vmatpush.bf16.msra.mxu0 %v16395_v5  ;;  %19791 = vst [vmem:[#allocation68_spill] sm:$0xff] %v16414_v33  ;;  %v13133_v57 = vld [vmem:[#allocation8 + $0xc74] sm:$0xf0]  ;;  %v11118_v5 = vld [vmem:[#allocation8 + $0xe88] sm:$0xf]  ;;  %v16428_v16 = vor.u32 %v13165_v58, %v10974_v15 }
 0x40c   : > { %5261 = vmatpush.bf16.msra.mxu1 %v16399_v54  ;;  %19792 = vst [vmem:[#allocation69_spill] sm:$0xff] %v16417_v60  ;;  %v4208_v54 = vadd.f32 %v4207_v9, %v19794_v59  ;;  %v16425_v55 = vor.u32 %v13133_v57, %v10846_v42  ;;  %v16433_v44 = vor.u32 %v13201_v23, %v11118_v5  ;;  %v10958_v59 = vld [vmem:[#allocation8 + $0xd48] sm:$0xf]  ;;  %v13161_v9 = vld [vmem:[#allocation8 + $0xd54] sm:$0xf0] }
 0x40d   : > { %19793 = vst [vmem:[#allocation70_spill] sm:$0xff] %v16420_v20  ;;  %v11102_v42 = vld [vmem:[#allocation8 + $0xe68] sm:$0xf]  ;;  %v13125_v5 = vld [vmem:[#allocation8 + $0xc34] sm:$0xf0] }
 0x40e   : > { %5273 = vmatpush.bf16.msra.mxu2 %v16403_v38  ;;  %19795 = vst [vmem:[#allocation71_spill] sm:$0xff] %v16425_v55  ;;  %v11246_v38 = vld [vmem:[#allocation8 + $0xf88] sm:$0xf]  ;;  %v16430_v31 = vadd.f32 %v4220_v62, %v4208_v54  ;;  %v16442_v54 = vor.u32 %v13161_v9, %v10958_v59 }
 0x40f   : > { %5286 = vmatpush.bf16.msra.mxu3 %v16406_v2  ;;  %5249 = vmatpush.bf16.msra.mxu0 %v16410_v50  ;;  %19796 = vst [vmem:[#allocation72_spill] sm:$0xff] %v16428_v16  ;;  %v10830_v2 = vld [vmem:[#allocation8 + $0xc48] sm:$0xf]  ;;  %v16436_v57 = vor.u32 %v13233_v1, %v11246_v38  ;;  %v13197_v50 = vld [vmem:[#allocation8 + $0xe74] sm:$0xf0] }
 0x410   : > { %5262 = vmatpush.bf16.msra.mxu1 %v16414_v33  ;;  %19797 = vst [vmem:[#allocation73_spill] sm:$0xff] %v16433_v44  ;;  %v16439_v58 = vor.u32 %v13129_v39, %v10830_v2  ;;  %v11230_v15 = vld [vmem:[#allocation8 + $0xf68] sm:$0xf]  ;;  %v13229_v33 = vld [vmem:[#allocation8 + $0xf74] sm:$0xf0]  ;;  %v16445_v62 = vor.u32 %v13197_v50, %v11102_v42 }
 0x411   : > { %19798 = vst [vmem:[#allocation74_spill] sm:$0xff] %v16436_v57  ;;  %v10814_v23 = vld [vmem:[#allocation8 + $0xc28] sm:$0xf]  ;;  %v13157_v1 = vld [vmem:[#allocation8 + $0xd34] sm:$0xf0] }
 0x412   : > { %5274 = vmatpush.bf16.msra.mxu2 %v16417_v60  ;;  %19799 = vst [vmem:[#allocation75_spill] sm:$0xff] %v16439_v58  ;;  %v10942_v38 = vld [vmem:[#allocation8 + $0xd28] sm:$0xf]  ;;  %v13193_v2 = vld [vmem:[#allocation8 + $0xe54] sm:$0xf0]  ;;  %v4222_v60 = vpop.f32.mrf.mxu1  ;;  %v16451_v59 = vor.u32 %v13125_v5, %v10814_v23  ;;  %v16460_v23 = vpop.f32.mrf.mxu2 }
 0x413   : > { %5287 = vmatpush.bf16.msra.mxu3 %v16420_v20  ;;  %5250 = vmatpush.bf16.msra.mxu0 %v16425_v55  ;;  %19800 = vst [vmem:[#allocation76_spill] sm:$0xff] %v16442_v54  ;;  %v4209_v20 = vpop.f32.mrf.mxu0  ;;  %v16448_v55 = vor.u32 %v13229_v33, %v11230_v15  ;;  %v11086_v39 = vld [vmem:[#allocation8 + $0xe48] sm:$0xf]  ;;  %v16454_v50 = vor.u32 %v13157_v1, %v10942_v38  ;;  %v13121_v42 = vld [vmem:[#allocation8 + $0xc14] sm:$0xf0]  ;;  %v16464_v1 = vpop.f32.mrf.mxu3 }
 0x414   : > { %5263 = vmatpush.bf16.msra.mxu1 %v16428_v16  ;;  %19801 = vst [vmem:[#allocation77_spill] sm:$0xff] %v16445_v62  ;;  %v11214_v9 = vld [vmem:[#allocation8 + $0xf48] sm:$0xf]  ;;  %v13225_v16 = vld [vmem:[#allocation8 + $0xf54] sm:$0xf0]  ;;  %v16457_v33 = vor.u32 %v13193_v2, %v11086_v39  ;;  %v16467_v37 = vor.u32 %v13121_v42, %v10798_v61 }
 0x415   : > { %19802 = vst [vmem:[#allocation78_spill] sm:$0xff] %v16448_v55  ;;  %v13147_v20 = vld [vmem:[#allocation8 + $0xcec] sm:$0xf]  ;;  %v10912_v60 = vld [vmem:[#allocation8 + $0xcf8] sm:$0xf0]  ;;  %v16462_v5 = vor.u32 %v13225_v16, %v11214_v9 }
 0x416   : > { %5275 = vmatpush.bf16.msra.mxu2 %v16433_v44  ;;  %19803 = vst [vmem:[#allocation79_spill] sm:$0xff] %v16451_v59  ;;  %v10926_v44 = vld [vmem:[#allocation8 + $0xd08] sm:$0xf]  ;;  %v13179_v15 = vld [vmem:[#allocation8 + $0xdec] sm:$0xf] }
 0x417   : > { %5288 = vmatpush.bf16.msra.mxu3 %v16436_v57  ;;  %5251 = vmatpush.bf16.msra.mxu0 %v16439_v58  ;;  %19804 = vst [vmem:[#allocation80_spill] sm:$0xff] %v16454_v50  ;;  %v13153_v57 = vld [vmem:[#allocation8 + $0xd14] sm:$0xf0]  ;;  %v11040_v58 = vld [vmem:[#allocation8 + $0xdf8] sm:$0xf0] }
 0x418   : > { %5264 = vmatpush.bf16.msra.mxu1 %v16442_v54  ;;  %19805 = vst [vmem:[#allocation81_spill] sm:$0xff] %v16462_v5  ;;  %v11070_v54 = vld [vmem:[#allocation8 + $0xe28] sm:$0xf]  ;;  %v13189_v38 = vld [vmem:[#allocation8 + $0xe34] sm:$0xf0]  ;;  %v16475_v16 = vor.u32 %v13179_v15, %v11040_v58  ;;  %v16485_v58 = vor.u32 %v13143_v0, %v10896_v45 }
 0x419   : > { %19806 = vst [vmem:[#allocation82_spill] sm:$0xff] %v16467_v37  ;;  %v11198_v39 = vld [vmem:[#allocation8 + $0xf28] sm:$0xf]  ;;  %v13221_v2 = vld [vmem:[#allocation8 + $0xf34] sm:$0xf0]  ;;  %v16477_v9 = vor.u32 %v13189_v38, %v11070_v54 }
 0x41a   : > { %5276 = vmatpush.bf16.msra.mxu2 %v16445_v62  ;;  %v16470_v62 = vor.u32 %v13153_v57, %v10926_v44  ;;  %19809 = vst [vmem:[#allocation85_spill] sm:$0xff] %v16475_v16  ;;  %v16480_v61 = vor.u32 %v13221_v2, %v11198_v39  ;;  %v11054_v42 = vld [vmem:[#allocation8 + $0xe08] sm:$0xf]  ;;  %v13217_v57 = vld [vmem:[#allocation8 + $0xf14] sm:$0xf0] }
 0x41b   : > { %5289 = vmatpush.bf16.msra.mxu3 %v16448_v55  ;;  %5252 = vmatpush.bf16.msra.mxu0 %v16451_v59  ;;  %v16472_v55 = vor.u32 %v13147_v20, %v10912_v60  ;;  %19810 = vst [vmem:[#allocation86_spill] sm:$0xff] %v16477_v9  ;;  %v11024_v59 = vld [vmem:[#allocation8 + $0xdd8] sm:$0xf0]  ;;  %v11182_v44 = vld [vmem:[#allocation8 + $0xf08] sm:$0xf] }
 0x41c   : > { %5265 = vmatpush.bf16.msra.mxu1 %v16454_v50  ;;  %19807 = vst [vmem:[#allocation83_spill] sm:$0xff] %v16470_v62  ;;  %v13185_v50 = vld [vmem:[#allocation8 + $0xe14] sm:$0xf0]  ;;  %v13211_v20 = vld [vmem:[#allocation8 + $0xeec] sm:$0xf]  ;;  %v16489_v38 = vor.u32 %v13175_v30, %v11024_v59 }
 0x41d   : > { %19808 = vst [vmem:[#allocation84_spill] sm:$0xff] %v16472_v55  ;;  %v11168_v60 = vld [vmem:[#allocation8 + $0xef8] sm:$0xf0]  ;;  %v13243_v54 = vld [vmem:[#allocation8 + $0xfec] sm:$0xf]  ;;  %v16491_v39 = vor.u32 %v13185_v50, %v11054_v42 }
 0x41e   : > { %5277 = vmatpush.bf16.msra.mxu2 %v16457_v33  ;;  %19811 = vst [vmem:[#allocation87_spill] sm:$0xff] %v16480_v61  ;;  %v11296_v15 = vld [vmem:[#allocation8 + $0xff8] sm:$0xf0]  ;;  %v13139_v2 = vld [vmem:[#allocation8 + $0xcac] sm:$0xf]  ;;  %v16497_v45 = vor.u32 %v13211_v20, %v11168_v60 }
 0x41f   : > { %5290 = vmatpush.bf16.msra.mxu3 %v16462_v5  ;;  %5253 = vmatpush.bf16.msra.mxu0 %v16467_v37  ;;  %19812 = vst [vmem:[#allocation88_spill] sm:$0xff] %v16485_v58  ;;  %v10880_v37 = vld [vmem:[#allocation8 + $0xcb8] sm:$0xf0]  ;;  %v4235_v5 = vpop.f32.mrf.mxu2  ;;  %v13171_v0 = vld [vmem:[#allocation8 + $0xdac] sm:$0xf]  ;;  %v16500_v30 = vor.u32 %v13243_v54, %v11296_v15 }
 0x420   : > { %5266 = vmatpush.bf16.msra.mxu1 %v16470_v62  ;;  %19813 = vst [vmem:[#allocation89_spill] sm:$0xff] %v16489_v38  ;;  %v11008_v62 = vld [vmem:[#allocation8 + $0xdb8] sm:$0xf0]  ;;  %v13207_v59 = vld [vmem:[#allocation8 + $0xecc] sm:$0xf]  ;;  %v16503_v42 = vor.u32 %v13139_v2, %v10880_v37 }
 0x421   : > { %19814 = vst [vmem:[#allocation90_spill] sm:$0xff] %v16491_v39  ;;  %v11152_v50 = vld [vmem:[#allocation8 + $0xed8] sm:$0xf0]  ;;  %v13239_v5 = vld [vmem:[#allocation8 + $0xfcc] sm:$0xf] }
 0x422   : > { %5278 = vmatpush.bf16.msra.mxu2 %v16477_v9  ;;  %5254 = vmatmul.bf16.vlgmr.msra.gmra.mxu0 %v16263_v40  ;;  %19816 = vst [vmem:[#allocation92_spill] sm:$0xff] %v16497_v45  ;;  %v16511_v20 = vor.u32 %v13207_v59, %v11152_v50  ;;  %v13167_v60 = vld [vmem:[#allocation8 + $0xd8c] sm:$0xf]  ;;  %v10992_v54 = vld [vmem:[#allocation8 + $0xd98] sm:$0xf0] }
 0x423   : > { %5298 = vmatpush.bf16.msrb.mxu0 %v16472_v55  ;;  %5291 = vmatpush.bf16.msra.mxu3 %v16480_v61  ;;  %v16495_v55 = vor.u32 %v13217_v57, %v11182_v44  ;;  %19817 = vst [vmem:[#allocation93_spill] sm:$0xff] %v16500_v30  ;;  %v11280_v61 = vld [vmem:[#allocation8 + $0xfd8] sm:$0xf0]  ;;  %v16507_v44 = vor.u32 %v13171_v0, %v11008_v62  ;;  %v13135_v57 = vld [vmem:[#allocation8 + $0xc8c] sm:$0xf] }
 0x424   : > { %5311 = vmatpush.bf16.msrb.mxu1 %v16475_v16  ;;  %v4248_v16 = vpop.f32.mrf.mxu3  ;;  %19818 = vst [vmem:[#allocation94_spill] sm:$0xff] %v16503_v42  ;;  %v16514_v37 = vor.u32 %v13239_v5, %v11280_v61  ;;  %v13203_v15 = vld [vmem:[#allocation8 + $0xeac] sm:$0xf]  ;;  %v11136_v2 = vld [vmem:[#allocation8 + $0xeb8] sm:$0xf0]  ;;  %v16522_v59 = vor.u32 %v13167_v60, %v10992_v54 }
 0x425   : > { %19815 = vst [vmem:[#allocation91_spill] sm:$0xff] %v16495_v55  ;;  %5267 = vmatmul.bf16.vlgmr.msra.gmra.mxu1 %v16269_v43  ;;  %v10864_v16 = vld [vmem:[#allocation8 + $0xc98] sm:$0xf0]  ;;  %v13235_v0 = vld [vmem:[#allocation8 + $0xfac] sm:$0xf]  ;;  %v16525_v61 = vor.u32 %v13203_v15, %v11136_v2 }
 0x426   : > { %5279 = vmatpush.bf16.msra.mxu2 %v16491_v39  ;;  %19819 = vst [vmem:[#allocation95_spill] sm:$0xff] %v16507_v44  ;;  %v16518_v62 = vor.u32 %v13135_v57, %v10864_v16  ;;  %v13131_v50 = vld [vmem:[#allocation8 + $0xc6c] sm:$0xf]  ;;  %v16528_v57 = vpop.f32.mrf.mxu0  ;;  %v11120_v39 = vld [vmem:[#allocation8 + $0xe98] sm:$0xf0] }
 0x427   : > { %5299 = vmatpush.bf16.msrb.mxu0 %v16485_v58  ;;  %5292 = vmatpush.bf16.msra.mxu3 %v16495_v55  ;;  %19820 = vst [vmem:[#allocation96_spill] sm:$0xff] %v16511_v20  ;;  %v11264_v55 = vld [vmem:[#allocation8 + $0xfb8] sm:$0xf0]  ;;  %v13163_v5 = vld [vmem:[#allocation8 + $0xd6c] sm:$0xf] }
 0x428   : > { %5312 = vmatpush.bf16.msrb.mxu1 %v16489_v38  ;;  %19821 = vst [vmem:[#allocation97_spill] sm:$0xff] %v16514_v37  ;;  %v16530_v16 = vor.u32 %v13235_v0, %v11264_v55  ;;  %v16532_v38 = vpop.f32.mrf.mxu1  ;;  %v13231_v54 = vld [vmem:[#allocation8 + $0xf8c] sm:$0xf] }
 0x429   : > { %5280 = vmatmul.bf16.vlgmr.msra.gmra.mxu2 %v16293_v35  ;;  %19822 = vst [vmem:[#allocation98_spill] sm:$0xff] %v16518_v62  ;;  %v13127_v2 = vld [vmem:[#allocation8 + $0xc4c] sm:$0xf] }
 0x42a   : > { %5324 = vmatpush.bf16.msrb.mxu2 %v16497_v45  ;;  %5293 = vmatmul.bf16.vlgmr.msra.gmra.mxu3 %v16299_v17  ;;  %19823 = vst [vmem:[#allocation99_spill] sm:$0xff] %v16522_v59  ;;  %v10976_v45 = vld [vmem:[#allocation8 + $0xd78] sm:$0xf0]  ;;  %v13159_v0 = vld [vmem:[#allocation8 + $0xd4c] sm:$0xf] }
 0x42b   : > { %5337 = vmatpush.bf16.msrb.mxu3 %v16500_v30  ;;  %5300 = vmatpush.bf16.msrb.mxu0 %v16503_v42  ;;  %v10848_v30 = vld [vmem:[#allocation8 + $0xc78] sm:$0xf0]  ;;  %19824 = vst [vmem:[#allocation100_spill] sm:$0xff] %v16525_v61  ;;  %v13199_v42 = vld [vmem:[#allocation8 + $0xe8c] sm:$0xf]  ;;  %v16538_v15 = vor.u32 %v13163_v5, %v10976_v45 }
 0x42c   : > { %5313 = vmatpush.bf16.msrb.mxu1 %v16507_v44  ;;  %19825 = vst [vmem:[#allocation101_spill] sm:$0xff] %v16530_v16  ;;  %v16535_v60 = vor.u32 %v13131_v50, %v10848_v30  ;;  %v16541_v55 = vor.u32 %v13199_v42, %v11120_v39  ;;  %v10960_v44 = vld [vmem:[#allocation8 + $0xd58] sm:$0xf0]  ;;  %v13195_v30 = vld [vmem:[#allocation8 + $0xe6c] sm:$0xf] }
 0x42d   : > { %19827 = vst [vmem:[#allocation103_spill] sm:$0xff] %v16538_v15  ;;  %v11104_v50 = vld [vmem:[#allocation8 + $0xe78] sm:$0xf0]  ;;  %v13227_v45 = vld [vmem:[#allocation8 + $0xf6c] sm:$0xf] }
 0x42e   : > { %5325 = vmatpush.bf16.msrb.mxu2 %v16511_v20  ;;  %19826 = vst [vmem:[#allocation102_spill] sm:$0xff] %v16535_v60  ;;  %v11248_v20 = vld [vmem:[#allocation8 + $0xf98] sm:$0xf0]  ;;  %v13123_v39 = vld [vmem:[#allocation8 + $0xc2c] sm:$0xf] }
 0x42f   : > { %5338 = vmatpush.bf16.msrb.mxu3 %v16514_v37  ;;  %5301 = vmatpush.bf16.msrb.mxu0 %v16518_v62  ;;  %v10832_v37 = vld [vmem:[#allocation8 + $0xc58] sm:$0xf0]  ;;  %19828 = vst [vmem:[#allocation104_spill] sm:$0xff] %v16541_v55  ;;  %v16544_v58 = vor.u32 %v13231_v54, %v11248_v20  ;;  %v13155_v20 = vld [vmem:[#allocation8 + $0xd2c] sm:$0xf] }
 0x430   : > { %5314 = vmatpush.bf16.msrb.mxu1 %v16522_v59  ;;  %v16547_v62 = vor.u32 %v13127_v2, %v10832_v37  ;;  %v11232_v5 = vld [vmem:[#allocation8 + $0xf78] sm:$0xf0]  ;;  %v16550_v59 = vor.u32 %v13159_v0, %v10960_v44  ;;  %v13191_v37 = vld [vmem:[#allocation8 + $0xe4c] sm:$0xf]  ;;  %v4274_v9 = vpop.f32.mrf.mxu1 }
 0x431   : > { %19829 = vst [vmem:[#allocation105_spill] sm:$0xff] %v16544_v58  ;;  %v10816_v42 = vld [vmem:[#allocation8 + $0xc38] sm:$0xf0]  ;;  %v13223_v0 = vld [vmem:[#allocation8 + $0xf4c] sm:$0xf]  ;;  %v16568_v9 = vpop.f32.mrf.mxu2 }
 0x432   : > { %5326 = vmatpush.bf16.msrb.mxu2 %v16525_v61  ;;  %19830 = vst [vmem:[#allocation106_spill] sm:$0xff] %v16547_v62  ;;  %v16553_v61 = vor.u32 %v13195_v30, %v11104_v50  ;;  %v10944_v54 = vld [vmem:[#allocation8 + $0xd38] sm:$0xf0]  ;;  %v16559_v44 = vor.u32 %v13123_v39, %v10816_v42  ;;  %v13119_v50 = vld [vmem:[#allocation8 + $0xc0c] sm:$0xf] }
 0x433   : > { %5339 = vmatpush.bf16.msrb.mxu3 %v16530_v16  ;;  %5302 = vmatpush.bf16.msrb.mxu0 %v16535_v60  ;;  %v4261_v16 = vpop.f32.mrf.mxu0  ;;  %v16556_v60 = vor.u32 %v13227_v45, %v11232_v5  ;;  %v11088_v2 = vld [vmem:[#allocation8 + $0xe58] sm:$0xf0]  ;;  %v16562_v30 = vor.u32 %v13155_v20, %v10944_v54  ;;  %v13151_v45 = vld [vmem:[#allocation8 + $0xd0c] sm:$0xf] }
 0x434   : > { %5315 = vmatpush.bf16.msrb.mxu1 %v16538_v15  ;;  %19831 = vst [vmem:[#allocation107_spill] sm:$0xff] %v16553_v61  ;;  %v11216_v15 = vld [vmem:[#allocation8 + $0xf58] sm:$0xf0]  ;;  %v16565_v16 = vor.u32 %v13191_v37, %v11088_v2  ;;  %v13187_v42 = vld [vmem:[#allocation8 + $0xe2c] sm:$0xf] }
 0x435   : > { %19832 = vst [vmem:[#allocation108_spill] sm:$0xff] %v16556_v60  ;;  %v10928_v5 = vld [vmem:[#allocation8 + $0xd18] sm:$0xf0]  ;;  %v16570_v39 = vor.u32 %v13223_v0, %v11216_v15  ;;  %v13219_v54 = vld [vmem:[#allocation8 + $0xf2c] sm:$0xf] }
 0x436   : > { %5327 = vmatpush.bf16.msrb.mxu2 %v16541_v55  ;;  %v10800_v55 = vld [vmem:[#allocation8 + $0xc18] sm:$0xf0]  ;;  %v16578_v37 = vor.u32 %v13151_v45, %v10928_v5  ;;  %v13183_v0 = vld [vmem:[#allocation8 + $0xe0c] sm:$0xf] }
 0x437   : > { %5340 = vmatpush.bf16.msrb.mxu3 %v16544_v58  ;;  %5303 = vmatpush.bf16.msrb.mxu0 %v16547_v62  ;;  %v11072_v62 = vld [vmem:[#allocation8 + $0xe38] sm:$0xf0]  ;;  %v16572_v58 = vpop.f32.mrf.mxu3  ;;  %v16575_v20 = vor.u32 %v13119_v50, %v10800_v55  ;;  %v13215_v55 = vld [vmem:[#allocation8 + $0xf0c] sm:$0xf] }
 0x438   : > { %5316 = vmatpush.bf16.msrb.mxu1 %v16550_v59  ;;  %v16581_v2 = vor.u32 %v13187_v42, %v11072_v62  ;;  %v11184_v50 = vld [vmem:[#allocation8 + $0xf18] sm:$0xf0]  ;;  %v19847_v42 = vld [vmem:[#allocation38_spill] sm:$0xff] }
 0x439   : > { %v16595_v45 = vor.u32 %v13215_v55, %v11184_v50  ;;  %v19849_v55 = vld [vmem:[#allocation37_spill] sm:$0xff]  ;;  %v19850_v50 = vld [vmem:[#allocation39_spill] sm:$0xff] }
 0x43a   : > { %5328 = vmatpush.bf16.msrb.mxu2 %v16553_v61  ;;  %v11200_v61 = vld [vmem:[#allocation8 + $0xf38] sm:$0xf0] }
 0x43b   : > { %5341 = vmatpush.bf16.msrb.mxu3 %v16556_v60  ;;  %5304 = vmatpush.bf16.msrb.mxu0 %v16559_v44  ;;  %v16584_v15 = vor.u32 %v13219_v54, %v11200_v61  ;;  %v11056_v60 = vld [vmem:[#allocation8 + $0xe18] sm:$0xf0]  ;;  %v4287_v61 = vpop.f32.mrf.mxu2 }
 0x43c   : > { %5317 = vmatpush.bf16.msrb.mxu1 %v16562_v30  ;;  %v16591_v62 = vor.u32 %v13183_v0, %v11056_v60  ;;  %v19848_v0 = vld [vmem:[#allocation35_spill] sm:$0xff]  ;;  %v19851_v61 = vld [vmem:[#allocation40_spill] sm:$0xff] }
 0x43e   : > { %5329 = vmatpush.bf16.msrb.mxu2 %v16565_v16 }
 0x43f   : > { %5342 = vmatpush.bf16.msrb.mxu3 %v16570_v39  ;;  %5305 = vmatpush.bf16.msrb.mxu0 %v16575_v20  ;;  %v4300_v5 = vpop.f32.mrf.mxu3 }
 0x440   : > { %5318 = vmatpush.bf16.msrb.mxu1 %v16578_v37  ;;  %v19852_v5 = vld [vmem:[#allocation41_spill] sm:$0xff] }
 0x442   : > { %5330 = vmatpush.bf16.msrb.mxu2 %v16581_v2  ;;  %5306 = vmatmul.bf16.vlgmr.msrb.gmra.mxu0 %v16263_v40  ;;  %v16653_v40 = vld [vmem:[#allocation10 + $0xc] sm:$0xf] }
 0x443   : > { %5358 = vmatpush.bf16.msra.mxu0 %v16146_v24  ;;  %5343 = vmatpush.bf16.msrb.mxu3 %v16584_v15  ;;  %v4311_v24 = vpop.f32.mrf.mxu0 }
 0x444   : > { %5371 = vmatpush.bf16.msra.mxu1 %v16149_v25  ;;  %v4324_v25 = vpop.f32.mrf.mxu1 }
 0x445   : > { %5319 = vmatmul.bf16.vlgmr.msrb.gmra.mxu1 %v16269_v43  ;;  %v19840_v43 = vld [vmem:[#allocation27_spill] sm:$0xff] }
 0x446   : > { %5331 = vmatpush.bf16.msrb.mxu2 %v16591_v62 }
 0x447   : > { %5359 = vmatpush.bf16.msra.mxu0 %v16155_v29  ;;  %5344 = vmatpush.bf16.msrb.mxu3 %v16595_v45  ;;  %v19833_v29 = vperm.slane %v16023_v11, 2 }
 0x448   : > { %5372 = vmatpush.bf16.msra.mxu1 %v16159_v34 }
 0x449   : > { %5332 = vmatmul.bf16.vlgmr.msrb.gmra.mxu2 %v16293_v35  ;;  %v4260_v34 = vadd.f32 %v16528_v57, %v19833_v29 }
 0x44a   : > { %5384 = vmatpush.bf16.msra.mxu2 %v16163_v28  ;;  %5345 = vmatmul.bf16.vlgmr.msrb.gmra.mxu3 %v16299_v17  ;;  %v4234_v28 = vadd.f32 %v16460_v23, %v16430_v31  ;;  %v19841_v17 = vld [vmem:[#allocation29_spill] sm:$0xff]  ;;  %v18982_v31 = vperm.slane %v16653_v40, 0  ;;  %v19843_v23 = vld [vmem:[#allocation34_spill] sm:$0xff] }
 0x44b   : > { %5397 = vmatpush.bf16.msra.mxu3 %v16166_v56  ;;  %5360 = vmatpush.bf16.msra.mxu0 %v16169_v27  ;;  %v19834_v56 = vperm.slane %v16023_v11, 3 }
 0x44c   : > { %5373 = vmatpush.bf16.msra.mxu1 %v16173_v36  ;;  %v4313_v36 = vpop.f32.mrf.mxu0 }
 0x44d   : > { %v4312_v27 = vadd.f32 %v4311_v24, %v19834_v56  ;;  %v19853_v24 = vld [vmem:[#allocation42_spill] sm:$0xff]  ;;  %v19856_v56 = vld [vmem:[#allocation45_spill] sm:$0xff] }
 0x44e   : > { %5385 = vmatpush.bf16.msra.mxu2 %v16177_v52  ;;  %v4326_v52 = vpop.f32.mrf.mxu1 }
 0x44f   : > { %5398 = vmatpush.bf16.msra.mxu3 %v16180_v19  ;;  %5361 = vmatpush.bf16.msra.mxu0 %v16184_v21  ;;  %v4273_v19 = vadd.f32 %v16532_v38, %v4260_v34  ;;  %v4247_v21 = vadd.f32 %v16464_v1, %v4234_v28  ;;  %v19844_v1 = vld [vmem:[#allocation31_spill] sm:$0xff]  ;;  %v19855_v28 = vld [vmem:[#allocation44_spill] sm:$0xff] }
 0x450   : > { %5374 = vmatpush.bf16.msra.mxu1 %v16188_v8  ;;  %v4325_v8 = vadd.f32 %v4324_v25, %v4312_v27  ;;  %v19854_v34 = vld [vmem:[#allocation43_spill] sm:$0xff]  ;;  %v19857_v27 = vld [vmem:[#allocation46_spill] sm:$0xff] }
 0x451   : > { %v4286_v11 = vadd.f32 %v16568_v9, %v4273_v19  ;;  %v19846_v9 = vld [vmem:[#allocation36_spill] sm:$0xff] }
 0x452   : > { %5386 = vmatpush.bf16.msra.mxu2 %v16191_v32  ;;  %v4337_v32 = vpop.f32.mrf.mxu2 }
 0x453   : > { %5399 = vmatpush.bf16.msra.mxu3 %v16194_v49  ;;  %5362 = vmatpush.bf16.msra.mxu0 %v16197_v13  ;;  %v4338_v49 = vadd.f32 %v4337_v32, %v4325_v8  ;;  %v4350_v13 = vpop.f32.mrf.mxu3  ;;  %v19859_v8 = vld [vmem:[#allocation48_spill] sm:$0xff]  ;;  %v19860_v32 = vld [vmem:[#allocation53_spill] sm:$0xff] }
 0x454   : > { %5375 = vmatpush.bf16.msra.mxu1 %v16201_v6  ;;  %v4354_v6 = vmax.f32 %v16364_v10, 0.0  ;;  %v19842_v10 = vld [vmem:[#allocation32_spill] sm:$0xff] }
 0x456   : > { %5387 = vmatpush.bf16.msra.mxu2 %v16205_v41  ;;  %v4355_v41 = vmax.f32 %v4247_v21, 0.0  ;;  %v19858_v21 = vld [vmem:[#allocation47_spill] sm:$0xff] }
 0x457   : > { %5400 = vmatpush.bf16.msra.mxu3 %v16208_v7  ;;  %5363 = vmatpush.bf16.msra.mxu0 %v16211_v53  ;;  %v4299_v7 = vadd.f32 %v16572_v58, %v4286_v11  ;;  %v4351_v53 = vadd.f32 %v4350_v13, %v4338_v49  ;;  %v19845_v58 = vld [vmem:[#allocation33_spill] sm:$0xff]  ;;  %v19861_v49 = vld [vmem:[#allocation54_spill] sm:$0xff] }
 0x458   : > { %5376 = vmatpush.bf16.msra.mxu1 %v16219_v3  ;;  %v16639_v3 = vpack.c.bf16 %v4354_v6, %v4354_v6  ;;  %v19862_v13 = vld [vmem:[#allocation49_spill] sm:$0xff]  ;;  %v19863_v6 = vld [vmem:[#allocation50_spill] sm:$0xff] }
 0x45a   : > { %5388 = vmatpush.bf16.msra.mxu2 %v16224_v26  ;;  %v16643_v26 = vpack.c.bf16 %v4355_v41, %v4355_v41  ;;  %v19864_v41 = vld [vmem:[#allocation55_spill] sm:$0xff] }
 0x45b   : > { %5401 = vmatpush.bf16.msra.mxu3 %v16227_v48  ;;  %5364 = vmatpush.bf16.msra.mxu0 %v16230_v4  ;;  %v4356_v48 = vmax.f32 %v4299_v7, 0.0  ;;  %v19835_v4 = vld [vmem:[#allocation24_spill] sm:$0xff] }
 0x45c   : > { %5377 = vmatpush.bf16.msra.mxu1 %v16235_v14  ;;  %v4339_v14 = vpop.f32.mrf.mxu2  ;;  %v19865_v7 = vld [vmem:[#allocation56_spill] sm:$0xff] }
 0x45e   : > { %5389 = vmatpush.bf16.msra.mxu2 %v16238_v46  ;;  %v4357_v46 = vmax.f32 %v4351_v53, 0.0  ;;  %v19866_v53 = vld [vmem:[#allocation51_spill] sm:$0xff] }
 0x45f   : > { %5402 = vmatpush.bf16.msra.mxu3 %v16242_v12  ;;  %5365 = vmatpush.bf16.msra.mxu0 %v16245_v63  ;;  %v4352_v12 = vpop.f32.mrf.mxu3  ;;  %v19836_v63 = vld [vmem:[#allocation25_spill] sm:$0xff]  ;;  %v5151_v38 = vpop.f32.mrf.mxu0 }
 0x460   : > { %5378 = vmatpush.bf16.msra.mxu1 %v16249_v47  ;;  %v19837_v47 = vld [vmem:[#allocation26_spill] sm:$0xff]  ;;  %v16659_v35 = vpack.c.bf16 %v4357_v46, %v4357_v46  ;;  %v5152_v57 = vadd.f32 %v5151_v38, %v18982_v31  ;;  %v19868_v46 = vld [vmem:[#allocation57_spill] sm:$0xff]  ;;  %v11624_v31 = vld [vmem:[#allocation8 + $0x1290] sm:$0xf0] }
 0x461   : > { %v19869_v12 = vld [vmem:[#allocation58_spill] sm:$0xff] }
 0x462   : > { %5390 = vmatpush.bf16.msra.mxu2 %v16256_v18  ;;  %5366 = vmatmul.bf16.vlgmr.msra.gmra.mxu0 %v16639_v3  ;;  %v19839_v18 = vld [vmem:[#allocation30_spill] sm:$0xff]  ;;  %v5164_v60 = vpop.f32.mrf.mxu1 }
 0x463   : > { %5410 = vmatpush.bf16.msrb.mxu0 %v16251_v22  ;;  %5403 = vmatpush.bf16.msra.mxu3 %v19835_v4  ;;  %v19838_v22 = vld [vmem:[#allocation28_spill] sm:$0xff]  ;;  %v5165_v54 = vadd.f32 %v5164_v60, %v5152_v57  ;;  %v19878_v60 = vld [vmem:[#allocation67_spill] sm:$0xff] }
 0x464   : > { %5423 = vmatpush.bf16.msrb.mxu1 %v16254_v51  ;;  %v16655_v51 = vpack.c.bf16 %v4356_v48, %v4356_v48  ;;  %v19867_v48 = vld [vmem:[#allocation52_spill] sm:$0xff] }
 0x465   : > { %5379 = vmatmul.bf16.vlgmr.msra.gmra.mxu1 %v16643_v26 }
 0x466   : > { %5391 = vmatpush.bf16.msra.mxu2 %v19838_v22  ;;  %v19872_v22 = vld [vmem:[#allocation61_spill] sm:$0xff] }
 0x467   : > { %5411 = vmatpush.bf16.msrb.mxu0 %v19836_v63  ;;  %5404 = vmatpush.bf16.msra.mxu3 %v19839_v18  ;;  %v5153_v25 = vpop.f32.mrf.mxu0  ;;  %v19870_v63 = vld [vmem:[#allocation59_spill] sm:$0xff]  ;;  %v19873_v18 = vld [vmem:[#allocation62_spill] sm:$0xff] }
 0x468   : > { %5424 = vmatpush.bf16.msrb.mxu1 %v19837_v47  ;;  %v19871_v47 = vld [vmem:[#allocation60_spill] sm:$0xff] }
 0x469   : > { %5392 = vmatmul.bf16.vlgmr.msra.gmra.mxu2 %v16655_v51 }
 0x46a   : > { %5436 = vmatpush.bf16.msrb.mxu2 %v19840_v43  ;;  %5405 = vmatmul.bf16.vlgmr.msra.gmra.mxu3 %v16659_v35  ;;  %v5166_v29 = vpop.f32.mrf.mxu1  ;;  %v19874_v43 = vld [vmem:[#allocation63_spill] sm:$0xff] }
 0x46b   : > { %5449 = vmatpush.bf16.msrb.mxu3 %v19841_v17  ;;  %5412 = vmatpush.bf16.msrb.mxu0 %v19842_v10  ;;  %v18981_v17 = vperm.slane %v16653_v40, 1  ;;  %v19875_v10 = vld [vmem:[#allocation64_spill] sm:$0xff]  ;;  %v19886_v29 = vld [vmem:[#allocation75_spill] sm:$0xff] }
 0x46c   : > { %5425 = vmatpush.bf16.msrb.mxu1 %v19843_v23  ;;  %v5177_v36 = vpop.f32.mrf.mxu2  ;;  %v19876_v23 = vld [vmem:[#allocation65_spill] sm:$0xff] }
 0x46d   : > { %v5178_v52 = vadd.f32 %v5177_v36, %v5165_v54  ;;  %v5190_v19 = vpop.f32.mrf.mxu3  ;;  %v19880_v54 = vld [vmem:[#allocation69_spill] sm:$0xff] }
 0x46e   : > { %5437 = vmatpush.bf16.msrb.mxu2 %v19844_v1  ;;  %v19877_v1 = vld [vmem:[#allocation66_spill] sm:$0xff] }
 0x46f   : > { %5450 = vmatpush.bf16.msrb.mxu3 %v19845_v58  ;;  %5413 = vmatpush.bf16.msrb.mxu0 %v19846_v9  ;;  %v16685_v11 = vadd.f32 %v5190_v19, %v5178_v52  ;;  %v19879_v9 = vld [vmem:[#allocation68_spill] sm:$0xff]  ;;  %v19890_v52 = vld [vmem:[#allocation79_spill] sm:$0xff] }
 0x470   : > { %5426 = vmatpush.bf16.msrb.mxu1 %v19847_v42  ;;  %v19891_v19 = vld [vmem:[#allocation80_spill] sm:$0xff] }
 0x472   : > { %5438 = vmatpush.bf16.msrb.mxu2 %v19848_v0  ;;  %v19881_v0 = vld [vmem:[#allocation70_spill] sm:$0xff] }
 0x473   : > { %5451 = vmatpush.bf16.msrb.mxu3 %v19849_v55  ;;  %5414 = vmatpush.bf16.msrb.mxu0 %v19850_v50  ;;  %v19882_v55 = vld [vmem:[#allocation71_spill] sm:$0xff]  ;;  %v19883_v50 = vld [vmem:[#allocation72_spill] sm:$0xff] }
 0x474   : > { %5427 = vmatpush.bf16.msrb.mxu1 %v19851_v61  ;;  %v5179_v4 = vpop.f32.mrf.mxu2  ;;  %v19884_v61 = vld [vmem:[#allocation73_spill] sm:$0xff] }
 0x475   : > { %v5192_v14 = vpop.f32.mrf.mxu3  ;;  %v19901_v4 = vld [vmem:[#allocation90_spill] sm:$0xff] }
 0x476   : > { %5439 = vmatpush.bf16.msrb.mxu2 %v19852_v5  ;;  %v19885_v5 = vld [vmem:[#allocation74_spill] sm:$0xff]  ;;  %v19902_v14 = vld [vmem:[#allocation91_spill] sm:$0xff] }
 0x477   : > { %5452 = vmatpush.bf16.msrb.mxu3 %v19853_v24  ;;  %5415 = vmatpush.bf16.msrb.mxu0 %v19854_v34  ;;  %v19887_v34 = vld [vmem:[#allocation76_spill] sm:$0xff] }
 0x478   : > { %5428 = vmatpush.bf16.msrb.mxu1 %v19855_v28  ;;  %v19888_v28 = vld [vmem:[#allocation77_spill] sm:$0xff] }
 0x47a   : > { %5440 = vmatpush.bf16.msrb.mxu2 %v19856_v56  ;;  %v19889_v56 = vld [vmem:[#allocation78_spill] sm:$0xff] }
 0x47b   : > { %5453 = vmatpush.bf16.msrb.mxu3 %v19857_v27  ;;  %5416 = vmatpush.bf16.msrb.mxu0 %v19858_v21  ;;  %v19892_v21 = vld [vmem:[#allocation81_spill] sm:$0xff] }
 0x47c   : > { %5429 = vmatpush.bf16.msrb.mxu1 %v19859_v8  ;;  %v19893_v8 = vld [vmem:[#allocation82_spill] sm:$0xff] }
 0x47e   : > { %5441 = vmatpush.bf16.msrb.mxu2 %v19860_v32  ;;  %v19894_v32 = vld [vmem:[#allocation83_spill] sm:$0xff] }
 0x47f   : > { %5454 = vmatpush.bf16.msrb.mxu3 %v19861_v49  ;;  %5417 = vmatpush.bf16.msrb.mxu0 %v19862_v13  ;;  %v5203_v58 = vpop.f32.mrf.mxu0  ;;  %v19895_v49 = vld [vmem:[#allocation84_spill] sm:$0xff]  ;;  %v19896_v13 = vld [vmem:[#allocation85_spill] sm:$0xff] }
 0x480   : > { %5430 = vmatpush.bf16.msrb.mxu1 %v19863_v6  ;;  %v5204_v38 = vadd.f32 %v5203_v58, %v18981_v17  ;;  %v19897_v6 = vld [vmem:[#allocation86_spill] sm:$0xff]  ;;  %v19911_v58 = vld [vmem:[#allocation100_spill] sm:$0xff]  ;;  %v13326_v17 = vld [vmem:[#allocation8 + $0x1284] sm:$0xf] }
 0x482   : > { %5442 = vmatpush.bf16.msrb.mxu2 %v19866_v53  ;;  %5418 = vmatmul.bf16.vlgmr.msrb.gmra.mxu0 %v16639_v3  ;;  %v5216_v57 = vpop.f32.mrf.mxu1 }
 0x483   : > { %5462 = vmatpush.bf16.msra.mxu0 %v19864_v41  ;;  %5455 = vmatpush.bf16.msrb.mxu3 %v19867_v48  ;;  %v16714_v42 = vadd.f32 %v5216_v57, %v5204_v38  ;;  %v19898_v41 = vld [vmem:[#allocation87_spill] sm:$0xff]  ;;  %v19900_v48 = vld [vmem:[#allocation89_spill] sm:$0xff]  ;;  %v19913_v57 = vld [vmem:[#allocation102_spill] sm:$0xff] }
 0x484   : > { %5475 = vmatpush.bf16.msra.mxu1 %v19865_v7  ;;  %v19912_v38 = vld [vmem:[#allocation101_spill] sm:$0xff] }
 0x485   : > { %5431 = vmatmul.bf16.vlgmr.msrb.gmra.mxu1 %v16643_v26 }
 0x486   : > { %5443 = vmatpush.bf16.msrb.mxu2 %v19870_v63  ;;  %v19905_v63 = vld [vmem:[#allocation94_spill] sm:$0xff] }
 0x487   : > { %5463 = vmatpush.bf16.msra.mxu0 %v19868_v46  ;;  %5456 = vmatpush.bf16.msrb.mxu3 %v19871_v47  ;;  %v5205_v24 = vpop.f32.mrf.mxu0  ;;  %v19903_v46 = vld [vmem:[#allocation92_spill] sm:$0xff]  ;;  %v19906_v47 = vld [vmem:[#allocation95_spill] sm:$0xff] }
 0x488   : > { %5476 = vmatpush.bf16.msra.mxu1 %v19869_v12  ;;  %v19904_v12 = vld [vmem:[#allocation93_spill] sm:$0xff]  ;;  %v13276_v24 = vld [vmem:[#allocation8 + $0x10ec] sm:$0xf0] }
 0x489   : > { %5444 = vmatmul.bf16.vlgmr.msrb.gmra.mxu2 %v16655_v51 }
 0x48a   : > { %5488 = vmatpush.bf16.msra.mxu2 %v19872_v22  ;;  %5457 = vmatmul.bf16.vlgmr.msrb.gmra.mxu3 %v16659_v35  ;;  %v5218_v25 = vpop.f32.mrf.mxu1  ;;  %v19907_v22 = vld [vmem:[#allocation96_spill] sm:$0xff] }
 0x48b   : > { %5501 = vmatpush.bf16.msra.mxu3 %v19873_v18  ;;  %5464 = vmatpush.bf16.msra.mxu0 %v19874_v43  ;;  %v19908_v18 = vld [vmem:[#allocation97_spill] sm:$0xff]  ;;  %v19919_v25 = vld [vmem:[#allocation108_spill] sm:$0xff] }
 0x48c   : > { %5477 = vmatpush.bf16.msra.mxu1 %v19875_v10  ;;  %v16726_v27 = vpop.f32.mrf.mxu2 }
 0x48d   : > { %v16728_v36 = vpop.f32.mrf.mxu3 }
 0x48e   : > { %5489 = vmatpush.bf16.msra.mxu2 %v19876_v23  ;;  %v19909_v23 = vld [vmem:[#allocation98_spill] sm:$0xff] }
 0x48f   : > { %5502 = vmatpush.bf16.msra.mxu3 %v19877_v1  ;;  %5465 = vmatpush.bf16.msra.mxu0 %v19878_v60  ;;  %v19910_v1 = vld [vmem:[#allocation99_spill] sm:$0xff] }
 0x490   : > { %5478 = vmatpush.bf16.msra.mxu1 %v19879_v9  ;;  %v19914_v60 = vld [vmem:[#allocation103_spill] sm:$0xff]  ;;  %v19915_v9 = vld [vmem:[#allocation104_spill] sm:$0xff] }
 0x492   : > { %5490 = vmatpush.bf16.msra.mxu2 %v19880_v54  ;;  %v19916_v54 = vld [vmem:[#allocation105_spill] sm:$0xff] }
 0x493   : > { %5503 = vmatpush.bf16.msra.mxu3 %v19881_v0  ;;  %5466 = vmatpush.bf16.msra.mxu0 %v19882_v55 }
 0x494   : > { %5479 = vmatpush.bf16.msra.mxu1 %v19883_v50  ;;  %v5231_v7 = vpop.f32.mrf.mxu2  ;;  %v19917_v50 = vld [vmem:[#allocation106_spill] sm:$0xff] }
 0x495   : > { %v5244_v53 = vpop.f32.mrf.mxu3  ;;  %v11510_v7 = vld [vmem:[#allocation8 + $0x11a0] sm:$0xf] }
 0x496   : > { %5491 = vmatpush.bf16.msra.mxu2 %v19884_v61  ;;  %v19918_v61 = vld [vmem:[#allocation107_spill] sm:$0xff]  ;;  %v13300_v53 = vld [vmem:[#allocation8 + $0x11ac] sm:$0xf0] }
 0x497   : > { %5504 = vmatpush.bf16.msra.mxu3 %v19885_v5  ;;  %5467 = vmatpush.bf16.msra.mxu0 %v19886_v29  ;;  %v11414_v5 = vld [vmem:[#allocation8 + $0x10e0] sm:$0xf] }
 0x498   : > { %5480 = vmatpush.bf16.msra.mxu1 %v19887_v34  ;;  %v11542_v34 = vld [vmem:[#allocation8 + $0x11e0] sm:$0xf] }
 0x49a   : > { %5492 = vmatpush.bf16.msra.mxu2 %v19888_v28  ;;  %v13308_v28 = vld [vmem:[#allocation8 + $0x11ec] sm:$0xf0] }
 0x49b   : > { %5505 = vmatpush.bf16.msra.mxu3 %v19889_v56  ;;  %5468 = vmatpush.bf16.msra.mxu0 %v19890_v52  ;;  %v16776_v52 = vor.u32 %v13276_v24, %v11414_v5  ;;  %v11750_v24 = vld [vmem:[#allocation8 + $0x1380] sm:$0xf] }
 0x49c   : > { %5481 = vmatpush.bf16.msra.mxu1 %v19891_v19  ;;  %v11398_v19 = vld [vmem:[#allocation8 + $0x10c0] sm:$0xf] }
 0x49e   : > { %5493 = vmatpush.bf16.msra.mxu2 %v16457_v33  ;;  %v19899_v33 = vld [vmem:[#allocation88_spill] sm:$0xff] }
 0x49f   : > { %5506 = vmatpush.bf16.msra.mxu3 %v19892_v21  ;;  %5469 = vmatpush.bf16.msra.mxu0 %v19893_v8  ;;  %v16754_v43 = vpop.f32.mrf.mxu0  ;;  %v13272_v21 = vld [vmem:[#allocation8 + $0x10cc] sm:$0xf0]  ;;  %v11526_v8 = vld [vmem:[#allocation8 + $0x11c0] sm:$0xf] }
 0x4a0   : > { %5482 = vmatpush.bf16.msra.mxu1 %v19894_v32  ;;  %v13304_v32 = vld [vmem:[#allocation8 + $0x11cc] sm:$0xf0] }
 0x4a2   : > { %5494 = vmatpush.bf16.msra.mxu2 %v19897_v6  ;;  %5470 = vmatmul.bf16.vlgmr.msra.gmra.mxu0 %v16639_v3  ;;  %v16756_v10 = vpop.f32.mrf.mxu1  ;;  %v16789_v6 = vor.u32 %v13304_v32, %v11526_v8  ;;  %v18979_v8 = vperm.slane %v16653_v40, 3 }
 0x4a3   : > { %5514 = vmatpush.bf16.msrb.mxu0 %v19895_v49  ;;  %5507 = vmatpush.bf16.msra.mxu3 %v19898_v41  ;;  %v11670_v49 = vld [vmem:[#allocation8 + $0x12e0] sm:$0xf]  ;;  %v13268_v41 = vld [vmem:[#allocation8 + $0x10ac] sm:$0xf0] }
 0x4a4   : > { %5527 = vmatpush.bf16.msrb.mxu1 %v19896_v13  ;;  %v13340_v13 = vld [vmem:[#allocation8 + $0x12ec] sm:$0xf0] }
 0x4a5   : > { %5483 = vmatmul.bf16.vlgmr.msra.gmra.mxu1 %v16643_v26 }
 0x4a6   : > { %5495 = vmatpush.bf16.msra.mxu2 %v19901_v4  ;;  %v11654_v4 = vld [vmem:[#allocation8 + $0x12c0] sm:$0xf] }
 0x4a7   : > { %5515 = vmatpush.bf16.msrb.mxu0 %v19899_v33  ;;  %5508 = vmatpush.bf16.msra.mxu3 %v19902_v14  ;;  %v5257_v0 = vpop.f32.mrf.mxu0 }
 0x4a8   : > { %5528 = vmatpush.bf16.msrb.mxu1 %v19900_v48 }
 0x4a9   : > { %5496 = vmatmul.bf16.vlgmr.msra.gmra.mxu2 %v16655_v51 }
 0x4aa   : > { %5540 = vmatpush.bf16.msrb.mxu2 %v19903_v46  ;;  %5509 = vmatmul.bf16.vlgmr.msra.gmra.mxu3 %v16659_v35  ;;  %v5270_v55 = vpop.f32.mrf.mxu1  ;;  %v11782_v46 = vld [vmem:[#allocation8 + $0x13c0] sm:$0xf] }
 0x4ab   : > { %5553 = vmatpush.bf16.msrb.mxu3 %v19904_v12  ;;  %5516 = vmatpush.bf16.msrb.mxu0 %v19905_v63  ;;  %v11366_v12 = vld [vmem:[#allocation8 + $0x1080] sm:$0xf]  ;;  %v13264_v63 = vld [vmem:[#allocation8 + $0x108c] sm:$0xf0] }
 0x4ac   : > { %5529 = vmatpush.bf16.msrb.mxu1 %v19906_v47  ;;  %v16770_v29 = vpop.f32.mrf.mxu2  ;;  %v11494_v47 = vld [vmem:[#allocation8 + $0x1180] sm:$0xf] }
 0x4ad   : > { %v16772_v56 = vpop.f32.mrf.mxu3 }
 0x4ae   : > { %5541 = vmatpush.bf16.msrb.mxu2 %v19907_v22  ;;  %v13296_v22 = vld [vmem:[#allocation8 + $0x118c] sm:$0xf0] }
 0x4af   : > { %5554 = vmatpush.bf16.msrb.mxu3 %v19908_v18  ;;  %5517 = vmatpush.bf16.msrb.mxu0 %v19909_v23  ;;  %v11638_v23 = vld [vmem:[#allocation8 + $0x12a0] sm:$0xf] }
 0x4b0   : > { %5530 = vmatpush.bf16.msrb.mxu1 %v19910_v1  ;;  %v13332_v1 = vld [vmem:[#allocation8 + $0x12ac] sm:$0xf0] }
 0x4b2   : > { %5542 = vmatpush.bf16.msrb.mxu2 %v19911_v58  ;;  %v11766_v58 = vld [vmem:[#allocation8 + $0x13a0] sm:$0xf] }
 0x4b3   : > { %5555 = vmatpush.bf16.msrb.mxu3 %v19912_v38  ;;  %5518 = vmatpush.bf16.msrb.mxu0 %v19913_v57  ;;  %v16818_v38 = vor.u32 %v13296_v22, %v11494_v47  ;;  %v11350_v57 = vld [vmem:[#allocation8 + $0x1060] sm:$0xf]  ;;  %v13284_v47 = vld [vmem:[#allocation8 + $0x112c] sm:$0xf0] }
 0x4b4   : > { %5531 = vmatpush.bf16.msrb.mxu1 %v19914_v60  ;;  %v13260_v60 = vld [vmem:[#allocation8 + $0x106c] sm:$0xf0] }
 0x4b5   : > { %v5296_v33 = vpop.f32.mrf.mxu3  ;;  %v16827_v5 = vor.u32 %v13260_v60, %v11350_v57  ;;  %v13320_v22 = vld [vmem:[#allocation8 + $0x124c] sm:$0xf0]  ;;  %v11302_v57 = vld [vmem:[#allocation8 + $0x1000] sm:$0xf] }
 0x4b6   : > { %5543 = vmatpush.bf16.msrb.mxu2 %v19915_v9  ;;  %v16821_v9 = vor.u32 %v13332_v1, %v11638_v23 }
 0x4b7   : > { %5556 = vmatpush.bf16.msrb.mxu3 %v19916_v54  ;;  %5519 = vmatpush.bf16.msrb.mxu0 %v19917_v50  ;;  %v11478_v54 = vld [vmem:[#allocation8 + $0x1160] sm:$0xf] }
 0x4b8   : > { %5532 = vmatpush.bf16.msrb.mxu1 %v16550_v59  ;;  %v16779_v59 = vor.u32 %v13308_v28, %v11542_v34  ;;  %v11622_v50 = vld [vmem:[#allocation8 + $0x1280] sm:$0xf]  ;;  %v18980_v34 = vperm.slane %v16653_v40, 2 }
 0x4ba   : > { %5544 = vmatpush.bf16.msrb.mxu2 %v19918_v61  ;;  %v13328_v61 = vld [vmem:[#allocation8 + $0x128c] sm:$0xf0]  ;;  %v5256_v33 = vadd.f32 %v16754_v43, %v18980_v34  ;;  %v11590_v43 = vld [vmem:[#allocation8 + $0x1240] sm:$0xf]  ;;  %v11480_v34 = vld [vmem:[#allocation8 + $0x1170] sm:$0xf0] }
 0x4bb   : > { %5557 = vmatpush.bf16.msrb.mxu3 %v19919_v25  ;;  %5520 = vmatpush.bf16.msrb.mxu0 %v16559_v44  ;;  %v16785_v44 = vor.u32 %v13272_v21, %v11398_v19  ;;  %v13360_v25 = vld [vmem:[#allocation8 + $0x138c] sm:$0xf0]  ;;  %v11334_v19 = vld [vmem:[#allocation8 + $0x1040] sm:$0xf]  ;;  %v16835_v32 = vor.u32 %v13328_v61, %v11622_v50 }
 0x4bc   : > { %5533 = vmatpush.bf16.msrb.mxu1 %v16562_v30  ;;  %v11798_v30 = vld [vmem:[#allocation8 + $0x13e0] sm:$0xf]  ;;  %v13256_v21 = vld [vmem:[#allocation8 + $0x104c] sm:$0xf0] }
 0x4bd   : > { %v11430_v50 = vld [vmem:[#allocation8 + $0x1100] sm:$0xf]  ;;  %v13280_v61 = vld [vmem:[#allocation8 + $0x110c] sm:$0xf0] }
 0x4be   : > { %5545 = vmatpush.bf16.msrb.mxu2 %v16565_v16  ;;  %v13372_v16 = vld [vmem:[#allocation8 + $0x13ec] sm:$0xf0] }
 0x4bf   : > { %5558 = vmatpush.bf16.msrb.mxu3 %v16570_v39  ;;  %5521 = vmatpush.bf16.msrb.mxu0 %v16575_v20  ;;  %v11382_v39 = vld [vmem:[#allocation8 + $0x10a0] sm:$0xf]  ;;  %v5283_v20 = vpop.f32.mrf.mxu2  ;;  %v16796_v48 = vor.u32 %v13372_v16, %v11798_v30  ;;  %v5307_v0 = vpop.f32.mrf.mxu0  ;;  %v16838_v30 = vor.u32 %v13360_v25, %v11750_v24  ;;  %v16868_v25 = vor.u32 %v13320_v22, %v11590_v43  ;;  %v11400_v22 = vld [vmem:[#allocation8 + $0x10d0] sm:$0xf0] }
 0x4c0   : > { %5534 = vmatpush.bf16.msrb.mxu1 %v16578_v37  ;;  %v16793_v37 = vor.u32 %v13340_v13, %v11670_v49  ;;  %v16799_v14 = vor.u32 %v13268_v41, %v11382_v39  ;;  %v11462_v49 = vld [vmem:[#allocation8 + $0x1140] sm:$0xf]  ;;  %v13288_v13 = vld [vmem:[#allocation8 + $0x114c] sm:$0xf0]  ;;  %v16841_v41 = vor.u32 %v13256_v21, %v11334_v19  ;;  %v13274_v19 = vld [vmem:[#allocation8 + $0x10e4] sm:$0xf] }
 0x4c1   : > { %v11606_v16 = vld [vmem:[#allocation8 + $0x1260] sm:$0xf]  ;;  %v13324_v39 = vld [vmem:[#allocation8 + $0x126c] sm:$0xf0]  ;;  %v11416_v21 = vld [vmem:[#allocation8 + $0x10f0] sm:$0xf0] }
 0x4c2   : > { %5546 = vmatpush.bf16.msrb.mxu2 %v16581_v2  ;;  %5522 = vmatmul.bf16.vlgmr.msrb.gmra.mxu0 %v16639_v3  ;;  %v13336_v2 = vld [vmem:[#allocation8 + $0x12cc] sm:$0xf0]  ;;  %v16803_v3 = vor.u32 %v13300_v53, %v11510_v7  ;;  %v11734_v20 = vld [vmem:[#allocation8 + $0x1360] sm:$0xf]  ;;  %v5230_v53 = vadd.f32 %v16726_v27, %v16714_v42 }
 0x4c3   : > { %6354 = vmatpush.bf16.msra.mxu0 %v16776_v52  ;;  %5559 = vmatpush.bf16.msrb.mxu3 %v16584_v15  ;;  %v13368_v15 = vld [vmem:[#allocation8 + $0x13cc] sm:$0xf0] }
 0x4c4   : > { %6367 = vmatpush.bf16.msra.mxu1 %v16779_v59  ;;  %v16810_v18 = vor.u32 %v13368_v15, %v11782_v46  ;;  %v13356_v7 = vld [vmem:[#allocation8 + $0x136c] sm:$0xf0]  ;;  %v5308_v15 = vadd.f32 %v5307_v0, %v18979_v8  ;;  %v5243_v60 = vadd.f32 %v16728_v36, %v5230_v53  ;;  %v11768_v8 = vld [vmem:[#allocation8 + $0x13b0] sm:$0xf0] }
 0x4c5   : > { %5535 = vmatmul.bf16.vlgmr.msrb.gmra.mxu1 %v16643_v26  ;;  %v16807_v26 = vor.u32 %v13336_v2, %v11654_v4  ;;  %v16849_v4 = vor.u32 %v13288_v13, %v11462_v49  ;;  %v11318_v2 = vld [vmem:[#allocation8 + $0x1020] sm:$0xf]  ;;  %v13252_v46 = vld [vmem:[#allocation8 + $0x102c] sm:$0xf0]  ;;  %v16857_v27 = vor.u32 %v13356_v7, %v11734_v20  ;;  %v13306_v49 = vld [vmem:[#allocation8 + $0x11e4] sm:$0xf] }
 0x4c6   : > { %5547 = vmatpush.bf16.msrb.mxu2 %v16591_v62  ;;  %v16814_v62 = vor.u32 %v13264_v63, %v11366_v12  ;;  %v16854_v12 = vor.u32 %v13324_v39, %v11606_v16  ;;  %v11446_v63 = vld [vmem:[#allocation8 + $0x1120] sm:$0xf]  ;;  %v16860_v1 = vor.u32 %v13252_v46, %v11318_v2  ;;  %v13248_v0 = vld [vmem:[#allocation8 + $0x100c] sm:$0xf0]  ;;  %v11544_v16 = vld [vmem:[#allocation8 + $0x11f0] sm:$0xf0] }
 0x4c7   : > { %6355 = vmatpush.bf16.msra.mxu0 %v16785_v44  ;;  %5560 = vmatpush.bf16.msrb.mxu3 %v16595_v45  ;;  %v13364_v45 = vld [vmem:[#allocation8 + $0x13ac] sm:$0xf0]  ;;  %v5309_v42 = vpop.f32.mrf.mxu0  ;;  %v11574_v39 = vld [vmem:[#allocation8 + $0x1220] sm:$0xf]  ;;  %v5350_v46 = vmax.f32 %v16685_v11, 0.0 }
 0x4c8   : > { %6368 = vmatpush.bf16.msra.mxu1 %v16789_v6  ;;  %v16824_v55 = vor.u32 %v13364_v45, %v11766_v58  ;;  %v11718_v58 = vld [vmem:[#allocation8 + $0x1340] sm:$0xf]  ;;  %v13352_v45 = vld [vmem:[#allocation8 + $0x134c] sm:$0xf0]  ;;  %v16884_v42 = vor.u32 %v13306_v49, %v11544_v16  ;;  %v11800_v49 = vld [vmem:[#allocation8 + $0x13f0] sm:$0xf0] }
 0x4c9   : > { %5548 = vmatmul.bf16.vlgmr.msrb.gmra.mxu2 %v16655_v51  ;;  %v13292_v51 = vld [vmem:[#allocation8 + $0x116c] sm:$0xf0] }
 0x4ca   : > { %6380 = vmatpush.bf16.msra.mxu2 %v16793_v37  ;;  %5561 = vmatmul.bf16.vlgmr.msrb.gmra.mxu3 %v16659_v35  ;;  %v5320_v35 = vpop.f32.mrf.mxu1  ;;  %v16831_v28 = vor.u32 %v13292_v51, %v11478_v54  ;;  %v5269_v54 = vadd.f32 %v16756_v10, %v5256_v33  ;;  %v16865_v51 = vor.u32 %v13284_v47, %v11446_v63  ;;  %v13316_v20 = vld [vmem:[#allocation8 + $0x122c] sm:$0xf0]  ;;  %v11702_v33 = vld [vmem:[#allocation8 + $0x1320] sm:$0xf]  ;;  %v13270_v47 = vld [vmem:[#allocation8 + $0x10c4] sm:$0xf] }
 0x4cb   : > { %6393 = vmatpush.bf16.msra.mxu3 %v16796_v48  ;;  %6356 = vmatpush.bf16.msra.mxu0 %v16799_v14  ;;  %v5321_v24 = vadd.f32 %v5320_v35, %v5308_v15  ;;  %v16872_v10 = vor.u32 %v13352_v45, %v11718_v58  ;;  %v16875_v35 = vor.u32 %v13248_v0, %v11302_v57  ;;  %v13348_v2 = vld [vmem:[#allocation8 + $0x132c] sm:$0xf0]  ;;  %v5351_v15 = vmax.f32 %v5243_v60, 0.0  ;;  %v11528_v58 = vld [vmem:[#allocation8 + $0x11d0] sm:$0xf0] }
 0x4cc   : > { %6369 = vmatpush.bf16.msra.mxu1 %v16803_v3  ;;  %v5282_v13 = vadd.f32 %v16770_v29, %v5269_v54  ;;  %v5333_v36 = vpop.f32.mrf.mxu2  ;;  %v16879_v29 = vor.u32 %v13280_v61, %v11430_v50  ;;  %v16881_v63 = vor.u32 %v13274_v19, %v11416_v21  ;;  %v16886_v43 = vor.u32 %v13316_v20, %v11574_v39  ;;  %v11558_v57 = vld [vmem:[#allocation8 + $0x1200] sm:$0xf]  ;;  %v13312_v60 = vld [vmem:[#allocation8 + $0x120c] sm:$0xf0]  ;;  %v13338_v61 = vld [vmem:[#allocation8 + $0x12e4] sm:$0xf] }
 0x4cd   : > { %v5334_v7 = vadd.f32 %v5333_v36, %v5321_v24  ;;  %v5346_v53 = vpop.f32.mrf.mxu3  ;;  %v16890_v11 = vor.u32 %v13348_v2, %v11702_v33  ;;  %v11686_v54 = vld [vmem:[#allocation8 + $0x1300] sm:$0xf]  ;;  %v13344_v50 = vld [vmem:[#allocation8 + $0x130c] sm:$0xf0]  ;;  %v11672_v24 = vld [vmem:[#allocation8 + $0x12f0] sm:$0xf0]  ;;  %v16893_v19 = vpack.c.bf16 %v5350_v46, %v5350_v46  ;;  %v16905_v16 = vor.u32 %v13312_v60, %v11558_v57 }
 0x4ce   : > { %6381 = vmatpush.bf16.msra.mxu2 %v16807_v26  ;;  %v5295_v45 = vadd.f32 %v16772_v56, %v5282_v13  ;;  %v16897_v56 = vor.u32 %v13270_v47, %v11400_v22  ;;  %v13370_v21 = vld [vmem:[#allocation8 + $0x13e4] sm:$0xf]  ;;  %v16899_v13 = vpack.c.bf16 %v5351_v15, %v5351_v15  ;;  %v11384_v20 = vld [vmem:[#allocation8 + $0x10b0] sm:$0xf0]  ;;  %v16909_v33 = vor.u32 %v13344_v50, %v11686_v54 }
 0x4cf   : > { %6394 = vmatpush.bf16.msra.mxu3 %v16810_v18  ;;  %6357 = vmatpush.bf16.msra.mxu0 %v16814_v62  ;;  %19920 = vst [vmem:[#allocation24_spill] sm:$0xff] %v16890_v11  ;;  %v5347_v0 = vadd.f32 %v5346_v53, %v5334_v7  ;;  %v13266_v39 = vld [vmem:[#allocation8 + $0x10a4] sm:$0xf]  ;;  %v16911_v2 = vor.u32 %v13338_v61, %v11672_v24  ;;  %v11512_v15 = vld [vmem:[#allocation8 + $0x11b0] sm:$0xf0] }
 0x4d0   : > { %6370 = vmatpush.bf16.msra.mxu1 %v16818_v38  ;;  %19921 = vst [vmem:[#allocation25_spill] sm:$0xff] %v16897_v56  ;;  %v5352_v7 = vmax.f32 %v5295_v45, 0.0  ;;  %v13298_v46 = vld [vmem:[#allocation8 + $0x11a4] sm:$0xf]  ;;  %v11656_v57 = vld [vmem:[#allocation8 + $0x12d0] sm:$0xf0]  ;;  %v16917_v45 = vor.u32 %v13266_v39, %v11384_v20 }
 0x4d1   : > { %19923 = vst [vmem:[#allocation28_spill] sm:$0xff] %v16905_v16  ;;  %v5353_v47 = vmax.f32 %v5347_v0, 0.0  ;;  %v13366_v60 = vld [vmem:[#allocation8 + $0x13c4] sm:$0xf]  ;;  %v16921_v54 = vor.u32 %v13298_v46, %v11512_v15  ;;  %v11368_v50 = vld [vmem:[#allocation8 + $0x1090] sm:$0xf0] }
 0x4d2   : > { %6382 = vmatpush.bf16.msra.mxu2 %v16821_v9  ;;  %v5322_v23 = vpop.f32.mrf.mxu1  ;;  %19924 = vst [vmem:[#allocation30_spill] sm:$0xff] %v16909_v33  ;;  %v13262_v0 = vld [vmem:[#allocation8 + $0x1084] sm:$0xf]  ;;  %v16923_v61 = vpack.c.bf16 %v5352_v7, %v5352_v7  ;;  %v11640_v15 = vld [vmem:[#allocation8 + $0x12b0] sm:$0xf0] }
 0x4d3   : > { %6395 = vmatpush.bf16.msra.mxu3 %v16824_v55  ;;  %6358 = vmatpush.bf16.msra.mxu0 %v16827_v5  ;;  %v13302_v23 = vld [vmem:[#allocation8 + $0x11c4] sm:$0xf]  ;;  %19925 = vst [vmem:[#allocation27_spill] sm:$0xff] %v16911_v2  ;;  %v16929_v39 = vpack.c.bf16 %v5353_v47, %v5353_v47  ;;  %v16936_v7 = vor.u32 %v13262_v0, %v11368_v50 }
 0x4d4   : > { %6371 = vmatpush.bf16.msra.mxu1 %v16831_v28  ;;  %v16903_v36 = vor.u32 %v13302_v23, %v11528_v58  ;;  %v5335_v53 = vpop.f32.mrf.mxu2  ;;  %v16914_v23 = vor.u32 %v13370_v21, %v11800_v49  ;;  %v13334_v58 = vld [vmem:[#allocation8 + $0x12c4] sm:$0xf]  ;;  %19927 = vst [vmem:[#allocation32_spill] sm:$0xff] %v16917_v45  ;;  %v11496_v49 = vld [vmem:[#allocation8 + $0x1190] sm:$0xf0] }
 0x4d5   : > { %v5348_v22 = vpop.f32.mrf.mxu3  ;;  %v11784_v53 = vld [vmem:[#allocation8 + $0x13d0] sm:$0xf0]  ;;  %19928 = vst [vmem:[#allocation34_spill] sm:$0xff] %v16921_v54  ;;  %v16927_v24 = vor.u32 %v13334_v58, %v11656_v57  ;;  %v13294_v21 = vld [vmem:[#allocation8 + $0x1184] sm:$0xf] }
 0x4d6   : > { %6383 = vmatpush.bf16.msra.mxu2 %v16835_v32  ;;  %19922 = vst [vmem:[#allocation26_spill] sm:$0xff] %v16903_v36  ;;  %v16932_v20 = vor.u32 %v13366_v60, %v11784_v53  ;;  %v13330_v46 = vld [vmem:[#allocation8 + $0x12a4] sm:$0xf]  ;;  %v16940_v47 = vor.u32 %v13294_v21, %v11496_v49  ;;  %v11352_v57 = vld [vmem:[#allocation8 + $0x1070] sm:$0xf0] }
 0x4d7   : > { %6396 = vmatpush.bf16.msra.mxu3 %v16838_v30  ;;  %6359 = vmatpush.bf16.msra.mxu0 %v16841_v41  ;;  %19926 = vst [vmem:[#allocation29_spill] sm:$0xff] %v16914_v23  ;;  %v13362_v22 = vld [vmem:[#allocation8 + $0x13a4] sm:$0xf]  ;;  %v16943_v60 = vor.u32 %v13330_v46, %v11640_v15  ;;  %v11752_v46 = vld [vmem:[#allocation8 + $0x1390] sm:$0xf0] }
 0x4d8   : > { %6372 = vmatpush.bf16.msra.mxu1 %v16849_v4  ;;  %19929 = vst [vmem:[#allocation31_spill] sm:$0xff] %v16927_v24  ;;  %v13258_v58 = vld [vmem:[#allocation8 + $0x1064] sm:$0xf]  ;;  %v16946_v50 = vor.u32 %v13362_v22, %v11768_v8  ;;  %v16957_v22 = vor.u32 %v13326_v17, %v11624_v31  ;;  %v11320_v17 = vld [vmem:[#allocation8 + $0x1030] sm:$0xf0] }
 0x4d9   : > { %19930 = vst [vmem:[#allocation33_spill] sm:$0xff] %v16932_v20  ;;  %v13290_v53 = vld [vmem:[#allocation8 + $0x1164] sm:$0xf]  ;;  %v16951_v49 = vor.u32 %v13258_v58, %v11352_v57  ;;  %v11608_v57 = vld [vmem:[#allocation8 + $0x1270] sm:$0xf0] }
 0x4da   : > { %6384 = vmatpush.bf16.msra.mxu2 %v16854_v12  ;;  %19931 = vst [vmem:[#allocation36_spill] sm:$0xff] %v16936_v7  ;;  %v16954_v15 = vor.u32 %v13290_v53, %v11480_v34  ;;  %v13322_v58 = vld [vmem:[#allocation8 + $0x1264] sm:$0xf]  ;;  %v11736_v53 = vld [vmem:[#allocation8 + $0x1370] sm:$0xf0] }
 0x4db   : > { %6397 = vmatpush.bf16.msra.mxu3 %v16857_v27  ;;  %6360 = vmatpush.bf16.msra.mxu0 %v16860_v1  ;;  %19932 = vst [vmem:[#allocation38_spill] sm:$0xff] %v16940_v47  ;;  %v13354_v34 = vld [vmem:[#allocation8 + $0x1364] sm:$0xf] }
 0x4dc   : > { %6373 = vmatpush.bf16.msra.mxu1 %v16865_v51  ;;  %19933 = vst [vmem:[#allocation35_spill] sm:$0xff] %v16943_v60  ;;  %v13250_v31 = vld [vmem:[#allocation8 + $0x1024] sm:$0xf] }
 0x4dd   : > { %19934 = vst [vmem:[#allocation37_spill] sm:$0xff] %v16946_v50 }
 0x4de   : > { %6385 = vmatpush.bf16.msra.mxu2 %v16868_v25  ;;  %19936 = vst [vmem:[#allocation39_spill] sm:$0xff] %v16951_v49 }
 0x4df   : > { %6398 = vmatpush.bf16.msra.mxu3 %v16872_v10  ;;  %6361 = vmatpush.bf16.msra.mxu0 %v16875_v35  ;;  %v5367_v0 = vpop.f32.mrf.mxu0  ;;  %19937 = vst [vmem:[#allocation40_spill] sm:$0xff] %v16954_v15 }
 0x4e0   : > { %6374 = vmatpush.bf16.msra.mxu1 %v16879_v29  ;;  %19938 = vst [vmem:[#allocation41_spill] sm:$0xff] %v16957_v22 }
 0x4e2   : > { %6386 = vmatpush.bf16.msra.mxu2 %v16886_v43  ;;  %6362 = vmatmul.bf16.vlgmr.msra.gmra.mxu0 %v16893_v19  ;;  %v5380_v21 = vpop.f32.mrf.mxu1 }
 0x4e3   : > { %6406 = vmatpush.bf16.msrb.mxu0 %v16881_v63  ;;  %6399 = vmatpush.bf16.msra.mxu3 %v16890_v11  ;;  %v13303_v11 = vld [vmem:[#allocation8 + $0x11cc] sm:$0xf] }
 0x4e4   : > { %6419 = vmatpush.bf16.msrb.mxu1 %v16884_v42 }
 0x4e5   : > { %6375 = vmatmul.bf16.vlgmr.msra.gmra.mxu1 %v16899_v13 }
 0x4e6   : > { %6387 = vmatpush.bf16.msra.mxu2 %v16905_v16 }
 0x4e7   : > { %6407 = vmatpush.bf16.msrb.mxu0 %v16897_v56  ;;  %6400 = vmatpush.bf16.msra.mxu3 %v16909_v33  ;;  %v13314_v33 = vld [vmem:[#allocation8 + $0x1224] sm:$0xf]  ;;  %v11408_v56 = vld [vmem:[#allocation8 + $0x10d8] sm:$0xf0] }
 0x4e8   : > { %6420 = vmatpush.bf16.msrb.mxu1 %v16903_v36 }
 0x4e9   : > { %6388 = vmatmul.bf16.vlgmr.msra.gmra.mxu2 %v16923_v61 }
 0x4ea   : > { %6432 = vmatpush.bf16.msrb.mxu2 %v16911_v2  ;;  %6401 = vmatmul.bf16.vlgmr.msra.gmra.mxu3 %v16929_v39  ;;  %v13286_v2 = vld [vmem:[#allocation8 + $0x1144] sm:$0xf] }
 0x4eb   : > { %6445 = vmatpush.bf16.msrb.mxu3 %v16914_v23  ;;  %6408 = vmatpush.bf16.msrb.mxu0 %v16917_v45  ;;  %v19935_v45 = vperm.slane %v16653_v40, 0  ;;  %v11336_v23 = vld [vmem:[#allocation8 + $0x1050] sm:$0xf0] }
 0x4ec   : > { %6421 = vmatpush.bf16.msrb.mxu1 %v16921_v54 }
 0x4ed   : > { %v5368_v54 = vadd.f32 %v5367_v0, %v19935_v45  ;;  %v11464_v45 = vld [vmem:[#allocation8 + $0x1150] sm:$0xf0] }
 0x4ee   : > { %6433 = vmatpush.bf16.msrb.mxu2 %v16927_v24  ;;  %v13358_v24 = vld [vmem:[#allocation8 + $0x1384] sm:$0xf] }
 0x4ef   : > { %6446 = vmatpush.bf16.msrb.mxu3 %v16932_v20  ;;  %6409 = vmatpush.bf16.msrb.mxu0 %v16936_v7  ;;  %v13254_v20 = vld [vmem:[#allocation8 + $0x1044] sm:$0xf]  ;;  %v5381_v8 = vadd.f32 %v5380_v21, %v5368_v54  ;;  %v16960_v0 = vor.u32 %v13358_v24, %v11752_v46  ;;  %v16966_v54 = vor.u32 %v13286_v2, %v11464_v45  ;;  %v11448_v46 = vld [vmem:[#allocation8 + $0x1130] sm:$0xf0] }
 0x4f0   : > { %6422 = vmatpush.bf16.msrb.mxu1 %v16940_v47  ;;  %v16963_v47 = vor.u32 %v13254_v20, %v11336_v23  ;;  %v16969_v21 = vor.u32 %v13322_v58, %v11608_v57  ;;  %v13282_v24 = vld [vmem:[#allocation8 + $0x1124] sm:$0xf]  ;;  %v11592_v20 = vld [vmem:[#allocation8 + $0x1250] sm:$0xf0]  ;;  %v16975_v2 = vor.u32 %v13250_v31, %v11320_v17  ;;  %v5393_v31 = vpop.f32.mrf.mxu2 }
 0x4f1   : > { %19939 = vst [vmem:[#allocation42_spill] sm:$0xff] %v16960_v0  ;;  %v13318_v23 = vld [vmem:[#allocation8 + $0x1244] sm:$0xf]  ;;  %v16978_v58 = vor.u32 %v13282_v24, %v11448_v46  ;;  %v11304_v57 = vld [vmem:[#allocation8 + $0x1010] sm:$0xf0]  ;;  %v5394_v24 = vadd.f32 %v5393_v31, %v5381_v8  ;;  %v5406_v46 = vpop.f32.mrf.mxu3 }
 0x4f2   : > { %6434 = vmatpush.bf16.msrb.mxu2 %v16943_v60  ;;  %19940 = vst [vmem:[#allocation43_spill] sm:$0xff] %v16963_v47  ;;  %v5382_v60 = vpop.f32.mrf.mxu1  ;;  %v13350_v45 = vld [vmem:[#allocation8 + $0x1344] sm:$0xf]  ;;  %v13273_v31 = vld [vmem:[#allocation8 + $0x10d4] sm:$0xf0] }
 0x4f3   : > { %6447 = vmatpush.bf16.msrb.mxu3 %v16946_v50  ;;  %6410 = vmatpush.bf16.msrb.mxu0 %v16951_v49  ;;  %19941 = vst [vmem:[#allocation44_spill] sm:$0xff] %v16966_v54  ;;  %v5369_v50 = vpop.f32.mrf.mxu0  ;;  %v16972_v49 = vor.u32 %v13354_v34, %v11736_v53  ;;  %v13246_v7 = vld [vmem:[#allocation8 + $0x1004] sm:$0xf]  ;;  %v11422_v34 = vld [vmem:[#allocation8 + $0x10e8] sm:$0xf] }
 0x4f4   : > { %6423 = vmatpush.bf16.msrb.mxu1 %v16954_v15  ;;  %19942 = vst [vmem:[#allocation45_spill] sm:$0xff] %v16969_v21  ;;  %v11720_v15 = vld [vmem:[#allocation8 + $0x1350] sm:$0xf0]  ;;  %v16981_v50 = vor.u32 %v13318_v23, %v11592_v20  ;;  %v13277_v60 = vld [vmem:[#allocation8 + $0x10f4] sm:$0xf0]  ;;  %v16987_v16 = vor.u32 %v13246_v7, %v11304_v57 }
 0x4f5   : > { %19943 = vst [vmem:[#allocation46_spill] sm:$0xff] %v16972_v49  ;;  %v11550_v53 = vld [vmem:[#allocation8 + $0x11e8] sm:$0xf]  ;;  %v16984_v17 = vor.u32 %v13350_v45, %v11720_v15  ;;  %v11704_v23 = vld [vmem:[#allocation8 + $0x1330] sm:$0xf0]  ;;  %v16992_v36 = vor.u32 %v13277_v60, %v11422_v34  ;;  %v16994_v15 = vadd.f32 %v5406_v46, %v5394_v24 }
 0x4f6   : > { %6435 = vmatpush.bf16.msrb.mxu2 %v16957_v22  ;;  %19944 = vst [vmem:[#allocation47_spill] sm:$0xff] %v16975_v2  ;;  %v13278_v22 = vld [vmem:[#allocation8 + $0x1104] sm:$0xf]  ;;  %v11534_v7 = vld [vmem:[#allocation8 + $0x11c8] sm:$0xf] }
 0x4f7   : > { %6448 = vmatpush.bf16.msrb.mxu3 %v16960_v0  ;;  %6411 = vmatpush.bf16.msrb.mxu0 %v16963_v47  ;;  %19945 = vst [vmem:[#allocation48_spill] sm:$0xff] %v16978_v58  ;;  %v11432_v0 = vld [vmem:[#allocation8 + $0x1110] sm:$0xf0]  ;;  %v13309_v47 = vld [vmem:[#allocation8 + $0x11f4] sm:$0xf0] }
 0x4f8   : > { %6424 = vmatpush.bf16.msrb.mxu1 %v16966_v54  ;;  %19946 = vst [vmem:[#allocation53_spill] sm:$0xff] %v16981_v50  ;;  %v11576_v54 = vld [vmem:[#allocation8 + $0x1230] sm:$0xf0]  ;;  %v16990_v20 = vor.u32 %v13278_v22, %v11432_v0  ;;  %v16997_v45 = vor.u32 %v13309_v47, %v11550_v53  ;;  %v13305_v57 = vld [vmem:[#allocation8 + $0x11d4] sm:$0xf0] }
 0x4f9   : > { %19947 = vst [vmem:[#allocation54_spill] sm:$0xff] %v16984_v17  ;;  %v16999_v8 = vor.u32 %v13314_v33, %v11576_v54  ;;  %v13310_v22 = vld [vmem:[#allocation8 + $0x1204] sm:$0xf]  ;;  %v11560_v0 = vld [vmem:[#allocation8 + $0x1210] sm:$0xf0] }
 0x4fa   : > { %6436 = vmatpush.bf16.msrb.mxu2 %v16969_v21  ;;  %19948 = vst [vmem:[#allocation49_spill] sm:$0xff] %v16987_v16  ;;  %v13346_v21 = vld [vmem:[#allocation8 + $0x1324] sm:$0xf]  ;;  %v11688_v60 = vld [vmem:[#allocation8 + $0x1310] sm:$0xf0]  ;;  %v17013_v53 = vor.u32 %v13310_v22, %v11560_v0 }
 0x4fb   : > { %6449 = vmatpush.bf16.msrb.mxu3 %v16972_v49  ;;  %6412 = vmatpush.bf16.msrb.mxu0 %v16975_v2  ;;  %19949 = vst [vmem:[#allocation50_spill] sm:$0xff] %v16990_v20  ;;  %v11406_v49 = vld [vmem:[#allocation8 + $0x10c8] sm:$0xf]  ;;  %v17002_v2 = vor.u32 %v13346_v21, %v11704_v23  ;;  %v13342_v34 = vld [vmem:[#allocation8 + $0x1304] sm:$0xf]  ;;  %v17011_v21 = vor.u32 %v13305_v57, %v11534_v7 }
 0x4fc   : > { %6425 = vmatpush.bf16.msrb.mxu1 %v16978_v58  ;;  %19950 = vst [vmem:[#allocation55_spill] sm:$0xff] %v16992_v36  ;;  %v11678_v24 = vld [vmem:[#allocation8 + $0x12e8] sm:$0xf]  ;;  %v13341_v46 = vld [vmem:[#allocation8 + $0x12f4] sm:$0xf0]  ;;  %v17007_v33 = vor.u32 %v13273_v31, %v11406_v49 }
 0x4fd   : > { %19951 = vst [vmem:[#allocation56_spill] sm:$0xff] %v16997_v45  ;;  %v11806_v47 = vld [vmem:[#allocation8 + $0x13e8] sm:$0xf]  ;;  %v13373_v54 = vld [vmem:[#allocation8 + $0x13f4] sm:$0xf0]  ;;  %v17019_v49 = vor.u32 %v13341_v46, %v11678_v24 }
 0x4fe   : > { %6437 = vmatpush.bf16.msrb.mxu2 %v16981_v50  ;;  %19952 = vst [vmem:[#allocation51_spill] sm:$0xff] %v16999_v8  ;;  %v11390_v23 = vld [vmem:[#allocation8 + $0x10a8] sm:$0xf]  ;;  %v17022_v7 = vor.u32 %v13373_v54, %v11806_v47  ;;  %v13337_v22 = vld [vmem:[#allocation8 + $0x12d4] sm:$0xf0] }
 0x4ff   : > { %6450 = vmatpush.bf16.msrb.mxu3 %v16984_v17  ;;  %19953 = vst [vmem:[#allocation52_spill] sm:$0xff] %v17002_v2  ;;  %6413 = vmatpush.bf16.msrb.mxu0 %v16987_v16  ;;  %v13269_v16 = vld [vmem:[#allocation8 + $0x10b4] sm:$0xf0]  ;;  %v5395_v17 = vpop.f32.mrf.mxu2  ;;  %v11518_v31 = vld [vmem:[#allocation8 + $0x11a8] sm:$0xf] }
 0x500   : > { %6426 = vmatpush.bf16.msrb.mxu1 %v16990_v20  ;;  %19954 = vst [vmem:[#allocation57_spill] sm:$0xff] %v17007_v33  ;;  %v13301_v20 = vld [vmem:[#allocation8 + $0x11b4] sm:$0xf0]  ;;  %v11662_v57 = vld [vmem:[#allocation8 + $0x12c8] sm:$0xf]  ;;  %v17025_v0 = vor.u32 %v13269_v16, %v11390_v23 }
 0x501   : > { %19955 = vst [vmem:[#allocation58_spill] sm:$0xff] %v17011_v21  ;;  %v11790_v17 = vld [vmem:[#allocation8 + $0x13c8] sm:$0xf]  ;;  %v17033_v24 = vor.u32 %v13337_v22, %v11662_v57  ;;  %v13297_v47 = vld [vmem:[#allocation8 + $0x1194] sm:$0xf0] }
 0x502   : > { %6438 = vmatpush.bf16.msrb.mxu2 %v16999_v8  ;;  %19956 = vst [vmem:[#allocation59_spill] sm:$0xff] %v17013_v53  ;;  %6414 = vmatmul.bf16.vlgmr.msrb.gmra.mxu0 %v16893_v19  ;;  %v11502_v46 = vld [vmem:[#allocation8 + $0x1188] sm:$0xf]  ;;  %v13333_v23 = vld [vmem:[#allocation8 + $0x12b4] sm:$0xf0] }
 0x503   : > { %6458 = vmatpush.bf16.msra.mxu0 %v16992_v36  ;;  %6451 = vmatpush.bf16.msrb.mxu3 %v17002_v2  ;;  %v17017_v36 = vor.u32 %v13342_v34, %v11688_v60  ;;  %19958 = vst [vmem:[#allocation61_spill] sm:$0xff] %v17019_v49  ;;  %v13369_v2 = vld [vmem:[#allocation8 + $0x13d4] sm:$0xf0]  ;;  %v17029_v34 = vor.u32 %v13301_v20, %v11518_v31  ;;  %v11374_v60 = vld [vmem:[#allocation8 + $0x1088] sm:$0xf] }
 0x504   : > { %6471 = vmatpush.bf16.msra.mxu1 %v16997_v45  ;;  %v5408_v45 = vpop.f32.mrf.mxu3  ;;  %19959 = vst [vmem:[#allocation62_spill] sm:$0xff] %v17022_v7  ;;  %v17036_v16 = vor.u32 %v13369_v2, %v11790_v17  ;;  %v11646_v54 = vld [vmem:[#allocation8 + $0x12a8] sm:$0xf]  ;;  %v17044_v57 = vor.u32 %v13297_v47, %v11502_v46  ;;  %v5432_v46 = vpop.f32.mrf.mxu1  ;;  %v13271_v58 = vld [vmem:[#allocation8 + $0x10cc] sm:$0xf] }
 0x505   : > { %19957 = vst [vmem:[#allocation60_spill] sm:$0xff] %v17017_v36  ;;  %6427 = vmatmul.bf16.vlgmr.msrb.gmra.mxu1 %v16899_v13  ;;  %v13265_v45 = vld [vmem:[#allocation8 + $0x1094] sm:$0xf0]  ;;  %v11774_v31 = vld [vmem:[#allocation8 + $0x13a8] sm:$0xf]  ;;  %v17047_v2 = vor.u32 %v13333_v23, %v11646_v54 }
 0x506   : > { %19960 = vst [vmem:[#allocation63_spill] sm:$0xff] %v17025_v0  ;;  %6439 = vmatpush.bf16.msrb.mxu2 %v17013_v53  ;;  %v17040_v20 = vor.u32 %v13265_v45, %v11374_v60  ;;  %v11358_v22 = vld [vmem:[#allocation8 + $0x1068] sm:$0xf]  ;;  %v5419_v60 = vpop.f32.mrf.mxu0  ;;  %v13329_v53 = vld [vmem:[#allocation8 + $0x1294] sm:$0xf0] }
 0x507   : > { %6459 = vmatpush.bf16.msra.mxu0 %v17007_v33  ;;  %19961 = vst [vmem:[#allocation64_spill] sm:$0xff] %v17029_v34  ;;  %6452 = vmatpush.bf16.msrb.mxu3 %v17017_v36  ;;  %v13365_v36 = vld [vmem:[#allocation8 + $0x13b4] sm:$0xf0]  ;;  %v11486_v17 = vld [vmem:[#allocation8 + $0x1168] sm:$0xf] }
 0x508   : > { %6472 = vmatpush.bf16.msra.mxu1 %v17011_v21  ;;  %19962 = vst [vmem:[#allocation65_spill] sm:$0xff] %v17033_v24  ;;  %v17050_v45 = vor.u32 %v13365_v36, %v11774_v31  ;;  %v19968_v21 = vperm.slane %v16653_v40, 1  ;;  %v13361_v54 = vld [vmem:[#allocation8 + $0x1394] sm:$0xf0]  ;;  %v11310_v8 = vld [vmem:[#allocation8 + $0x1008] sm:$0xf] }
 0x509   : > { %19963 = vst [vmem:[#allocation66_spill] sm:$0xff] %v17036_v16  ;;  %6440 = vmatmul.bf16.vlgmr.msrb.gmra.mxu2 %v16923_v61  ;;  %v13257_v33 = vld [vmem:[#allocation8 + $0x1054] sm:$0xf0] }
 0x50a   : > { %6484 = vmatpush.bf16.msra.mxu2 %v17019_v49  ;;  %19964 = vst [vmem:[#allocation67_spill] sm:$0xff] %v17040_v20  ;;  %6453 = vmatmul.bf16.vlgmr.msrb.gmra.mxu3 %v16929_v39  ;;  %v13293_v49 = vld [vmem:[#allocation8 + $0x1174] sm:$0xf0] }
 0x50b   : > { %6497 = vmatpush.bf16.msra.mxu3 %v17022_v7  ;;  %6460 = vmatpush.bf16.msra.mxu0 %v17025_v0  ;;  %19965 = vst [vmem:[#allocation68_spill] sm:$0xff] %v17044_v57  ;;  %v13261_v7 = vld [vmem:[#allocation8 + $0x1074] sm:$0xf0]  ;;  %v11630_v0 = vld [vmem:[#allocation8 + $0x1288] sm:$0xf]  ;;  %v17058_v23 = vor.u32 %v13293_v49, %v11486_v17 }
 0x50c   : > { %6473 = vmatpush.bf16.msra.mxu1 %v17029_v34  ;;  %19966 = vst [vmem:[#allocation69_spill] sm:$0xff] %v17047_v2  ;;  %v5420_v34 = vadd.f32 %v5419_v60, %v19968_v21  ;;  %v17055_v47 = vor.u32 %v13261_v7, %v11358_v22  ;;  %v17063_v31 = vor.u32 %v13329_v53, %v11630_v0  ;;  %v11470_v21 = vld [vmem:[#allocation8 + $0x1148] sm:$0xf]  ;;  %v13289_v60 = vld [vmem:[#allocation8 + $0x1154] sm:$0xf0] }
 0x50d   : > { %19967 = vst [vmem:[#allocation70_spill] sm:$0xff] %v17050_v45  ;;  %v11614_v22 = vld [vmem:[#allocation8 + $0x1268] sm:$0xf]  ;;  %v13253_v0 = vld [vmem:[#allocation8 + $0x1034] sm:$0xf0] }
 0x50e   : > { %6485 = vmatpush.bf16.msra.mxu2 %v17033_v24  ;;  %19969 = vst [vmem:[#allocation71_spill] sm:$0xff] %v17055_v47  ;;  %v11758_v24 = vld [vmem:[#allocation8 + $0x1388] sm:$0xf]  ;;  %v17060_v36 = vadd.f32 %v5432_v46, %v5420_v34  ;;  %v17072_v34 = vor.u32 %v13289_v60, %v11470_v21 }
 0x50f   : > { %6498 = vmatpush.bf16.msra.mxu3 %v17036_v16  ;;  %6461 = vmatpush.bf16.msra.mxu0 %v17040_v20  ;;  %19970 = vst [vmem:[#allocation72_spill] sm:$0xff] %v17058_v23  ;;  %v11342_v16 = vld [vmem:[#allocation8 + $0x1048] sm:$0xf]  ;;  %v17066_v7 = vor.u32 %v13361_v54, %v11758_v24  ;;  %v13325_v20 = vld [vmem:[#allocation8 + $0x1274] sm:$0xf0] }
 0x510   : > { %6474 = vmatpush.bf16.msra.mxu1 %v17044_v57  ;;  %19971 = vst [vmem:[#allocation73_spill] sm:$0xff] %v17063_v31  ;;  %v17069_v49 = vor.u32 %v13257_v33, %v11342_v16  ;;  %v11742_v17 = vld [vmem:[#allocation8 + $0x1368] sm:$0xf]  ;;  %v13357_v57 = vld [vmem:[#allocation8 + $0x1374] sm:$0xf0]  ;;  %v17075_v46 = vor.u32 %v13325_v20, %v11614_v22 }
 0x511   : > { %19972 = vst [vmem:[#allocation74_spill] sm:$0xff] %v17066_v7  ;;  %v11326_v53 = vld [vmem:[#allocation8 + $0x1028] sm:$0xf]  ;;  %v13285_v54 = vld [vmem:[#allocation8 + $0x1134] sm:$0xf0] }
 0x512   : > { %6486 = vmatpush.bf16.msra.mxu2 %v17047_v2  ;;  %19973 = vst [vmem:[#allocation75_spill] sm:$0xff] %v17069_v49  ;;  %v11454_v24 = vld [vmem:[#allocation8 + $0x1128] sm:$0xf]  ;;  %v13321_v16 = vld [vmem:[#allocation8 + $0x1254] sm:$0xf0]  ;;  %v5434_v2 = vpop.f32.mrf.mxu1  ;;  %v17081_v21 = vor.u32 %v13253_v0, %v11326_v53  ;;  %v17090_v53 = vpop.f32.mrf.mxu2 }
 0x513   : > { %6499 = vmatpush.bf16.msra.mxu3 %v17050_v45  ;;  %6462 = vmatpush.bf16.msra.mxu0 %v17055_v47  ;;  %19974 = vst [vmem:[#allocation76_spill] sm:$0xff] %v17072_v34  ;;  %v5421_v45 = vpop.f32.mrf.mxu0  ;;  %v17078_v47 = vor.u32 %v13357_v57, %v11742_v17  ;;  %v11598_v33 = vld [vmem:[#allocation8 + $0x1248] sm:$0xf]  ;;  %v17084_v20 = vor.u32 %v13285_v54, %v11454_v24  ;;  %v13249_v22 = vld [vmem:[#allocation8 + $0x1014] sm:$0xf0]  ;;  %v17094_v54 = vpop.f32.mrf.mxu3 }
 0x514   : > { %6475 = vmatpush.bf16.msra.mxu1 %v17058_v23  ;;  %19975 = vst [vmem:[#allocation77_spill] sm:$0xff] %v17075_v46  ;;  %v11726_v60 = vld [vmem:[#allocation8 + $0x1348] sm:$0xf]  ;;  %v13353_v23 = vld [vmem:[#allocation8 + $0x1354] sm:$0xf0]  ;;  %v17087_v57 = vor.u32 %v13321_v16, %v11598_v33  ;;  %v17097_v50 = vor.u32 %v13249_v22, %v11310_v8 }
 0x515   : > { %19976 = vst [vmem:[#allocation78_spill] sm:$0xff] %v17078_v47  ;;  %v13275_v45 = vld [vmem:[#allocation8 + $0x10ec] sm:$0xf]  ;;  %v11424_v2 = vld [vmem:[#allocation8 + $0x10f8] sm:$0xf0]  ;;  %v17092_v0 = vor.u32 %v13353_v23, %v11726_v60 }
 0x516   : > { %6487 = vmatpush.bf16.msra.mxu2 %v17063_v31  ;;  %19977 = vst [vmem:[#allocation79_spill] sm:$0xff] %v17081_v21  ;;  %v11438_v31 = vld [vmem:[#allocation8 + $0x1108] sm:$0xf]  ;;  %v13307_v17 = vld [vmem:[#allocation8 + $0x11ec] sm:$0xf] }
 0x517   : > { %6500 = vmatpush.bf16.msra.mxu3 %v17066_v7  ;;  %6463 = vmatpush.bf16.msra.mxu0 %v17069_v49  ;;  %19978 = vst [vmem:[#allocation80_spill] sm:$0xff] %v17084_v20  ;;  %v13281_v7 = vld [vmem:[#allocation8 + $0x1114] sm:$0xf0]  ;;  %v11552_v49 = vld [vmem:[#allocation8 + $0x11f8] sm:$0xf0] }
 0x518   : > { %6476 = vmatpush.bf16.msra.mxu1 %v17072_v34  ;;  %19979 = vst [vmem:[#allocation81_spill] sm:$0xff] %v17092_v0  ;;  %v11582_v34 = vld [vmem:[#allocation8 + $0x1228] sm:$0xf]  ;;  %v13317_v24 = vld [vmem:[#allocation8 + $0x1234] sm:$0xf0]  ;;  %v17105_v23 = vor.u32 %v13307_v17, %v11552_v49  ;;  %v17115_v49 = vor.u32 %v13271_v58, %v11408_v56 }
 0x519   : > { %19980 = vst [vmem:[#allocation82_spill] sm:$0xff] %v17097_v50  ;;  %v11710_v33 = vld [vmem:[#allocation8 + $0x1328] sm:$0xf]  ;;  %v13349_v16 = vld [vmem:[#allocation8 + $0x1334] sm:$0xf0]  ;;  %v17107_v60 = vor.u32 %v13317_v24, %v11582_v34 }
 0x51a   : > { %6488 = vmatpush.bf16.msra.mxu2 %v17075_v46  ;;  %v17100_v46 = vor.u32 %v13281_v7, %v11438_v31  ;;  %19983 = vst [vmem:[#allocation85_spill] sm:$0xff] %v17105_v23  ;;  %v17110_v8 = vor.u32 %v13349_v16, %v11710_v33  ;;  %v11566_v22 = vld [vmem:[#allocation8 + $0x1208] sm:$0xf]  ;;  %v13345_v7 = vld [vmem:[#allocation8 + $0x1314] sm:$0xf0] }
 0x51b   : > { %6501 = vmatpush.bf16.msra.mxu3 %v17078_v47  ;;  %6464 = vmatpush.bf16.msra.mxu0 %v17081_v21  ;;  %v17102_v47 = vor.u32 %v13275_v45, %v11424_v2  ;;  %19984 = vst [vmem:[#allocation86_spill] sm:$0xff] %v17107_v60  ;;  %v11536_v21 = vld [vmem:[#allocation8 + $0x11d8] sm:$0xf0]  ;;  %v11694_v31 = vld [vmem:[#allocation8 + $0x1308] sm:$0xf] }
 0x51c   : > { %6477 = vmatpush.bf16.msra.mxu1 %v17084_v20  ;;  %19981 = vst [vmem:[#allocation83_spill] sm:$0xff] %v17100_v46  ;;  %v13313_v20 = vld [vmem:[#allocation8 + $0x1214] sm:$0xf0]  ;;  %v13339_v45 = vld [vmem:[#allocation8 + $0x12ec] sm:$0xf]  ;;  %v17119_v24 = vor.u32 %v13303_v11, %v11536_v21 }
 0x51d   : > { %19982 = vst [vmem:[#allocation84_spill] sm:$0xff] %v17102_v47  ;;  %v11680_v2 = vld [vmem:[#allocation8 + $0x12f8] sm:$0xf0]  ;;  %v13371_v34 = vld [vmem:[#allocation8 + $0x13ec] sm:$0xf]  ;;  %v17121_v33 = vor.u32 %v13313_v20, %v11566_v22 }
 0x51e   : > { %6489 = vmatpush.bf16.msra.mxu2 %v17087_v57  ;;  %19985 = vst [vmem:[#allocation87_spill] sm:$0xff] %v17110_v8  ;;  %v11808_v17 = vld [vmem:[#allocation8 + $0x13f8] sm:$0xf0]  ;;  %v13267_v16 = vld [vmem:[#allocation8 + $0x10ac] sm:$0xf]  ;;  %v17127_v56 = vor.u32 %v13339_v45, %v11680_v2 }
 0x51f   : > { %6502 = vmatpush.bf16.msra.mxu3 %v17092_v0  ;;  %6465 = vmatpush.bf16.msra.mxu0 %v17097_v50  ;;  %19986 = vst [vmem:[#allocation88_spill] sm:$0xff] %v17115_v49  ;;  %v11392_v50 = vld [vmem:[#allocation8 + $0x10b8] sm:$0xf0]  ;;  %v5447_v0 = vpop.f32.mrf.mxu2  ;;  %v13299_v58 = vld [vmem:[#allocation8 + $0x11ac] sm:$0xf]  ;;  %v17130_v11 = vor.u32 %v13371_v34, %v11808_v17 }
 0x520   : > { %6478 = vmatpush.bf16.msra.mxu1 %v17100_v46  ;;  %19987 = vst [vmem:[#allocation89_spill] sm:$0xff] %v17119_v24  ;;  %v11520_v46 = vld [vmem:[#allocation8 + $0x11b8] sm:$0xf0]  ;;  %v13335_v21 = vld [vmem:[#allocation8 + $0x12cc] sm:$0xf]  ;;  %v17133_v22 = vor.u32 %v13267_v16, %v11392_v50 }
 0x521   : > { %19988 = vst [vmem:[#allocation90_spill] sm:$0xff] %v17121_v33  ;;  %v11664_v20 = vld [vmem:[#allocation8 + $0x12d8] sm:$0xf0]  ;;  %v13367_v0 = vld [vmem:[#allocation8 + $0x13cc] sm:$0xf] }
 0x522   : > { %6490 = vmatpush.bf16.msra.mxu2 %v17107_v60  ;;  %6466 = vmatmul.bf16.vlgmr.msra.gmra.mxu0 %v16893_v19  ;;  %19990 = vst [vmem:[#allocation92_spill] sm:$0xff] %v17127_v56  ;;  %v17141_v45 = vor.u32 %v13335_v21, %v11664_v20  ;;  %v13295_v2 = vld [vmem:[#allocation8 + $0x118c] sm:$0xf]  ;;  %v11504_v34 = vld [vmem:[#allocation8 + $0x1198] sm:$0xf0] }
 0x523   : > { %6510 = vmatpush.bf16.msrb.mxu0 %v17102_v47  ;;  %6503 = vmatpush.bf16.msra.mxu3 %v17110_v8  ;;  %v17125_v47 = vor.u32 %v13345_v7, %v11694_v31  ;;  %19991 = vst [vmem:[#allocation93_spill] sm:$0xff] %v17130_v11  ;;  %v11792_v8 = vld [vmem:[#allocation8 + $0x13d8] sm:$0xf0]  ;;  %v17137_v31 = vor.u32 %v13299_v58, %v11520_v46  ;;  %v13263_v7 = vld [vmem:[#allocation8 + $0x108c] sm:$0xf] }
 0x524   : > { %6523 = vmatpush.bf16.msrb.mxu1 %v17105_v23  ;;  %v5460_v23 = vpop.f32.mrf.mxu3  ;;  %19992 = vst [vmem:[#allocation94_spill] sm:$0xff] %v17133_v22  ;;  %v17144_v50 = vor.u32 %v13367_v0, %v11792_v8  ;;  %v13331_v17 = vld [vmem:[#allocation8 + $0x12ac] sm:$0xf]  ;;  %v11648_v16 = vld [vmem:[#allocation8 + $0x12b8] sm:$0xf0]  ;;  %v17152_v21 = vor.u32 %v13295_v2, %v11504_v34 }
 0x525   : > { %19989 = vst [vmem:[#allocation91_spill] sm:$0xff] %v17125_v47  ;;  %6479 = vmatmul.bf16.vlgmr.msra.gmra.mxu1 %v16899_v13  ;;  %v11376_v23 = vld [vmem:[#allocation8 + $0x1098] sm:$0xf0]  ;;  %v13363_v58 = vld [vmem:[#allocation8 + $0x13ac] sm:$0xf]  ;;  %v17155_v8 = vor.u32 %v13331_v17, %v11648_v16 }
 0x526   : > { %6491 = vmatpush.bf16.msra.mxu2 %v17121_v33  ;;  %19993 = vst [vmem:[#allocation95_spill] sm:$0xff] %v17137_v31  ;;  %v17148_v46 = vor.u32 %v13263_v7, %v11376_v23  ;;  %v13259_v20 = vld [vmem:[#allocation8 + $0x106c] sm:$0xf]  ;;  %v17158_v7 = vpop.f32.mrf.mxu0  ;;  %v11632_v33 = vld [vmem:[#allocation8 + $0x1298] sm:$0xf0] }
 0x527   : > { %6511 = vmatpush.bf16.msrb.mxu0 %v17115_v49  ;;  %6504 = vmatpush.bf16.msra.mxu3 %v17125_v47  ;;  %19994 = vst [vmem:[#allocation96_spill] sm:$0xff] %v17141_v45  ;;  %v11776_v47 = vld [vmem:[#allocation8 + $0x13b8] sm:$0xf0]  ;;  %v13291_v0 = vld [vmem:[#allocation8 + $0x116c] sm:$0xf] }
 0x528   : > { %6524 = vmatpush.bf16.msrb.mxu1 %v17119_v24  ;;  %19995 = vst [vmem:[#allocation97_spill] sm:$0xff] %v17144_v50  ;;  %v17160_v23 = vor.u32 %v13363_v58, %v11776_v47  ;;  %v17162_v24 = vpop.f32.mrf.mxu1  ;;  %v13359_v34 = vld [vmem:[#allocation8 + $0x138c] sm:$0xf] }
 0x529   : > { %6492 = vmatmul.bf16.vlgmr.msra.gmra.mxu2 %v16923_v61  ;;  %19996 = vst [vmem:[#allocation98_spill] sm:$0xff] %v17148_v46  ;;  %v13255_v16 = vld [vmem:[#allocation8 + $0x104c] sm:$0xf] }
 0x52a   : > { %6536 = vmatpush.bf16.msrb.mxu2 %v17127_v56  ;;  %6505 = vmatmul.bf16.vlgmr.msra.gmra.mxu3 %v16929_v39  ;;  %19997 = vst [vmem:[#allocation99_spill] sm:$0xff] %v17152_v21  ;;  %v11488_v56 = vld [vmem:[#allocation8 + $0x1178] sm:$0xf0]  ;;  %v13287_v58 = vld [vmem:[#allocation8 + $0x114c] sm:$0xf] }
 0x52b   : > { %6549 = vmatpush.bf16.msrb.mxu3 %v17130_v11  ;;  %6512 = vmatpush.bf16.msrb.mxu0 %v17133_v22  ;;  %v11360_v11 = vld [vmem:[#allocation8 + $0x1078] sm:$0xf0]  ;;  %19998 = vst [vmem:[#allocation100_spill] sm:$0xff] %v17155_v8  ;;  %v13327_v22 = vld [vmem:[#allocation8 + $0x128c] sm:$0xf]  ;;  %v17168_v17 = vor.u32 %v13291_v0, %v11488_v56 }
 0x52c   : > { %6525 = vmatpush.bf16.msrb.mxu1 %v17137_v31  ;;  %19999 = vst [vmem:[#allocation101_spill] sm:$0xff] %v17160_v23  ;;  %v17165_v2 = vor.u32 %v13259_v20, %v11360_v11  ;;  %v17171_v47 = vor.u32 %v13327_v22, %v11632_v33  ;;  %v11472_v31 = vld [vmem:[#allocation8 + $0x1158] sm:$0xf0]  ;;  %v13323_v11 = vld [vmem:[#allocation8 + $0x126c] sm:$0xf] }
 0x52d   : > { %20001 = vst [vmem:[#allocation103_spill] sm:$0xff] %v17168_v17  ;;  %v11616_v20 = vld [vmem:[#allocation8 + $0x1278] sm:$0xf0]  ;;  %v13355_v56 = vld [vmem:[#allocation8 + $0x136c] sm:$0xf] }
 0x52e   : > { %6537 = vmatpush.bf16.msrb.mxu2 %v17141_v45  ;;  %20000 = vst [vmem:[#allocation102_spill] sm:$0xff] %v17165_v2  ;;  %v11760_v45 = vld [vmem:[#allocation8 + $0x1398] sm:$0xf0]  ;;  %v13251_v33 = vld [vmem:[#allocation8 + $0x102c] sm:$0xf] }
 0x52f   : > { %6550 = vmatpush.bf16.msrb.mxu3 %v17144_v50  ;;  %6513 = vmatpush.bf16.msrb.mxu0 %v17148_v46  ;;  %v11344_v50 = vld [vmem:[#allocation8 + $0x1058] sm:$0xf0]  ;;  %20002 = vst [vmem:[#allocation104_spill] sm:$0xff] %v17171_v47  ;;  %v17174_v49 = vor.u32 %v13359_v34, %v11760_v45  ;;  %v13283_v45 = vld [vmem:[#allocation8 + $0x112c] sm:$0xf] }
 0x530   : > { %6526 = vmatpush.bf16.msrb.mxu1 %v17152_v21  ;;  %v17177_v46 = vor.u32 %v13255_v16, %v11344_v50  ;;  %v11744_v0 = vld [vmem:[#allocation8 + $0x1378] sm:$0xf0]  ;;  %v17180_v21 = vor.u32 %v13287_v58, %v11472_v31  ;;  %v13319_v50 = vld [vmem:[#allocation8 + $0x124c] sm:$0xf]  ;;  %v5486_v60 = vpop.f32.mrf.mxu1 }
 0x531   : > { %20003 = vst [vmem:[#allocation105_spill] sm:$0xff] %v17174_v49  ;;  %v11328_v22 = vld [vmem:[#allocation8 + $0x1038] sm:$0xf0]  ;;  %v13351_v58 = vld [vmem:[#allocation8 + $0x134c] sm:$0xf]  ;;  %v17198_v60 = vpop.f32.mrf.mxu2 }
 0x532   : > { %6538 = vmatpush.bf16.msrb.mxu2 %v17155_v8  ;;  %20004 = vst [vmem:[#allocation106_spill] sm:$0xff] %v17177_v46  ;;  %v17183_v8 = vor.u32 %v13323_v11, %v11616_v20  ;;  %v11456_v34 = vld [vmem:[#allocation8 + $0x1138] sm:$0xf0]  ;;  %v17189_v31 = vor.u32 %v13251_v33, %v11328_v22  ;;  %v13247_v20 = vld [vmem:[#allocation8 + $0x100c] sm:$0xf] }
 0x533   : > { %6551 = vmatpush.bf16.msrb.mxu3 %v17160_v23  ;;  %6514 = vmatpush.bf16.msrb.mxu0 %v17165_v2  ;;  %v5473_v23 = vpop.f32.mrf.mxu0  ;;  %v17186_v2 = vor.u32 %v13355_v56, %v11744_v0  ;;  %v11600_v16 = vld [vmem:[#allocation8 + $0x1258] sm:$0xf0]  ;;  %v17192_v11 = vor.u32 %v13283_v45, %v11456_v34  ;;  %v13279_v56 = vld [vmem:[#allocation8 + $0x110c] sm:$0xf] }
 0x534   : > { %6527 = vmatpush.bf16.msrb.mxu1 %v17168_v17  ;;  %20005 = vst [vmem:[#allocation107_spill] sm:$0xff] %v17183_v8  ;;  %v11728_v17 = vld [vmem:[#allocation8 + $0x1358] sm:$0xf0]  ;;  %v17195_v23 = vor.u32 %v13319_v50, %v11600_v16  ;;  %v13315_v22 = vld [vmem:[#allocation8 + $0x122c] sm:$0xf] }
 0x535   : > { %20006 = vst [vmem:[#allocation108_spill] sm:$0xff] %v17186_v2  ;;  %v11440_v0 = vld [vmem:[#allocation8 + $0x1118] sm:$0xf0]  ;;  %v17200_v33 = vor.u32 %v13351_v58, %v11728_v17  ;;  %v13347_v34 = vld [vmem:[#allocation8 + $0x132c] sm:$0xf] }
 0x536   : > { %6539 = vmatpush.bf16.msrb.mxu2 %v17171_v47  ;;  %v11312_v47 = vld [vmem:[#allocation8 + $0x1018] sm:$0xf0]  ;;  %v17208_v50 = vor.u32 %v13279_v56, %v11440_v0  ;;  %v13311_v58 = vld [vmem:[#allocation8 + $0x120c] sm:$0xf] }
 0x537   : > { %6552 = vmatpush.bf16.msrb.mxu3 %v17174_v49  ;;  %6515 = vmatpush.bf16.msrb.mxu0 %v17177_v46  ;;  %v11584_v46 = vld [vmem:[#allocation8 + $0x1238] sm:$0xf0]  ;;  %v17202_v49 = vpop.f32.mrf.mxu3  ;;  %v17205_v45 = vor.u32 %v13247_v20, %v11312_v47  ;;  %v13343_v47 = vld [vmem:[#allocation8 + $0x130c] sm:$0xf] }
 0x538   : > { %6528 = vmatpush.bf16.msrb.mxu1 %v17180_v21  ;;  %v17211_v16 = vor.u32 %v13315_v22, %v11584_v46  ;;  %v11696_v20 = vld [vmem:[#allocation8 + $0x1318] sm:$0xf0]  ;;  %v20021_v22 = vld [vmem:[#allocation38_spill] sm:$0xff] }
 0x539   : > { %v17225_v56 = vor.u32 %v13343_v47, %v11696_v20  ;;  %v20023_v47 = vld [vmem:[#allocation37_spill] sm:$0xff]  ;;  %v20024_v20 = vld [vmem:[#allocation39_spill] sm:$0xff] }
 0x53a   : > { %6540 = vmatpush.bf16.msrb.mxu2 %v17183_v8  ;;  %v11712_v8 = vld [vmem:[#allocation8 + $0x1338] sm:$0xf0] }
 0x53b   : > { %6553 = vmatpush.bf16.msrb.mxu3 %v17186_v2  ;;  %6516 = vmatpush.bf16.msrb.mxu0 %v17189_v31  ;;  %v17214_v17 = vor.u32 %v13347_v34, %v11712_v8  ;;  %v11568_v2 = vld [vmem:[#allocation8 + $0x1218] sm:$0xf0]  ;;  %v5499_v8 = vpop.f32.mrf.mxu2 }
 0x53c   : > { %6529 = vmatpush.bf16.msrb.mxu1 %v17192_v11  ;;  %v17221_v46 = vor.u32 %v13311_v58, %v11568_v2  ;;  %v20022_v58 = vld [vmem:[#allocation35_spill] sm:$0xff]  ;;  %v20025_v8 = vld [vmem:[#allocation40_spill] sm:$0xff] }
 0x53e   : > { %6541 = vmatpush.bf16.msrb.mxu2 %v17195_v23 }
 0x53f   : > { %6554 = vmatpush.bf16.msrb.mxu3 %v17200_v33  ;;  %6517 = vmatpush.bf16.msrb.mxu0 %v17205_v45  ;;  %v5512_v0 = vpop.f32.mrf.mxu3 }
 0x540   : > { %6530 = vmatpush.bf16.msrb.mxu1 %v17208_v50  ;;  %v20026_v0 = vld [vmem:[#allocation41_spill] sm:$0xff] }
 0x542   : > { %6542 = vmatpush.bf16.msrb.mxu2 %v17211_v16  ;;  %6518 = vmatmul.bf16.vlgmr.msrb.gmra.mxu0 %v16893_v19  ;;  %v17283_v19 = vld [vmem:[#allocation10 + $0x10] sm:$0xf] }
 0x543   : > { %6570 = vmatpush.bf16.msra.mxu0 %v16776_v52  ;;  %6555 = vmatpush.bf16.msrb.mxu3 %v17214_v17  ;;  %v5523_v52 = vpop.f32.mrf.mxu0 }
 0x544   : > { %6583 = vmatpush.bf16.msra.mxu1 %v16779_v59  ;;  %v5536_v59 = vpop.f32.mrf.mxu1 }
 0x545   : > { %6531 = vmatmul.bf16.vlgmr.msrb.gmra.mxu1 %v16899_v13  ;;  %v20014_v13 = vld [vmem:[#allocation27_spill] sm:$0xff] }
 0x546   : > { %6543 = vmatpush.bf16.msrb.mxu2 %v17221_v46 }
 0x547   : > { %6571 = vmatpush.bf16.msra.mxu0 %v16785_v44  ;;  %6556 = vmatpush.bf16.msrb.mxu3 %v17225_v56  ;;  %v20007_v44 = vperm.slane %v16653_v40, 2 }
 0x548   : > { %6584 = vmatpush.bf16.msra.mxu1 %v16789_v6 }
 0x549   : > { %6544 = vmatmul.bf16.vlgmr.msrb.gmra.mxu2 %v16923_v61  ;;  %v5472_v6 = vadd.f32 %v17158_v7, %v20007_v44 }
 0x54a   : > { %6596 = vmatpush.bf16.msra.mxu2 %v16793_v37  ;;  %6557 = vmatmul.bf16.vlgmr.msrb.gmra.mxu3 %v16929_v39  ;;  %v5446_v37 = vadd.f32 %v17090_v53, %v17060_v36  ;;  %v20015_v39 = vld [vmem:[#allocation29_spill] sm:$0xff]  ;;  %v19071_v36 = vperm.slane %v17283_v19, 0  ;;  %v20017_v53 = vld [vmem:[#allocation34_spill] sm:$0xff] }
 0x54b   : > { %6609 = vmatpush.bf16.msra.mxu3 %v16796_v48  ;;  %6572 = vmatpush.bf16.msra.mxu0 %v16799_v14  ;;  %v20008_v48 = vperm.slane %v16653_v40, 3 }
 0x54c   : > { %6585 = vmatpush.bf16.msra.mxu1 %v16803_v3  ;;  %v5525_v3 = vpop.f32.mrf.mxu0 }
 0x54d   : > { %v5524_v14 = vadd.f32 %v5523_v52, %v20008_v48  ;;  %v20027_v52 = vld [vmem:[#allocation42_spill] sm:$0xff]  ;;  %v20030_v48 = vld [vmem:[#allocation45_spill] sm:$0xff] }
 0x54e   : > { %6597 = vmatpush.bf16.msra.mxu2 %v16807_v26  ;;  %v5538_v26 = vpop.f32.mrf.mxu1 }
 0x54f   : > { %6610 = vmatpush.bf16.msra.mxu3 %v16810_v18  ;;  %6573 = vmatpush.bf16.msra.mxu0 %v16814_v62  ;;  %v5485_v18 = vadd.f32 %v17162_v24, %v5472_v6  ;;  %v5459_v62 = vadd.f32 %v17094_v54, %v5446_v37  ;;  %v20018_v54 = vld [vmem:[#allocation31_spill] sm:$0xff]  ;;  %v20029_v37 = vld [vmem:[#allocation44_spill] sm:$0xff] }
 0x550   : > { %6586 = vmatpush.bf16.msra.mxu1 %v16818_v38  ;;  %v5537_v38 = vadd.f32 %v5536_v59, %v5524_v14  ;;  %v20028_v6 = vld [vmem:[#allocation43_spill] sm:$0xff]  ;;  %v20031_v14 = vld [vmem:[#allocation46_spill] sm:$0xff] }
 0x551   : > { %v5498_v40 = vadd.f32 %v17198_v60, %v5485_v18  ;;  %v20020_v60 = vld [vmem:[#allocation36_spill] sm:$0xff] }
 0x552   : > { %6598 = vmatpush.bf16.msra.mxu2 %v16821_v9  ;;  %v5549_v9 = vpop.f32.mrf.mxu2 }
 0x553   : > { %6611 = vmatpush.bf16.msra.mxu3 %v16824_v55  ;;  %6574 = vmatpush.bf16.msra.mxu0 %v16827_v5  ;;  %v5550_v55 = vadd.f32 %v5549_v9, %v5537_v38  ;;  %v5562_v5 = vpop.f32.mrf.mxu3  ;;  %v20033_v38 = vld [vmem:[#allocation48_spill] sm:$0xff]  ;;  %v20034_v9 = vld [vmem:[#allocation53_spill] sm:$0xff] }
 0x554   : > { %6587 = vmatpush.bf16.msra.mxu1 %v16831_v28  ;;  %v5566_v28 = vmax.f32 %v16994_v15, 0.0  ;;  %v20016_v15 = vld [vmem:[#allocation32_spill] sm:$0xff] }
 0x556   : > { %6599 = vmatpush.bf16.msra.mxu2 %v16835_v32  ;;  %v5567_v32 = vmax.f32 %v5459_v62, 0.0  ;;  %v20032_v62 = vld [vmem:[#allocation47_spill] sm:$0xff] }
 0x557   : > { %6612 = vmatpush.bf16.msra.mxu3 %v16838_v30  ;;  %6575 = vmatpush.bf16.msra.mxu0 %v16841_v41  ;;  %v5511_v30 = vadd.f32 %v17202_v49, %v5498_v40  ;;  %v5563_v41 = vadd.f32 %v5562_v5, %v5550_v55  ;;  %v20019_v49 = vld [vmem:[#allocation33_spill] sm:$0xff]  ;;  %v20035_v55 = vld [vmem:[#allocation54_spill] sm:$0xff] }
 0x558   : > { %6588 = vmatpush.bf16.msra.mxu1 %v16849_v4  ;;  %v17269_v4 = vpack.c.bf16 %v5566_v28, %v5566_v28  ;;  %v20036_v5 = vld [vmem:[#allocation49_spill] sm:$0xff]  ;;  %v20037_v28 = vld [vmem:[#allocation50_spill] sm:$0xff] }
 0x55a   : > { %6600 = vmatpush.bf16.msra.mxu2 %v16854_v12  ;;  %v17273_v12 = vpack.c.bf16 %v5567_v32, %v5567_v32  ;;  %v20038_v32 = vld [vmem:[#allocation55_spill] sm:$0xff] }
 0x55b   : > { %6613 = vmatpush.bf16.msra.mxu3 %v16857_v27  ;;  %6576 = vmatpush.bf16.msra.mxu0 %v16860_v1  ;;  %v5568_v27 = vmax.f32 %v5511_v30, 0.0  ;;  %v20009_v1 = vld [vmem:[#allocation24_spill] sm:$0xff] }
 0x55c   : > { %6589 = vmatpush.bf16.msra.mxu1 %v16865_v51  ;;  %v5551_v51 = vpop.f32.mrf.mxu2  ;;  %v20039_v30 = vld [vmem:[#allocation56_spill] sm:$0xff] }
 0x55e   : > { %6601 = vmatpush.bf16.msra.mxu2 %v16868_v25  ;;  %v5569_v25 = vmax.f32 %v5563_v41, 0.0  ;;  %v20040_v41 = vld [vmem:[#allocation51_spill] sm:$0xff] }
 0x55f   : > { %6614 = vmatpush.bf16.msra.mxu3 %v16872_v10  ;;  %6577 = vmatpush.bf16.msra.mxu0 %v16875_v35  ;;  %v5564_v10 = vpop.f32.mrf.mxu3  ;;  %v20010_v35 = vld [vmem:[#allocation25_spill] sm:$0xff]  ;;  %v6363_v24 = vpop.f32.mrf.mxu0 }
 0x560   : > { %6590 = vmatpush.bf16.msra.mxu1 %v16879_v29  ;;  %v20011_v29 = vld [vmem:[#allocation26_spill] sm:$0xff]  ;;  %v17289_v61 = vpack.c.bf16 %v5569_v25, %v5569_v25  ;;  %v6364_v7 = vadd.f32 %v6363_v24, %v19071_v36  ;;  %v20042_v25 = vld [vmem:[#allocation57_spill] sm:$0xff]  ;;  %v12136_v36 = vld [vmem:[#allocation8 + $0x1690] sm:$0xf0] }
 0x561   : > { %v20043_v10 = vld [vmem:[#allocation58_spill] sm:$0xff] }
 0x562   : > { %6602 = vmatpush.bf16.msra.mxu2 %v16886_v43  ;;  %6578 = vmatmul.bf16.vlgmr.msra.gmra.mxu0 %v17269_v4  ;;  %v20013_v43 = vld [vmem:[#allocation30_spill] sm:$0xff]  ;;  %v6376_v2 = vpop.f32.mrf.mxu1 }
 0x563   : > { %6622 = vmatpush.bf16.msrb.mxu0 %v16881_v63  ;;  %6615 = vmatpush.bf16.msra.mxu3 %v20009_v1  ;;  %v20012_v63 = vld [vmem:[#allocation28_spill] sm:$0xff]  ;;  %v6377_v34 = vadd.f32 %v6376_v2, %v6364_v7  ;;  %v20052_v2 = vld [vmem:[#allocation67_spill] sm:$0xff] }
 0x564   : > { %6635 = vmatpush.bf16.msrb.mxu1 %v16884_v42  ;;  %v17285_v42 = vpack.c.bf16 %v5568_v27, %v5568_v27  ;;  %v20041_v27 = vld [vmem:[#allocation52_spill] sm:$0xff] }
 0x565   : > { %6591 = vmatmul.bf16.vlgmr.msra.gmra.mxu1 %v17273_v12 }
 0x566   : > { %6603 = vmatpush.bf16.msra.mxu2 %v20012_v63  ;;  %v20046_v63 = vld [vmem:[#allocation61_spill] sm:$0xff] }
 0x567   : > { %6623 = vmatpush.bf16.msrb.mxu0 %v20010_v35  ;;  %6616 = vmatpush.bf16.msra.mxu3 %v20013_v43  ;;  %v6365_v59 = vpop.f32.mrf.mxu0  ;;  %v20044_v35 = vld [vmem:[#allocation59_spill] sm:$0xff]  ;;  %v20047_v43 = vld [vmem:[#allocation62_spill] sm:$0xff] }
 0x568   : > { %6636 = vmatpush.bf16.msrb.mxu1 %v20011_v29  ;;  %v20045_v29 = vld [vmem:[#allocation60_spill] sm:$0xff] }
 0x569   : > { %6604 = vmatmul.bf16.vlgmr.msra.gmra.mxu2 %v17285_v42 }
 0x56a   : > { %6648 = vmatpush.bf16.msrb.mxu2 %v20014_v13  ;;  %6617 = vmatmul.bf16.vlgmr.msra.gmra.mxu3 %v17289_v61  ;;  %v6378_v44 = vpop.f32.mrf.mxu1  ;;  %v20048_v13 = vld [vmem:[#allocation63_spill] sm:$0xff] }
 0x56b   : > { %6661 = vmatpush.bf16.msrb.mxu3 %v20015_v39  ;;  %6624 = vmatpush.bf16.msrb.mxu0 %v20016_v15  ;;  %v19070_v39 = vperm.slane %v17283_v19, 1  ;;  %v20049_v15 = vld [vmem:[#allocation64_spill] sm:$0xff]  ;;  %v20060_v44 = vld [vmem:[#allocation75_spill] sm:$0xff] }
 0x56c   : > { %6637 = vmatpush.bf16.msrb.mxu1 %v20017_v53  ;;  %v6389_v3 = vpop.f32.mrf.mxu2  ;;  %v20050_v53 = vld [vmem:[#allocation65_spill] sm:$0xff] }
 0x56d   : > { %v6390_v26 = vadd.f32 %v6389_v3, %v6377_v34  ;;  %v6402_v18 = vpop.f32.mrf.mxu3  ;;  %v20054_v34 = vld [vmem:[#allocation69_spill] sm:$0xff] }
 0x56e   : > { %6649 = vmatpush.bf16.msrb.mxu2 %v20018_v54  ;;  %v20051_v54 = vld [vmem:[#allocation66_spill] sm:$0xff] }
 0x56f   : > { %6662 = vmatpush.bf16.msrb.mxu3 %v20019_v49  ;;  %6625 = vmatpush.bf16.msrb.mxu0 %v20020_v60  ;;  %v17315_v40 = vadd.f32 %v6402_v18, %v6390_v26  ;;  %v20053_v60 = vld [vmem:[#allocation68_spill] sm:$0xff]  ;;  %v20064_v26 = vld [vmem:[#allocation79_spill] sm:$0xff] }
 0x570   : > { %6638 = vmatpush.bf16.msrb.mxu1 %v20021_v22  ;;  %v20065_v18 = vld [vmem:[#allocation80_spill] sm:$0xff] }
 0x572   : > { %6650 = vmatpush.bf16.msrb.mxu2 %v20022_v58  ;;  %v20055_v58 = vld [vmem:[#allocation70_spill] sm:$0xff] }
 0x573   : > { %6663 = vmatpush.bf16.msrb.mxu3 %v20023_v47  ;;  %6626 = vmatpush.bf16.msrb.mxu0 %v20024_v20  ;;  %v20056_v47 = vld [vmem:[#allocation71_spill] sm:$0xff]  ;;  %v20057_v20 = vld [vmem:[#allocation72_spill] sm:$0xff] }
 0x574   : > { %6639 = vmatpush.bf16.msrb.mxu1 %v20025_v8  ;;  %v6391_v1 = vpop.f32.mrf.mxu2  ;;  %v20058_v8 = vld [vmem:[#allocation73_spill] sm:$0xff] }
 0x575   : > { %v6404_v51 = vpop.f32.mrf.mxu3  ;;  %v20075_v1 = vld [vmem:[#allocation90_spill] sm:$0xff] }
 0x576   : > { %6651 = vmatpush.bf16.msrb.mxu2 %v20026_v0  ;;  %v20059_v0 = vld [vmem:[#allocation74_spill] sm:$0xff]  ;;  %v20076_v51 = vld [vmem:[#allocation91_spill] sm:$0xff] }
 0x577   : > { %6664 = vmatpush.bf16.msrb.mxu3 %v20027_v52  ;;  %6627 = vmatpush.bf16.msrb.mxu0 %v20028_v6  ;;  %v20061_v6 = vld [vmem:[#allocation76_spill] sm:$0xff] }
 0x578   : > { %6640 = vmatpush.bf16.msrb.mxu1 %v20029_v37  ;;  %v20062_v37 = vld [vmem:[#allocation77_spill] sm:$0xff] }
 0x57a   : > { %6652 = vmatpush.bf16.msrb.mxu2 %v20030_v48  ;;  %v20063_v48 = vld [vmem:[#allocation78_spill] sm:$0xff] }
 0x57b   : > { %6665 = vmatpush.bf16.msrb.mxu3 %v20031_v14  ;;  %6628 = vmatpush.bf16.msrb.mxu0 %v20032_v62  ;;  %v20066_v62 = vld [vmem:[#allocation81_spill] sm:$0xff] }
 0x57c   : > { %6641 = vmatpush.bf16.msrb.mxu1 %v20033_v38  ;;  %v20067_v38 = vld [vmem:[#allocation82_spill] sm:$0xff] }
 0x57e   : > { %6653 = vmatpush.bf16.msrb.mxu2 %v20034_v9  ;;  %v20068_v9 = vld [vmem:[#allocation83_spill] sm:$0xff] }
 0x57f   : > { %6666 = vmatpush.bf16.msrb.mxu3 %v20035_v55  ;;  %6629 = vmatpush.bf16.msrb.mxu0 %v20036_v5  ;;  %v6415_v49 = vpop.f32.mrf.mxu0  ;;  %v20069_v55 = vld [vmem:[#allocation84_spill] sm:$0xff]  ;;  %v20070_v5 = vld [vmem:[#allocation85_spill] sm:$0xff] }
 0x580   : > { %6642 = vmatpush.bf16.msrb.mxu1 %v20037_v28  ;;  %v6416_v24 = vadd.f32 %v6415_v49, %v19070_v39  ;;  %v20071_v28 = vld [vmem:[#allocation86_spill] sm:$0xff]  ;;  %v20085_v49 = vld [vmem:[#allocation100_spill] sm:$0xff]  ;;  %v13454_v39 = vld [vmem:[#allocation8 + $0x1684] sm:$0xf] }
 0x582   : > { %6654 = vmatpush.bf16.msrb.mxu2 %v20040_v41  ;;  %6630 = vmatmul.bf16.vlgmr.msrb.gmra.mxu0 %v17269_v4  ;;  %v6428_v7 = vpop.f32.mrf.mxu1 }
 0x583   : > { %6674 = vmatpush.bf16.msra.mxu0 %v20038_v32  ;;  %6667 = vmatpush.bf16.msrb.mxu3 %v20041_v27  ;;  %v17344_v22 = vadd.f32 %v6428_v7, %v6416_v24  ;;  %v20072_v32 = vld [vmem:[#allocation87_spill] sm:$0xff]  ;;  %v20074_v27 = vld [vmem:[#allocation89_spill] sm:$0xff]  ;;  %v20087_v7 = vld [vmem:[#allocation102_spill] sm:$0xff] }
 0x584   : > { %6687 = vmatpush.bf16.msra.mxu1 %v20039_v30  ;;  %v20086_v24 = vld [vmem:[#allocation101_spill] sm:$0xff] }
 0x585   : > { %6643 = vmatmul.bf16.vlgmr.msrb.gmra.mxu1 %v17273_v12 }
 0x586   : > { %6655 = vmatpush.bf16.msrb.mxu2 %v20044_v35  ;;  %v20079_v35 = vld [vmem:[#allocation94_spill] sm:$0xff] }
 0x587   : > { %6675 = vmatpush.bf16.msra.mxu0 %v20042_v25  ;;  %6668 = vmatpush.bf16.msrb.mxu3 %v20045_v29  ;;  %v6417_v52 = vpop.f32.mrf.mxu0  ;;  %v20077_v25 = vld [vmem:[#allocation92_spill] sm:$0xff]  ;;  %v20080_v29 = vld [vmem:[#allocation95_spill] sm:$0xff] }
 0x588   : > { %6688 = vmatpush.bf16.msra.mxu1 %v20043_v10  ;;  %v20078_v10 = vld [vmem:[#allocation93_spill] sm:$0xff]  ;;  %v13404_v52 = vld [vmem:[#allocation8 + $0x14ec] sm:$0xf0] }
 0x589   : > { %6656 = vmatmul.bf16.vlgmr.msrb.gmra.mxu2 %v17285_v42 }
 0x58a   : > { %6700 = vmatpush.bf16.msra.mxu2 %v20046_v63  ;;  %6669 = vmatmul.bf16.vlgmr.msrb.gmra.mxu3 %v17289_v61  ;;  %v6430_v59 = vpop.f32.mrf.mxu1  ;;  %v20081_v63 = vld [vmem:[#allocation96_spill] sm:$0xff] }
 0x58b   : > { %6713 = vmatpush.bf16.msra.mxu3 %v20047_v43  ;;  %6676 = vmatpush.bf16.msra.mxu0 %v20048_v13  ;;  %v20082_v43 = vld [vmem:[#allocation97_spill] sm:$0xff]  ;;  %v20093_v59 = vld [vmem:[#allocation108_spill] sm:$0xff] }
 0x58c   : > { %6689 = vmatpush.bf16.msra.mxu1 %v20049_v15  ;;  %v17356_v14 = vpop.f32.mrf.mxu2 }
 0x58d   : > { %v17358_v3 = vpop.f32.mrf.mxu3 }
 0x58e   : > { %6701 = vmatpush.bf16.msra.mxu2 %v20050_v53  ;;  %v20083_v53 = vld [vmem:[#allocation98_spill] sm:$0xff] }
 0x58f   : > { %6714 = vmatpush.bf16.msra.mxu3 %v20051_v54  ;;  %6677 = vmatpush.bf16.msra.mxu0 %v20052_v2  ;;  %v20084_v54 = vld [vmem:[#allocation99_spill] sm:$0xff] }
 0x590   : > { %6690 = vmatpush.bf16.msra.mxu1 %v20053_v60  ;;  %v20088_v2 = vld [vmem:[#allocation103_spill] sm:$0xff]  ;;  %v20089_v60 = vld [vmem:[#allocation104_spill] sm:$0xff] }
 0x592   : > { %6702 = vmatpush.bf16.msra.mxu2 %v20054_v34  ;;  %v20090_v34 = vld [vmem:[#allocation105_spill] sm:$0xff] }
 0x593   : > { %6715 = vmatpush.bf16.msra.mxu3 %v20055_v58  ;;  %6678 = vmatpush.bf16.msra.mxu0 %v20056_v47 }
 0x594   : > { %6691 = vmatpush.bf16.msra.mxu1 %v20057_v20  ;;  %v6443_v30 = vpop.f32.mrf.mxu2  ;;  %v20091_v20 = vld [vmem:[#allocation106_spill] sm:$0xff] }
 0x595   : > { %v6456_v41 = vpop.f32.mrf.mxu3  ;;  %v12022_v30 = vld [vmem:[#allocation8 + $0x15a0] sm:$0xf] }
 0x596   : > { %6703 = vmatpush.bf16.msra.mxu2 %v20058_v8  ;;  %v20092_v8 = vld [vmem:[#allocation107_spill] sm:$0xff]  ;;  %v13428_v41 = vld [vmem:[#allocation8 + $0x15ac] sm:$0xf0] }
 0x597   : > { %6716 = vmatpush.bf16.msra.mxu3 %v20059_v0  ;;  %6679 = vmatpush.bf16.msra.mxu0 %v20060_v44  ;;  %v11926_v0 = vld [vmem:[#allocation8 + $0x14e0] sm:$0xf] }
 0x598   : > { %6692 = vmatpush.bf16.msra.mxu1 %v20061_v6  ;;  %v12054_v6 = vld [vmem:[#allocation8 + $0x15e0] sm:$0xf] }
 0x59a   : > { %6704 = vmatpush.bf16.msra.mxu2 %v20062_v37  ;;  %v13436_v37 = vld [vmem:[#allocation8 + $0x15ec] sm:$0xf0] }
 0x59b   : > { %6717 = vmatpush.bf16.msra.mxu3 %v20063_v48  ;;  %6680 = vmatpush.bf16.msra.mxu0 %v20064_v26  ;;  %v17406_v26 = vor.u32 %v13404_v52, %v11926_v0  ;;  %v12262_v52 = vld [vmem:[#allocation8 + $0x1780] sm:$0xf] }
 0x59c   : > { %6693 = vmatpush.bf16.msra.mxu1 %v20065_v18  ;;  %v11910_v18 = vld [vmem:[#allocation8 + $0x14c0] sm:$0xf] }
 0x59e   : > { %6705 = vmatpush.bf16.msra.mxu2 %v17087_v57  ;;  %v20073_v57 = vld [vmem:[#allocation88_spill] sm:$0xff] }
 0x59f   : > { %6718 = vmatpush.bf16.msra.mxu3 %v20066_v62  ;;  %6681 = vmatpush.bf16.msra.mxu0 %v20067_v38  ;;  %v17384_v13 = vpop.f32.mrf.mxu0  ;;  %v13400_v62 = vld [vmem:[#allocation8 + $0x14cc] sm:$0xf0]  ;;  %v12038_v38 = vld [vmem:[#allocation8 + $0x15c0] sm:$0xf] }
 0x5a0   : > { %6694 = vmatpush.bf16.msra.mxu1 %v20068_v9  ;;  %v13432_v9 = vld [vmem:[#allocation8 + $0x15cc] sm:$0xf0] }
 0x5a2   : > { %6706 = vmatpush.bf16.msra.mxu2 %v20071_v28  ;;  %6682 = vmatmul.bf16.vlgmr.msra.gmra.mxu0 %v17269_v4  ;;  %v17386_v15 = vpop.f32.mrf.mxu1  ;;  %v17419_v28 = vor.u32 %v13432_v9, %v12038_v38  ;;  %v19068_v38 = vperm.slane %v17283_v19, 3 }
 0x5a3   : > { %6726 = vmatpush.bf16.msrb.mxu0 %v20069_v55  ;;  %6719 = vmatpush.bf16.msra.mxu3 %v20072_v32  ;;  %v12182_v55 = vld [vmem:[#allocation8 + $0x16e0] sm:$0xf]  ;;  %v13396_v32 = vld [vmem:[#allocation8 + $0x14ac] sm:$0xf0] }
 0x5a4   : > { %6739 = vmatpush.bf16.msrb.mxu1 %v20070_v5  ;;  %v13468_v5 = vld [vmem:[#allocation8 + $0x16ec] sm:$0xf0] }
 0x5a5   : > { %6695 = vmatmul.bf16.vlgmr.msra.gmra.mxu1 %v17273_v12 }
 0x5a6   : > { %6707 = vmatpush.bf16.msra.mxu2 %v20075_v1  ;;  %v12166_v1 = vld [vmem:[#allocation8 + $0x16c0] sm:$0xf] }
 0x5a7   : > { %6727 = vmatpush.bf16.msrb.mxu0 %v20073_v57  ;;  %6720 = vmatpush.bf16.msra.mxu3 %v20076_v51  ;;  %v6469_v58 = vpop.f32.mrf.mxu0 }
 0x5a8   : > { %6740 = vmatpush.bf16.msrb.mxu1 %v20074_v27 }
 0x5a9   : > { %6708 = vmatmul.bf16.vlgmr.msra.gmra.mxu2 %v17285_v42 }
 0x5aa   : > { %6752 = vmatpush.bf16.msrb.mxu2 %v20077_v25  ;;  %6721 = vmatmul.bf16.vlgmr.msra.gmra.mxu3 %v17289_v61  ;;  %v6482_v47 = vpop.f32.mrf.mxu1  ;;  %v12294_v25 = vld [vmem:[#allocation8 + $0x17c0] sm:$0xf] }
 0x5ab   : > { %6765 = vmatpush.bf16.msrb.mxu3 %v20078_v10  ;;  %6728 = vmatpush.bf16.msrb.mxu0 %v20079_v35  ;;  %v11878_v10 = vld [vmem:[#allocation8 + $0x1480] sm:$0xf]  ;;  %v13392_v35 = vld [vmem:[#allocation8 + $0x148c] sm:$0xf0] }
 0x5ac   : > { %6741 = vmatpush.bf16.msrb.mxu1 %v20080_v29  ;;  %v17400_v44 = vpop.f32.mrf.mxu2  ;;  %v12006_v29 = vld [vmem:[#allocation8 + $0x1580] sm:$0xf] }
 0x5ad   : > { %v17402_v48 = vpop.f32.mrf.mxu3 }
 0x5ae   : > { %6753 = vmatpush.bf16.msrb.mxu2 %v20081_v63  ;;  %v13424_v63 = vld [vmem:[#allocation8 + $0x158c] sm:$0xf0] }
 0x5af   : > { %6766 = vmatpush.bf16.msrb.mxu3 %v20082_v43  ;;  %6729 = vmatpush.bf16.msrb.mxu0 %v20083_v53  ;;  %v12150_v53 = vld [vmem:[#allocation8 + $0x16a0] sm:$0xf] }
 0x5b0   : > { %6742 = vmatpush.bf16.msrb.mxu1 %v20084_v54  ;;  %v13460_v54 = vld [vmem:[#allocation8 + $0x16ac] sm:$0xf0] }
 0x5b2   : > { %6754 = vmatpush.bf16.msrb.mxu2 %v20085_v49  ;;  %v12278_v49 = vld [vmem:[#allocation8 + $0x17a0] sm:$0xf] }
 0x5b3   : > { %6767 = vmatpush.bf16.msrb.mxu3 %v20086_v24  ;;  %6730 = vmatpush.bf16.msrb.mxu0 %v20087_v7  ;;  %v17448_v24 = vor.u32 %v13424_v63, %v12006_v29  ;;  %v11862_v7 = vld [vmem:[#allocation8 + $0x1460] sm:$0xf]  ;;  %v13412_v29 = vld [vmem:[#allocation8 + $0x152c] sm:$0xf0] }
 0x5b4   : > { %6743 = vmatpush.bf16.msrb.mxu1 %v20088_v2  ;;  %v13388_v2 = vld [vmem:[#allocation8 + $0x146c] sm:$0xf0] }
 0x5b5   : > { %v6508_v57 = vpop.f32.mrf.mxu3  ;;  %v17457_v0 = vor.u32 %v13388_v2, %v11862_v7  ;;  %v13448_v63 = vld [vmem:[#allocation8 + $0x164c] sm:$0xf0]  ;;  %v11814_v7 = vld [vmem:[#allocation8 + $0x1400] sm:$0xf] }
 0x5b6   : > { %6755 = vmatpush.bf16.msrb.mxu2 %v20089_v60  ;;  %v17451_v60 = vor.u32 %v13460_v54, %v12150_v53 }
 0x5b7   : > { %6768 = vmatpush.bf16.msrb.mxu3 %v20090_v34  ;;  %6731 = vmatpush.bf16.msrb.mxu0 %v20091_v20  ;;  %v11990_v34 = vld [vmem:[#allocation8 + $0x1560] sm:$0xf] }
 0x5b8   : > { %6744 = vmatpush.bf16.msrb.mxu1 %v17180_v21  ;;  %v17409_v21 = vor.u32 %v13436_v37, %v12054_v6  ;;  %v12134_v20 = vld [vmem:[#allocation8 + $0x1680] sm:$0xf]  ;;  %v19069_v6 = vperm.slane %v17283_v19, 2 }
 0x5ba   : > { %6756 = vmatpush.bf16.msrb.mxu2 %v20092_v8  ;;  %v13456_v8 = vld [vmem:[#allocation8 + $0x168c] sm:$0xf0]  ;;  %v6468_v57 = vadd.f32 %v17384_v13, %v19069_v6  ;;  %v12102_v13 = vld [vmem:[#allocation8 + $0x1640] sm:$0xf]  ;;  %v11992_v6 = vld [vmem:[#allocation8 + $0x1570] sm:$0xf0] }
 0x5bb   : > { %6769 = vmatpush.bf16.msrb.mxu3 %v20093_v59  ;;  %6732 = vmatpush.bf16.msrb.mxu0 %v17189_v31  ;;  %v17415_v31 = vor.u32 %v13400_v62, %v11910_v18  ;;  %v13488_v59 = vld [vmem:[#allocation8 + $0x178c] sm:$0xf0]  ;;  %v11846_v18 = vld [vmem:[#allocation8 + $0x1440] sm:$0xf]  ;;  %v17465_v9 = vor.u32 %v13456_v8, %v12134_v20 }
 0x5bc   : > { %6745 = vmatpush.bf16.msrb.mxu1 %v17192_v11  ;;  %v12310_v11 = vld [vmem:[#allocation8 + $0x17e0] sm:$0xf]  ;;  %v13384_v62 = vld [vmem:[#allocation8 + $0x144c] sm:$0xf0] }
 0x5bd   : > { %v11942_v20 = vld [vmem:[#allocation8 + $0x1500] sm:$0xf]  ;;  %v13408_v8 = vld [vmem:[#allocation8 + $0x150c] sm:$0xf0] }
 0x5be   : > { %6757 = vmatpush.bf16.msrb.mxu2 %v17195_v23  ;;  %v13500_v23 = vld [vmem:[#allocation8 + $0x17ec] sm:$0xf0] }
 0x5bf   : > { %6770 = vmatpush.bf16.msrb.mxu3 %v17200_v33  ;;  %6733 = vmatpush.bf16.msrb.mxu0 %v17205_v45  ;;  %v11894_v33 = vld [vmem:[#allocation8 + $0x14a0] sm:$0xf]  ;;  %v6495_v45 = vpop.f32.mrf.mxu2  ;;  %v17426_v27 = vor.u32 %v13500_v23, %v12310_v11  ;;  %v6519_v58 = vpop.f32.mrf.mxu0  ;;  %v17468_v11 = vor.u32 %v13488_v59, %v12262_v52  ;;  %v17498_v59 = vor.u32 %v13448_v63, %v12102_v13  ;;  %v11912_v63 = vld [vmem:[#allocation8 + $0x14d0] sm:$0xf0] }
 0x5c0   : > { %6746 = vmatpush.bf16.msrb.mxu1 %v17208_v50  ;;  %v17423_v50 = vor.u32 %v13468_v5, %v12182_v55  ;;  %v17429_v51 = vor.u32 %v13396_v32, %v11894_v33  ;;  %v11974_v55 = vld [vmem:[#allocation8 + $0x1540] sm:$0xf]  ;;  %v13416_v5 = vld [vmem:[#allocation8 + $0x154c] sm:$0xf0]  ;;  %v17471_v32 = vor.u32 %v13384_v62, %v11846_v18  ;;  %v13402_v18 = vld [vmem:[#allocation8 + $0x14e4] sm:$0xf] }
 0x5c1   : > { %v12118_v23 = vld [vmem:[#allocation8 + $0x1660] sm:$0xf]  ;;  %v13452_v33 = vld [vmem:[#allocation8 + $0x166c] sm:$0xf0]  ;;  %v11928_v62 = vld [vmem:[#allocation8 + $0x14f0] sm:$0xf0] }
 0x5c2   : > { %6758 = vmatpush.bf16.msrb.mxu2 %v17211_v16  ;;  %6734 = vmatmul.bf16.vlgmr.msrb.gmra.mxu0 %v17269_v4  ;;  %v13464_v16 = vld [vmem:[#allocation8 + $0x16cc] sm:$0xf0]  ;;  %v17433_v4 = vor.u32 %v13428_v41, %v12022_v30  ;;  %v12246_v45 = vld [vmem:[#allocation8 + $0x1760] sm:$0xf]  ;;  %v6442_v41 = vadd.f32 %v17356_v14, %v17344_v22 }
 0x5c3   : > { %7566 = vmatpush.bf16.msra.mxu0 %v17406_v26  ;;  %6771 = vmatpush.bf16.msrb.mxu3 %v17214_v17  ;;  %v13496_v17 = vld [vmem:[#allocation8 + $0x17cc] sm:$0xf0] }
 0x5c4   : > { %7579 = vmatpush.bf16.msra.mxu1 %v17409_v21  ;;  %v17440_v43 = vor.u32 %v13496_v17, %v12294_v25  ;;  %v13484_v30 = vld [vmem:[#allocation8 + $0x176c] sm:$0xf0]  ;;  %v6520_v17 = vadd.f32 %v6519_v58, %v19068_v38  ;;  %v6455_v2 = vadd.f32 %v17358_v3, %v6442_v41  ;;  %v12280_v38 = vld [vmem:[#allocation8 + $0x17b0] sm:$0xf0] }
 0x5c5   : > { %6747 = vmatmul.bf16.vlgmr.msrb.gmra.mxu1 %v17273_v12  ;;  %v17437_v12 = vor.u32 %v13464_v16, %v12166_v1  ;;  %v17479_v1 = vor.u32 %v13416_v5, %v11974_v55  ;;  %v11830_v16 = vld [vmem:[#allocation8 + $0x1420] sm:$0xf]  ;;  %v13380_v25 = vld [vmem:[#allocation8 + $0x142c] sm:$0xf0]  ;;  %v17487_v14 = vor.u32 %v13484_v30, %v12246_v45  ;;  %v13434_v55 = vld [vmem:[#allocation8 + $0x15e4] sm:$0xf] }
 0x5c6   : > { %6759 = vmatpush.bf16.msrb.mxu2 %v17221_v46  ;;  %v17444_v46 = vor.u32 %v13392_v35, %v11878_v10  ;;  %v17484_v10 = vor.u32 %v13452_v33, %v12118_v23  ;;  %v11958_v35 = vld [vmem:[#allocation8 + $0x1520] sm:$0xf]  ;;  %v17490_v54 = vor.u32 %v13380_v25, %v11830_v16  ;;  %v13376_v58 = vld [vmem:[#allocation8 + $0x140c] sm:$0xf0]  ;;  %v12056_v23 = vld [vmem:[#allocation8 + $0x15f0] sm:$0xf0] }
 0x5c7   : > { %7567 = vmatpush.bf16.msra.mxu0 %v17415_v31  ;;  %6772 = vmatpush.bf16.msrb.mxu3 %v17225_v56  ;;  %v13492_v56 = vld [vmem:[#allocation8 + $0x17ac] sm:$0xf0]  ;;  %v6521_v22 = vpop.f32.mrf.mxu0  ;;  %v12086_v33 = vld [vmem:[#allocation8 + $0x1620] sm:$0xf]  ;;  %v6562_v25 = vmax.f32 %v17315_v40, 0.0 }
 0x5c8   : > { %7580 = vmatpush.bf16.msra.mxu1 %v17419_v28  ;;  %v17454_v47 = vor.u32 %v13492_v56, %v12278_v49  ;;  %v12230_v49 = vld [vmem:[#allocation8 + $0x1740] sm:$0xf]  ;;  %v13480_v56 = vld [vmem:[#allocation8 + $0x174c] sm:$0xf0]  ;;  %v17514_v22 = vor.u32 %v13434_v55, %v12056_v23  ;;  %v12312_v55 = vld [vmem:[#allocation8 + $0x17f0] sm:$0xf0] }
 0x5c9   : > { %6760 = vmatmul.bf16.vlgmr.msrb.gmra.mxu2 %v17285_v42  ;;  %v13420_v42 = vld [vmem:[#allocation8 + $0x156c] sm:$0xf0] }
 0x5ca   : > { %7592 = vmatpush.bf16.msra.mxu2 %v17423_v50  ;;  %6773 = vmatmul.bf16.vlgmr.msrb.gmra.mxu3 %v17289_v61  ;;  %v6532_v61 = vpop.f32.mrf.mxu1  ;;  %v17461_v37 = vor.u32 %v13420_v42, %v11990_v34  ;;  %v6481_v34 = vadd.f32 %v17386_v15, %v6468_v57  ;;  %v17495_v42 = vor.u32 %v13412_v29, %v11958_v35  ;;  %v13444_v45 = vld [vmem:[#allocation8 + $0x162c] sm:$0xf0]  ;;  %v12214_v57 = vld [vmem:[#allocation8 + $0x1720] sm:$0xf]  ;;  %v13398_v29 = vld [vmem:[#allocation8 + $0x14c4] sm:$0xf] }
 0x5cb   : > { %7605 = vmatpush.bf16.msra.mxu3 %v17426_v27  ;;  %7568 = vmatpush.bf16.msra.mxu0 %v17429_v51  ;;  %v6533_v52 = vadd.f32 %v6532_v61, %v6520_v17  ;;  %v17502_v15 = vor.u32 %v13480_v56, %v12230_v49  ;;  %v17505_v61 = vor.u32 %v13376_v58, %v11814_v7  ;;  %v13476_v16 = vld [vmem:[#allocation8 + $0x172c] sm:$0xf0]  ;;  %v6563_v17 = vmax.f32 %v6455_v2, 0.0  ;;  %v12040_v49 = vld [vmem:[#allocation8 + $0x15d0] sm:$0xf0] }
 0x5cc   : > { %7581 = vmatpush.bf16.msra.mxu1 %v17433_v4  ;;  %v6494_v5 = vadd.f32 %v17400_v44, %v6481_v34  ;;  %v6545_v3 = vpop.f32.mrf.mxu2  ;;  %v17509_v44 = vor.u32 %v13408_v8, %v11942_v20  ;;  %v17511_v35 = vor.u32 %v13402_v18, %v11928_v62  ;;  %v17516_v13 = vor.u32 %v13444_v45, %v12086_v33  ;;  %v12070_v7 = vld [vmem:[#allocation8 + $0x1600] sm:$0xf]  ;;  %v13440_v2 = vld [vmem:[#allocation8 + $0x160c] sm:$0xf0]  ;;  %v13466_v8 = vld [vmem:[#allocation8 + $0x16e4] sm:$0xf] }
 0x5cd   : > { %v6546_v30 = vadd.f32 %v6545_v3, %v6533_v52  ;;  %v6558_v41 = vpop.f32.mrf.mxu3  ;;  %v17520_v40 = vor.u32 %v13476_v16, %v12214_v57  ;;  %v12198_v34 = vld [vmem:[#allocation8 + $0x1700] sm:$0xf]  ;;  %v13472_v20 = vld [vmem:[#allocation8 + $0x170c] sm:$0xf0]  ;;  %v12184_v52 = vld [vmem:[#allocation8 + $0x16f0] sm:$0xf0]  ;;  %v17523_v18 = vpack.c.bf16 %v6562_v25, %v6562_v25  ;;  %v17535_v23 = vor.u32 %v13440_v2, %v12070_v7 }
 0x5ce   : > { %7593 = vmatpush.bf16.msra.mxu2 %v17437_v12  ;;  %v6507_v56 = vadd.f32 %v17402_v48, %v6494_v5  ;;  %v17527_v48 = vor.u32 %v13398_v29, %v11912_v63  ;;  %v13498_v62 = vld [vmem:[#allocation8 + $0x17e4] sm:$0xf]  ;;  %v17529_v5 = vpack.c.bf16 %v6563_v17, %v6563_v17  ;;  %v11896_v45 = vld [vmem:[#allocation8 + $0x14b0] sm:$0xf0]  ;;  %v17539_v57 = vor.u32 %v13472_v20, %v12198_v34 }
 0x5cf   : > { %7606 = vmatpush.bf16.msra.mxu3 %v17440_v43  ;;  %7569 = vmatpush.bf16.msra.mxu0 %v17444_v46  ;;  %20094 = vst [vmem:[#allocation24_spill] sm:$0xff] %v17520_v40  ;;  %v6559_v58 = vadd.f32 %v6558_v41, %v6546_v30  ;;  %v13394_v33 = vld [vmem:[#allocation8 + $0x14a4] sm:$0xf]  ;;  %v17541_v16 = vor.u32 %v13466_v8, %v12184_v52  ;;  %v12024_v17 = vld [vmem:[#allocation8 + $0x15b0] sm:$0xf0] }
 0x5d0   : > { %7582 = vmatpush.bf16.msra.mxu1 %v17448_v24  ;;  %20095 = vst [vmem:[#allocation25_spill] sm:$0xff] %v17527_v48  ;;  %v6564_v30 = vmax.f32 %v6507_v56, 0.0  ;;  %v13426_v25 = vld [vmem:[#allocation8 + $0x15a4] sm:$0xf]  ;;  %v12168_v7 = vld [vmem:[#allocation8 + $0x16d0] sm:$0xf0]  ;;  %v17547_v56 = vor.u32 %v13394_v33, %v11896_v45 }
 0x5d1   : > { %20097 = vst [vmem:[#allocation28_spill] sm:$0xff] %v17535_v23  ;;  %v6565_v29 = vmax.f32 %v6559_v58, 0.0  ;;  %v13494_v2 = vld [vmem:[#allocation8 + $0x17c4] sm:$0xf]  ;;  %v17551_v34 = vor.u32 %v13426_v25, %v12024_v17  ;;  %v11880_v20 = vld [vmem:[#allocation8 + $0x1490] sm:$0xf0] }
 0x5d2   : > { %7594 = vmatpush.bf16.msra.mxu2 %v17451_v60  ;;  %v6534_v53 = vpop.f32.mrf.mxu1  ;;  %20098 = vst [vmem:[#allocation30_spill] sm:$0xff] %v17539_v57  ;;  %v13390_v58 = vld [vmem:[#allocation8 + $0x1484] sm:$0xf]  ;;  %v17553_v8 = vpack.c.bf16 %v6564_v30, %v6564_v30  ;;  %v12152_v17 = vld [vmem:[#allocation8 + $0x16b0] sm:$0xf0] }
 0x5d3   : > { %7607 = vmatpush.bf16.msra.mxu3 %v17454_v47  ;;  %7570 = vmatpush.bf16.msra.mxu0 %v17457_v0  ;;  %v13430_v53 = vld [vmem:[#allocation8 + $0x15c4] sm:$0xf]  ;;  %20099 = vst [vmem:[#allocation27_spill] sm:$0xff] %v17541_v16  ;;  %v17559_v33 = vpack.c.bf16 %v6565_v29, %v6565_v29  ;;  %v17566_v30 = vor.u32 %v13390_v58, %v11880_v20 }
 0x5d4   : > { %7583 = vmatpush.bf16.msra.mxu1 %v17461_v37  ;;  %v17533_v3 = vor.u32 %v13430_v53, %v12040_v49  ;;  %v6547_v41 = vpop.f32.mrf.mxu2  ;;  %v17544_v53 = vor.u32 %v13498_v62, %v12312_v55  ;;  %v13462_v49 = vld [vmem:[#allocation8 + $0x16c4] sm:$0xf]  ;;  %20101 = vst [vmem:[#allocation32_spill] sm:$0xff] %v17547_v56  ;;  %v12008_v55 = vld [vmem:[#allocation8 + $0x1590] sm:$0xf0] }
 0x5d5   : > { %v6560_v63 = vpop.f32.mrf.mxu3  ;;  %v12296_v41 = vld [vmem:[#allocation8 + $0x17d0] sm:$0xf0]  ;;  %20102 = vst [vmem:[#allocation34_spill] sm:$0xff] %v17551_v34  ;;  %v17557_v52 = vor.u32 %v13462_v49, %v12168_v7  ;;  %v13422_v62 = vld [vmem:[#allocation8 + $0x1584] sm:$0xf] }
 0x5d6   : > { %7595 = vmatpush.bf16.msra.mxu2 %v17465_v9  ;;  %20096 = vst [vmem:[#allocation26_spill] sm:$0xff] %v17533_v3  ;;  %v17562_v45 = vor.u32 %v13494_v2, %v12296_v41  ;;  %v13458_v25 = vld [vmem:[#allocation8 + $0x16a4] sm:$0xf]  ;;  %v17570_v29 = vor.u32 %v13422_v62, %v12008_v55  ;;  %v11864_v7 = vld [vmem:[#allocation8 + $0x1470] sm:$0xf0] }
 0x5d7   : > { %7608 = vmatpush.bf16.msra.mxu3 %v17468_v11  ;;  %7571 = vmatpush.bf16.msra.mxu0 %v17471_v32  ;;  %20100 = vst [vmem:[#allocation29_spill] sm:$0xff] %v17544_v53  ;;  %v13490_v63 = vld [vmem:[#allocation8 + $0x17a4] sm:$0xf]  ;;  %v17573_v2 = vor.u32 %v13458_v25, %v12152_v17  ;;  %v12264_v25 = vld [vmem:[#allocation8 + $0x1790] sm:$0xf0] }
 0x5d8   : > { %7584 = vmatpush.bf16.msra.mxu1 %v17479_v1  ;;  %20103 = vst [vmem:[#allocation31_spill] sm:$0xff] %v17557_v52  ;;  %v13386_v49 = vld [vmem:[#allocation8 + $0x1464] sm:$0xf]  ;;  %v17576_v20 = vor.u32 %v13490_v63, %v12280_v38  ;;  %v17587_v63 = vor.u32 %v13454_v39, %v12136_v36  ;;  %v11832_v39 = vld [vmem:[#allocation8 + $0x1430] sm:$0xf0] }
 0x5d9   : > { %20104 = vst [vmem:[#allocation33_spill] sm:$0xff] %v17562_v45  ;;  %v13418_v41 = vld [vmem:[#allocation8 + $0x1564] sm:$0xf]  ;;  %v17581_v55 = vor.u32 %v13386_v49, %v11864_v7  ;;  %v12120_v7 = vld [vmem:[#allocation8 + $0x1670] sm:$0xf0] }
 0x5da   : > { %7596 = vmatpush.bf16.msra.mxu2 %v17484_v10  ;;  %20105 = vst [vmem:[#allocation36_spill] sm:$0xff] %v17566_v30  ;;  %v17584_v17 = vor.u32 %v13418_v41, %v11992_v6  ;;  %v13450_v49 = vld [vmem:[#allocation8 + $0x1664] sm:$0xf]  ;;  %v12248_v41 = vld [vmem:[#allocation8 + $0x1770] sm:$0xf0] }
 0x5db   : > { %7609 = vmatpush.bf16.msra.mxu3 %v17487_v14  ;;  %7572 = vmatpush.bf16.msra.mxu0 %v17490_v54  ;;  %20106 = vst [vmem:[#allocation38_spill] sm:$0xff] %v17570_v29  ;;  %v13482_v6 = vld [vmem:[#allocation8 + $0x1764] sm:$0xf] }
 0x5dc   : > { %7585 = vmatpush.bf16.msra.mxu1 %v17495_v42  ;;  %20107 = vst [vmem:[#allocation35_spill] sm:$0xff] %v17573_v2  ;;  %v13378_v36 = vld [vmem:[#allocation8 + $0x1424] sm:$0xf] }
 0x5dd   : > { %20108 = vst [vmem:[#allocation37_spill] sm:$0xff] %v17576_v20 }
 0x5de   : > { %7597 = vmatpush.bf16.msra.mxu2 %v17498_v59  ;;  %20110 = vst [vmem:[#allocation39_spill] sm:$0xff] %v17581_v55 }
 0x5df   : > { %7610 = vmatpush.bf16.msra.mxu3 %v17502_v15  ;;  %7573 = vmatpush.bf16.msra.mxu0 %v17505_v61  ;;  %v6579_v58 = vpop.f32.mrf.mxu0  ;;  %20111 = vst [vmem:[#allocation40_spill] sm:$0xff] %v17584_v17 }
 0x5e0   : > { %7586 = vmatpush.bf16.msra.mxu1 %v17509_v44  ;;  %20112 = vst [vmem:[#allocation41_spill] sm:$0xff] %v17587_v63 }
 0x5e2   : > { %7598 = vmatpush.bf16.msra.mxu2 %v17516_v13  ;;  %7574 = vmatmul.bf16.vlgmr.msra.gmra.mxu0 %v17523_v18  ;;  %v6592_v62 = vpop.f32.mrf.mxu1 }
 0x5e3   : > { %7618 = vmatpush.bf16.msrb.mxu0 %v17511_v35  ;;  %7611 = vmatpush.bf16.msra.mxu3 %v17520_v40  ;;  %v13431_v40 = vld [vmem:[#allocation8 + $0x15cc] sm:$0xf] }
 0x5e4   : > { %7631 = vmatpush.bf16.msrb.mxu1 %v17514_v22 }
 0x5e5   : > { %7587 = vmatmul.bf16.vlgmr.msra.gmra.mxu1 %v17529_v5 }
 0x5e6   : > { %7599 = vmatpush.bf16.msra.mxu2 %v17535_v23 }
 0x5e7   : > { %7619 = vmatpush.bf16.msrb.mxu0 %v17527_v48  ;;  %7612 = vmatpush.bf16.msra.mxu3 %v17539_v57  ;;  %v13442_v57 = vld [vmem:[#allocation8 + $0x1624] sm:$0xf]  ;;  %v11920_v48 = vld [vmem:[#allocation8 + $0x14d8] sm:$0xf0] }
 0x5e8   : > { %7632 = vmatpush.bf16.msrb.mxu1 %v17533_v3 }
 0x5e9   : > { %7600 = vmatmul.bf16.vlgmr.msra.gmra.mxu2 %v17553_v8 }
 0x5ea   : > { %7644 = vmatpush.bf16.msrb.mxu2 %v17541_v16  ;;  %7613 = vmatmul.bf16.vlgmr.msra.gmra.mxu3 %v17559_v33  ;;  %v13414_v16 = vld [vmem:[#allocation8 + $0x1544] sm:$0xf] }
 0x5eb   : > { %7657 = vmatpush.bf16.msrb.mxu3 %v17544_v53  ;;  %7620 = vmatpush.bf16.msrb.mxu0 %v17547_v56  ;;  %v20109_v56 = vperm.slane %v17283_v19, 0  ;;  %v11848_v53 = vld [vmem:[#allocation8 + $0x1450] sm:$0xf0] }
 0x5ec   : > { %7633 = vmatpush.bf16.msrb.mxu1 %v17551_v34 }
 0x5ed   : > { %v6580_v34 = vadd.f32 %v6579_v58, %v20109_v56  ;;  %v11976_v56 = vld [vmem:[#allocation8 + $0x1550] sm:$0xf0] }
 0x5ee   : > { %7645 = vmatpush.bf16.msrb.mxu2 %v17557_v52  ;;  %v13486_v52 = vld [vmem:[#allocation8 + $0x1784] sm:$0xf] }
 0x5ef   : > { %7658 = vmatpush.bf16.msrb.mxu3 %v17562_v45  ;;  %7621 = vmatpush.bf16.msrb.mxu0 %v17566_v30  ;;  %v13382_v45 = vld [vmem:[#allocation8 + $0x1444] sm:$0xf]  ;;  %v6593_v38 = vadd.f32 %v6592_v62, %v6580_v34  ;;  %v17590_v58 = vor.u32 %v13486_v52, %v12264_v25  ;;  %v17596_v34 = vor.u32 %v13414_v16, %v11976_v56  ;;  %v11960_v25 = vld [vmem:[#allocation8 + $0x1530] sm:$0xf0] }
 0x5f0   : > { %7634 = vmatpush.bf16.msrb.mxu1 %v17570_v29  ;;  %v17593_v29 = vor.u32 %v13382_v45, %v11848_v53  ;;  %v17599_v62 = vor.u32 %v13450_v49, %v12120_v7  ;;  %v13410_v52 = vld [vmem:[#allocation8 + $0x1524] sm:$0xf]  ;;  %v12104_v45 = vld [vmem:[#allocation8 + $0x1650] sm:$0xf0]  ;;  %v17605_v16 = vor.u32 %v13378_v36, %v11832_v39  ;;  %v6605_v36 = vpop.f32.mrf.mxu2 }
 0x5f1   : > { %20113 = vst [vmem:[#allocation42_spill] sm:$0xff] %v17590_v58  ;;  %v13446_v53 = vld [vmem:[#allocation8 + $0x1644] sm:$0xf]  ;;  %v17608_v49 = vor.u32 %v13410_v52, %v11960_v25  ;;  %v11816_v7 = vld [vmem:[#allocation8 + $0x1410] sm:$0xf0]  ;;  %v6606_v52 = vadd.f32 %v6605_v36, %v6593_v38  ;;  %v6618_v25 = vpop.f32.mrf.mxu3 }
 0x5f2   : > { %7646 = vmatpush.bf16.msrb.mxu2 %v17573_v2  ;;  %20114 = vst [vmem:[#allocation43_spill] sm:$0xff] %v17593_v29  ;;  %v6594_v2 = vpop.f32.mrf.mxu1  ;;  %v13478_v56 = vld [vmem:[#allocation8 + $0x1744] sm:$0xf]  ;;  %v13401_v36 = vld [vmem:[#allocation8 + $0x14d4] sm:$0xf0] }
 0x5f3   : > { %7659 = vmatpush.bf16.msrb.mxu3 %v17576_v20  ;;  %7622 = vmatpush.bf16.msrb.mxu0 %v17581_v55  ;;  %20115 = vst [vmem:[#allocation44_spill] sm:$0xff] %v17596_v34  ;;  %v6581_v20 = vpop.f32.mrf.mxu0  ;;  %v17602_v55 = vor.u32 %v13482_v6, %v12248_v41  ;;  %v13374_v30 = vld [vmem:[#allocation8 + $0x1404] sm:$0xf]  ;;  %v11934_v6 = vld [vmem:[#allocation8 + $0x14e8] sm:$0xf] }
 0x5f4   : > { %7635 = vmatpush.bf16.msrb.mxu1 %v17584_v17  ;;  %20116 = vst [vmem:[#allocation45_spill] sm:$0xff] %v17599_v62  ;;  %v12232_v17 = vld [vmem:[#allocation8 + $0x1750] sm:$0xf0]  ;;  %v17611_v20 = vor.u32 %v13446_v53, %v12104_v45  ;;  %v13405_v2 = vld [vmem:[#allocation8 + $0x14f4] sm:$0xf0]  ;;  %v17617_v23 = vor.u32 %v13374_v30, %v11816_v7 }
 0x5f5   : > { %20117 = vst [vmem:[#allocation46_spill] sm:$0xff] %v17602_v55  ;;  %v12062_v41 = vld [vmem:[#allocation8 + $0x15e8] sm:$0xf]  ;;  %v17614_v39 = vor.u32 %v13478_v56, %v12232_v17  ;;  %v12216_v53 = vld [vmem:[#allocation8 + $0x1730] sm:$0xf0]  ;;  %v17622_v3 = vor.u32 %v13405_v2, %v11934_v6  ;;  %v17624_v17 = vadd.f32 %v6618_v25, %v6606_v52 }
 0x5f6   : > { %7647 = vmatpush.bf16.msrb.mxu2 %v17587_v63  ;;  %20118 = vst [vmem:[#allocation47_spill] sm:$0xff] %v17605_v16  ;;  %v13406_v63 = vld [vmem:[#allocation8 + $0x1504] sm:$0xf]  ;;  %v12046_v30 = vld [vmem:[#allocation8 + $0x15c8] sm:$0xf] }
 0x5f7   : > { %7660 = vmatpush.bf16.msrb.mxu3 %v17590_v58  ;;  %7623 = vmatpush.bf16.msrb.mxu0 %v17593_v29  ;;  %20119 = vst [vmem:[#allocation48_spill] sm:$0xff] %v17608_v49  ;;  %v11944_v58 = vld [vmem:[#allocation8 + $0x1510] sm:$0xf0]  ;;  %v13437_v29 = vld [vmem:[#allocation8 + $0x15f4] sm:$0xf0] }
 0x5f8   : > { %7636 = vmatpush.bf16.msrb.mxu1 %v17596_v34  ;;  %20120 = vst [vmem:[#allocation53_spill] sm:$0xff] %v17611_v20  ;;  %v12088_v34 = vld [vmem:[#allocation8 + $0x1630] sm:$0xf0]  ;;  %v17620_v45 = vor.u32 %v13406_v63, %v11944_v58  ;;  %v17627_v56 = vor.u32 %v13437_v29, %v12062_v41  ;;  %v13433_v7 = vld [vmem:[#allocation8 + $0x15d4] sm:$0xf0] }
 0x5f9   : > { %20121 = vst [vmem:[#allocation54_spill] sm:$0xff] %v17614_v39  ;;  %v17629_v38 = vor.u32 %v13442_v57, %v12088_v34  ;;  %v13438_v63 = vld [vmem:[#allocation8 + $0x1604] sm:$0xf]  ;;  %v12072_v58 = vld [vmem:[#allocation8 + $0x1610] sm:$0xf0] }
 0x5fa   : > { %7648 = vmatpush.bf16.msrb.mxu2 %v17599_v62  ;;  %20122 = vst [vmem:[#allocation49_spill] sm:$0xff] %v17617_v23  ;;  %v13474_v62 = vld [vmem:[#allocation8 + $0x1724] sm:$0xf]  ;;  %v12200_v2 = vld [vmem:[#allocation8 + $0x1710] sm:$0xf0]  ;;  %v17643_v41 = vor.u32 %v13438_v63, %v12072_v58 }
 0x5fb   : > { %7661 = vmatpush.bf16.msrb.mxu3 %v17602_v55  ;;  %7624 = vmatpush.bf16.msrb.mxu0 %v17605_v16  ;;  %20123 = vst [vmem:[#allocation50_spill] sm:$0xff] %v17620_v45  ;;  %v11918_v55 = vld [vmem:[#allocation8 + $0x14c8] sm:$0xf]  ;;  %v17632_v16 = vor.u32 %v13474_v62, %v12216_v53  ;;  %v13470_v6 = vld [vmem:[#allocation8 + $0x1704] sm:$0xf]  ;;  %v17641_v62 = vor.u32 %v13433_v7, %v12046_v30 }
 0x5fc   : > { %7637 = vmatpush.bf16.msrb.mxu1 %v17608_v49  ;;  %20124 = vst [vmem:[#allocation55_spill] sm:$0xff] %v17622_v3  ;;  %v12190_v52 = vld [vmem:[#allocation8 + $0x16e8] sm:$0xf]  ;;  %v13469_v25 = vld [vmem:[#allocation8 + $0x16f4] sm:$0xf0]  ;;  %v17637_v57 = vor.u32 %v13401_v36, %v11918_v55 }
 0x5fd   : > { %20125 = vst [vmem:[#allocation56_spill] sm:$0xff] %v17627_v56  ;;  %v12318_v29 = vld [vmem:[#allocation8 + $0x17e8] sm:$0xf]  ;;  %v13501_v34 = vld [vmem:[#allocation8 + $0x17f4] sm:$0xf0]  ;;  %v17649_v55 = vor.u32 %v13469_v25, %v12190_v52 }
 0x5fe   : > { %7649 = vmatpush.bf16.msrb.mxu2 %v17611_v20  ;;  %20126 = vst [vmem:[#allocation51_spill] sm:$0xff] %v17629_v38  ;;  %v11902_v53 = vld [vmem:[#allocation8 + $0x14a8] sm:$0xf]  ;;  %v17652_v30 = vor.u32 %v13501_v34, %v12318_v29  ;;  %v13465_v63 = vld [vmem:[#allocation8 + $0x16d4] sm:$0xf0] }
 0x5ff   : > { %7662 = vmatpush.bf16.msrb.mxu3 %v17614_v39  ;;  %20127 = vst [vmem:[#allocation52_spill] sm:$0xff] %v17632_v16  ;;  %7625 = vmatpush.bf16.msrb.mxu0 %v17617_v23  ;;  %v13397_v23 = vld [vmem:[#allocation8 + $0x14b4] sm:$0xf0]  ;;  %v6607_v39 = vpop.f32.mrf.mxu2  ;;  %v12030_v36 = vld [vmem:[#allocation8 + $0x15a8] sm:$0xf] }
 0x600   : > { %7638 = vmatpush.bf16.msrb.mxu1 %v17620_v45  ;;  %20128 = vst [vmem:[#allocation57_spill] sm:$0xff] %v17637_v57  ;;  %v13429_v45 = vld [vmem:[#allocation8 + $0x15b4] sm:$0xf0]  ;;  %v12174_v7 = vld [vmem:[#allocation8 + $0x16c8] sm:$0xf]  ;;  %v17655_v58 = vor.u32 %v13397_v23, %v11902_v53 }
 0x601   : > { %20129 = vst [vmem:[#allocation58_spill] sm:$0xff] %v17641_v62  ;;  %v12302_v39 = vld [vmem:[#allocation8 + $0x17c8] sm:$0xf]  ;;  %v17663_v52 = vor.u32 %v13465_v63, %v12174_v7  ;;  %v13425_v29 = vld [vmem:[#allocation8 + $0x1594] sm:$0xf0] }
 0x602   : > { %7650 = vmatpush.bf16.msrb.mxu2 %v17629_v38  ;;  %20130 = vst [vmem:[#allocation59_spill] sm:$0xff] %v17643_v41  ;;  %7626 = vmatmul.bf16.vlgmr.msrb.gmra.mxu0 %v17523_v18  ;;  %v12014_v25 = vld [vmem:[#allocation8 + $0x1588] sm:$0xf]  ;;  %v13461_v53 = vld [vmem:[#allocation8 + $0x16b4] sm:$0xf0] }
 0x603   : > { %7670 = vmatpush.bf16.msra.mxu0 %v17622_v3  ;;  %7663 = vmatpush.bf16.msrb.mxu3 %v17632_v16  ;;  %v17647_v3 = vor.u32 %v13470_v6, %v12200_v2  ;;  %20132 = vst [vmem:[#allocation61_spill] sm:$0xff] %v17649_v55  ;;  %v13497_v16 = vld [vmem:[#allocation8 + $0x17d4] sm:$0xf0]  ;;  %v17659_v6 = vor.u32 %v13429_v45, %v12030_v36  ;;  %v11886_v2 = vld [vmem:[#allocation8 + $0x1488] sm:$0xf] }
 0x604   : > { %7683 = vmatpush.bf16.msra.mxu1 %v17627_v56  ;;  %v6620_v56 = vpop.f32.mrf.mxu3  ;;  %20133 = vst [vmem:[#allocation62_spill] sm:$0xff] %v17652_v30  ;;  %v17666_v23 = vor.u32 %v13497_v16, %v12302_v39  ;;  %v12158_v34 = vld [vmem:[#allocation8 + $0x16a8] sm:$0xf]  ;;  %v17674_v7 = vor.u32 %v13425_v29, %v12014_v25  ;;  %v6644_v25 = vpop.f32.mrf.mxu1  ;;  %v13399_v49 = vld [vmem:[#allocation8 + $0x14cc] sm:$0xf] }
 0x605   : > { %20131 = vst [vmem:[#allocation60_spill] sm:$0xff] %v17647_v3  ;;  %7639 = vmatmul.bf16.vlgmr.msrb.gmra.mxu1 %v17529_v5  ;;  %v13393_v56 = vld [vmem:[#allocation8 + $0x1494] sm:$0xf0]  ;;  %v12286_v36 = vld [vmem:[#allocation8 + $0x17a8] sm:$0xf]  ;;  %v17677_v16 = vor.u32 %v13461_v53, %v12158_v34 }
 0x606   : > { %20134 = vst [vmem:[#allocation63_spill] sm:$0xff] %v17655_v58  ;;  %7651 = vmatpush.bf16.msrb.mxu2 %v17643_v41  ;;  %v17670_v45 = vor.u32 %v13393_v56, %v11886_v2  ;;  %v11870_v63 = vld [vmem:[#allocation8 + $0x1468] sm:$0xf]  ;;  %v6631_v2 = vpop.f32.mrf.mxu0  ;;  %v13457_v41 = vld [vmem:[#allocation8 + $0x1694] sm:$0xf0] }
 0x607   : > { %7671 = vmatpush.bf16.msra.mxu0 %v17637_v57  ;;  %20135 = vst [vmem:[#allocation64_spill] sm:$0xff] %v17659_v6  ;;  %7664 = vmatpush.bf16.msrb.mxu3 %v17647_v3  ;;  %v13493_v3 = vld [vmem:[#allocation8 + $0x17b4] sm:$0xf0]  ;;  %v11998_v39 = vld [vmem:[#allocation8 + $0x1568] sm:$0xf] }
 0x608   : > { %7684 = vmatpush.bf16.msra.mxu1 %v17641_v62  ;;  %20136 = vst [vmem:[#allocation65_spill] sm:$0xff] %v17663_v52  ;;  %v17680_v56 = vor.u32 %v13493_v3, %v12286_v36  ;;  %v20142_v62 = vperm.slane %v17283_v19, 1  ;;  %v13489_v34 = vld [vmem:[#allocation8 + $0x1794] sm:$0xf0]  ;;  %v11822_v38 = vld [vmem:[#allocation8 + $0x1408] sm:$0xf] }
 0x609   : > { %20137 = vst [vmem:[#allocation66_spill] sm:$0xff] %v17666_v23  ;;  %7652 = vmatmul.bf16.vlgmr.msrb.gmra.mxu2 %v17553_v8  ;;  %v13385_v57 = vld [vmem:[#allocation8 + $0x1454] sm:$0xf0] }
 0x60a   : > { %7696 = vmatpush.bf16.msra.mxu2 %v17649_v55  ;;  %20138 = vst [vmem:[#allocation67_spill] sm:$0xff] %v17670_v45  ;;  %7665 = vmatmul.bf16.vlgmr.msrb.gmra.mxu3 %v17559_v33  ;;  %v13421_v55 = vld [vmem:[#allocation8 + $0x1574] sm:$0xf0] }
 0x60b   : > { %7709 = vmatpush.bf16.msra.mxu3 %v17652_v30  ;;  %7672 = vmatpush.bf16.msra.mxu0 %v17655_v58  ;;  %20139 = vst [vmem:[#allocation68_spill] sm:$0xff] %v17674_v7  ;;  %v13389_v30 = vld [vmem:[#allocation8 + $0x1474] sm:$0xf0]  ;;  %v12142_v58 = vld [vmem:[#allocation8 + $0x1688] sm:$0xf]  ;;  %v17688_v53 = vor.u32 %v13421_v55, %v11998_v39 }
 0x60c   : > { %7685 = vmatpush.bf16.msra.mxu1 %v17659_v6  ;;  %20140 = vst [vmem:[#allocation69_spill] sm:$0xff] %v17677_v16  ;;  %v6632_v6 = vadd.f32 %v6631_v2, %v20142_v62  ;;  %v17685_v29 = vor.u32 %v13389_v30, %v11870_v63  ;;  %v17693_v36 = vor.u32 %v13457_v41, %v12142_v58  ;;  %v11982_v62 = vld [vmem:[#allocation8 + $0x1548] sm:$0xf]  ;;  %v13417_v2 = vld [vmem:[#allocation8 + $0x1554] sm:$0xf0] }
 0x60d   : > { %20141 = vst [vmem:[#allocation70_spill] sm:$0xff] %v17680_v56  ;;  %v12126_v63 = vld [vmem:[#allocation8 + $0x1668] sm:$0xf]  ;;  %v13381_v58 = vld [vmem:[#allocation8 + $0x1434] sm:$0xf0] }
 0x60e   : > { %7697 = vmatpush.bf16.msra.mxu2 %v17663_v52  ;;  %20143 = vst [vmem:[#allocation71_spill] sm:$0xff] %v17685_v29  ;;  %v12270_v52 = vld [vmem:[#allocation8 + $0x1788] sm:$0xf]  ;;  %v17690_v3 = vadd.f32 %v6644_v25, %v6632_v6  ;;  %v17702_v6 = vor.u32 %v13417_v2, %v11982_v62 }
 0x60f   : > { %7710 = vmatpush.bf16.msra.mxu3 %v17666_v23  ;;  %7673 = vmatpush.bf16.msra.mxu0 %v17670_v45  ;;  %20144 = vst [vmem:[#allocation72_spill] sm:$0xff] %v17688_v53  ;;  %v11854_v23 = vld [vmem:[#allocation8 + $0x1448] sm:$0xf]  ;;  %v17696_v30 = vor.u32 %v13489_v34, %v12270_v52  ;;  %v13453_v45 = vld [vmem:[#allocation8 + $0x1674] sm:$0xf0] }
 0x610   : > { %7686 = vmatpush.bf16.msra.mxu1 %v17674_v7  ;;  %20145 = vst [vmem:[#allocation73_spill] sm:$0xff] %v17693_v36  ;;  %v17699_v55 = vor.u32 %v13385_v57, %v11854_v23  ;;  %v12254_v39 = vld [vmem:[#allocation8 + $0x1768] sm:$0xf]  ;;  %v13485_v7 = vld [vmem:[#allocation8 + $0x1774] sm:$0xf0]  ;;  %v17705_v25 = vor.u32 %v13453_v45, %v12126_v63 }
 0x611   : > { %20146 = vst [vmem:[#allocation74_spill] sm:$0xff] %v17696_v30  ;;  %v11838_v41 = vld [vmem:[#allocation8 + $0x1428] sm:$0xf]  ;;  %v13413_v34 = vld [vmem:[#allocation8 + $0x1534] sm:$0xf0] }
 0x612   : > { %7698 = vmatpush.bf16.msra.mxu2 %v17677_v16  ;;  %20147 = vst [vmem:[#allocation75_spill] sm:$0xff] %v17699_v55  ;;  %v11966_v52 = vld [vmem:[#allocation8 + $0x1528] sm:$0xf]  ;;  %v13449_v23 = vld [vmem:[#allocation8 + $0x1654] sm:$0xf0]  ;;  %v6646_v16 = vpop.f32.mrf.mxu1  ;;  %v17711_v62 = vor.u32 %v13381_v58, %v11838_v41  ;;  %v17720_v41 = vpop.f32.mrf.mxu2 }
 0x613   : > { %7711 = vmatpush.bf16.msra.mxu3 %v17680_v56  ;;  %7674 = vmatpush.bf16.msra.mxu0 %v17685_v29  ;;  %20148 = vst [vmem:[#allocation76_spill] sm:$0xff] %v17702_v6  ;;  %v6633_v56 = vpop.f32.mrf.mxu0  ;;  %v17708_v29 = vor.u32 %v13485_v7, %v12254_v39  ;;  %v12110_v57 = vld [vmem:[#allocation8 + $0x1648] sm:$0xf]  ;;  %v17714_v45 = vor.u32 %v13413_v34, %v11966_v52  ;;  %v13377_v63 = vld [vmem:[#allocation8 + $0x1414] sm:$0xf0]  ;;  %v17724_v34 = vpop.f32.mrf.mxu3 }
 0x614   : > { %7687 = vmatpush.bf16.msra.mxu1 %v17688_v53  ;;  %20149 = vst [vmem:[#allocation77_spill] sm:$0xff] %v17705_v25  ;;  %v12238_v2 = vld [vmem:[#allocation8 + $0x1748] sm:$0xf]  ;;  %v13481_v53 = vld [vmem:[#allocation8 + $0x1754] sm:$0xf0]  ;;  %v17717_v7 = vor.u32 %v13449_v23, %v12110_v57  ;;  %v17727_v20 = vor.u32 %v13377_v63, %v11822_v38 }
 0x615   : > { %20150 = vst [vmem:[#allocation78_spill] sm:$0xff] %v17708_v29  ;;  %v13403_v56 = vld [vmem:[#allocation8 + $0x14ec] sm:$0xf]  ;;  %v11936_v16 = vld [vmem:[#allocation8 + $0x14f8] sm:$0xf0]  ;;  %v17722_v58 = vor.u32 %v13481_v53, %v12238_v2 }
 0x616   : > { %7699 = vmatpush.bf16.msra.mxu2 %v17693_v36  ;;  %20151 = vst [vmem:[#allocation79_spill] sm:$0xff] %v17711_v62  ;;  %v11950_v36 = vld [vmem:[#allocation8 + $0x1508] sm:$0xf]  ;;  %v13435_v39 = vld [vmem:[#allocation8 + $0x15ec] sm:$0xf] }
 0x617   : > { %7712 = vmatpush.bf16.msra.mxu3 %v17696_v30  ;;  %7675 = vmatpush.bf16.msra.mxu0 %v17699_v55  ;;  %20152 = vst [vmem:[#allocation80_spill] sm:$0xff] %v17714_v45  ;;  %v13409_v30 = vld [vmem:[#allocation8 + $0x1514] sm:$0xf0]  ;;  %v12064_v55 = vld [vmem:[#allocation8 + $0x15f8] sm:$0xf0] }
 0x618   : > { %7688 = vmatpush.bf16.msra.mxu1 %v17702_v6  ;;  %20153 = vst [vmem:[#allocation81_spill] sm:$0xff] %v17722_v58  ;;  %v12094_v6 = vld [vmem:[#allocation8 + $0x1628] sm:$0xf]  ;;  %v13445_v52 = vld [vmem:[#allocation8 + $0x1634] sm:$0xf0]  ;;  %v17735_v53 = vor.u32 %v13435_v39, %v12064_v55  ;;  %v17745_v55 = vor.u32 %v13399_v49, %v11920_v48 }
 0x619   : > { %20154 = vst [vmem:[#allocation82_spill] sm:$0xff] %v17727_v20  ;;  %v12222_v57 = vld [vmem:[#allocation8 + $0x1728] sm:$0xf]  ;;  %v13477_v23 = vld [vmem:[#allocation8 + $0x1734] sm:$0xf0]  ;;  %v17737_v2 = vor.u32 %v13445_v52, %v12094_v6 }
 0x61a   : > { %7700 = vmatpush.bf16.msra.mxu2 %v17705_v25  ;;  %v17730_v25 = vor.u32 %v13409_v30, %v11950_v36  ;;  %20157 = vst [vmem:[#allocation85_spill] sm:$0xff] %v17735_v53  ;;  %v17740_v38 = vor.u32 %v13477_v23, %v12222_v57  ;;  %v12078_v63 = vld [vmem:[#allocation8 + $0x1608] sm:$0xf]  ;;  %v13473_v30 = vld [vmem:[#allocation8 + $0x1714] sm:$0xf0] }
 0x61b   : > { %7713 = vmatpush.bf16.msra.mxu3 %v17708_v29  ;;  %7676 = vmatpush.bf16.msra.mxu0 %v17711_v62  ;;  %v17732_v29 = vor.u32 %v13403_v56, %v11936_v16  ;;  %20158 = vst [vmem:[#allocation86_spill] sm:$0xff] %v17737_v2  ;;  %v12048_v62 = vld [vmem:[#allocation8 + $0x15d8] sm:$0xf0]  ;;  %v12206_v36 = vld [vmem:[#allocation8 + $0x1708] sm:$0xf] }
 0x61c   : > { %7689 = vmatpush.bf16.msra.mxu1 %v17714_v45  ;;  %20155 = vst [vmem:[#allocation83_spill] sm:$0xff] %v17730_v25  ;;  %v13441_v45 = vld [vmem:[#allocation8 + $0x1614] sm:$0xf0]  ;;  %v13467_v56 = vld [vmem:[#allocation8 + $0x16ec] sm:$0xf]  ;;  %v17749_v52 = vor.u32 %v13431_v40, %v12048_v62 }
 0x61d   : > { %20156 = vst [vmem:[#allocation84_spill] sm:$0xff] %v17732_v29  ;;  %v12192_v16 = vld [vmem:[#allocation8 + $0x16f8] sm:$0xf0]  ;;  %v13499_v6 = vld [vmem:[#allocation8 + $0x17ec] sm:$0xf]  ;;  %v17751_v57 = vor.u32 %v13441_v45, %v12078_v63 }
 0x61e   : > { %7701 = vmatpush.bf16.msra.mxu2 %v17717_v7  ;;  %20159 = vst [vmem:[#allocation87_spill] sm:$0xff] %v17740_v38  ;;  %v12320_v39 = vld [vmem:[#allocation8 + $0x17f8] sm:$0xf0]  ;;  %v13395_v23 = vld [vmem:[#allocation8 + $0x14ac] sm:$0xf]  ;;  %v17757_v48 = vor.u32 %v13467_v56, %v12192_v16 }
 0x61f   : > { %7714 = vmatpush.bf16.msra.mxu3 %v17722_v58  ;;  %7677 = vmatpush.bf16.msra.mxu0 %v17727_v20  ;;  %20160 = vst [vmem:[#allocation88_spill] sm:$0xff] %v17745_v55  ;;  %v11904_v20 = vld [vmem:[#allocation8 + $0x14b8] sm:$0xf0]  ;;  %v6659_v58 = vpop.f32.mrf.mxu2  ;;  %v13427_v49 = vld [vmem:[#allocation8 + $0x15ac] sm:$0xf]  ;;  %v17760_v40 = vor.u32 %v13499_v6, %v12320_v39 }
 0x620   : > { %7690 = vmatpush.bf16.msra.mxu1 %v17730_v25  ;;  %20161 = vst [vmem:[#allocation89_spill] sm:$0xff] %v17749_v52  ;;  %v12032_v25 = vld [vmem:[#allocation8 + $0x15b8] sm:$0xf0]  ;;  %v13463_v62 = vld [vmem:[#allocation8 + $0x16cc] sm:$0xf]  ;;  %v17763_v63 = vor.u32 %v13395_v23, %v11904_v20 }
 0x621   : > { %20162 = vst [vmem:[#allocation90_spill] sm:$0xff] %v17751_v57  ;;  %v12176_v45 = vld [vmem:[#allocation8 + $0x16d8] sm:$0xf0]  ;;  %v13495_v58 = vld [vmem:[#allocation8 + $0x17cc] sm:$0xf] }
 0x622   : > { %7702 = vmatpush.bf16.msra.mxu2 %v17737_v2  ;;  %7678 = vmatmul.bf16.vlgmr.msra.gmra.mxu0 %v17523_v18  ;;  %20164 = vst [vmem:[#allocation92_spill] sm:$0xff] %v17757_v48  ;;  %v17771_v56 = vor.u32 %v13463_v62, %v12176_v45  ;;  %v13423_v16 = vld [vmem:[#allocation8 + $0x158c] sm:$0xf]  ;;  %v12016_v6 = vld [vmem:[#allocation8 + $0x1598] sm:$0xf0] }
 0x623   : > { %7722 = vmatpush.bf16.msrb.mxu0 %v17732_v29  ;;  %7715 = vmatpush.bf16.msra.mxu3 %v17740_v38  ;;  %v17755_v29 = vor.u32 %v13473_v30, %v12206_v36  ;;  %20165 = vst [vmem:[#allocation93_spill] sm:$0xff] %v17760_v40  ;;  %v12304_v38 = vld [vmem:[#allocation8 + $0x17d8] sm:$0xf0]  ;;  %v17767_v36 = vor.u32 %v13427_v49, %v12032_v25  ;;  %v13391_v30 = vld [vmem:[#allocation8 + $0x148c] sm:$0xf] }
 0x624   : > { %7735 = vmatpush.bf16.msrb.mxu1 %v17735_v53  ;;  %v6672_v53 = vpop.f32.mrf.mxu3  ;;  %20166 = vst [vmem:[#allocation94_spill] sm:$0xff] %v17763_v63  ;;  %v17774_v20 = vor.u32 %v13495_v58, %v12304_v38  ;;  %v13459_v39 = vld [vmem:[#allocation8 + $0x16ac] sm:$0xf]  ;;  %v12160_v23 = vld [vmem:[#allocation8 + $0x16b8] sm:$0xf0]  ;;  %v17782_v62 = vor.u32 %v13423_v16, %v12016_v6 }
 0x625   : > { %20163 = vst [vmem:[#allocation91_spill] sm:$0xff] %v17755_v29  ;;  %7691 = vmatmul.bf16.vlgmr.msra.gmra.mxu1 %v17529_v5  ;;  %v11888_v53 = vld [vmem:[#allocation8 + $0x1498] sm:$0xf0]  ;;  %v13491_v49 = vld [vmem:[#allocation8 + $0x17ac] sm:$0xf]  ;;  %v17785_v38 = vor.u32 %v13459_v39, %v12160_v23 }
 0x626   : > { %7703 = vmatpush.bf16.msra.mxu2 %v17751_v57  ;;  %20167 = vst [vmem:[#allocation95_spill] sm:$0xff] %v17767_v36  ;;  %v17778_v25 = vor.u32 %v13391_v30, %v11888_v53  ;;  %v13387_v45 = vld [vmem:[#allocation8 + $0x146c] sm:$0xf]  ;;  %v17788_v30 = vpop.f32.mrf.mxu0  ;;  %v12144_v57 = vld [vmem:[#allocation8 + $0x1698] sm:$0xf0] }
 0x627   : > { %7723 = vmatpush.bf16.msrb.mxu0 %v17745_v55  ;;  %7716 = vmatpush.bf16.msra.mxu3 %v17755_v29  ;;  %20168 = vst [vmem:[#allocation96_spill] sm:$0xff] %v17771_v56  ;;  %v12288_v29 = vld [vmem:[#allocation8 + $0x17b8] sm:$0xf0]  ;;  %v13419_v58 = vld [vmem:[#allocation8 + $0x156c] sm:$0xf] }
 0x628   : > { %7736 = vmatpush.bf16.msrb.mxu1 %v17749_v52  ;;  %20169 = vst [vmem:[#allocation97_spill] sm:$0xff] %v17774_v20  ;;  %v17790_v53 = vor.u32 %v13491_v49, %v12288_v29  ;;  %v17792_v52 = vpop.f32.mrf.mxu1  ;;  %v13487_v6 = vld [vmem:[#allocation8 + $0x178c] sm:$0xf] }
 0x629   : > { %7704 = vmatmul.bf16.vlgmr.msra.gmra.mxu2 %v17553_v8  ;;  %20170 = vst [vmem:[#allocation98_spill] sm:$0xff] %v17778_v25  ;;  %v13383_v23 = vld [vmem:[#allocation8 + $0x144c] sm:$0xf] }
 0x62a   : > { %7748 = vmatpush.bf16.msrb.mxu2 %v17757_v48  ;;  %7717 = vmatmul.bf16.vlgmr.msra.gmra.mxu3 %v17559_v33  ;;  %20171 = vst [vmem:[#allocation99_spill] sm:$0xff] %v17782_v62  ;;  %v12000_v48 = vld [vmem:[#allocation8 + $0x1578] sm:$0xf0]  ;;  %v13415_v49 = vld [vmem:[#allocation8 + $0x154c] sm:$0xf] }
 0x62b   : > { %7761 = vmatpush.bf16.msrb.mxu3 %v17760_v40  ;;  %7724 = vmatpush.bf16.msrb.mxu0 %v17763_v63  ;;  %v11872_v40 = vld [vmem:[#allocation8 + $0x1478] sm:$0xf0]  ;;  %20172 = vst [vmem:[#allocation100_spill] sm:$0xff] %v17785_v38  ;;  %v13455_v63 = vld [vmem:[#allocation8 + $0x168c] sm:$0xf]  ;;  %v17798_v39 = vor.u32 %v13419_v58, %v12000_v48 }
 0x62c   : > { %7737 = vmatpush.bf16.msrb.mxu1 %v17767_v36  ;;  %20173 = vst [vmem:[#allocation101_spill] sm:$0xff] %v17790_v53  ;;  %v17795_v16 = vor.u32 %v13387_v45, %v11872_v40  ;;  %v17801_v29 = vor.u32 %v13455_v63, %v12144_v57  ;;  %v11984_v36 = vld [vmem:[#allocation8 + $0x1558] sm:$0xf0]  ;;  %v13451_v40 = vld [vmem:[#allocation8 + $0x166c] sm:$0xf] }
 0x62d   : > { %20175 = vst [vmem:[#allocation103_spill] sm:$0xff] %v17798_v39  ;;  %v12128_v45 = vld [vmem:[#allocation8 + $0x1678] sm:$0xf0]  ;;  %v13483_v48 = vld [vmem:[#allocation8 + $0x176c] sm:$0xf] }
 0x62e   : > { %7749 = vmatpush.bf16.msrb.mxu2 %v17771_v56  ;;  %20174 = vst [vmem:[#allocation102_spill] sm:$0xff] %v17795_v16  ;;  %v12272_v56 = vld [vmem:[#allocation8 + $0x1798] sm:$0xf0]  ;;  %v13379_v57 = vld [vmem:[#allocation8 + $0x142c] sm:$0xf] }
 0x62f   : > { %7762 = vmatpush.bf16.msrb.mxu3 %v17774_v20  ;;  %7725 = vmatpush.bf16.msrb.mxu0 %v17778_v25  ;;  %v11856_v20 = vld [vmem:[#allocation8 + $0x1458] sm:$0xf0]  ;;  %20176 = vst [vmem:[#allocation104_spill] sm:$0xff] %v17801_v29  ;;  %v17804_v55 = vor.u32 %v13487_v6, %v12272_v56  ;;  %v13411_v56 = vld [vmem:[#allocation8 + $0x152c] sm:$0xf] }
 0x630   : > { %7738 = vmatpush.bf16.msrb.mxu1 %v17782_v62  ;;  %v17807_v25 = vor.u32 %v13383_v23, %v11856_v20  ;;  %v12256_v58 = vld [vmem:[#allocation8 + $0x1778] sm:$0xf0]  ;;  %v17810_v62 = vor.u32 %v13415_v49, %v11984_v36  ;;  %v13447_v20 = vld [vmem:[#allocation8 + $0x164c] sm:$0xf]  ;;  %v6698_v2 = vpop.f32.mrf.mxu1 }
 0x631   : > { %20177 = vst [vmem:[#allocation105_spill] sm:$0xff] %v17804_v55  ;;  %v11840_v63 = vld [vmem:[#allocation8 + $0x1438] sm:$0xf0]  ;;  %v13479_v49 = vld [vmem:[#allocation8 + $0x174c] sm:$0xf]  ;;  %v17828_v2 = vpop.f32.mrf.mxu2 }
 0x632   : > { %7750 = vmatpush.bf16.msrb.mxu2 %v17785_v38  ;;  %20178 = vst [vmem:[#allocation106_spill] sm:$0xff] %v17807_v25  ;;  %v17813_v38 = vor.u32 %v13451_v40, %v12128_v45  ;;  %v11968_v6 = vld [vmem:[#allocation8 + $0x1538] sm:$0xf0]  ;;  %v17819_v36 = vor.u32 %v13379_v57, %v11840_v63  ;;  %v13375_v45 = vld [vmem:[#allocation8 + $0x140c] sm:$0xf] }
 0x633   : > { %7763 = vmatpush.bf16.msrb.mxu3 %v17790_v53  ;;  %7726 = vmatpush.bf16.msrb.mxu0 %v17795_v16  ;;  %v6685_v53 = vpop.f32.mrf.mxu0  ;;  %v17816_v16 = vor.u32 %v13483_v48, %v12256_v58  ;;  %v12112_v23 = vld [vmem:[#allocation8 + $0x1658] sm:$0xf0]  ;;  %v17822_v40 = vor.u32 %v13411_v56, %v11968_v6  ;;  %v13407_v48 = vld [vmem:[#allocation8 + $0x150c] sm:$0xf] }
 0x634   : > { %7739 = vmatpush.bf16.msrb.mxu1 %v17798_v39  ;;  %20179 = vst [vmem:[#allocation107_spill] sm:$0xff] %v17813_v38  ;;  %v12240_v39 = vld [vmem:[#allocation8 + $0x1758] sm:$0xf0]  ;;  %v17825_v53 = vor.u32 %v13447_v20, %v12112_v23  ;;  %v13443_v63 = vld [vmem:[#allocation8 + $0x162c] sm:$0xf] }
 0x635   : > { %20180 = vst [vmem:[#allocation108_spill] sm:$0xff] %v17816_v16  ;;  %v11952_v58 = vld [vmem:[#allocation8 + $0x1518] sm:$0xf0]  ;;  %v17830_v57 = vor.u32 %v13479_v49, %v12240_v39  ;;  %v13475_v6 = vld [vmem:[#allocation8 + $0x172c] sm:$0xf] }
 0x636   : > { %7751 = vmatpush.bf16.msrb.mxu2 %v17801_v29  ;;  %v11824_v29 = vld [vmem:[#allocation8 + $0x1418] sm:$0xf0]  ;;  %v17838_v20 = vor.u32 %v13407_v48, %v11952_v58  ;;  %v13439_v49 = vld [vmem:[#allocation8 + $0x160c] sm:$0xf] }
 0x637   : > { %7764 = vmatpush.bf16.msrb.mxu3 %v17804_v55  ;;  %7727 = vmatpush.bf16.msrb.mxu0 %v17807_v25  ;;  %v12096_v25 = vld [vmem:[#allocation8 + $0x1638] sm:$0xf0]  ;;  %v17832_v55 = vpop.f32.mrf.mxu3  ;;  %v17835_v56 = vor.u32 %v13375_v45, %v11824_v29  ;;  %v13471_v29 = vld [vmem:[#allocation8 + $0x170c] sm:$0xf] }
 0x638   : > { %7740 = vmatpush.bf16.msrb.mxu1 %v17810_v62  ;;  %v17841_v23 = vor.u32 %v13443_v63, %v12096_v25  ;;  %v12208_v45 = vld [vmem:[#allocation8 + $0x1718] sm:$0xf0]  ;;  %v20195_v63 = vld [vmem:[#allocation38_spill] sm:$0xff] }
 0x639   : > { %v17855_v48 = vor.u32 %v13471_v29, %v12208_v45  ;;  %v20197_v29 = vld [vmem:[#allocation37_spill] sm:$0xff]  ;;  %v20198_v45 = vld [vmem:[#allocation39_spill] sm:$0xff] }
 0x63a   : > { %7752 = vmatpush.bf16.msrb.mxu2 %v17813_v38  ;;  %v12224_v38 = vld [vmem:[#allocation8 + $0x1738] sm:$0xf0] }
 0x63b   : > { %7765 = vmatpush.bf16.msrb.mxu3 %v17816_v16  ;;  %7728 = vmatpush.bf16.msrb.mxu0 %v17819_v36  ;;  %v17844_v39 = vor.u32 %v13475_v6, %v12224_v38  ;;  %v12080_v16 = vld [vmem:[#allocation8 + $0x1618] sm:$0xf0]  ;;  %v6711_v38 = vpop.f32.mrf.mxu2 }
 0x63c   : > { %7741 = vmatpush.bf16.msrb.mxu1 %v17822_v40  ;;  %v17851_v25 = vor.u32 %v13439_v49, %v12080_v16  ;;  %v20196_v49 = vld [vmem:[#allocation35_spill] sm:$0xff]  ;;  %v20199_v38 = vld [vmem:[#allocation40_spill] sm:$0xff] }
 0x63e   : > { %7753 = vmatpush.bf16.msrb.mxu2 %v17825_v53 }
 0x63f   : > { %7766 = vmatpush.bf16.msrb.mxu3 %v17830_v57  ;;  %7729 = vmatpush.bf16.msrb.mxu0 %v17835_v56  ;;  %v6724_v58 = vpop.f32.mrf.mxu3 }
 0x640   : > { %7742 = vmatpush.bf16.msrb.mxu1 %v17838_v20  ;;  %v20200_v58 = vld [vmem:[#allocation41_spill] sm:$0xff] }
 0x642   : > { %7754 = vmatpush.bf16.msrb.mxu2 %v17841_v23  ;;  %7730 = vmatmul.bf16.vlgmr.msrb.gmra.mxu0 %v17523_v18  ;;  %v17913_v18 = vld [vmem:[#allocation10 + $0x14] sm:$0xf] }
 0x643   : > { %7782 = vmatpush.bf16.msra.mxu0 %v17406_v26  ;;  %7767 = vmatpush.bf16.msrb.mxu3 %v17844_v39  ;;  %v6735_v26 = vpop.f32.mrf.mxu0 }
 0x644   : > { %7795 = vmatpush.bf16.msra.mxu1 %v17409_v21  ;;  %v6748_v21 = vpop.f32.mrf.mxu1 }
 0x645   : > { %7743 = vmatmul.bf16.vlgmr.msrb.gmra.mxu1 %v17529_v5  ;;  %v20188_v5 = vld [vmem:[#allocation27_spill] sm:$0xff] }
 0x646   : > { %7755 = vmatpush.bf16.msrb.mxu2 %v17851_v25 }
 0x647   : > { %7783 = vmatpush.bf16.msra.mxu0 %v17415_v31  ;;  %7768 = vmatpush.bf16.msrb.mxu3 %v17855_v48  ;;  %v20181_v31 = vperm.slane %v17283_v19, 2 }
 0x648   : > { %7796 = vmatpush.bf16.msra.mxu1 %v17419_v28 }
 0x649   : > { %7756 = vmatmul.bf16.vlgmr.msrb.gmra.mxu2 %v17553_v8  ;;  %v6684_v28 = vadd.f32 %v17788_v30, %v20181_v31 }
 0x64a   : > { %7808 = vmatpush.bf16.msra.mxu2 %v17423_v50  ;;  %7769 = vmatmul.bf16.vlgmr.msrb.gmra.mxu3 %v17559_v33  ;;  %v6658_v50 = vadd.f32 %v17720_v41, %v17690_v3  ;;  %v20189_v33 = vld [vmem:[#allocation29_spill] sm:$0xff]  ;;  %v19160_v3 = vperm.slane %v17913_v18, 0  ;;  %v20191_v41 = vld [vmem:[#allocation34_spill] sm:$0xff] }
 0x64b   : > { %7821 = vmatpush.bf16.msra.mxu3 %v17426_v27  ;;  %7784 = vmatpush.bf16.msra.mxu0 %v17429_v51  ;;  %v20182_v27 = vperm.slane %v17283_v19, 3 }
 0x64c   : > { %7797 = vmatpush.bf16.msra.mxu1 %v17433_v4  ;;  %v6737_v4 = vpop.f32.mrf.mxu0 }
 0x64d   : > { %v6736_v51 = vadd.f32 %v6735_v26, %v20182_v27  ;;  %v20201_v26 = vld [vmem:[#allocation42_spill] sm:$0xff]  ;;  %v20204_v27 = vld [vmem:[#allocation45_spill] sm:$0xff] }
 0x64e   : > { %7809 = vmatpush.bf16.msra.mxu2 %v17437_v12  ;;  %v6750_v12 = vpop.f32.mrf.mxu1 }
 0x64f   : > { %7822 = vmatpush.bf16.msra.mxu3 %v17440_v43  ;;  %7785 = vmatpush.bf16.msra.mxu0 %v17444_v46  ;;  %v6697_v43 = vadd.f32 %v17792_v52, %v6684_v28  ;;  %v6671_v46 = vadd.f32 %v17724_v34, %v6658_v50  ;;  %v20192_v34 = vld [vmem:[#allocation31_spill] sm:$0xff]  ;;  %v20203_v50 = vld [vmem:[#allocation44_spill] sm:$0xff] }
 0x650   : > { %7798 = vmatpush.bf16.msra.mxu1 %v17448_v24  ;;  %v6749_v24 = vadd.f32 %v6748_v21, %v6736_v51  ;;  %v20202_v28 = vld [vmem:[#allocation43_spill] sm:$0xff]  ;;  %v20205_v51 = vld [vmem:[#allocation46_spill] sm:$0xff] }
 0x651   : > { %v6710_v19 = vadd.f32 %v17828_v2, %v6697_v43  ;;  %v20194_v2 = vld [vmem:[#allocation36_spill] sm:$0xff] }
 0x652   : > { %7810 = vmatpush.bf16.msra.mxu2 %v17451_v60  ;;  %v6761_v60 = vpop.f32.mrf.mxu2 }
 0x653   : > { %7823 = vmatpush.bf16.msra.mxu3 %v17454_v47  ;;  %7786 = vmatpush.bf16.msra.mxu0 %v17457_v0  ;;  %v6762_v47 = vadd.f32 %v6761_v60, %v6749_v24  ;;  %v6774_v0 = vpop.f32.mrf.mxu3  ;;  %v20207_v24 = vld [vmem:[#allocation48_spill] sm:$0xff]  ;;  %v20208_v60 = vld [vmem:[#allocation53_spill] sm:$0xff] }
 0x654   : > { %7799 = vmatpush.bf16.msra.mxu1 %v17461_v37  ;;  %v6778_v37 = vmax.f32 %v17624_v17, 0.0  ;;  %v20190_v17 = vld [vmem:[#allocation32_spill] sm:$0xff] }
 0x656   : > { %7811 = vmatpush.bf16.msra.mxu2 %v17465_v9  ;;  %v6779_v9 = vmax.f32 %v6671_v46, 0.0  ;;  %v20206_v46 = vld [vmem:[#allocation47_spill] sm:$0xff] }
 0x657   : > { %7824 = vmatpush.bf16.msra.mxu3 %v17468_v11  ;;  %7787 = vmatpush.bf16.msra.mxu0 %v17471_v32  ;;  %v6723_v11 = vadd.f32 %v17832_v55, %v6710_v19  ;;  %v6775_v32 = vadd.f32 %v6774_v0, %v6762_v47  ;;  %v20193_v55 = vld [vmem:[#allocation33_spill] sm:$0xff]  ;;  %v20209_v47 = vld [vmem:[#allocation54_spill] sm:$0xff] }
 0x658   : > { %7800 = vmatpush.bf16.msra.mxu1 %v17479_v1  ;;  %v17899_v1 = vpack.c.bf16 %v6778_v37, %v6778_v37  ;;  %v20210_v0 = vld [vmem:[#allocation49_spill] sm:$0xff]  ;;  %v20211_v37 = vld [vmem:[#allocation50_spill] sm:$0xff] }
 0x65a   : > { %7812 = vmatpush.bf16.msra.mxu2 %v17484_v10  ;;  %v17903_v10 = vpack.c.bf16 %v6779_v9, %v6779_v9  ;;  %v20212_v9 = vld [vmem:[#allocation55_spill] sm:$0xff] }
 0x65b   : > { %7825 = vmatpush.bf16.msra.mxu3 %v17487_v14  ;;  %7788 = vmatpush.bf16.msra.mxu0 %v17490_v54  ;;  %v6780_v14 = vmax.f32 %v6723_v11, 0.0  ;;  %v20183_v54 = vld [vmem:[#allocation24_spill] sm:$0xff] }
 0x65c   : > { %7801 = vmatpush.bf16.msra.mxu1 %v17495_v42  ;;  %v6763_v42 = vpop.f32.mrf.mxu2  ;;  %v20213_v11 = vld [vmem:[#allocation56_spill] sm:$0xff] }
 0x65e   : > { %7813 = vmatpush.bf16.msra.mxu2 %v17498_v59  ;;  %v6781_v59 = vmax.f32 %v6775_v32, 0.0  ;;  %v20214_v32 = vld [vmem:[#allocation51_spill] sm:$0xff] }
 0x65f   : > { %7826 = vmatpush.bf16.msra.mxu3 %v17502_v15  ;;  %7789 = vmatpush.bf16.msra.mxu0 %v17505_v61  ;;  %v6776_v15 = vpop.f32.mrf.mxu3  ;;  %v20184_v61 = vld [vmem:[#allocation25_spill] sm:$0xff]  ;;  %v7575_v52 = vpop.f32.mrf.mxu0 }
 0x660   : > { %7802 = vmatpush.bf16.msra.mxu1 %v17509_v44  ;;  %v20185_v44 = vld [vmem:[#allocation26_spill] sm:$0xff]  ;;  %v17919_v8 = vpack.c.bf16 %v6781_v59, %v6781_v59  ;;  %v7576_v30 = vadd.f32 %v7575_v52, %v19160_v3  ;;  %v20216_v59 = vld [vmem:[#allocation57_spill] sm:$0xff] }
 0x661   : > { %v20217_v15 = vld [vmem:[#allocation58_spill] sm:$0xff]  ;;  %v12568_v3 = vld [vmem:[#allocation11 + $0x1ec] sm:$0xf0] }
 0x662   : > { %7814 = vmatpush.bf16.msra.mxu2 %v17516_v13  ;;  %7790 = vmatmul.bf16.vlgmr.msra.gmra.mxu0 %v17899_v1  ;;  %v20187_v13 = vld [vmem:[#allocation30_spill] sm:$0xff]  ;;  %v7588_v16 = vpop.f32.mrf.mxu1 }
 0x663   : > { %7834 = vmatpush.bf16.msrb.mxu0 %v17511_v35  ;;  %7827 = vmatpush.bf16.msra.mxu3 %v20183_v54  ;;  %v20186_v35 = vld [vmem:[#allocation28_spill] sm:$0xff]  ;;  %v7589_v6 = vadd.f32 %v7588_v16, %v7576_v30  ;;  %v20226_v16 = vld [vmem:[#allocation67_spill] sm:$0xff] }
 0x664   : > { %7847 = vmatpush.bf16.msrb.mxu1 %v17514_v22  ;;  %v17915_v22 = vpack.c.bf16 %v6780_v14, %v6780_v14  ;;  %v20215_v14 = vld [vmem:[#allocation52_spill] sm:$0xff] }
 0x665   : > { %7803 = vmatmul.bf16.vlgmr.msra.gmra.mxu1 %v17903_v10 }
 0x666   : > { %7815 = vmatpush.bf16.msra.mxu2 %v20186_v35  ;;  %v20220_v35 = vld [vmem:[#allocation61_spill] sm:$0xff] }
 0x667   : > { %7835 = vmatpush.bf16.msrb.mxu0 %v20184_v61  ;;  %7828 = vmatpush.bf16.msra.mxu3 %v20187_v13  ;;  %v7577_v21 = vpop.f32.mrf.mxu0  ;;  %v20218_v61 = vld [vmem:[#allocation59_spill] sm:$0xff]  ;;  %v20221_v13 = vld [vmem:[#allocation62_spill] sm:$0xff] }
 0x668   : > { %7848 = vmatpush.bf16.msrb.mxu1 %v20185_v44  ;;  %v20219_v44 = vld [vmem:[#allocation60_spill] sm:$0xff] }
 0x669   : > { %7816 = vmatmul.bf16.vlgmr.msra.gmra.mxu2 %v17915_v22 }
 0x66a   : > { %7860 = vmatpush.bf16.msrb.mxu2 %v20188_v5  ;;  %7829 = vmatmul.bf16.vlgmr.msra.gmra.mxu3 %v17919_v8  ;;  %v7590_v31 = vpop.f32.mrf.mxu1  ;;  %v20222_v5 = vld [vmem:[#allocation63_spill] sm:$0xff] }
 0x66b   : > { %7873 = vmatpush.bf16.msrb.mxu3 %v20189_v33  ;;  %7836 = vmatpush.bf16.msrb.mxu0 %v20190_v17  ;;  %v19159_v33 = vperm.slane %v17913_v18, 1  ;;  %v20223_v17 = vld [vmem:[#allocation64_spill] sm:$0xff]  ;;  %v20234_v31 = vld [vmem:[#allocation75_spill] sm:$0xff] }
 0x66c   : > { %7849 = vmatpush.bf16.msrb.mxu1 %v20191_v41  ;;  %v7601_v4 = vpop.f32.mrf.mxu2  ;;  %v20224_v41 = vld [vmem:[#allocation65_spill] sm:$0xff] }
 0x66d   : > { %v7602_v12 = vadd.f32 %v7601_v4, %v7589_v6  ;;  %v7614_v43 = vpop.f32.mrf.mxu3  ;;  %v20228_v6 = vld [vmem:[#allocation69_spill] sm:$0xff] }
 0x66e   : > { %7861 = vmatpush.bf16.msrb.mxu2 %v20192_v34  ;;  %v20225_v34 = vld [vmem:[#allocation66_spill] sm:$0xff] }
 0x66f   : > { %7874 = vmatpush.bf16.msrb.mxu3 %v20193_v55  ;;  %7837 = vmatpush.bf16.msrb.mxu0 %v20194_v2  ;;  %v17945_v19 = vadd.f32 %v7614_v43, %v7602_v12  ;;  %v20227_v2 = vld [vmem:[#allocation68_spill] sm:$0xff]  ;;  %v20238_v12 = vld [vmem:[#allocation79_spill] sm:$0xff] }
 0x670   : > { %7850 = vmatpush.bf16.msrb.mxu1 %v20195_v63  ;;  %v20239_v43 = vld [vmem:[#allocation80_spill] sm:$0xff] }
 0x672   : > { %7862 = vmatpush.bf16.msrb.mxu2 %v20196_v49  ;;  %v20229_v49 = vld [vmem:[#allocation70_spill] sm:$0xff] }
 0x673   : > { %7875 = vmatpush.bf16.msrb.mxu3 %v20197_v29  ;;  %7838 = vmatpush.bf16.msrb.mxu0 %v20198_v45  ;;  %v20230_v29 = vld [vmem:[#allocation71_spill] sm:$0xff]  ;;  %v20231_v45 = vld [vmem:[#allocation72_spill] sm:$0xff] }
 0x674   : > { %7851 = vmatpush.bf16.msrb.mxu1 %v20199_v38  ;;  %v7603_v54 = vpop.f32.mrf.mxu2  ;;  %v20232_v38 = vld [vmem:[#allocation73_spill] sm:$0xff] }
 0x675   : > { %v7616_v42 = vpop.f32.mrf.mxu3  ;;  %v20249_v54 = vld [vmem:[#allocation90_spill] sm:$0xff] }
 0x676   : > { %7863 = vmatpush.bf16.msrb.mxu2 %v20200_v58  ;;  %v20233_v58 = vld [vmem:[#allocation74_spill] sm:$0xff]  ;;  %v20250_v42 = vld [vmem:[#allocation91_spill] sm:$0xff] }
 0x677   : > { %7876 = vmatpush.bf16.msrb.mxu3 %v20201_v26  ;;  %7839 = vmatpush.bf16.msrb.mxu0 %v20202_v28  ;;  %v20235_v28 = vld [vmem:[#allocation76_spill] sm:$0xff] }
 0x678   : > { %7852 = vmatpush.bf16.msrb.mxu1 %v20203_v50  ;;  %v20236_v50 = vld [vmem:[#allocation77_spill] sm:$0xff] }
 0x67a   : > { %7864 = vmatpush.bf16.msrb.mxu2 %v20204_v27  ;;  %v20237_v27 = vld [vmem:[#allocation78_spill] sm:$0xff] }
 0x67b   : > { %7877 = vmatpush.bf16.msrb.mxu3 %v20205_v51  ;;  %7840 = vmatpush.bf16.msrb.mxu0 %v20206_v46  ;;  %v20240_v46 = vld [vmem:[#allocation81_spill] sm:$0xff] }
 0x67c   : > { %7853 = vmatpush.bf16.msrb.mxu1 %v20207_v24  ;;  %v20241_v24 = vld [vmem:[#allocation82_spill] sm:$0xff] }
 0x67e   : > { %7865 = vmatpush.bf16.msrb.mxu2 %v20208_v60  ;;  %v20242_v60 = vld [vmem:[#allocation83_spill] sm:$0xff] }
 0x67f   : > { %7878 = vmatpush.bf16.msrb.mxu3 %v20209_v47  ;;  %7841 = vmatpush.bf16.msrb.mxu0 %v20210_v0  ;;  %v7627_v55 = vpop.f32.mrf.mxu0  ;;  %v20243_v47 = vld [vmem:[#allocation84_spill] sm:$0xff]  ;;  %v20244_v0 = vld [vmem:[#allocation85_spill] sm:$0xff] }
 0x680   : > { %7854 = vmatpush.bf16.msrb.mxu1 %v20211_v37  ;;  %v7628_v52 = vadd.f32 %v7627_v55, %v19159_v33  ;;  %v20245_v37 = vld [vmem:[#allocation86_spill] sm:$0xff]  ;;  %v20259_v55 = vld [vmem:[#allocation100_spill] sm:$0xff] }
 0x681   : > { %v13562_v33 = vld [vmem:[#allocation11 + $0x1e4] sm:$0xf] }
 0x682   : > { %7866 = vmatpush.bf16.msrb.mxu2 %v20214_v32  ;;  %7842 = vmatmul.bf16.vlgmr.msrb.gmra.mxu0 %v17899_v1  ;;  %v7640_v30 = vpop.f32.mrf.mxu1 }
 0x683   : > { %7886 = vmatpush.bf16.msra.mxu0 %v20212_v9  ;;  %7879 = vmatpush.bf16.msrb.mxu3 %v20215_v14  ;;  %v17974_v63 = vadd.f32 %v7640_v30, %v7628_v52  ;;  %v20246_v9 = vld [vmem:[#allocation87_spill] sm:$0xff]  ;;  %v20248_v14 = vld [vmem:[#allocation89_spill] sm:$0xff]  ;;  %v20261_v30 = vld [vmem:[#allocation102_spill] sm:$0xff] }
 0x684   : > { %7899 = vmatpush.bf16.msra.mxu1 %v20213_v11  ;;  %v20260_v52 = vld [vmem:[#allocation101_spill] sm:$0xff] }
 0x685   : > { %7855 = vmatmul.bf16.vlgmr.msrb.gmra.mxu1 %v17903_v10 }
 0x686   : > { %7867 = vmatpush.bf16.msrb.mxu2 %v20218_v61  ;;  %v20253_v61 = vld [vmem:[#allocation94_spill] sm:$0xff] }
 0x687   : > { %7887 = vmatpush.bf16.msra.mxu0 %v20216_v59  ;;  %7880 = vmatpush.bf16.msrb.mxu3 %v20219_v44  ;;  %v7629_v26 = vpop.f32.mrf.mxu0  ;;  %v20251_v59 = vld [vmem:[#allocation92_spill] sm:$0xff]  ;;  %v20254_v44 = vld [vmem:[#allocation95_spill] sm:$0xff] }
 0x688   : > { %7900 = vmatpush.bf16.msra.mxu1 %v20217_v15  ;;  %v20252_v15 = vld [vmem:[#allocation93_spill] sm:$0xff]  ;;  %v13524_v26 = vld [vmem:[#allocation11 + $0xb0] sm:$0xf0] }
 0x689   : > { %7868 = vmatmul.bf16.vlgmr.msrb.gmra.mxu2 %v17915_v22 }
 0x68a   : > { %7912 = vmatpush.bf16.msra.mxu2 %v20220_v35  ;;  %7881 = vmatmul.bf16.vlgmr.msrb.gmra.mxu3 %v17919_v8  ;;  %v7642_v21 = vpop.f32.mrf.mxu1  ;;  %v20255_v35 = vld [vmem:[#allocation96_spill] sm:$0xff] }
 0x68b   : > { %7925 = vmatpush.bf16.msra.mxu3 %v20221_v13  ;;  %7888 = vmatpush.bf16.msra.mxu0 %v20222_v5  ;;  %v20256_v13 = vld [vmem:[#allocation97_spill] sm:$0xff]  ;;  %v20267_v21 = vld [vmem:[#allocation108_spill] sm:$0xff] }
 0x68c   : > { %7901 = vmatpush.bf16.msra.mxu1 %v20223_v17  ;;  %v17986_v51 = vpop.f32.mrf.mxu2 }
 0x68d   : > { %v17988_v4 = vpop.f32.mrf.mxu3 }
 0x68e   : > { %7913 = vmatpush.bf16.msra.mxu2 %v20224_v41  ;;  %v20257_v41 = vld [vmem:[#allocation98_spill] sm:$0xff] }
 0x68f   : > { %7926 = vmatpush.bf16.msra.mxu3 %v20225_v34  ;;  %7889 = vmatpush.bf16.msra.mxu0 %v20226_v16  ;;  %v20258_v34 = vld [vmem:[#allocation99_spill] sm:$0xff] }
 0x690   : > { %7902 = vmatpush.bf16.msra.mxu1 %v20227_v2  ;;  %v20262_v16 = vld [vmem:[#allocation103_spill] sm:$0xff]  ;;  %v20263_v2 = vld [vmem:[#allocation104_spill] sm:$0xff] }
 0x692   : > { %7914 = vmatpush.bf16.msra.mxu2 %v20228_v6  ;;  %v20264_v6 = vld [vmem:[#allocation105_spill] sm:$0xff] }
 0x693   : > { %7927 = vmatpush.bf16.msra.mxu3 %v20229_v49  ;;  %7890 = vmatpush.bf16.msra.mxu0 %v20230_v29 }
 0x694   : > { %7903 = vmatpush.bf16.msra.mxu1 %v20231_v45  ;;  %v7655_v11 = vpop.f32.mrf.mxu2  ;;  %v20265_v45 = vld [vmem:[#allocation106_spill] sm:$0xff] }
 0x695   : > { %v7668_v32 = vpop.f32.mrf.mxu3  ;;  %v12482_v11 = vld [vmem:[#allocation11 + $0x138] sm:$0xf] }
 0x696   : > { %7915 = vmatpush.bf16.msra.mxu2 %v20232_v38  ;;  %v20266_v38 = vld [vmem:[#allocation107_spill] sm:$0xff]  ;;  %v13542_v32 = vld [vmem:[#allocation11 + $0x140] sm:$0xf0] }
 0x697   : > { %7928 = vmatpush.bf16.msra.mxu3 %v20233_v58  ;;  %7891 = vmatpush.bf16.msra.mxu0 %v20234_v31  ;;  %v12410_v58 = vld [vmem:[#allocation11 + $0xa8] sm:$0xf] }
 0x698   : > { %7904 = vmatpush.bf16.msra.mxu1 %v20235_v28  ;;  %v12506_v28 = vld [vmem:[#allocation11 + $0x168] sm:$0xf] }
 0x69a   : > { %7916 = vmatpush.bf16.msra.mxu2 %v20236_v50  ;;  %v13548_v50 = vld [vmem:[#allocation11 + $0x170] sm:$0xf0] }
 0x69b   : > { %7929 = vmatpush.bf16.msra.mxu3 %v20237_v27  ;;  %7892 = vmatpush.bf16.msra.mxu0 %v20238_v12  ;;  %v18036_v12 = vor.u32 %v13524_v26, %v12410_v58  ;;  %v12662_v26 = vld [vmem:[#allocation11 + $0x2a0] sm:$0xf] }
 0x69c   : > { %7905 = vmatpush.bf16.msra.mxu1 %v20239_v43  ;;  %v12398_v43 = vld [vmem:[#allocation11 + $0x90] sm:$0xf] }
 0x69e   : > { %7917 = vmatpush.bf16.msra.mxu2 %v17717_v7  ;;  %v20247_v7 = vld [vmem:[#allocation88_spill] sm:$0xff] }
 0x69f   : > { %7930 = vmatpush.bf16.msra.mxu3 %v20240_v46  ;;  %7893 = vmatpush.bf16.msra.mxu0 %v20241_v24  ;;  %v18014_v5 = vpop.f32.mrf.mxu0  ;;  %v13521_v46 = vld [vmem:[#allocation11 + $0x98] sm:$0xf0]  ;;  %v12494_v24 = vld [vmem:[#allocation11 + $0x150] sm:$0xf] }
 0x6a0   : > { %7906 = vmatpush.bf16.msra.mxu1 %v20242_v60  ;;  %v13545_v60 = vld [vmem:[#allocation11 + $0x158] sm:$0xf0] }
 0x6a2   : > { %7918 = vmatpush.bf16.msra.mxu2 %v20245_v37  ;;  %7894 = vmatmul.bf16.vlgmr.msra.gmra.mxu0 %v17899_v1  ;;  %v18016_v17 = vpop.f32.mrf.mxu1  ;;  %v18049_v37 = vor.u32 %v13545_v60, %v12494_v24  ;;  %v19157_v24 = vperm.slane %v17913_v18, 3 }
 0x6a3   : > { %7938 = vmatpush.bf16.msrb.mxu0 %v20243_v47  ;;  %7931 = vmatpush.bf16.msra.mxu3 %v20246_v9  ;;  %v12602_v47 = vld [vmem:[#allocation11 + $0x228] sm:$0xf]  ;;  %v13518_v9 = vld [vmem:[#allocation11 + $0x80] sm:$0xf0] }
 0x6a4   : > { %7951 = vmatpush.bf16.msrb.mxu1 %v20244_v0  ;;  %v13572_v0 = vld [vmem:[#allocation11 + $0x230] sm:$0xf0] }
 0x6a5   : > { %7907 = vmatmul.bf16.vlgmr.msra.gmra.mxu1 %v17903_v10 }
 0x6a6   : > { %7919 = vmatpush.bf16.msra.mxu2 %v20249_v54  ;;  %v12590_v54 = vld [vmem:[#allocation11 + $0x210] sm:$0xf] }
 0x6a7   : > { %7939 = vmatpush.bf16.msrb.mxu0 %v20247_v7  ;;  %7932 = vmatpush.bf16.msra.mxu3 %v20250_v42  ;;  %v7681_v49 = vpop.f32.mrf.mxu0 }
 0x6a8   : > { %7952 = vmatpush.bf16.msrb.mxu1 %v20248_v14 }
 0x6a9   : > { %7920 = vmatmul.bf16.vlgmr.msra.gmra.mxu2 %v17915_v22 }
 0x6aa   : > { %7964 = vmatpush.bf16.msrb.mxu2 %v20251_v59  ;;  %7933 = vmatmul.bf16.vlgmr.msra.gmra.mxu3 %v17919_v8  ;;  %v7694_v29 = vpop.f32.mrf.mxu1  ;;  %v12686_v59 = vld [vmem:[#allocation11 + $0x2d0] sm:$0xf] }
 0x6ab   : > { %7977 = vmatpush.bf16.msrb.mxu3 %v20252_v15  ;;  %7940 = vmatpush.bf16.msrb.mxu0 %v20253_v61  ;;  %v12374_v15 = vld [vmem:[#allocation11 + $0x60] sm:$0xf]  ;;  %v13515_v61 = vld [vmem:[#allocation11 + $0x68] sm:$0xf0] }
 0x6ac   : > { %7953 = vmatpush.bf16.msrb.mxu1 %v20254_v44  ;;  %v18030_v31 = vpop.f32.mrf.mxu2  ;;  %v12470_v44 = vld [vmem:[#allocation11 + $0x120] sm:$0xf] }
 0x6ad   : > { %v18032_v27 = vpop.f32.mrf.mxu3 }
 0x6ae   : > { %7965 = vmatpush.bf16.msrb.mxu2 %v20255_v35  ;;  %v13539_v35 = vld [vmem:[#allocation11 + $0x128] sm:$0xf0] }
 0x6af   : > { %7978 = vmatpush.bf16.msrb.mxu3 %v20256_v13  ;;  %7941 = vmatpush.bf16.msrb.mxu0 %v20257_v41  ;;  %v12578_v41 = vld [vmem:[#allocation11 + $0x1f8] sm:$0xf] }
 0x6b0   : > { %7954 = vmatpush.bf16.msrb.mxu1 %v20258_v34  ;;  %v13566_v34 = vld [vmem:[#allocation11 + $0x200] sm:$0xf0] }
 0x6b2   : > { %7966 = vmatpush.bf16.msrb.mxu2 %v20259_v55  ;;  %v12674_v55 = vld [vmem:[#allocation11 + $0x2b8] sm:$0xf] }
 0x6b3   : > { %7979 = vmatpush.bf16.msrb.mxu3 %v20260_v52  ;;  %7942 = vmatpush.bf16.msrb.mxu0 %v20261_v30  ;;  %v18078_v52 = vor.u32 %v13539_v35, %v12470_v44  ;;  %v12362_v30 = vld [vmem:[#allocation11 + $0x48] sm:$0xf]  ;;  %v13530_v44 = vld [vmem:[#allocation11 + $0xe0] sm:$0xf0]  ;;  %v13557_v35 = vld [vmem:[#allocation11 + $0x1b8] sm:$0xf0] }
 0x6b4   : > { %7955 = vmatpush.bf16.msrb.mxu1 %v20262_v16  ;;  %v13512_v16 = vld [vmem:[#allocation11 + $0x50] sm:$0xf0] }
 0x6b5   : > { %v7720_v7 = vpop.f32.mrf.mxu3  ;;  %v18087_v58 = vor.u32 %v13512_v16, %v12362_v30  ;;  %v12326_v30 = vld [vmem:[#allocation11] sm:$0xf] }
 0x6b6   : > { %7967 = vmatpush.bf16.msrb.mxu2 %v20263_v2  ;;  %v18081_v2 = vor.u32 %v13566_v34, %v12578_v41 }
 0x6b7   : > { %7980 = vmatpush.bf16.msrb.mxu3 %v20264_v6  ;;  %7943 = vmatpush.bf16.msrb.mxu0 %v20265_v45  ;;  %v12458_v6 = vld [vmem:[#allocation11 + $0x108] sm:$0xf]  ;;  %v12566_v45 = vld [vmem:[#allocation11 + $0x1e0] sm:$0xf] }
 0x6b8   : > { %7956 = vmatpush.bf16.msrb.mxu1 %v17810_v62  ;;  %v18039_v62 = vor.u32 %v13548_v50, %v12506_v28  ;;  %v19158_v28 = vperm.slane %v17913_v18, 2 }
 0x6ba   : > { %7968 = vmatpush.bf16.msrb.mxu2 %v20266_v38  ;;  %v13563_v38 = vld [vmem:[#allocation11 + $0x1e8] sm:$0xf0]  ;;  %v7680_v7 = vadd.f32 %v18014_v5, %v19158_v28  ;;  %v12542_v5 = vld [vmem:[#allocation11 + $0x1b0] sm:$0xf]  ;;  %v12460_v28 = vld [vmem:[#allocation11 + $0x114] sm:$0xf0] }
 0x6bb   : > { %7981 = vmatpush.bf16.msrb.mxu3 %v20267_v21  ;;  %7944 = vmatpush.bf16.msrb.mxu0 %v17819_v36  ;;  %v18045_v36 = vor.u32 %v13521_v46, %v12398_v43  ;;  %v13587_v21 = vld [vmem:[#allocation11 + $0x2a8] sm:$0xf0]  ;;  %v12350_v43 = vld [vmem:[#allocation11 + $0x30] sm:$0xf]  ;;  %v13509_v46 = vld [vmem:[#allocation11 + $0x38] sm:$0xf0]  ;;  %v18095_v60 = vor.u32 %v13563_v38, %v12566_v45 }
 0x6bc   : > { %7957 = vmatpush.bf16.msrb.mxu1 %v17822_v40  ;;  %v12698_v40 = vld [vmem:[#allocation11 + $0x2e8] sm:$0xf]  ;;  %v12422_v45 = vld [vmem:[#allocation11 + $0xc0] sm:$0xf]  ;;  %v13527_v38 = vld [vmem:[#allocation11 + $0xc8] sm:$0xf0] }
 0x6be   : > { %7969 = vmatpush.bf16.msrb.mxu2 %v17825_v53  ;;  %v13596_v53 = vld [vmem:[#allocation11 + $0x2f0] sm:$0xf0] }
 0x6bf   : > { %7982 = vmatpush.bf16.msrb.mxu3 %v17830_v57  ;;  %7945 = vmatpush.bf16.msrb.mxu0 %v17835_v56  ;;  %v12386_v57 = vld [vmem:[#allocation11 + $0x78] sm:$0xf]  ;;  %v7707_v56 = vpop.f32.mrf.mxu2  ;;  %v18056_v14 = vor.u32 %v13596_v53, %v12698_v40  ;;  %v7731_v49 = vpop.f32.mrf.mxu0  ;;  %v18098_v40 = vor.u32 %v13587_v21, %v12662_v26  ;;  %v12554_v53 = vld [vmem:[#allocation11 + $0x1c8] sm:$0xf]  ;;  %v18128_v21 = vor.u32 %v13557_v35, %v12542_v5  ;;  %v12400_v35 = vld [vmem:[#allocation11 + $0x9c] sm:$0xf0] }
 0x6c0   : > { %7958 = vmatpush.bf16.msrb.mxu1 %v17838_v20  ;;  %v18053_v20 = vor.u32 %v13572_v0, %v12602_v47  ;;  %v18059_v42 = vor.u32 %v13518_v9, %v12386_v57  ;;  %v12446_v47 = vld [vmem:[#allocation11 + $0xf0] sm:$0xf]  ;;  %v13533_v0 = vld [vmem:[#allocation11 + $0xf8] sm:$0xf0]  ;;  %v13560_v57 = vld [vmem:[#allocation11 + $0x1d0] sm:$0xf0]  ;;  %v18101_v9 = vor.u32 %v13509_v46, %v12350_v43 }
 0x6c1   : > { %v12650_v56 = vld [vmem:[#allocation11 + $0x288] sm:$0xf]  ;;  %v13523_v43 = vld [vmem:[#allocation11 + $0xac] sm:$0xf]  ;;  %v12412_v46 = vld [vmem:[#allocation11 + $0xb4] sm:$0xf0] }
 0x6c2   : > { %7970 = vmatpush.bf16.msrb.mxu2 %v17841_v23  ;;  %7946 = vmatmul.bf16.vlgmr.msrb.gmra.mxu0 %v17899_v1  ;;  %v13569_v23 = vld [vmem:[#allocation11 + $0x218] sm:$0xf0]  ;;  %v18063_v1 = vor.u32 %v13542_v32, %v12482_v11  ;;  %v13584_v11 = vld [vmem:[#allocation11 + $0x290] sm:$0xf0]  ;;  %v7654_v32 = vadd.f32 %v17986_v51, %v17974_v63 }
 0x6c3   : > { %8646 = vmatpush.bf16.msra.mxu0 %v18036_v12  ;;  %7983 = vmatpush.bf16.msrb.mxu3 %v17844_v39  ;;  %v13593_v39 = vld [vmem:[#allocation11 + $0x2d8] sm:$0xf0]  ;;  %v18117_v51 = vor.u32 %v13584_v11, %v12650_v56  ;;  %v13554_v56 = vld [vmem:[#allocation11 + $0x1a0] sm:$0xf0] }
 0x6c4   : > { %8659 = vmatpush.bf16.msra.mxu1 %v18039_v62  ;;  %v18070_v13 = vor.u32 %v13593_v39, %v12686_v59  ;;  %v13506_v59 = vld [vmem:[#allocation11 + $0x20] sm:$0xf0]  ;;  %v7732_v39 = vadd.f32 %v7731_v49, %v19157_v24  ;;  %v7667_v16 = vadd.f32 %v17988_v4, %v7654_v32  ;;  %v13503_v49 = vld [vmem:[#allocation11 + $0x8] sm:$0xf0] }
 0x6c5   : > { %7959 = vmatmul.bf16.vlgmr.msrb.gmra.mxu1 %v17903_v10  ;;  %v18067_v10 = vor.u32 %v13569_v23, %v12590_v54  ;;  %v18109_v54 = vor.u32 %v13533_v0, %v12446_v47  ;;  %v12338_v23 = vld [vmem:[#allocation11 + $0x18] sm:$0xf]  ;;  %v13547_v47 = vld [vmem:[#allocation11 + $0x16c] sm:$0xf] }
 0x6c6   : > { %7971 = vmatpush.bf16.msrb.mxu2 %v17851_v25  ;;  %v18074_v25 = vor.u32 %v13515_v61, %v12374_v15  ;;  %v18114_v15 = vor.u32 %v13560_v57, %v12554_v53  ;;  %v12434_v61 = vld [vmem:[#allocation11 + $0xd8] sm:$0xf]  ;;  %v18120_v34 = vor.u32 %v13506_v59, %v12338_v23  ;;  %v13578_v23 = vld [vmem:[#allocation11 + $0x260] sm:$0xf0]  ;;  %v7774_v59 = vmax.f32 %v17945_v19, 0.0 }
 0x6c7   : > { %8647 = vmatpush.bf16.msra.mxu0 %v18045_v36  ;;  %7984 = vmatpush.bf16.msrb.mxu3 %v17855_v48  ;;  %v13590_v48 = vld [vmem:[#allocation11 + $0x2c0] sm:$0xf0]  ;;  %v7733_v63 = vpop.f32.mrf.mxu0  ;;  %v12508_v53 = vld [vmem:[#allocation11 + $0x174] sm:$0xf0]  ;;  %v13535_v24 = vld [vmem:[#allocation11 + $0x10c] sm:$0xf] }
 0x6c8   : > { %8660 = vmatpush.bf16.msra.mxu1 %v18049_v37  ;;  %v18084_v29 = vor.u32 %v13590_v48, %v12674_v55  ;;  %v12638_v55 = vld [vmem:[#allocation11 + $0x270] sm:$0xf]  ;;  %v13581_v48 = vld [vmem:[#allocation11 + $0x278] sm:$0xf0]  ;;  %v12530_v57 = vld [vmem:[#allocation11 + $0x198] sm:$0xf]  ;;  %v18144_v63 = vor.u32 %v13547_v47, %v12508_v53 }
 0x6c9   : > { %7972 = vmatmul.bf16.vlgmr.msrb.gmra.mxu2 %v17915_v22  ;;  %v13536_v22 = vld [vmem:[#allocation11 + $0x110] sm:$0xf0]  ;;  %v18146_v5 = vor.u32 %v13554_v56, %v12530_v57  ;;  %v12700_v47 = vld [vmem:[#allocation11 + $0x2f4] sm:$0xf0]  ;;  %v13517_v57 = vld [vmem:[#allocation11 + $0x7c] sm:$0xf] }
 0x6ca   : > { %8672 = vmatpush.bf16.msra.mxu2 %v18053_v20  ;;  %7985 = vmatmul.bf16.vlgmr.msrb.gmra.mxu3 %v17919_v8  ;;  %v7744_v8 = vpop.f32.mrf.mxu1  ;;  %v18091_v50 = vor.u32 %v13536_v22, %v12458_v6  ;;  %v7693_v6 = vadd.f32 %v18016_v17, %v7680_v7  ;;  %v18125_v22 = vor.u32 %v13530_v44, %v12434_v61  ;;  %v12626_v7 = vld [vmem:[#allocation11 + $0x258] sm:$0xf]  ;;  %v13520_v44 = vld [vmem:[#allocation11 + $0x94] sm:$0xf]  ;;  %v12388_v56 = vld [vmem:[#allocation11 + $0x84] sm:$0xf0] }
 0x6cb   : > { %8685 = vmatpush.bf16.msra.mxu3 %v18056_v14  ;;  %8648 = vmatpush.bf16.msra.mxu0 %v18059_v42  ;;  %v7745_v26 = vadd.f32 %v7744_v8, %v7732_v39  ;;  %v18132_v17 = vor.u32 %v13581_v48, %v12638_v55  ;;  %v18135_v8 = vor.u32 %v13503_v49, %v12326_v30  ;;  %v7775_v39 = vmax.f32 %v7667_v16, 0.0  ;;  %v12496_v55 = vld [vmem:[#allocation11 + $0x15c] sm:$0xf0]  ;;  %v13551_v16 = vld [vmem:[#allocation11 + $0x188] sm:$0xf0] }
 0x6cc   : > { %8661 = vmatpush.bf16.msra.mxu1 %v18063_v1  ;;  %v7706_v0 = vadd.f32 %v18030_v31, %v7693_v6  ;;  %v7757_v4 = vpop.f32.mrf.mxu2  ;;  %v18139_v31 = vor.u32 %v13527_v38, %v12422_v45  ;;  %v18141_v61 = vor.u32 %v13523_v43, %v12412_v46  ;;  %20268 = vst [vmem:[#allocation24_spill] sm:$0xff] %v18146_v5  ;;  %v12518_v30 = vld [vmem:[#allocation11 + $0x180] sm:$0xf]  ;;  %v13575_v45 = vld [vmem:[#allocation11 + $0x248] sm:$0xf0] }
 0x6cd   : > { %v7758_v11 = vadd.f32 %v7757_v4, %v7745_v26  ;;  %v7770_v32 = vpop.f32.mrf.mxu3  ;;  %v18150_v19 = vor.u32 %v13578_v23, %v12626_v7  ;;  %v12614_v6 = vld [vmem:[#allocation11 + $0x240] sm:$0xf]  ;;  %v13571_v38 = vld [vmem:[#allocation11 + $0x22c] sm:$0xf]  ;;  %v12604_v26 = vld [vmem:[#allocation11 + $0x234] sm:$0xf0]  ;;  %v18153_v43 = vpack.c.bf16 %v7774_v59, %v7774_v59  ;;  %v18165_v53 = vor.u32 %v13551_v16, %v12518_v30 }
 0x6ce   : > { %8673 = vmatpush.bf16.msra.mxu2 %v18067_v10  ;;  %v7719_v48 = vadd.f32 %v18032_v27, %v7706_v0  ;;  %v18157_v27 = vor.u32 %v13520_v44, %v12400_v35  ;;  %v13595_v46 = vld [vmem:[#allocation11 + $0x2ec] sm:$0xf]  ;;  %v18159_v0 = vpack.c.bf16 %v7775_v39, %v7775_v39  ;;  %v18169_v7 = vor.u32 %v13575_v45, %v12614_v6  ;;  %v13541_v59 = vld [vmem:[#allocation11 + $0x13c] sm:$0xf]  ;;  %v12484_v39 = vld [vmem:[#allocation11 + $0x144] sm:$0xf0] }
 0x6cf   : > { %8686 = vmatpush.bf16.msra.mxu3 %v18070_v13  ;;  %8649 = vmatpush.bf16.msra.mxu0 %v18074_v25  ;;  %20269 = vst [vmem:[#allocation25_spill] sm:$0xff] %v18150_v19  ;;  %v7771_v49 = vadd.f32 %v7770_v32, %v7758_v11  ;;  %v18171_v23 = vor.u32 %v13571_v38, %v12604_v26  ;;  %v12592_v30 = vld [vmem:[#allocation11 + $0x21c] sm:$0xf0]  ;;  %v13592_v16 = vld [vmem:[#allocation11 + $0x2d4] sm:$0xf] }
 0x6d0   : > { %8662 = vmatpush.bf16.msra.mxu1 %v18078_v52  ;;  %20270 = vst [vmem:[#allocation26_spill] sm:$0xff] %v18157_v27  ;;  %v7776_v11 = vmax.f32 %v7719_v48, 0.0  ;;  %v18180_v48 = vor.u32 %v13517_v57, %v12388_v56  ;;  %v12688_v6 = vld [vmem:[#allocation11 + $0x2dc] sm:$0xf0]  ;;  %v13514_v45 = vld [vmem:[#allocation11 + $0x64] sm:$0xf] }
 0x6d1   : > { %20272 = vst [vmem:[#allocation30_spill] sm:$0xff] %v18165_v53  ;;  %v7777_v44 = vmax.f32 %v7771_v49, 0.0  ;;  %v18184_v49 = vor.u32 %v13541_v59, %v12484_v39  ;;  %v12376_v38 = vld [vmem:[#allocation11 + $0x6c] sm:$0xf0]  ;;  %v13565_v59 = vld [vmem:[#allocation11 + $0x1fc] sm:$0xf] }
 0x6d2   : > { %8674 = vmatpush.bf16.msra.mxu2 %v18081_v2  ;;  %v7746_v41 = vpop.f32.mrf.mxu1  ;;  %20273 = vst [vmem:[#allocation27_spill] sm:$0xff] %v18169_v7  ;;  %v18186_v26 = vpack.c.bf16 %v7776_v11, %v7776_v11  ;;  %v12472_v57 = vld [vmem:[#allocation11 + $0x12c] sm:$0xf0]  ;;  %v12580_v11 = vld [vmem:[#allocation11 + $0x204] sm:$0xf0]  ;;  %v18200_v39 = vor.u32 %v13514_v45, %v12376_v38 }
 0x6d3   : > { %8687 = vmatpush.bf16.msra.mxu3 %v18084_v29  ;;  %8650 = vmatpush.bf16.msra.mxu0 %v18087_v58  ;;  %v13544_v41 = vld [vmem:[#allocation11 + $0x154] sm:$0xf]  ;;  %20274 = vst [vmem:[#allocation29_spill] sm:$0xff] %v18171_v23  ;;  %v18193_v56 = vpack.c.bf16 %v7777_v44, %v7777_v44 }
 0x6d4   : > { %8663 = vmatpush.bf16.msra.mxu1 %v18091_v50  ;;  %v18163_v4 = vor.u32 %v13544_v41, %v12496_v55  ;;  %v7759_v32 = vpop.f32.mrf.mxu2  ;;  %v18174_v41 = vor.u32 %v13595_v46, %v12700_v47  ;;  %v13568_v55 = vld [vmem:[#allocation11 + $0x214] sm:$0xf]  ;;  %20276 = vst [vmem:[#allocation34_spill] sm:$0xff] %v18180_v48  ;;  %v13538_v47 = vld [vmem:[#allocation11 + $0x124] sm:$0xf] }
 0x6d5   : > { %v7772_v35 = vpop.f32.mrf.mxu3  ;;  %20277 = vst [vmem:[#allocation31_spill] sm:$0xff] %v18184_v49  ;;  %v18190_v46 = vor.u32 %v13568_v55, %v12592_v30  ;;  %v18196_v32 = vor.u32 %v13592_v16, %v12688_v6  ;;  %v12676_v55 = vld [vmem:[#allocation11 + $0x2c4] sm:$0xf0]  ;;  %v18204_v44 = vor.u32 %v13538_v47, %v12472_v57  ;;  %v13511_v30 = vld [vmem:[#allocation11 + $0x4c] sm:$0xf]  ;;  %v18207_v6 = vor.u32 %v13565_v59, %v12580_v11 }
 0x6d6   : > { %8675 = vmatpush.bf16.msra.mxu2 %v18095_v60  ;;  %20271 = vst [vmem:[#allocation28_spill] sm:$0xff] %v18163_v4  ;;  %v13589_v35 = vld [vmem:[#allocation11 + $0x2bc] sm:$0xf]  ;;  %v12364_v16 = vld [vmem:[#allocation11 + $0x54] sm:$0xf0]  ;;  %v20284_v47 = vperm.slane %v17913_v18, 0 }
 0x6d7   : > { %8688 = vmatpush.bf16.msra.mxu3 %v18098_v40  ;;  %8651 = vmatpush.bf16.msra.mxu0 %v18101_v9  ;;  %20275 = vst [vmem:[#allocation32_spill] sm:$0xff] %v18174_v41  ;;  %v18215_v38 = vor.u32 %v13589_v35, %v12676_v55  ;;  %v18220_v59 = vor.u32 %v13511_v30, %v12364_v16  ;;  %v13586_v11 = vld [vmem:[#allocation11 + $0x2a4] sm:$0xf]  ;;  %v12352_v35 = vld [vmem:[#allocation11 + $0x3c] sm:$0xf0] }
 0x6d8   : > { %8664 = vmatpush.bf16.msra.mxu1 %v18109_v54  ;;  %20278 = vst [vmem:[#allocation33_spill] sm:$0xff] %v18190_v46  ;;  %v13559_v16 = vld [vmem:[#allocation11 + $0x1cc] sm:$0xf] }
 0x6d9   : > { %20279 = vst [vmem:[#allocation36_spill] sm:$0xff] %v18196_v32 }
 0x6da   : > { %8676 = vmatpush.bf16.msra.mxu2 %v18114_v15  ;;  %20280 = vst [vmem:[#allocation38_spill] sm:$0xff] %v18200_v39 }
 0x6db   : > { %8689 = vmatpush.bf16.msra.mxu3 %v18117_v51  ;;  %8652 = vmatpush.bf16.msra.mxu0 %v18120_v34  ;;  %20281 = vst [vmem:[#allocation35_spill] sm:$0xff] %v18204_v44 }
 0x6dc   : > { %8665 = vmatpush.bf16.msra.mxu1 %v18125_v22  ;;  %20282 = vst [vmem:[#allocation37_spill] sm:$0xff] %v18207_v6 }
 0x6dd   : > { %20283 = vst [vmem:[#allocation39_spill] sm:$0xff] %v18215_v38 }
 0x6de   : > { %8677 = vmatpush.bf16.msra.mxu2 %v18128_v21  ;;  %20285 = vst [vmem:[#allocation40_spill] sm:$0xff] %v18220_v59 }
 0x6df   : > { %8690 = vmatpush.bf16.msra.mxu3 %v18132_v17  ;;  %8653 = vmatpush.bf16.msra.mxu0 %v18135_v8  ;;  %v7791_v45 = vpop.f32.mrf.mxu0 }
 0x6e0   : > { %8666 = vmatpush.bf16.msra.mxu1 %v18139_v31  ;;  %v7792_v57 = vadd.f32 %v7791_v45, %v20284_v47  ;;  %v13532_v45 = vld [vmem:[#allocation11 + $0xf4] sm:$0xf]  ;;  %v12448_v47 = vld [vmem:[#allocation11 + $0xfc] sm:$0xf0] }
 0x6e2   : > { %8678 = vmatpush.bf16.msra.mxu2 %v18146_v5  ;;  %8654 = vmatmul.bf16.vlgmr.msra.gmra.mxu0 %v18153_v43  ;;  %v13550_v5 = vld [vmem:[#allocation11 + $0x184] sm:$0xf] }
 0x6e3   : > { %8698 = vmatpush.bf16.msrb.mxu0 %v18141_v61  ;;  %8691 = vmatpush.bf16.msra.mxu3 %v18150_v19  ;;  %v19187_v19 = vmov 0  }
 0x6e4   : > { %8711 = vmatpush.bf16.msrb.mxu1 %v18144_v63  ;;  %13710 = vset.pattern.permute.xlu0 %v19187_v19 }
 0x6e5   : > { %8667 = vmatmul.bf16.vlgmr.msra.gmra.mxu1 %v18159_v0  ;;  %13711 = vset.pattern.permute.xlu1 %v19187_v19 }
 0x6e6   : > { %8679 = vmatpush.bf16.msra.mxu2 %v18165_v53  ;;  %v12424_v53 = vld [vmem:[#allocation11 + $0xcc] sm:$0xf0] }
 0x6e7   : > { %8699 = vmatpush.bf16.msrb.mxu0 %v18157_v27  ;;  %8692 = vmatpush.bf16.msra.mxu3 %v18169_v7 }
 0x6e8   : > { %8712 = vmatpush.bf16.msrb.mxu1 %v18163_v4  ;;  %v12418_v4 = vld [vmem:[#allocation11 + $0xb0] sm:$0xf] }
 0x6e9   : > { %8680 = vmatmul.bf16.vlgmr.msra.gmra.mxu2 %v18186_v26 }
 0x6ea   : > { %8724 = vmatpush.bf16.msrb.mxu2 %v18171_v23  ;;  %8693 = vmatmul.bf16.vlgmr.msra.gmra.mxu3 %v18193_v56 }
 0x6eb   : > { %8737 = vmatpush.bf16.msrb.mxu3 %v18174_v41  ;;  %8700 = vmatpush.bf16.msrb.mxu0 %v18180_v48  ;;  %v18223_v48 = vor.u32 %v13535_v24, %v12460_v28  ;;  %v18228_v41 = vor.u32 %v13562_v33, %v12568_v3  ;;  %v13583_v24 = vld [vmem:[#allocation11 + $0x28c] sm:$0xf]  ;;  %v18238_v3 = vor.u32 %v13532_v45, %v12448_v47  ;;  %v12340_v33 = vld [vmem:[#allocation11 + $0x24] sm:$0xf0]  ;;  %v7793_v45 = vpop.f32.mrf.mxu0 }
 0x6ec   : > { %8713 = vmatpush.bf16.msrb.mxu1 %v18184_v49  ;;  %v7804_v49 = vpop.f32.mrf.mxu1  ;;  %v12514_v45 = vld [vmem:[#allocation11 + $0x170] sm:$0xf] }
 0x6ed   : > { %20286 = vst [vmem:[#allocation41_spill] sm:$0xff] %v18223_v48  ;;  %v18225_v55 = vadd.f32 %v7804_v49, %v7792_v57  ;;  %v12652_v49 = vld [vmem:[#allocation11 + $0x294] sm:$0xf0]  ;;  %v13505_v57 = vld [vmem:[#allocation11 + $0x1c] sm:$0xf] }
 0x6ee   : > { %8725 = vmatpush.bf16.msrb.mxu2 %v18190_v46  ;;  %v12664_v46 = vld [vmem:[#allocation11 + $0x2ac] sm:$0xf0]  ;;  %20287 = vst [vmem:[#allocation42_spill] sm:$0xff] %v18228_v41  ;;  %v18249_v47 = vor.u32 %v13583_v24, %v12652_v49  ;;  %v18252_v7 = vor.u32 %v13505_v57, %v12340_v33  ;;  %v13549_v49 = vld [vmem:[#allocation11 + $0x178] sm:$0xf0]  ;;  %v18262_v57 = vpop.f32.mrf.mxu2 }
 0x6ef   : > { %8738 = vmatpush.bf16.msrb.mxu3 %v18196_v32  ;;  %8701 = vmatpush.bf16.msrb.mxu0 %v18200_v39  ;;  %v13508_v32 = vld [vmem:[#allocation11 + $0x34] sm:$0xf]  ;;  %v18232_v30 = vor.u32 %v13586_v11, %v12664_v46  ;;  %v12556_v39 = vld [vmem:[#allocation11 + $0x1d4] sm:$0xf0]  ;;  %20290 = vst [vmem:[#allocation45_spill] sm:$0xff] %v18238_v3 }
 0x6f0   : > { %8714 = vmatpush.bf16.msrb.mxu1 %v18204_v44  ;;  %v18235_v28 = vor.u32 %v13508_v32, %v12352_v35  ;;  %v12436_v44 = vld [vmem:[#allocation11 + $0xe4] sm:$0xf0]  ;;  %v18246_v46 = vor.u32 %v13559_v16, %v12556_v39  ;;  %v13556_v32 = vld [vmem:[#allocation11 + $0x1b4] sm:$0xf]  ;;  %v12544_v11 = vld [vmem:[#allocation11 + $0x1bc] sm:$0xf0] }
 0x6f1   : > { %20288 = vst [vmem:[#allocation43_spill] sm:$0xff] %v18232_v30  ;;  %v13580_v35 = vld [vmem:[#allocation11 + $0x274] sm:$0xf]  ;;  %v483_v39 = vld [vmem:[%s18243_s20] sm:$0xff]  ;;  %v18259_v24 = vor.u32 %v13556_v32, %v12544_v11  ;;  %v12406_v11 = vld [vmem:[#allocation11 + $0x98] sm:$0xf] }
 0x6f2   : > { %8726 = vmatpush.bf16.msrb.mxu2 %v18207_v6  ;;  %20289 = vst [vmem:[#allocation44_spill] sm:$0xff] %v18235_v28  ;;  %v13529_v6 = vld [vmem:[#allocation11 + $0xdc] sm:$0xf]  ;;  %vm485_vm1 = vcmp.gt.s32.totalorder %v483_v39, 0  ;;  %v12628_v32 = vld [vmem:[#allocation11 + $0x264] sm:$0xf0] }
 0x6f3   : > { %8739 = vmatpush.bf16.msrb.mxu3 %v18215_v38  ;;  %8702 = vmatpush.bf16.msrb.mxu0 %v18220_v59  ;;  %20291 = vst [vmem:[#allocation46_spill] sm:$0xff] %v18246_v46  ;;  %v13502_v59 = vld [vmem:[#allocation11 + $0x4] sm:$0xf]  ;;  %v12328_v38 = vld [vmem:[#allocation11 + $0xc] sm:$0xf0]  ;;  %v18256_v16 = vor.u32 %v13529_v6, %v12436_v44  ;;  %v486_v44 = vsel %vm485_vm1, %v483_v39, 0  ;;  %v18266_v6 = vpop.f32.mrf.mxu3 }
 0x6f4   : > { %8715 = vmatpush.bf16.msrb.mxu1 %v18223_v48  ;;  %20292 = vst [vmem:[#allocation47_spill] sm:$0xff] %v18249_v47  ;;  %v12640_v48 = vld [vmem:[#allocation11 + $0x27c] sm:$0xf0]  ;;  %v7806_v23 = vpop.f32.mrf.mxu1  ;;  %v18269_v27 = vor.u32 %v13502_v59, %v12328_v38  ;;  %vm489_vm2 = vcmp.lt.s32.totalorder %v486_v44, 2  ;;  %v18280_v38 = vor.u32 %v13549_v49, %v12514_v45  ;;  %v12616_v45 = vld [vmem:[#allocation11 + $0x24c] sm:$0xf0] }
 0x6f5   : > { %20293 = vst [vmem:[#allocation48_spill] sm:$0xff] %v18252_v7  ;;  %v13553_v23 = vld [vmem:[#allocation11 + $0x19c] sm:$0xf]  ;;  %v18264_v33 = vor.u32 %v13580_v35, %v12640_v48  ;;  %v13522_v48 = vld [vmem:[#allocation11 + $0xa0] sm:$0xf0]  ;;  %v18277_v39 = vsel %vm489_vm2, %v486_v44, 2 }
 0x6f6   : > { %8727 = vmatpush.bf16.msrb.mxu2 %v18228_v41  ;;  %v13526_v41 = vld [vmem:[#allocation11 + $0xc4] sm:$0xf]  ;;  %20295 = vst [vmem:[#allocation54_spill] sm:$0xff] %v18269_v27  ;;  %v12502_v35 = vld [vmem:[#allocation11 + $0x158] sm:$0xf]  ;;  %vm8802_vm3 = vcmp.eq.s32.totalorder %v18277_v39, 1 }
 0x6f7   : > { %8740 = vmatpush.bf16.msrb.mxu3 %v18232_v30  ;;  %8703 = vmatpush.bf16.msrb.mxu0 %v18235_v28  ;;  %v13525_v30 = vld [vmem:[#allocation11 + $0xb8] sm:$0xf0]  ;;  %20294 = vst [vmem:[#allocation53_spill] sm:$0xff] %v18264_v33  ;;  %v12532_v28 = vld [vmem:[#allocation11 + $0x1a4] sm:$0xf0]  ;;  %vm8809_vm4 = vcmp.eq.s32.totalorder %v18277_v39, 2 }
 0x6f8   : > { %8716 = vmatpush.bf16.msrb.mxu1 %v18238_v3  ;;  %v13577_v3 = vld [vmem:[#allocation11 + $0x25c] sm:$0xf]  ;;  %20298 = vst [vmem:[#allocation55_spill] sm:$0xff] %v18280_v38  ;;  %v18282_v59 = vor.u32 %v13553_v23, %v12532_v28  ;;  %v12610_v49 = vld [vmem:[#allocation11 + $0x230] sm:$0xf]  ;;  %v18293_v23 = vor.u32 %v13522_v48, %v12406_v11 }
 0x6f9   : > { %v13573_v28 = vld [vmem:[#allocation11 + $0x238] sm:$0xf0]  ;;  %v12706_v44 = vld [vmem:[#allocation11 + $0x2f0] sm:$0xf]  ;;  %v12490_v48 = vld [vmem:[#allocation11 + $0x140] sm:$0xf] }
 0x6fa   : > { %8728 = vmatpush.bf16.msrb.mxu2 %v18246_v46  ;;  %v18272_v46 = vor.u32 %v13526_v41, %v12424_v53  ;;  %20299 = vst [vmem:[#allocation56_spill] sm:$0xff] %v18282_v59  ;;  %v12520_v53 = vld [vmem:[#allocation11 + $0x18c] sm:$0xf0]  ;;  %v13574_v41 = vld [vmem:[#allocation11 + $0x244] sm:$0xf]  ;;  %v18305_v11 = vor.u32 %v13573_v28, %v12610_v49 }
 0x6fb   : > { %8741 = vmatpush.bf16.msrb.mxu3 %v18249_v47  ;;  %8704 = vmatpush.bf16.msrb.mxu0 %v18252_v7  ;;  %v18274_v47 = vor.u32 %v13525_v30, %v12418_v4  ;;  %v13546_v7 = vld [vmem:[#allocation11 + $0x160] sm:$0xf0]  ;;  %v18287_v4 = vor.u32 %v13577_v3, %v12628_v32  ;;  %v8803_v30 = vsel %vm8802_vm3, 1, %v19187_v19  ;;  %20301 = vst [vmem:[#allocation52_spill] sm:$0xff] %v18293_v23  ;;  %v12394_v19 = vld [vmem:[#allocation11 + $0x80] sm:$0xf] }
 0x6fc   : > { %8717 = vmatpush.bf16.msrb.mxu1 %v18256_v16  ;;  %20296 = vst [vmem:[#allocation49_spill] sm:$0xff] %v18272_v46  ;;  %8805 = vperm.xlu0 %13710, %v8803_v30   ;;  %v18297_v3 = vor.u32 %v13546_v7, %v12502_v35  ;;  %v18299_v32 = vor.u32 %v13550_v5, %v12520_v53  ;;  %v7819_v30 = vpop.f32.mrf.mxu2  ;;  %v12598_v5 = vld [vmem:[#allocation11 + $0x218] sm:$0xf]  ;;  %v13570_v35 = vld [vmem:[#allocation11 + $0x220] sm:$0xf0] }
 0x6fd   : > { %20297 = vst [vmem:[#allocation50_spill] sm:$0xff] %v18274_v47  ;;  %v12694_v30 = vld [vmem:[#allocation11 + $0x2d8] sm:$0xf]  ;;  %v12478_v49 = vld [vmem:[#allocation11 + $0x128] sm:$0xf] }
 0x6fe   : > { %8729 = vmatpush.bf16.msrb.mxu2 %v18259_v24  ;;  %20300 = vst [vmem:[#allocation51_spill] sm:$0xff] %v18287_v4  ;;  %v13540_v28 = vld [vmem:[#allocation11 + $0x130] sm:$0xf0]  ;;  %v12622_v39 = vld [vmem:[#allocation11 + $0x248] sm:$0xf] }
 0x6ff   : > { %8742 = vmatpush.bf16.msrb.mxu3 %v18264_v33  ;;  %8705 = vmatpush.bf16.msrb.mxu0 %v18269_v27  ;;  %v13597_v33 = vld [vmem:[#allocation11 + $0x2f8] sm:$0xf0]  ;;  %20302 = vst [vmem:[#allocation57_spill] sm:$0xff] %v18297_v3  ;;  %v13519_v27 = vld [vmem:[#allocation11 + $0x88] sm:$0xf0] }
 0x700   : > { %8718 = vmatpush.bf16.msrb.mxu1 %v18272_v46  ;;  %20303 = vst [vmem:[#allocation58_spill] sm:$0xff] %v18299_v32  ;;  %v13543_v46 = vld [vmem:[#allocation11 + $0x148] sm:$0xf0]  ;;  %v18308_v7 = vor.u32 %v13597_v33, %v12706_v44  ;;  %v18311_v53 = vor.u32 %v13519_v27, %v12394_v19  ;;  %v18319_v33 = vor.u32 %v13570_v35, %v12598_v5  ;;  %v12586_v27 = vld [vmem:[#allocation11 + $0x200] sm:$0xf] }
 0x701   : > { %20305 = vst [vmem:[#allocation60_spill] sm:$0xff] %v18305_v11  ;;  %v13567_v44 = vld [vmem:[#allocation11 + $0x208] sm:$0xf0]  ;;  %v18330_v5 = vor.u32 %v13540_v28, %v12478_v49  ;;  %v12370_v35 = vld [vmem:[#allocation11 + $0x50] sm:$0xf] }
 0x702   : > { %8730 = vmatpush.bf16.msrb.mxu2 %v18282_v59  ;;  %8706 = vmatmul.bf16.vlgmr.msrb.gmra.mxu0 %v18153_v43  ;;  %20306 = vst [vmem:[#allocation61_spill] sm:$0xff] %v18308_v7  ;;  %v12670_v28 = vld [vmem:[#allocation11 + $0x2a8] sm:$0xf] }
 0x703   : > { %8750 = vmatpush.bf16.msra.mxu0 %v18274_v47  ;;  %8743 = vmatpush.bf16.msrb.mxu3 %v18287_v4  ;;  %v18303_v47 = vor.u32 %v13574_v41, %v12616_v45  ;;  %20307 = vst [vmem:[#allocation62_spill] sm:$0xff] %v18311_v53  ;;  %v13594_v4 = vld [vmem:[#allocation11 + $0x2e0] sm:$0xf0]  ;;  %v18315_v41 = vor.u32 %v13543_v46, %v12490_v48  ;;  %v12382_v45 = vld [vmem:[#allocation11 + $0x68] sm:$0xf] }
 0x704   : > { %8763 = vmatpush.bf16.msra.mxu1 %v18280_v38  ;;  %v7832_v38 = vpop.f32.mrf.mxu3  ;;  %20309 = vst [vmem:[#allocation64_spill] sm:$0xff] %v18319_v33  ;;  %v18322_v19 = vor.u32 %v13594_v4, %v12694_v30  ;;  %v12682_v48 = vld [vmem:[#allocation11 + $0x2c0] sm:$0xf]  ;;  %v18333_v4 = vor.u32 %v13567_v44, %v12586_v27  ;;  %v12466_v30 = vld [vmem:[#allocation11 + $0x110] sm:$0xf] }
 0x705   : > { %20304 = vst [vmem:[#allocation59_spill] sm:$0xff] %v18303_v47  ;;  %8719 = vmatmul.bf16.vlgmr.msrb.gmra.mxu1 %v18159_v0  ;;  %v13516_v38 = vld [vmem:[#allocation11 + $0x70] sm:$0xf0]  ;;  %v12358_v44 = vld [vmem:[#allocation11 + $0x38] sm:$0xf] }
 0x706   : > { %8731 = vmatpush.bf16.msrb.mxu2 %v18299_v32  ;;  %20308 = vst [vmem:[#allocation63_spill] sm:$0xff] %v18315_v41  ;;  %v18326_v46 = vor.u32 %v13516_v38, %v12382_v45  ;;  %v18336_v45 = vpop.f32.mrf.mxu0  ;;  %v13564_v32 = vld [vmem:[#allocation11 + $0x1f0] sm:$0xf0] }
 0x707   : > { %8751 = vmatpush.bf16.msra.mxu0 %v18293_v23  ;;  %8744 = vmatpush.bf16.msrb.mxu3 %v18303_v47  ;;  %20310 = vst [vmem:[#allocation65_spill] sm:$0xff] %v18322_v19  ;;  %v13591_v47 = vld [vmem:[#allocation11 + $0x2c8] sm:$0xf0] }
 0x708   : > { %8764 = vmatpush.bf16.msra.mxu1 %v18297_v3  ;;  %20311 = vst [vmem:[#allocation66_spill] sm:$0xff] %v18326_v46  ;;  %v18338_v38 = vor.u32 %v13591_v47, %v12682_v48  ;;  %v18340_v3 = vpop.f32.mrf.mxu1  ;;  %v12454_v48 = vld [vmem:[#allocation11 + $0xf8] sm:$0xf] }
 0x709   : > { %8732 = vmatmul.bf16.vlgmr.msrb.gmra.mxu2 %v18186_v26  ;;  %20312 = vst [vmem:[#allocation67_spill] sm:$0xff] %v18330_v5 }
 0x70a   : > { %8776 = vmatpush.bf16.msra.mxu2 %v18305_v11  ;;  %8745 = vmatmul.bf16.vlgmr.msrb.gmra.mxu3 %v18193_v56  ;;  %20313 = vst [vmem:[#allocation68_spill] sm:$0xff] %v18333_v4  ;;  %v13537_v11 = vld [vmem:[#allocation11 + $0x118] sm:$0xf0] }
 0x70b   : > { %8789 = vmatpush.bf16.msra.mxu3 %v18308_v7  ;;  %8752 = vmatpush.bf16.msra.mxu0 %v18311_v53  ;;  %v13513_v7 = vld [vmem:[#allocation11 + $0x58] sm:$0xf0]  ;;  %20314 = vst [vmem:[#allocation69_spill] sm:$0xff] %v18338_v38  ;;  %v12574_v53 = vld [vmem:[#allocation11 + $0x1e8] sm:$0xf]  ;;  %v18346_v27 = vor.u32 %v13537_v11, %v12466_v30 }
 0x70c   : > { %8765 = vmatpush.bf16.msra.mxu1 %v18315_v41  ;;  %v18343_v49 = vor.u32 %v13513_v7, %v12370_v35  ;;  %v18349_v47 = vor.u32 %v13564_v32, %v12574_v53  ;;  %v13534_v41 = vld [vmem:[#allocation11 + $0x100] sm:$0xf0]  ;;  %v12562_v7 = vld [vmem:[#allocation11 + $0x1d0] sm:$0xf]  ;;  %v13561_v35 = vld [vmem:[#allocation11 + $0x1d8] sm:$0xf0] }
 0x70d   : > { %20316 = vst [vmem:[#allocation71_spill] sm:$0xff] %v18346_v27  ;;  %v12658_v11 = vld [vmem:[#allocation11 + $0x290] sm:$0xf]  ;;  %v13585_v30 = vld [vmem:[#allocation11 + $0x298] sm:$0xf0] }
 0x70e   : > { %8777 = vmatpush.bf16.msra.mxu2 %v18319_v33  ;;  %20315 = vst [vmem:[#allocation70_spill] sm:$0xff] %v18343_v49  ;;  %v13588_v33 = vld [vmem:[#allocation11 + $0x2b0] sm:$0xf0]  ;;  %v12346_v32 = vld [vmem:[#allocation11 + $0x20] sm:$0xf] }
 0x70f   : > { %8790 = vmatpush.bf16.msra.mxu3 %v18322_v19  ;;  %8753 = vmatpush.bf16.msra.mxu0 %v18326_v46  ;;  %v13510_v19 = vld [vmem:[#allocation11 + $0x40] sm:$0xf0]  ;;  %20317 = vst [vmem:[#allocation72_spill] sm:$0xff] %v18349_v47  ;;  %v18352_v23 = vor.u32 %v13588_v33, %v12670_v28  ;;  %v13507_v53 = vld [vmem:[#allocation11 + $0x28] sm:$0xf0] }
 0x710   : > { %8766 = vmatpush.bf16.msra.mxu1 %v18330_v5  ;;  %v18355_v46 = vor.u32 %v13510_v19, %v12358_v44  ;;  %v18358_v5 = vor.u32 %v13534_v41, %v12454_v48  ;;  %v12442_v33 = vld [vmem:[#allocation11 + $0xe0] sm:$0xf]  ;;  %v13531_v28 = vld [vmem:[#allocation11 + $0xe8] sm:$0xf0]  ;;  %v12550_v19 = vld [vmem:[#allocation11 + $0x1b8] sm:$0xf]  ;;  %v7858_v59 = vpop.f32.mrf.mxu1  ;;  %v18367_v41 = vor.u32 %v13507_v53, %v12346_v32 }
 0x711   : > { %20318 = vst [vmem:[#allocation73_spill] sm:$0xff] %v18352_v23  ;;  %v13558_v44 = vld [vmem:[#allocation11 + $0x1c0] sm:$0xf0]  ;;  %v12646_v48 = vld [vmem:[#allocation11 + $0x278] sm:$0xf]  ;;  %v7869_v59 = vpop.f32.mrf.mxu2 }
 0x712   : > { %8778 = vmatpush.bf16.msra.mxu2 %v18333_v4  ;;  %20319 = vst [vmem:[#allocation74_spill] sm:$0xff] %v18355_v46  ;;  %v18361_v4 = vor.u32 %v13561_v35, %v12562_v7  ;;  %v18370_v7 = vor.u32 %v13531_v28, %v12442_v33  ;;  %v12334_v35 = vld [vmem:[#allocation11 + $0x8] sm:$0xf]  ;;  %v12538_v32 = vld [vmem:[#allocation11 + $0x1a0] sm:$0xf] }
 0x713   : > { %8791 = vmatpush.bf16.msra.mxu3 %v18338_v38  ;;  %8754 = vmatpush.bf16.msra.mxu0 %v18343_v49  ;;  %20320 = vst [vmem:[#allocation75_spill] sm:$0xff] %v18358_v5  ;;  %v7845_v38 = vpop.f32.mrf.mxu0  ;;  %v18364_v49 = vor.u32 %v13585_v30, %v12658_v11  ;;  %v12430_v11 = vld [vmem:[#allocation11 + $0xc8] sm:$0xf]  ;;  %v13528_v30 = vld [vmem:[#allocation11 + $0xd0] sm:$0xf0] }
 0x714   : > { %8767 = vmatpush.bf16.msra.mxu1 %v18346_v27  ;;  %20322 = vst [vmem:[#allocation77_spill] sm:$0xff] %v18367_v41  ;;  %v13582_v27 = vld [vmem:[#allocation11 + $0x280] sm:$0xf0]  ;;  %v18373_v38 = vor.u32 %v13558_v44, %v12550_v19  ;;  %v13555_v53 = vld [vmem:[#allocation11 + $0x1a8] sm:$0xf0]  ;;  %v18383_v19 = vor.u32 %v13528_v30, %v12430_v11  ;;  %v20323_v44 = vmov 0  }
 0x715   : > { %20321 = vst [vmem:[#allocation76_spill] sm:$0xff] %v18364_v49  ;;  %v12634_v28 = vld [vmem:[#allocation11 + $0x260] sm:$0xf] }
 0x716   : > { %8779 = vmatpush.bf16.msra.mxu2 %v18349_v47  ;;  %v13504_v47 = vld [vmem:[#allocation11 + $0x10] sm:$0xf0] }
 0x717   : > { %8792 = vmatpush.bf16.msra.mxu3 %v18352_v23  ;;  %8755 = vmatpush.bf16.msra.mxu0 %v18355_v46  ;;  %v18376_v46 = vor.u32 %v13582_v27, %v12646_v48  ;;  %v7882_v23 = vpop.f32.mrf.mxu3  ;;  %v18379_v33 = vor.u32 %v13504_v47, %v12334_v35  ;;  %v18387_v27 = vor.u32 %v13555_v53, %v12538_v32  ;;  %v12526_v47 = vld [vmem:[#allocation11 + $0x188] sm:$0xf]  ;;  %v13552_v35 = vld [vmem:[#allocation11 + $0x190] sm:$0xf0]  ;;  %v20340_v32 = vld [vmem:[#allocation37_spill] sm:$0xff] }
 0x718   : > { %8768 = vmatpush.bf16.msra.mxu1 %v18358_v5  ;;  %v13579_v5 = vld [vmem:[#allocation11 + $0x268] sm:$0xf0]  ;;  %v18397_v11 = vor.u32 %v13552_v35, %v12526_v47  ;;  %v20341_v53 = vld [vmem:[#allocation39_spill] sm:$0xff]  ;;  %v20344_v35 = vperm.slane %v17913_v18, 3 }
 0x719   : > { %v18390_v48 = vor.u32 %v13579_v5, %v12634_v28  ;;  %v7871_v5 = vpop.f32.mrf.mxu2  ;;  %v20342_v28 = vld [vmem:[#allocation40_spill] sm:$0xff]  ;;  %v20343_v47 = vld [vmem:[#allocation41_spill] sm:$0xff] }
 0x71a   : > { %8780 = vmatpush.bf16.msra.mxu2 %v18361_v4  ;;  %v20345_v5 = vld [vmem:[#allocation42_spill] sm:$0xff] }
 0x71b   : > { %8793 = vmatpush.bf16.msra.mxu3 %v18364_v49  ;;  %8756 = vmatpush.bf16.msra.mxu0 %v18367_v41  ;;  %v8810_v49 = vsel %vm8809_vm4, 1, %v20323_v44  ;;  %v13576_v41 = vld [vmem:[#allocation11 + $0x250] sm:$0xf0] }
 0x71c   : > { %8769 = vmatpush.bf16.msra.mxu1 %v18370_v7  ;;  %8812 = vperm.xlu1 %13711, %v8810_v49   ;;  %v18401_v49 = vor.u32 %v13576_v41, %v12622_v39  ;;  %v20338_v41 = vld [vmem:[#allocation38_spill] sm:$0xff] }
 0x71e   : > { %8781 = vmatpush.bf16.msra.mxu2 %v18373_v38 }
 0x71f   : > { %8794 = vmatpush.bf16.msra.mxu3 %v18376_v46  ;;  %8757 = vmatpush.bf16.msra.mxu0 %v18379_v33  ;;  %v7884_v30 = vpop.f32.mrf.mxu3 }
 0x720   : > { %8770 = vmatpush.bf16.msra.mxu1 %v18383_v19  ;;  %v20346_v30 = vld [vmem:[#allocation43_spill] sm:$0xff] }
 0x722   : > { %8782 = vmatpush.bf16.msra.mxu2 %v18387_v27  ;;  %8758 = vmatmul.bf16.vlgmr.msra.gmra.mxu0 %v18153_v43 }
 0x723   : > { %8817 = vmatpush.bf16.msrb.mxu0 %v18036_v12  ;;  %8795 = vmatpush.bf16.msra.mxu3 %v18390_v48  ;;  %v7895_v12 = vpop.f32.mrf.mxu0 }
 0x724   : > { %8830 = vmatpush.bf16.msrb.mxu1 %v18039_v62  ;;  %v20324_v62 = vperm.slane %v17913_v18, 1 }
 0x725   : > { %8771 = vmatmul.bf16.vlgmr.msra.gmra.mxu1 %v18159_v0 }
 0x726   : > { %8783 = vmatpush.bf16.msra.mxu2 %v18397_v11 }
 0x727   : > { %8818 = vmatpush.bf16.msrb.mxu0 %v18045_v36  ;;  %8796 = vmatpush.bf16.msra.mxu3 %v18401_v49  ;;  %v7844_v36 = vadd.f32 %v18336_v45, %v20324_v62 }
 0x728   : > { %8831 = vmatpush.bf16.msrb.mxu1 %v18049_v37  ;;  %v7908_v37 = vpop.f32.mrf.mxu1 }
 0x729   : > { %8784 = vmatmul.bf16.vlgmr.msra.gmra.mxu2 %v18186_v26  ;;  %v20332_v26 = vld [vmem:[#allocation29_spill] sm:$0xff] }
 0x72a   : > { %8843 = vmatpush.bf16.msrb.mxu2 %v18053_v20  ;;  %8797 = vmatmul.bf16.vlgmr.msra.gmra.mxu3 %v18193_v56  ;;  %v7857_v20 = vadd.f32 %v18340_v3, %v7844_v36  ;;  %v20333_v56 = vld [vmem:[#allocation32_spill] sm:$0xff] }
 0x72b   : > { %8856 = vmatpush.bf16.msrb.mxu3 %v18056_v14  ;;  %8819 = vmatpush.bf16.msrb.mxu0 %v18059_v42  ;;  %v7818_v14 = vadd.f32 %v18262_v57, %v18225_v55  ;;  %v20334_v55 = vld [vmem:[#allocation34_spill] sm:$0xff]  ;;  %v20335_v57 = vld [vmem:[#allocation31_spill] sm:$0xff]  ;;  %v20347_v36 = vld [vmem:[#allocation44_spill] sm:$0xff] }
 0x72c   : > { %8832 = vmatpush.bf16.msrb.mxu1 %v18063_v1  ;;  %v7870_v42 = vadd.f32 %v7869_v59, %v7857_v20  ;;  %v20325_v1 = vperm.slane %v17913_v18, 2  ;;  %v20339_v59 = vld [vmem:[#allocation35_spill] sm:$0xff] }
 0x72d   : > { %v7934_v43 = vpop.f32.mrf.mxu3 }
 0x72e   : > { %8844 = vmatpush.bf16.msrb.mxu2 %v18067_v10  ;;  %v7896_v10 = vadd.f32 %v7895_v12, %v20325_v1 }
 0x72f   : > { %8857 = vmatpush.bf16.msrb.mxu3 %v18070_v13  ;;  %8820 = vmatpush.bf16.msrb.mxu0 %v18074_v25  ;;  %v7897_v13 = vpop.f32.mrf.mxu0 }
 0x730   : > { %8833 = vmatpush.bf16.msrb.mxu1 %v18078_v52  ;;  %v7910_v25 = vpop.f32.mrf.mxu1  ;;  %v7831_v52 = vadd.f32 %v18266_v6, %v7818_v14  ;;  %v20336_v6 = vld [vmem:[#allocation33_spill] sm:$0xff]  ;;  %v20349_v14 = vld [vmem:[#allocation46_spill] sm:$0xff]  ;;  %v20351_v13 = vld [vmem:[#allocation48_spill] sm:$0xff] }
 0x732   : > { %8845 = vmatpush.bf16.msrb.mxu2 %v18081_v2  ;;  %v7883_v2 = vadd.f32 %v7882_v23, %v7870_v42  ;;  %v20337_v23 = vld [vmem:[#allocation36_spill] sm:$0xff]  ;;  %v20350_v42 = vld [vmem:[#allocation47_spill] sm:$0xff] }
 0x733   : > { %8858 = vmatpush.bf16.msrb.mxu3 %v18084_v29  ;;  %8821 = vmatpush.bf16.msrb.mxu0 %v18087_v58  ;;  %v7909_v29 = vadd.f32 %v7908_v37, %v7896_v10  ;;  %v7921_v58 = vpop.f32.mrf.mxu2  ;;  %v20348_v37 = vld [vmem:[#allocation45_spill] sm:$0xff] }
 0x734   : > { %8834 = vmatpush.bf16.msrb.mxu1 %v18091_v50 }
 0x735   : > { %v7922_v50 = vadd.f32 %v7921_v58, %v7909_v29  ;;  %v20353_v29 = vld [vmem:[#allocation54_spill] sm:$0xff]  ;;  %v484_v58 = vld [vmem:[%s18243_s20 + $0x8] sm:$0xff] }
 0x736   : > { %8846 = vmatpush.bf16.msrb.mxu2 %v18095_v60  ;;  %v7990_v60 = vmax.f32 %v7831_v52, 0.0  ;;  %v20352_v52 = vld [vmem:[#allocation53_spill] sm:$0xff]  ;;  %vm487_vm5 = vcmp.gt.s32.totalorder %v484_v58, 0 }
 0x737   : > { %8859 = vmatpush.bf16.msrb.mxu3 %v18098_v40  ;;  %8822 = vmatpush.bf16.msrb.mxu0 %v18101_v9  ;;  %v7991_v40 = vmax.f32 %v7883_v2, 0.0  ;;  %v7935_v9 = vadd.f32 %v7934_v43, %v7922_v50  ;;  %v20354_v50 = vld [vmem:[#allocation49_spill] sm:$0xff]  ;;  %v20355_v43 = vld [vmem:[#allocation50_spill] sm:$0xff] }
 0x738   : > { %8835 = vmatpush.bf16.msrb.mxu1 %v18109_v54  ;;  %v18442_v54 = vpack.c.bf16 %v7990_v60, %v7990_v60 }
 0x73a   : > { %8847 = vmatpush.bf16.msrb.mxu2 %v18114_v15  ;;  %v18446_v15 = vpack.c.bf16 %v7991_v40, %v7991_v40  ;;  %v20356_v40 = vld [vmem:[#allocation55_spill] sm:$0xff] }
 0x73b   : > { %8860 = vmatpush.bf16.msrb.mxu3 %v18117_v51  ;;  %8823 = vmatpush.bf16.msrb.mxu0 %v18120_v34  ;;  %v20326_v51 = vld [vmem:[#allocation24_spill] sm:$0xff]  ;;  %v7992_v34 = vmax.f32 %v7935_v9, 0.0 }
 0x73c   : > { %8836 = vmatpush.bf16.msrb.mxu1 %v18125_v22  ;;  %v20327_v22 = vld [vmem:[#allocation25_spill] sm:$0xff]  ;;  %v20357_v9 = vld [vmem:[#allocation56_spill] sm:$0xff] }
 0x73d   : > { %v18456_v0 = vpack.c.bf16 %v7992_v34, %v7992_v34 }
 0x73e   : > { %8848 = vmatpush.bf16.msrb.mxu2 %v18128_v21  ;;  %v7923_v21 = vpop.f32.mrf.mxu2 }
 0x73f   : > { %8861 = vmatpush.bf16.msrb.mxu3 %v18132_v17  ;;  %8824 = vmatpush.bf16.msrb.mxu0 %v18135_v8  ;;  %v7936_v17 = vpop.f32.mrf.mxu3  ;;  %v20328_v8 = vld [vmem:[#allocation26_spill] sm:$0xff]  ;;  %v7947_v3 = vpop.f32.mrf.mxu0  ;;  %v20359_v21 = vld [vmem:[#allocation52_spill] sm:$0xff] }
 0x740   : > { %8837 = vmatpush.bf16.msrb.mxu1 %v18139_v31  ;;  %v20329_v31 = vld [vmem:[#allocation28_spill] sm:$0xff]  ;;  %v7948_v39 = vadd.f32 %v7947_v3, %v20344_v35  ;;  %v20360_v17 = vld [vmem:[#allocation57_spill] sm:$0xff] }
 0x741   : > { %v20368_v3 = vld [vmem:[#allocation65_spill] sm:$0xff] }
 0x742   : > { %8849 = vmatpush.bf16.msrb.mxu2 %v20326_v51  ;;  %8825 = vmatmul.bf16.vlgmr.msrb.gmra.mxu0 %v18442_v54  ;;  %v7960_v45 = vpop.f32.mrf.mxu1  ;;  %v20358_v51 = vld [vmem:[#allocation51_spill] sm:$0xff]  ;;  %v20372_v35 = vld [vmem:[#allocation69_spill] sm:$0xff] }
 0x743   : > { %8869 = vmatpush.bf16.msra.mxu0 %v18141_v61  ;;  %8862 = vmatpush.bf16.msrb.mxu3 %v20327_v22  ;;  %v20330_v61 = vld [vmem:[#allocation30_spill] sm:$0xff]  ;;  %v7961_v20 = vadd.f32 %v7960_v45, %v7948_v39 }
 0x744   : > { %8882 = vmatpush.bf16.msra.mxu1 %v18144_v63  ;;  %v20331_v63 = vld [vmem:[#allocation27_spill] sm:$0xff]  ;;  %v20373_v39 = vld [vmem:[#allocation70_spill] sm:$0xff] }
 0x745   : > { %8838 = vmatmul.bf16.vlgmr.msrb.gmra.mxu1 %v18446_v15 }
 0x746   : > { %8850 = vmatpush.bf16.msrb.mxu2 %v20330_v61 }
 0x747   : > { %8870 = vmatpush.bf16.msra.mxu0 %v20328_v8  ;;  %8863 = vmatpush.bf16.msrb.mxu3 %v20331_v63  ;;  %v7949_v12 = vpop.f32.mrf.mxu0  ;;  %v20361_v8 = vld [vmem:[#allocation58_spill] sm:$0xff]  ;;  %v20362_v63 = vld [vmem:[#allocation59_spill] sm:$0xff] }
 0x748   : > { %8883 = vmatpush.bf16.msra.mxu1 %v20329_v31  ;;  %v18499_v31 = vld [vmem:[#allocation13] sm:$0x7] }
 0x749   : > { %8851 = vmatmul.bf16.vlgmr.msrb.gmra.mxu2 %v18456_v0 }
 0x74a   : > { %8895 = vmatpush.bf16.msra.mxu2 %v20332_v26  ;;  %v7962_v62 = vpop.f32.mrf.mxu1  ;;  %v20363_v26 = vld [vmem:[#allocation60_spill] sm:$0xff] }
 0x74b   : > { %8908 = vmatpush.bf16.msra.mxu3 %v20333_v56  ;;  %8871 = vmatpush.bf16.msra.mxu0 %v20334_v55  ;;  %v20364_v56 = vld [vmem:[#allocation61_spill] sm:$0xff]  ;;  %v20365_v55 = vld [vmem:[#allocation62_spill] sm:$0xff] }
 0x74c   : > { %8884 = vmatpush.bf16.msra.mxu1 %v20335_v57  ;;  %v7973_v1 = vpop.f32.mrf.mxu2  ;;  %v8128_v57 = vperm.slane %v18499_v31, 0  ;;  %v20376_v62 = vld [vmem:[#allocation73_spill] sm:$0xff] }
 0x74d   : > { %v7974_v10 = vadd.f32 %v7973_v1, %v7961_v20  ;;  %v7986_v18 = vpop.f32.mrf.mxu3  ;;  %v20377_v20 = vld [vmem:[#allocation74_spill] sm:$0xff] }
 0x74e   : > { %8896 = vmatpush.bf16.msra.mxu2 %v20336_v6  ;;  %v20366_v6 = vld [vmem:[#allocation63_spill] sm:$0xff] }
 0x74f   : > { %8909 = vmatpush.bf16.msra.mxu3 %v20337_v23  ;;  %8872 = vmatpush.bf16.msra.mxu0 %v20338_v41  ;;  %v7987_v25 = vadd.f32 %v7986_v18, %v7974_v10  ;;  %v20367_v23 = vld [vmem:[#allocation64_spill] sm:$0xff]  ;;  %v20380_v18 = vld [vmem:[#allocation77_spill] sm:$0xff] }
 0x750   : > { %8885 = vmatpush.bf16.msra.mxu1 %v20339_v59 }
 0x751   : > { %v7993_v2 = vmax.f32 %v7987_v25, 0.0 }
 0x752   : > { %8897 = vmatpush.bf16.msra.mxu2 %v20340_v32  ;;  %v20369_v32 = vld [vmem:[#allocation66_spill] sm:$0xff] }
 0x753   : > { %8910 = vmatpush.bf16.msra.mxu3 %v20341_v53  ;;  %8873 = vmatpush.bf16.msra.mxu0 %v20342_v28  ;;  %v18488_v60 = vpack.c.bf16 %v7993_v2, %v7993_v2  ;;  %v20370_v53 = vld [vmem:[#allocation67_spill] sm:$0xff] }
 0x754   : > { %8886 = vmatpush.bf16.msra.mxu1 %v20343_v47  ;;  %v20371_v47 = vld [vmem:[#allocation68_spill] sm:$0xff] }
 0x755   : > { %v7988_v34 = vpop.f32.mrf.mxu3  ;;  %8864 = vmatmul.bf16.vlgmr.msrb.gmra.mxu3 %v18488_v60 }
 0x756   : > { %8898 = vmatpush.bf16.msra.mxu2 %v20345_v5  ;;  %v20374_v5 = vld [vmem:[#allocation71_spill] sm:$0xff] }
 0x757   : > { %8911 = vmatpush.bf16.msra.mxu3 %v20346_v30  ;;  %8874 = vmatpush.bf16.msra.mxu0 %v20347_v36  ;;  %v20375_v30 = vld [vmem:[#allocation72_spill] sm:$0xff] }
 0x758   : > { %8887 = vmatpush.bf16.msra.mxu1 %v20348_v37 }
 0x75a   : > { %8899 = vmatpush.bf16.msra.mxu2 %v20349_v14  ;;  %v20378_v14 = vld [vmem:[#allocation75_spill] sm:$0xff] }
 0x75b   : > { %8912 = vmatpush.bf16.msra.mxu3 %v20350_v42  ;;  %8875 = vmatpush.bf16.msra.mxu0 %v20351_v13  ;;  %v20379_v42 = vld [vmem:[#allocation76_spill] sm:$0xff] }
 0x75c   : > { %8888 = vmatpush.bf16.msra.mxu1 %v18256_v16  ;;  %v488_v16 = vsel %vm487_vm5, %v484_v58, 0 }
 0x75d   : > { %vm491_vm6 = vcmp.lt.s32.totalorder %v488_v16, 2 }
 0x75e   : > { %8900 = vmatpush.bf16.msra.mxu2 %v18259_v24  ;;  %v7975_v24 = vpop.f32.mrf.mxu2  ;;  %v492_v22 = vsel %vm491_vm6, %v488_v16, 2 }
 0x75f   : > { %8913 = vmatpush.bf16.msra.mxu3 %v20352_v52  ;;  %8876 = vmatpush.bf16.msra.mxu0 %v20353_v29  ;;  %vm8973_vm7 = vcmp.eq.s32.totalorder %v492_v22, 1  ;;  %v8655_v45 = vpop.f32.mrf.mxu0  ;;  %vm8980_vm8 = vcmp.eq.s32.totalorder %v492_v22, 2 }
 0x760   : > { %8889 = vmatpush.bf16.msra.mxu1 %v20354_v50  ;;  %v8974_v61 = vsel %vm8973_vm7, 1, %v20323_v44  ;;  %v8656_v41 = vadd.f32 %v8655_v45, %v8128_v57  ;;  %v8981_v12 = vsel %vm8980_vm8, 1, %v20323_v44 }
 0x761   : > { %8976 = vperm.xlu0 %13710, %v8974_v61   ;;  %8983 = vperm.xlu1 %13711, %v8981_v12  }
 0x762   : > { %8901 = vmatpush.bf16.msra.mxu2 %v20357_v9  ;;  %8877 = vmatmul.bf16.vlgmr.msra.gmra.mxu0 %v18442_v54  ;;  %v8668_v59 = vpop.f32.mrf.mxu1 }
 0x763   : > { %8921 = vmatpush.bf16.msrb.mxu0 %v20355_v43  ;;  %8914 = vmatpush.bf16.msra.mxu3 %v20358_v51  ;;  %v8669_v28 = vadd.f32 %v8668_v59, %v8656_v41 }
 0x764   : > { %8934 = vmatpush.bf16.msrb.mxu1 %v20356_v40 }
 0x765   : > { %8890 = vmatmul.bf16.vlgmr.msra.gmra.mxu1 %v18446_v15 }
 0x766   : > { %8902 = vmatpush.bf16.msra.mxu2 %v20361_v8 }
 0x767   : > { %8922 = vmatpush.bf16.msrb.mxu0 %v20359_v21  ;;  %8915 = vmatpush.bf16.msra.mxu3 %v20362_v63  ;;  %v8657_v36 = vpop.f32.mrf.mxu0 }
 0x768   : > { %8935 = vmatpush.bf16.msrb.mxu1 %v20360_v17 }
 0x769   : > { %8903 = vmatmul.bf16.vlgmr.msra.gmra.mxu2 %v18456_v0 }
 0x76a   : > { %8947 = vmatpush.bf16.msrb.mxu2 %v20363_v26  ;;  %v8670_v37 = vpop.f32.mrf.mxu1  ;;  %8916 = vmatmul.bf16.vlgmr.msra.gmra.mxu3 %v18488_v60 }
 0x76b   : > { %8960 = vmatpush.bf16.msrb.mxu3 %v20364_v56  ;;  %8923 = vmatpush.bf16.msrb.mxu0 %v20365_v55 }
 0x76c   : > { %8936 = vmatpush.bf16.msrb.mxu1 %v20366_v6  ;;  %v8681_v1 = vpop.f32.mrf.mxu2 }
 0x76d   : > { %v8694_v10 = vpop.f32.mrf.mxu3  ;;  %v8682_v50 = vadd.f32 %v8681_v1, %v8669_v28 }
 0x76e   : > { %8948 = vmatpush.bf16.msrb.mxu2 %v20367_v23  ;;  %v8806_v43 = vpop.permute.xlu0 %8805 }
 0x76f   : > { %8961 = vmatpush.bf16.msrb.mxu3 %v20368_v3  ;;  %8924 = vmatpush.bf16.msrb.mxu0 %v20369_v32  ;;  %vm8807_vm9 = vcmp.eq.s32.totalorder %v8806_v43, 1  ;;  %v8695_v34 = vadd.f32 %v8694_v10, %v8682_v50 }
 0x770   : > { %8937 = vmatpush.bf16.msrb.mxu1 %v20370_v53 }
 0x772   : > { %8949 = vmatpush.bf16.msrb.mxu2 %v20371_v47 }
 0x773   : > { %8962 = vmatpush.bf16.msrb.mxu3 %v20372_v35  ;;  %8925 = vmatpush.bf16.msrb.mxu0 %v20373_v39 }
 0x774   : > { %8938 = vmatpush.bf16.msrb.mxu1 %v20374_v5 }
 0x775   : > { %v8696_v44 = vpop.f32.mrf.mxu3 }
 0x776   : > { %8950 = vmatpush.bf16.msrb.mxu2 %v20375_v30 }
 0x777   : > { %8963 = vmatpush.bf16.msrb.mxu3 %v20376_v62  ;;  %8926 = vmatpush.bf16.msrb.mxu0 %v20377_v20 }
 0x778   : > { %8939 = vmatpush.bf16.msrb.mxu1 %v20378_v14 }
 0x77a   : > { %8951 = vmatpush.bf16.msrb.mxu2 %v18361_v4  ;;  %v8683_v4 = vpop.f32.mrf.mxu2 }
 0x77b   : > { %8964 = vmatpush.bf16.msrb.mxu3 %v20379_v42  ;;  %8927 = vmatpush.bf16.msrb.mxu0 %v20380_v18 }
 0x77c   : > { %8940 = vmatpush.bf16.msrb.mxu1 %v18370_v7 }
 0x77e   : > { %8952 = vmatpush.bf16.msrb.mxu2 %v18373_v38 }
 0x77f   : > { %8965 = vmatpush.bf16.msrb.mxu3 %v18376_v46  ;;  %8928 = vmatpush.bf16.msrb.mxu0 %v18379_v33  ;;  %v8707_v46 = vpop.f32.mrf.mxu0 }
 0x780   : > { %8941 = vmatpush.bf16.msrb.mxu1 %v18383_v19 }
 0x782   : > { %8953 = vmatpush.bf16.msrb.mxu2 %v18387_v27  ;;  %8929 = vmatmul.bf16.vlgmr.msrb.gmra.mxu0 %v18442_v54  ;;  %v8720_v7 = vpop.f32.mrf.mxu1  ;;  %v8129_v54 = vperm.slane %v18499_v31, 1 }
 0x783   : > { %8966 = vmatpush.bf16.msrb.mxu3 %v18390_v48  ;;  %8942 = vmatmul.bf16.vlgmr.msrb.gmra.mxu1 %v18446_v15 }
 0x784   : > { %v8708_v52 = vadd.f32 %v8707_v46, %v8129_v54 }
 0x786   : > { %8954 = vmatpush.bf16.msrb.mxu2 %v18397_v11  ;;  %v8130_v11 = vperm.slane %v18499_v31, 2 }
 0x787   : > { %8967 = vmatpush.bf16.msrb.mxu3 %v18401_v49  ;;  %v8709_v38 = vpop.f32.mrf.mxu0  ;;  %v8721_v49 = vadd.f32 %v8720_v7, %v8708_v52 }
 0x789   : > { %8955 = vmatmul.bf16.vlgmr.msrb.gmra.mxu2 %v18456_v0 }
 0x78a   : > { %8968 = vmatmul.bf16.vlgmr.msrb.gmra.mxu3 %v18488_v60  ;;  %v8722_v33 = vpop.f32.mrf.mxu1 }
 0x78c   : > { %v8733_v19 = vpop.f32.mrf.mxu2 }
 0x78d   : > { %v8746_v27 = vpop.f32.mrf.mxu3  ;;  %v8734_v0 = vadd.f32 %v8733_v19, %v8721_v49 }
 0x78e   : > { %v8813_v40 = vpop.permute.xlu1 %8812 }
 0x78f   : > { %v8747_v9 = vadd.f32 %v8746_v27, %v8734_v0  ;;  %vm8814_vm10 = vcmp.eq.s32.totalorder %v8813_v40, 1 }
 0x791   : > { %v8808_v21 = vsel %vm8807_vm9, %v8747_v9, %v8695_v34 }
 0x794   : > { %v8735_v48 = vpop.f32.mrf.mxu2 }
 0x795   : > { %v8748_v13 = vpop.f32.mrf.mxu3 }
 0x79f   : > { %v8759_v25 = vpop.f32.mrf.mxu0 }
 0x7a0   : > { %v8760_v2 = vadd.f32 %v8759_v25, %v8130_v11 }
 0x7a2   : > { %v8772_v15 = vpop.f32.mrf.mxu1 }
 0x7a3   : > { %v8773_v60 = vadd.f32 %v8772_v15, %v8760_v2 }
 0x7a7   : > { %v8761_v29 = vpop.f32.mrf.mxu0 }
 0x7aa   : > { %v8774_v58 = vpop.f32.mrf.mxu1 }
 0x7ac   : > { %v8785_v16 = vpop.f32.mrf.mxu2 }
 0x7ad   : > { %v8786_v51 = vadd.f32 %v8785_v16, %v8773_v60  ;;  %v8798_v24 = vpop.f32.mrf.mxu3 }
 0x7af   : > { %v8799_v22 = vadd.f32 %v8798_v24, %v8786_v51 }
 0x7b1   : > { %v8815_v17 = vsel %vm8814_vm10, %v8799_v22, %v8808_v21 }
 0x7b2   : > { %8816 = vst.msk [vmem:[%s18545_s26] sm:$0xff] %vm601_vm0, %v8815_v17 }
 0x7b4   : > { %v8787_v8 = vpop.f32.mrf.mxu2 }
 0x7b5   : > { %v8800_v61 = vpop.f32.mrf.mxu3 }
 0x7bf   : > { %v8826_v63 = vpop.f32.mrf.mxu0 }
 0x7c0   : > { %v8827_v26 = vadd.f32 %v8826_v63, %v8128_v57 }
 0x7c2   : > { %v8839_v56 = vpop.f32.mrf.mxu1 }
 0x7c3   : > { %v8840_v55 = vadd.f32 %v8839_v56, %v8827_v26 }
 0x7c7   : > { %v8828_v6 = vpop.f32.mrf.mxu0 }
 0x7ca   : > { %v8841_v23 = vpop.f32.mrf.mxu1 }
 0x7cc   : > { %v8852_v3 = vpop.f32.mrf.mxu2 }
 0x7cd   : > { %v8853_v10 = vadd.f32 %v8852_v3, %v8840_v55 }
 0x7d3   : > { %v8977_v42 = vpop.permute.xlu0 %8976  ;;  %v8984_v44 = vpop.permute.xlu1 %8983 }
 0x7d4   : > { %v8854_v45 = vpop.f32.mrf.mxu2  ;;  %vm8978_vm11 = vcmp.eq.s32.totalorder %v8977_v42, 1  ;;  %vm8985_vm12 = vcmp.eq.s32.totalorder %v8984_v44, 1 }
 0x7d8   : > { %v8865_v32 = vpop.f32.mrf.mxu3 }
 0x7d9   : > { %v8866_v38 = vadd.f32 %v8865_v32, %v8853_v10 }
 0x7df   : > { %v8878_v41 = vpop.f32.mrf.mxu0 }
 0x7e0   : > { %v8867_v35 = vpop.f32.mrf.mxu3  ;;  %v8879_v31 = vadd.f32 %v8878_v41, %v8129_v54 }
 0x7e2   : > { %v8891_v59 = vpop.f32.mrf.mxu1 }
 0x7e3   : > { %v8892_v36 = vadd.f32 %v8891_v59, %v8879_v31 }
 0x7e7   : > { %v8880_v53 = vpop.f32.mrf.mxu0 }
 0x7ea   : > { %v8893_v28 = vpop.f32.mrf.mxu1 }
 0x7ec   : > { %v8904_v47 = vpop.f32.mrf.mxu2 }
 0x7ed   : > { %v8917_v5 = vpop.f32.mrf.mxu3  ;;  %v8905_v14 = vadd.f32 %v8904_v47, %v8892_v36 }
 0x7ef   : > { %v8918_v18 = vadd.f32 %v8917_v5, %v8905_v14 }
 0x7f1   : > { %v8979_v19 = vsel %vm8978_vm11, %v8918_v18, %v8866_v38 }
 0x7f4   : > { %v8906_v39 = vpop.f32.mrf.mxu2 }
 0x7f5   : > { %v8919_v62 = vpop.f32.mrf.mxu3 }
 0x7ff   : > { %v8930_v30 = vpop.f32.mrf.mxu0 }
 0x800   : > { %v8943_v12 = vpop.f32.mrf.mxu1  ;;  %v8931_v57 = vadd.f32 %v8930_v30, %v8130_v11 }
 0x802   : > { %v8944_v1 = vadd.f32 %v8943_v12, %v8931_v57 }
 0x807   : > { %v8932_v37 = vpop.f32.mrf.mxu0 }
 0x808   : > { %v8945_v20 = vpop.f32.mrf.mxu1 }
 0x80c   : > { %v8956_v4 = vpop.f32.mrf.mxu2 }
 0x80d   : > { %v8957_v46 = vadd.f32 %v8956_v4, %v8944_v1  ;;  %v8969_v7 = vpop.f32.mrf.mxu3 }
 0x80f   : > { %v8970_v33 = vadd.f32 %v8969_v7, %v8957_v46 }
 0x811   : > { %v8986_v27 = vsel %vm8985_vm12, %v8970_v33, %v8979_v19  ;;  %8995 = sbr.rel (!%p14138_p11) target bundleno = 2101 (0x835), region = 84 }
 0x812   : > { %8987 = vst.msk [vmem:[%s18545_s26 + $0x8] sm:$0xff] %vm601_vm0, %v8986_v27 }
 0x814   : > { %v8958_v48 = vpop.f32.mrf.mxu2 }
 0x815   : > { %v8971_v13 = vpop.f32.mrf.mxu3 }
 0x816   : > { %s20394_s14 = smov (!%p8998_p10, %s8997_s14), 2 }
 0x817   : > { %s12710_s12 = sshll.u32 %s20394_s14, 3 }
 0x818   : > { %s9001_s13 = ssub.s32 16, %s12710_s12 }
 0x819   : > { %s9002_s2 = sshll.u32 %s9001_s13, 4 }
 0x81a   : > { %9003 = vsyncadd %s8989_s10, %s9002_s2  ;;  %p18562_p1 = scmp.ne.s32.totalorder %s12710_s12, 0  ;;  %s13598_s17 = sshll.u32 %s14107_s9, 4 }
 0x81b   : > { %s9006_s27 = scalar_lea.hbm %s18624_s8, %s13598_s17  ;;  %s9008_s24 = sshll.u32 %s18545_s26, 4  ;;  %s18571_s24 = int_to_ptr.vmem [resolvable:$true] %s9008_s24 }
 0x81c   : > { %s9010_s25 = sshll.u32 %s9006_s27, 4  ;;  %s12714_s23 = sshll.u32 %s20394_s14, 7  ;;  %s18573_s25 = int_to_ptr.hbm [resolvable:$true] %s9010_s25 }
 0x81d   : > { %s13931_s16 = sshra.s32 %s18571_s24, 4  ;;  %s13933_s19 = sshrl.u32 %s12714_s23, 4  ;;  %s13932_s16 = int_to_ptr.vmem [resolvable:$true] %s13931_s16 }
 0x81e   : > { %s13938_s21 = scalar_lea.vmem %s13932_s16, %s13933_s19  ;;  %s14038_s9 = smov [#allocation14]  }
 0x81f   : > { %p13939_p11 = scmp.ne.s32.totalorder %s13932_s16, %s13938_s21  ;;  %s13942_s11 = scalar_lea.vmem %s14038_s9, 32 }
 0x820   : > { %p13944_p7 = scmp.lt.s32.totalorder %s13942_s11, %s13938_s21 }
 0x821   : > { %p13940_p0 = pnand %p13939_p11, %p18562_p1 }
 0x823   : > { %p13941_p3 = pneg %p13940_p0 }
 0x825   : > { %p13946_p8 = pnand %p13944_p7, %p13941_p3 }
 0x827   : > { %13949 = shalt.err (!%p13946_p8)
}
 0x828   : > { %s13950_s15 = sshra.s32 %s18573_s25, 4  ;;  %s13961_s13 = scalar_lea.hbm %s18624_s8, 24  ;;  %s13951_s15 = int_to_ptr.hbm [resolvable:$true] %s13950_s15 }
 0x829   : > { %s13957_s20 = scalar_lea.hbm %s13951_s15, %s13933_s19  ;;  %p13962_p2 = scmp.lt.s32.totalorder %s13951_s15, %s18624_s8 }
 0x82a   : > { %p13958_p4 = scmp.ne.s32.totalorder %s13951_s15, %s13957_s20  ;;  %p13963_p5 = scmp.lt.s32.totalorder %s13961_s13, %s13957_s20 }
 0x82c   : > { %p13959_p12 = pnand %p13958_p4, %p18562_p1  ;;  %p13964_p9 = por %p13963_p5, %p13962_p2 }
 0x82e   : > { %p13960_p13 = pneg %p13959_p12 }
 0x830   : > { %p13965_p6 = pnand %p13964_p9, %p13960_p13 }
 0x832   : > { %13968 = shalt.err (!%p13965_p6)
}
 0x833   : > { %s14039_s18 = smov 128   ;;  %s14040_s22 = smov 8  }
 0x834   : > { %9016 = dma.vmem_to_hbm [thread:$0]  (%p18562_p1), %s18571_s24, %s12714_s23, %s18573_s25, %s8989_s10, %s14039_s18, %s14039_s18, %s14040_s22  }
 0x835 PF: > { %s20382_s27 = sld [smem:[#allocation20_spill]]  ;;  %p20385_p11 = scmp.ge.s32.totalorder %s14020_s30, 2 }
 0x836   : > { %s20383_s16 = sld [smem:[#allocation23_spill]] }
 0x83b   : > { %s9025_s19 = sand.u32 1, %s20382_s27  }
 0x83c   : > { %p20384_p10 = scmp.ne.s32.totalorder %s20383_s16, 0  ;;  %s9026_s21 = scalar_lea.sflag [#allocation4], %s9025_s19 }
 0x83e   : > { %p13645_p0 = pnand %p20385_p11, %p20384_p10 }
 0x840   : > { %p13646_p3 = pneg %p13645_p0 }
 0x842   : > { %14003 = dma.done.wait (%p13646_p3), %s9026_s21, 256  }
 0x843   : > { %14005 = vsyncadd (%p13646_p3), %s9026_s21, 4294967040  ;;  %s20386_s30 = sld [smem:[#allocation21_spill]]  ;;  %s20388_s27 = smov %s14012_s28 }
 0x844   : > { %s20387_s4 = sld [smem:[#allocation22_spill]]  ;;  %s20389_s28 = smov %s14016_s29 }
 0x849   : > { %p24_p7 = scmp.ge.s32.totalorder %s20386_s30, 4  }
 0x84a   : > { %s20390_s29 = smov %s20387_s4 }
 0x84b   :  { %26 = sbr.rel (!%p24_p7) target bundleno = 12 (0xc), region = 134 }
 0x850   :  { %9032 = vsyncpa [#allocation3], 1 }
 0x851   :  { %9034 = vsyncpa [#allocation3 + $0x1], 1 }
 0x852   :  { %9035 = vsyncpa [#allocation6], 1 }
 0x853   :  { %9036 = vsyncpa [#allocation9], 1 }
 0x854   :  { %9037 = vsyncpa [#allocation12], 1 }
 0x855   :  { %9038 = vsyncpa [#allocation4], 1 }
 0x856   :  { %9040 = vsyncpa [#allocation4 + $0x1], 1 }

</bundles_post_ra>
